<compile_context>
chip_gen: v6e
topology: v6e:2x2x1
jax: 0.10.0
libtpu: 0.0.40
codegen_flags: <defaults>
</compile_context>

<pallas_src>
import functools

import jax
import jax.numpy as jnp
from jax.experimental import pallas as pl
from jax.experimental.pallas import tpu as pltpu

_BN_EPS = 1e-5  # nn.BatchNorm2d default


# ----------------------------- in-kernel helpers ----------------------------

def _leaky(y):
    return jnp.where(y > 0, y, 0.2 * y)


def _bn_stats(blocks):
    """Single-pass batch-norm stats over the columns of a list of [C, M] blocks."""
    cnt = sum(b.shape[1] for b in blocks)
    ssum, ssq = None, None
    for b in blocks:
        s = jnp.sum(b, axis=1, keepdims=True)
        q = jnp.sum(b * b, axis=1, keepdims=True)
        ssum = s if ssum is None else ssum + s
        ssq = q if ssq is None else ssq + q
    mean = ssum / cnt
    var = ssq / cnt - mean * mean            # biased variance (training-mode BN)
    return mean, jax.lax.rsqrt(var + _BN_EPS)


def _pad_grid(h, hs, ws, n):
    """[C, hs*ws*n] (cols (i, j, n)) -> zero-ringed [C, (hs+2)*(ws+2)*n]."""
    c = h.shape[0]
    zrow = jnp.zeros((c, (ws + 2) * n), h.dtype)
    zcol = jnp.zeros((c, n), h.dtype)
    rows = [zrow]
    for i in range(hs):
        rows.append(jnp.concatenate(
            [zcol, h[:, i * ws * n:(i + 1) * ws * n], zcol], axis=1))
    rows.append(zrow)
    return jnp.concatenate(rows, axis=1)


def _window_segments(gpad, hp, wp, n, win):
    """All row segments gpad[:, (r*wp+c0)*n : (r*wp+c0+win)*n] (r, c0 static)."""
    segs = {}
    for r in range(hp):
        for c0 in range(wp - win + 1):
            segs[(r, c0)] = gpad[:, (r * wp + c0) * n:(r * wp + c0 + win) * n]
    return segs


def _window(segs, r0, c0, win):
    """win x win window (cols (a, b, n)) assembled from precomputed segments."""
    return jnp.concatenate([segs[(r0 + a, c0)] for a in range(win)], axis=1)


# ------------------------- encoder + VQ fused kernel -------------------------

def _encoder_vq_kernel(p1e_ref, mask_ref, w1_ref, b1_ref, w2_ref, b2_ref,
                       g2_ref, bt2_ref, w3_ref, b3_ref, e_ref, et_ref, e2_ref,
                       o_ref, *, n_batch):
    n = n_batch
    m2 = 49 * n                                              # conv2 output columns (oi, oj, n)
    # conv1 (4x4, s=2, p=1), evaluated once per (conv2 tap, conv2 output pos).
    h1 = jnp.dot(w1_ref[...], p1e_ref[...], preferred_element_type=jnp.float32)
    h1 = _leaky(h1 + b1_ref[...]) * mask_ref[...]            # [fd, 16*m2]
    # conv2 (4x4, s=2, p=1) + BN + LeakyReLU; patch rows ordered (kh2, kw2, c1).
    p2 = jnp.concatenate([h1[:, t * m2:(t + 1) * m2] for t in range(16)], axis=0)
    y2 = jnp.dot(w2_ref[...], p2.astype(jnp.bfloat16),
                 preferred_element_type=jnp.float32) + b2_ref[...]
    mean, rstd = _bn_stats([y2])
    h2 = _leaky((y2 - mean) * rstd * g2_ref[...] + bt2_ref[...])   # [2fd, m2]
    # conv3 (7x7 -> 1x1): rows (spatial, c2), cols n.
    p3 = jnp.concatenate([h2[:, s * n:(s + 1) * n] for s in range(49)], axis=0)
    z_e = jnp.dot(w3_ref[...], p3.astype(jnp.bfloat16),
                  preferred_element_type=jnp.float32) + b3_ref[...]  # [D, N]
    # VQ nearest-codebook lookup (f32, first-index argmin like torch.argmin).
    e = e_ref[...]
    kc = e.shape[0]
    ez = jnp.dot(e, z_e, preferred_element_type=jnp.float32)          # [Kc, N]
    z2 = jnp.sum(z_e * z_e, axis=0, keepdims=True)
    d = e2_ref[...] - 2.0 * ez + z2
    dmin = jnp.min(d, axis=0, keepdims=True)
    kk = jax.lax.broadcasted_iota(jnp.int32, d.shape, 0)
    idx = jnp.min(jnp.where(d == dmin, kk, kc), axis=0, keepdims=True)
    onehot = (kk == idx).astype(jnp.float32)
    z_q = jnp.dot(et_ref[...], onehot, preferred_element_type=jnp.float32)
    o_ref[...] = jnp.concatenate([z_e, z_q], axis=0)         # rows: [z_e ; z_q]


# ------------------------------ decoder kernel -------------------------------

def _decoder_kernel(zq_ref, w1_ref, b1_ref, g1_ref, bt1_ref,
                    w2_ref, b2_ref, g2_ref, bt2_ref,
                    w3_ref, b3_ref, o_ref, *, n_batch):
    n = n_batch
    c1 = b1_ref.shape[0]                                     # 2*fg
    # dec1: ConvTranspose(k=7, s=1, p=0) on a 1x1 map == direct matmul.
    zq = zq_ref[...].astype(jnp.bfloat16)                    # [D, N]
    y1 = jnp.dot(w1_ref[...], zq, preferred_element_type=jnp.float32)  # [(i,j,co), n]
    h1 = jnp.concatenate([y1[s * c1:(s + 1) * c1, :] for s in range(49)], axis=1)
    h1 = h1 + b1_ref[...]                                    # [c1, 49n], cols (i, j, n)
    mean, rstd = _bn_stats([h1])
    h1 = jnp.maximum((h1 - mean) * rstd * g1_ref[...] + bt1_ref[...], 0.0)

    # dec2: ConvTranspose(k=4, s=2, p=1): 4 output phases, each a stride-1 2x2
    # conv on the zero-ringed 9x9 grid of h1.  out[2a+q] uses weight
    # W[ci,co,1-q+2d] and padded row a + (q+1-d).
    g1pad = _pad_grid(h1, 7, 7, n)
    segs1 = _window_segments(g1pad, 9, 9, n, 7)
    win1 = {(r, c): _window(segs1, r, c, 7) for r in range(3) for c in range(3)}
    raw = []
    for qh in range(2):
        for qw in range(2):
            taps = [win1[(qh + 1 - dh, qw + 1 - dw)]
                    for dh in range(2) for dw in range(2)]
            patch = jnp.concatenate(taps, axis=0).astype(jnp.bfloat16)   # [4*c1, 49n]
            raw.append(jnp.dot(w2_ref[qh * 2 + qw], patch,
                               preferred_element_type=jnp.float32) + b2_ref[...])
    mean, rstd = _bn_stats(raw)                              # BN over all 4 phases
    h2ph = [jnp.maximum((y - mean) * rstd * g2_ref[...] + bt2_ref[...], 0.0)
            for y in raw]

    # dec3: ConvTranspose(k=4, s=2, p=1) + tanh, applied to the phase-separated
    # dec2 output (double phase decomposition -> only contiguous slices needed).
    segs2 = []
    for ph in range(4):
        gp = _pad_grid(h2ph[ph], 7, 7, n)
        segs2.append(_window_segments(gp, 9, 9, n, 7))

    def _src_win(th, tw):
        sph = (th % 2) * 2 + (tw % 2)
        r0 = 1 + (th - th % 2) // 2
        c0 = 1 + (tw - tw % 2) // 2
        return _window(segs2[sph], r0, c0, 7)

    win2 = {(th, tw): _src_win(th, tw)
            for th in range(-1, 3) for tw in range(-1, 3)}
    blocks = []
    for rh in range(2):
        for rw in range(2):
            wq = w3_ref[rh * 2 + rw]                         # [c3, 4*fg]
            for gh in range(2):
                for gw in range(2):
                    taps = [win2[(gh + rh - dh, gw + rw - dw)]
                            for dh in range(2) for dw in range(2)]
                    patch = jnp.concatenate(taps, axis=0).astype(jnp.bfloat16)
                    y = jnp.dot(wq, patch,
                                preferred_element_type=jnp.float32) + b3_ref[...]
                    blocks.append(jnp.tanh(y))               # [c3, 49n]
    out = jnp.concatenate(blocks, axis=0)                    # [16*c3, 49n]
    pad = o_ref.shape[1] - out.shape[1]
    if pad:                                                  # lane-pad to 128-multiple
        out = jnp.concatenate(
            [out, jnp.zeros((out.shape[0], pad), jnp.float32)], axis=1)
    o_ref[...] = out                                         # single lane-dense store


# ------------------------------ pallas wrappers ------------------------------

def _full_spec(shape):
    nd = len(shape)
    return pl.BlockSpec(tuple(shape), lambda i, _nd=nd: (0,) * _nd)


def encoder_vq_call(p1e, mask, q, n_batch):
    d = q["enc_w3"].shape[0]
    args = [p1e, mask, q["enc_w1"], q["enc_b1"], q["enc_w2"], q["enc_b2"],
            q["enc_g2"], q["enc_bt2"], q["enc_w3"], q["enc_b3"],
            q["vq_e"], q["vq_et"], q["vq_e2"]]
    return pl.pallas_call(
        functools.partial(_encoder_vq_kernel, n_batch=n_batch),
        out_shape=jax.ShapeDtypeStruct((2 * d, n_batch), jnp.float32),
        grid=(1,),
        in_specs=[_full_spec(a.shape) for a in args],
        out_specs=_full_spec((2 * d, n_batch)),
        compiler_params=pltpu.CompilerParams(dimension_semantics=("arbitrary",)),
    )(*args)


def decoder_call(z_q, q, n_batch):
    c3 = q["dec_b3"].shape[0]
    m = 49 * n_batch
    m_pad = max(128, pl.cdiv(m, 128) * 128)
    args = [z_q, q["dec_w1"], q["dec_b1"], q["dec_g1"], q["dec_bt1"],
            q["dec_w2"], q["dec_b2"], q["dec_g2"], q["dec_bt2"],
            q["dec_w3"], q["dec_b3"]]
    return pl.pallas_call(
        functools.partial(_decoder_kernel, n_batch=n_batch),
        out_shape=jax.ShapeDtypeStruct((16 * c3, m_pad), jnp.float32),
        grid=(1,),
        in_specs=[_full_spec(a.shape) for a in args],
        out_specs=_full_spec((16 * c3, m_pad)),
        compiler_params=pltpu.CompilerParams(dimension_semantics=("arbitrary",)),
    )(*args)


# ------------------------- XLA-side input preparation ------------------------

def _build_encoder_inputs(x):
    """conv1 im2col expanded per (conv2-tap, conv2-output) column; cols ordered
    (kh2, kw2, oi, oj, n), rows (kh1, kw1, c).  Plus the conv2 zero-pad mask."""
    n, c, h, w = x.shape
    assert h == 28 and w == 28, "architecture is fixed for 28x28 inputs"
    xp = jnp.pad(x, ((0, 0), (0, 0), (1, 1), (1, 1)))
    taps = []
    for kh in range(4):
        for kw in range(4):
            taps.append(xp[:, :, kh:kh + 28:2, kw:kw + 28:2])       # [n, c, 14, 14]
    p1 = jnp.stack(taps, axis=0)                                     # [16, n, c, 14, 14]
    p1 = jnp.transpose(p1, (0, 2, 1, 3, 4)).reshape(16 * c, n, 14, 14)
    p1p = jnp.pad(p1, ((0, 0), (0, 0), (1, 1), (1, 1)))
    mk = jnp.pad(jnp.ones((1, n, 14, 14), jnp.float32),
                 ((0, 0), (0, 0), (1, 1), (1, 1)))
    cols, mcols = [], []
    for kh2 in range(4):
        for kw2 in range(4):
            e = p1p[:, :, kh2:kh2 + 13:2, kw2:kw2 + 13:2]            # [16c, n, 7, 7]
            cols.append(jnp.transpose(e, (0, 2, 3, 1)).reshape(16 * c, 49 * n))
            m = mk[:, :, kh2:kh2 + 13:2, kw2:kw2 + 13:2]
            mcols.append(jnp.transpose(m, (0, 2, 3, 1)).reshape(1, 49 * n))
    p1e = jnp.concatenate(cols, axis=1).astype(jnp.bfloat16)
    mask = jnp.concatenate(mcols, axis=1)
    return p1e, mask


def _tconv_phase_weights(wt):
    """PyTorch ConvTranspose2d weight [ci, co, 4, 4] -> per-output-phase 2x2
    sub-kernels [4, co, 4*ci]; tap blocks ordered (dh, dw), columns = ci."""
    phases = []
    for qh in range(2):
        for qw in range(2):
            taps = []
            for dh in range(2):
                for dw in range(2):
                    taps.append(jnp.transpose(
                        wt[:, :, 1 - qh + 2 * dh, 1 - qw + 2 * dw], (1, 0)))
            phases.append(jnp.concatenate(taps, axis=1))
    return jnp.stack(phases, axis=0).astype(jnp.bfloat16)


def prepare_params(p):
    """Rearrange PyTorch-layout weights into kernel-ready matrices (bf16)."""
    def conv_mat(w):                      # [co, ci, kh, kw] -> [co, (kh, kw, ci)]
        return jnp.transpose(w, (0, 2, 3, 1)).reshape(w.shape[0], -1).astype(jnp.bfloat16)

    def col(v):
        return v.reshape(-1, 1)

    e = p["codebook"]
    q = {
        "enc_w1": conv_mat(p["enc1_w"]), "enc_b1": col(p["enc1_b"]),
        "enc_w2": conv_mat(p["enc2_w"]), "enc_b2": col(p["enc2_b"]),
        "enc_g2": col(p["enc2_bn_g"]), "enc_bt2": col(p["enc2_bn_b"]),
        "enc_w3": conv_mat(p["enc3_w"]), "enc_b3": col(p["enc3_b"]),
        "vq_e": e, "vq_et": e.T, "vq_e2": jnp.sum(e * e, axis=1, keepdims=True),
        "dec_b1": col(p["dec1_b"]), "dec_g1": col(p["dec1_bn_g"]),
        "dec_bt1": col(p["dec1_bn_b"]),
        "dec_b2": col(p["dec2_b"]), "dec_g2": col(p["dec2_bn_g"]),
        "dec_bt2": col(p["dec2_bn_b"]),
        "dec_b3": col(p["dec3_b"]),
    }
    wt1 = p["dec1_w"]                                        # [D, 2fg, 7, 7]
    q["dec_w1"] = jnp.transpose(wt1, (2, 3, 1, 0)).reshape(
        49 * wt1.shape[1], wt1.shape[0]).astype(jnp.bfloat16)
    q["dec_w2"] = _tconv_phase_weights(p["dec2_w"])
    q["dec_w3"] = _tconv_phase_weights(p["dec3_w"])
    return q


def init_params(key, channels_img=3, embedded_dim=32, num_embedding=64,
                features_g=16, features_d=16):
    """PyTorch-layout parameters with xavier_uniform conv init (weights_init)."""
    ks = jax.random.split(key, 7)
    fd, fg, d, k = features_d, features_g, embedded_dim, num_embedding

    def xavier(kk, shape):                # shape[0/1] = out/in (or in/out) channels
        rf = shape[2] * shape[3]
        bound = (6.0 / ((shape[0] + shape[1]) * rf)) ** 0.5
        return jax.random.uniform(kk, shape, jnp.float32, -bound, bound)

    return {
        "enc1_w": xavier(ks[0], (fd, channels_img, 4, 4)),
        "enc1_b": jnp.zeros((fd,), jnp.float32),
        "enc2_w": xavier(ks[1], (2 * fd, fd, 4, 4)),
        "enc2_b": jnp.zeros((2 * fd,), jnp.float32),
        "enc2_bn_g": jnp.ones((2 * fd,), jnp.float32),
        "enc2_bn_b": jnp.zeros((2 * fd,), jnp.float32),
        "enc3_w": xavier(ks[2], (d, 2 * fd, 7, 7)),
        "enc3_b": jnp.zeros((d,), jnp.float32),
        "codebook": jax.random.uniform(ks[3], (k, d), jnp.float32, -1.0 / k, 1.0 / k),
        "dec1_w": xavier(ks[4], (d, 2 * fg, 7, 7)),
        "dec1_b": jnp.zeros((2 * fg,), jnp.float32),
        "dec1_bn_g": jnp.ones((2 * fg,), jnp.float32),
        "dec1_bn_b": jnp.zeros((2 * fg,), jnp.float32),
        "dec2_w": xavier(ks[5], (2 * fg, fg, 4, 4)),
        "dec2_b": jnp.zeros((fg,), jnp.float32),
        "dec2_bn_g": jnp.ones((fg,), jnp.float32),
        "dec2_bn_b": jnp.zeros((fg,), jnp.float32),
        "dec3_w": xavier(ks[6], (fg, channels_img, 4, 4)),
        "dec3_b": jnp.zeros((channels_img,), jnp.float32),
    }


# ---------------------------------- forward ----------------------------------

def vqvae_gan_forward(params, x):
    n, c_img = x.shape[0], x.shape[1]
    d = params["enc3_w"].shape[0]
    q = prepare_params(params)

    p1e, mask = _build_encoder_inputs(x)
    enc = encoder_vq_call(p1e, mask, q, n)                   # [2D, N] = [z_e ; z_q]
    z_e, z_q = enc[:d, :], enc[d:, :]
    # TODO(synk): straight-through / detach only change gradients; forward values
    # of z_q_x_st and z_q_x are identical (the selected codebook vectors).

    dec = decoder_call(z_q, q, n)                            # [16*C, 128], phase-folded
    m = 49 * n
    blocks = dec[:, :m].reshape(2, 2, 2, 2, c_img, 7, 7, n)  # (rh, rw, gh, gw, co, a, b, n)
    x_tilde = jnp.transpose(blocks, (7, 4, 5, 2, 0, 6, 3, 1)).reshape(n, c_img, 28, 28)

    z_e_x = jnp.transpose(z_e, (1, 0)).reshape(n, d, 1, 1)
    z_q_x = jnp.transpose(z_q, (1, 0)).reshape(n, d, 1, 1)
    return x_tilde, z_e_x, z_q_x
    # TODO(synk): BatchNorm uses per-batch statistics (training-mode forward);
    # an eval-mode PyTorch forward with running stats would differ.


if __name__ == "__main__":
    key = jax.random.PRNGKey(0)
    k_param, k_x = jax.random.split(key)
    channels_img = 3
    params = init_params(k_param, channels_img=channels_img, embedded_dim=32,
                         num_embedding=64, features_g=16, features_d=16)
    # 28x28 input: encoder 28 -> 14 -> 7 -> 1 ; decoder 1 -> 7 -> 14 -> 28
    x = jax.random.normal(k_x, (2, channels_img, 28, 28), jnp.float32)

    fwd = jax.jit(vqvae_gan_forward)
    x_tilde, z_e_x, z_q_x = fwd(params, x)
    jax.block_until_ready((x_tilde, z_e_x, z_q_x))

    assert x_tilde.shape == (2, channels_img, 28, 28)
    assert z_e_x.shape == (2, 32, 1, 1)
    assert z_q_x.shape == (2, 32, 1, 1)
    assert bool(jnp.all(jnp.isfinite(x_tilde)))
    assert bool(jnp.all(jnp.isfinite(z_e_x)))
    assert bool(jnp.all(jnp.isfinite(z_q_x)))
    print("KERNEL_OK")
</pallas_src>

<mosaic_0001>
module attributes {stable_mosaic.version = 11 : i64} {
  func.func @_decoder_kernel(%arg0: i32, %arg1: memref<32x2xf32, #tpu.memory_space<vmem>>, %arg2: memref<1568x32xbf16, #tpu.memory_space<vmem>>, %arg3: memref<32x1xf32, #tpu.memory_space<vmem>>, %arg4: memref<32x1xf32, #tpu.memory_space<vmem>>, %arg5: memref<32x1xf32, #tpu.memory_space<vmem>>, %arg6: memref<4x16x128xbf16, #tpu.memory_space<vmem>>, %arg7: memref<16x1xf32, #tpu.memory_space<vmem>>, %arg8: memref<16x1xf32, #tpu.memory_space<vmem>>, %arg9: memref<16x1xf32, #tpu.memory_space<vmem>>, %arg10: memref<4x3x64xbf16, #tpu.memory_space<vmem>>, %arg11: memref<3x1xf32, #tpu.memory_space<vmem>>, %arg12: memref<48x128xf32, #tpu.memory_space<vmem>>) attributes {dimension_semantics = [#tpu.dimension_semantics<arbitrary>], iteration_bounds = array<i64: 1>, scalar_prefetch = 0 : i64, scratch_operands = 0 : i64, tpu.core_type = #tpu.core_type<tc>, window_params = [{pipeline_mode = #tpu.pipeline_mode<synchronous>, transform_indices = @transform_0, window_bounds = array<i64: 32, 2>}, {pipeline_mode = #tpu.pipeline_mode<synchronous>, transform_indices = @transform_1, window_bounds = array<i64: 1568, 32>}, {pipeline_mode = #tpu.pipeline_mode<synchronous>, transform_indices = @transform_2, window_bounds = array<i64: 32, 1>}, {pipeline_mode = #tpu.pipeline_mode<synchronous>, transform_indices = @transform_3, window_bounds = array<i64: 32, 1>}, {pipeline_mode = #tpu.pipeline_mode<synchronous>, transform_indices = @transform_4, window_bounds = array<i64: 32, 1>}, {pipeline_mode = #tpu.pipeline_mode<synchronous>, transform_indices = @transform_5, window_bounds = array<i64: 4, 16, 128>}, {pipeline_mode = #tpu.pipeline_mode<synchronous>, transform_indices = @transform_6, window_bounds = array<i64: 16, 1>}, {pipeline_mode = #tpu.pipeline_mode<synchronous>, transform_indices = @transform_7, window_bounds = array<i64: 16, 1>}, {pipeline_mode = #tpu.pipeline_mode<synchronous>, transform_indices = @transform_8, window_bounds = array<i64: 16, 1>}, {pipeline_mode = #tpu.pipeline_mode<synchronous>, transform_indices = @transform_9, window_bounds = array<i64: 4, 3, 64>}, {pipeline_mode = #tpu.pipeline_mode<synchronous>, transform_indices = @transform_10, window_bounds = array<i64: 3, 1>}, {pipeline_mode = #tpu.pipeline_mode<synchronous>, transform_indices = @transform_11, window_bounds = array<i64: 48, 128>}]} {
    %c0 = arith.constant 0 : index
    %c0_0 = arith.constant 0 : index
    %0 = vector.load %arg1[%c0, %c0_0] : memref<32x2xf32, #tpu.memory_space<vmem>>, vector<32x2xf32>
    %1 = arith.truncf %0 : vector<32x2xf32> to vector<32x2xbf16>
    %c0_1 = arith.constant 0 : index
    %c0_2 = arith.constant 0 : index
    %2 = vector.load %arg2[%c0_1, %c0_2] : memref<1568x32xbf16, #tpu.memory_space<vmem>>, vector<1568x32xbf16>
    %cst = arith.constant dense<0.000000e+00> : vector<1568x2xf32>
    %3 = tpu.matmul %2, %1, %cst {dimension_numbers = #tpu.dot_dimension_numbers<[1], [0], [0], [1], [0, 0, 1, 1], [], []>} : vector<1568x32xbf16>, vector<32x2xbf16>, vector<1568x2xf32> -> vector<1568x2xf32>
    %4 = vector.extract_strided_slice %3 {offsets = [0, 0], sizes = [32, 2], strides = [1, 1]} : vector<1568x2xf32> to vector<32x2xf32>
    %5 = vector.extract_strided_slice %3 {offsets = [32, 0], sizes = [32, 2], strides = [1, 1]} : vector<1568x2xf32> to vector<32x2xf32>
    %6 = vector.extract_strided_slice %3 {offsets = [64, 0], sizes = [32, 2], strides = [1, 1]} : vector<1568x2xf32> to vector<32x2xf32>
    %7 = vector.extract_strided_slice %3 {offsets = [96, 0], sizes = [32, 2], strides = [1, 1]} : vector<1568x2xf32> to vector<32x2xf32>
    %8 = vector.extract_strided_slice %3 {offsets = [128, 0], sizes = [32, 2], strides = [1, 1]} : vector<1568x2xf32> to vector<32x2xf32>
    %9 = vector.extract_strided_slice %3 {offsets = [160, 0], sizes = [32, 2], strides = [1, 1]} : vector<1568x2xf32> to vector<32x2xf32>
    %10 = vector.extract_strided_slice %3 {offsets = [192, 0], sizes = [32, 2], strides = [1, 1]} : vector<1568x2xf32> to vector<32x2xf32>
    %11 = vector.extract_strided_slice %3 {offsets = [224, 0], sizes = [32, 2], strides = [1, 1]} : vector<1568x2xf32> to vector<32x2xf32>
    %12 = vector.extract_strided_slice %3 {offsets = [256, 0], sizes = [32, 2], strides = [1, 1]} : vector<1568x2xf32> to vector<32x2xf32>
    %13 = vector.extract_strided_slice %3 {offsets = [288, 0], sizes = [32, 2], strides = [1, 1]} : vector<1568x2xf32> to vector<32x2xf32>
    %14 = vector.extract_strided_slice %3 {offsets = [320, 0], sizes = [32, 2], strides = [1, 1]} : vector<1568x2xf32> to vector<32x2xf32>
    %15 = vector.extract_strided_slice %3 {offsets = [352, 0], sizes = [32, 2], strides = [1, 1]} : vector<1568x2xf32> to vector<32x2xf32>
    %16 = vector.extract_strided_slice %3 {offsets = [384, 0], sizes = [32, 2], strides = [1, 1]} : vector<1568x2xf32> to vector<32x2xf32>
    %17 = vector.extract_strided_slice %3 {offsets = [416, 0], sizes = [32, 2], strides = [1, 1]} : vector<1568x2xf32> to vector<32x2xf32>
    %18 = vector.extract_strided_slice %3 {offsets = [448, 0], sizes = [32, 2], strides = [1, 1]} : vector<1568x2xf32> to vector<32x2xf32>
    %19 = vector.extract_strided_slice %3 {offsets = [480, 0], sizes = [32, 2], strides = [1, 1]} : vector<1568x2xf32> to vector<32x2xf32>
    %20 = vector.extract_strided_slice %3 {offsets = [512, 0], sizes = [32, 2], strides = [1, 1]} : vector<1568x2xf32> to vector<32x2xf32>
    %21 = vector.extract_strided_slice %3 {offsets = [544, 0], sizes = [32, 2], strides = [1, 1]} : vector<1568x2xf32> to vector<32x2xf32>
    %22 = vector.extract_strided_slice %3 {offsets = [576, 0], sizes = [32, 2], strides = [1, 1]} : vector<1568x2xf32> to vector<32x2xf32>
    %23 = vector.extract_strided_slice %3 {offsets = [608, 0], sizes = [32, 2], strides = [1, 1]} : vector<1568x2xf32> to vector<32x2xf32>
    %24 = vector.extract_strided_slice %3 {offsets = [640, 0], sizes = [32, 2], strides = [1, 1]} : vector<1568x2xf32> to vector<32x2xf32>
    %25 = vector.extract_strided_slice %3 {offsets = [672, 0], sizes = [32, 2], strides = [1, 1]} : vector<1568x2xf32> to vector<32x2xf32>
    %26 = vector.extract_strided_slice %3 {offsets = [704, 0], sizes = [32, 2], strides = [1, 1]} : vector<1568x2xf32> to vector<32x2xf32>
    %27 = vector.extract_strided_slice %3 {offsets = [736, 0], sizes = [32, 2], strides = [1, 1]} : vector<1568x2xf32> to vector<32x2xf32>
    %28 = vector.extract_strided_slice %3 {offsets = [768, 0], sizes = [32, 2], strides = [1, 1]} : vector<1568x2xf32> to vector<32x2xf32>
    %29 = vector.extract_strided_slice %3 {offsets = [800, 0], sizes = [32, 2], strides = [1, 1]} : vector<1568x2xf32> to vector<32x2xf32>
    %30 = vector.extract_strided_slice %3 {offsets = [832, 0], sizes = [32, 2], strides = [1, 1]} : vector<1568x2xf32> to vector<32x2xf32>
    %31 = vector.extract_strided_slice %3 {offsets = [864, 0], sizes = [32, 2], strides = [1, 1]} : vector<1568x2xf32> to vector<32x2xf32>
    %32 = vector.extract_strided_slice %3 {offsets = [896, 0], sizes = [32, 2], strides = [1, 1]} : vector<1568x2xf32> to vector<32x2xf32>
    %33 = vector.extract_strided_slice %3 {offsets = [928, 0], sizes = [32, 2], strides = [1, 1]} : vector<1568x2xf32> to vector<32x2xf32>
    %34 = vector.extract_strided_slice %3 {offsets = [960, 0], sizes = [32, 2], strides = [1, 1]} : vector<1568x2xf32> to vector<32x2xf32>
    %35 = vector.extract_strided_slice %3 {offsets = [992, 0], sizes = [32, 2], strides = [1, 1]} : vector<1568x2xf32> to vector<32x2xf32>
    %36 = vector.extract_strided_slice %3 {offsets = [1024, 0], sizes = [32, 2], strides = [1, 1]} : vector<1568x2xf32> to vector<32x2xf32>
    %37 = vector.extract_strided_slice %3 {offsets = [1056, 0], sizes = [32, 2], strides = [1, 1]} : vector<1568x2xf32> to vector<32x2xf32>
    %38 = vector.extract_strided_slice %3 {offsets = [1088, 0], sizes = [32, 2], strides = [1, 1]} : vector<1568x2xf32> to vector<32x2xf32>
    %39 = vector.extract_strided_slice %3 {offsets = [1120, 0], sizes = [32, 2], strides = [1, 1]} : vector<1568x2xf32> to vector<32x2xf32>
    %40 = vector.extract_strided_slice %3 {offsets = [1152, 0], sizes = [32, 2], strides = [1, 1]} : vector<1568x2xf32> to vector<32x2xf32>
    %41 = vector.extract_strided_slice %3 {offsets = [1184, 0], sizes = [32, 2], strides = [1, 1]} : vector<1568x2xf32> to vector<32x2xf32>
    %42 = vector.extract_strided_slice %3 {offsets = [1216, 0], sizes = [32, 2], strides = [1, 1]} : vector<1568x2xf32> to vector<32x2xf32>
    %43 = vector.extract_strided_slice %3 {offsets = [1248, 0], sizes = [32, 2], strides = [1, 1]} : vector<1568x2xf32> to vector<32x2xf32>
    %44 = vector.extract_strided_slice %3 {offsets = [1280, 0], sizes = [32, 2], strides = [1, 1]} : vector<1568x2xf32> to vector<32x2xf32>
    %45 = vector.extract_strided_slice %3 {offsets = [1312, 0], sizes = [32, 2], strides = [1, 1]} : vector<1568x2xf32> to vector<32x2xf32>
    %46 = vector.extract_strided_slice %3 {offsets = [1344, 0], sizes = [32, 2], strides = [1, 1]} : vector<1568x2xf32> to vector<32x2xf32>
    %47 = vector.extract_strided_slice %3 {offsets = [1376, 0], sizes = [32, 2], strides = [1, 1]} : vector<1568x2xf32> to vector<32x2xf32>
    %48 = vector.extract_strided_slice %3 {offsets = [1408, 0], sizes = [32, 2], strides = [1, 1]} : vector<1568x2xf32> to vector<32x2xf32>
    %49 = vector.extract_strided_slice %3 {offsets = [1440, 0], sizes = [32, 2], strides = [1, 1]} : vector<1568x2xf32> to vector<32x2xf32>
    %50 = vector.extract_strided_slice %3 {offsets = [1472, 0], sizes = [32, 2], strides = [1, 1]} : vector<1568x2xf32> to vector<32x2xf32>
    %51 = vector.extract_strided_slice %3 {offsets = [1504, 0], sizes = [32, 2], strides = [1, 1]} : vector<1568x2xf32> to vector<32x2xf32>
    %52 = vector.extract_strided_slice %3 {offsets = [1536, 0], sizes = [32, 2], strides = [1, 1]} : vector<1568x2xf32> to vector<32x2xf32>
    %53 = tpu.concatenate %4, %5, %6, %7, %8, %9, %10, %11, %12, %13, %14, %15, %16, %17, %18, %19 in 1 : vector<32x2xf32>, vector<32x2xf32>, vector<32x2xf32>, vector<32x2xf32>, vector<32x2xf32>, vector<32x2xf32>, vector<32x2xf32>, vector<32x2xf32>, vector<32x2xf32>, vector<32x2xf32>, vector<32x2xf32>, vector<32x2xf32>, vector<32x2xf32>, vector<32x2xf32>, vector<32x2xf32>, vector<32x2xf32> -> vector<32x32xf32>
    %54 = tpu.concatenate %20, %21, %22, %23, %24, %25, %26, %27, %28, %29, %30, %31, %32, %33, %34, %35 in 1 : vector<32x2xf32>, vector<32x2xf32>, vector<32x2xf32>, vector<32x2xf32>, vector<32x2xf32>, vector<32x2xf32>, vector<32x2xf32>, vector<32x2xf32>, vector<32x2xf32>, vector<32x2xf32>, vector<32x2xf32>, vector<32x2xf32>, vector<32x2xf32>, vector<32x2xf32>, vector<32x2xf32>, vector<32x2xf32> -> vector<32x32xf32>
    %55 = tpu.concatenate %36, %37, %38, %39, %40, %41, %42, %43, %44, %45, %46, %47, %48, %49, %50, %51 in 1 : vector<32x2xf32>, vector<32x2xf32>, vector<32x2xf32>, vector<32x2xf32>, vector<32x2xf32>, vector<32x2xf32>, vector<32x2xf32>, vector<32x2xf32>, vector<32x2xf32>, vector<32x2xf32>, vector<32x2xf32>, vector<32x2xf32>, vector<32x2xf32>, vector<32x2xf32>, vector<32x2xf32>, vector<32x2xf32> -> vector<32x32xf32>
    %56 = tpu.concatenate %53, %54, %55, %52 in 1 : vector<32x32xf32>, vector<32x32xf32>, vector<32x32xf32>, vector<32x2xf32> -> vector<32x98xf32>
    %c0_3 = arith.constant 0 : index
    %c0_4 = arith.constant 0 : index
    %57 = vector.load %arg3[%c0_3, %c0_4] : memref<32x1xf32, #tpu.memory_space<vmem>>, vector<32x1xf32>
    %58 = vector.broadcast %57 : vector<32x1xf32> to vector<32x98xf32>
    %59 = arith.addf %56, %58 : vector<32x98xf32>
    %cst_5 = arith.constant dense<0.000000e+00> : vector<32xf32>
    %60 = vector.multi_reduction <add>, %59, %cst_5 [1] : vector<32x98xf32> to vector<32xf32>
    %61 = vector.shape_cast %60 : vector<32xf32> to vector<32x1xf32>
    %62 = arith.mulf %59, %59 : vector<32x98xf32>
    %cst_6 = arith.constant dense<0.000000e+00> : vector<32xf32>
    %63 = vector.multi_reduction <add>, %62, %cst_6 [1] : vector<32x98xf32> to vector<32xf32>
    %64 = vector.shape_cast %63 : vector<32xf32> to vector<32x1xf32>
    %cst_7 = arith.constant 9.800000e+01 : f32
    %65 = vector.broadcast %cst_7 : f32 to vector<32x1xf32>
    %66 = arith.divf %61, %65 : vector<32x1xf32>
    %cst_8 = arith.constant 9.800000e+01 : f32
    %67 = vector.broadcast %cst_8 : f32 to vector<32x1xf32>
    %68 = arith.divf %64, %67 : vector<32x1xf32>
    %69 = arith.mulf %66, %66 : vector<32x1xf32>
    %70 = arith.subf %68, %69 : vector<32x1xf32>
    %cst_9 = arith.constant 9.99999974E-6 : f32
    %71 = vector.broadcast %cst_9 : f32 to vector<32x1xf32>
    %72 = arith.addf %70, %71 : vector<32x1xf32>
    %73 = math.rsqrt %72 : vector<32x1xf32>
    %74 = vector.broadcast %66 : vector<32x1xf32> to vector<32x98xf32>
    %75 = arith.subf %59, %74 : vector<32x98xf32>
    %76 = vector.broadcast %73 : vector<32x1xf32> to vector<32x98xf32>
    %77 = arith.mulf %75, %76 : vector<32x98xf32>
    %c0_10 = arith.constant 0 : index
    %c0_11 = arith.constant 0 : index
    %78 = vector.load %arg4[%c0_10, %c0_11] : memref<32x1xf32, #tpu.memory_space<vmem>>, vector<32x1xf32>
    %79 = vector.broadcast %78 : vector<32x1xf32> to vector<32x98xf32>
    %80 = arith.mulf %77, %79 : vector<32x98xf32>
    %c0_12 = arith.constant 0 : index
    %c0_13 = arith.constant 0 : index
    %81 = vector.load %arg5[%c0_12, %c0_13] : memref<32x1xf32, #tpu.memory_space<vmem>>, vector<32x1xf32>
    %82 = vector.broadcast %81 : vector<32x1xf32> to vector<32x98xf32>
    %83 = arith.addf %80, %82 : vector<32x98xf32>
    %cst_14 = arith.constant 0.000000e+00 : f32
    %84 = vector.broadcast %cst_14 : f32 to vector<32x98xf32>
    %85 = arith.maximumf %83, %84 : vector<32x98xf32>
    %cst_15 = arith.constant 0.000000e+00 : f32
    %86 = vector.broadcast %cst_15 : f32 to vector<32x18xf32>
    %cst_16 = arith.constant 0.000000e+00 : f32
    %87 = vector.broadcast %cst_16 : f32 to vector<32x2xf32>
    %88 = vector.extract_strided_slice %85 {offsets = [0, 0], sizes = [32, 14], strides = [1, 1]} : vector<32x98xf32> to vector<32x14xf32>
    %89 = tpu.concatenate %87, %88, %87 in 1 : vector<32x2xf32>, vector<32x14xf32>, vector<32x2xf32> -> vector<32x18xf32>
    %90 = vector.extract_strided_slice %85 {offsets = [0, 14], sizes = [32, 14], strides = [1, 1]} : vector<32x98xf32> to vector<32x14xf32>
    %91 = tpu.concatenate %87, %90, %87 in 1 : vector<32x2xf32>, vector<32x14xf32>, vector<32x2xf32> -> vector<32x18xf32>
    %92 = vector.extract_strided_slice %85 {offsets = [0, 28], sizes = [32, 14], strides = [1, 1]} : vector<32x98xf32> to vector<32x14xf32>
    %93 = tpu.concatenate %87, %92, %87 in 1 : vector<32x2xf32>, vector<32x14xf32>, vector<32x2xf32> -> vector<32x18xf32>
    %94 = vector.extract_strided_slice %85 {offsets = [0, 42], sizes = [32, 14], strides = [1, 1]} : vector<32x98xf32> to vector<32x14xf32>
    %95 = tpu.concatenate %87, %94, %87 in 1 : vector<32x2xf32>, vector<32x14xf32>, vector<32x2xf32> -> vector<32x18xf32>
    %96 = vector.extract_strided_slice %85 {offsets = [0, 56], sizes = [32, 14], strides = [1, 1]} : vector<32x98xf32> to vector<32x14xf32>
    %97 = tpu.concatenate %87, %96, %87 in 1 : vector<32x2xf32>, vector<32x14xf32>, vector<32x2xf32> -> vector<32x18xf32>
    %98 = vector.extract_strided_slice %85 {offsets = [0, 70], sizes = [32, 14], strides = [1, 1]} : vector<32x98xf32> to vector<32x14xf32>
    %99 = tpu.concatenate %87, %98, %87 in 1 : vector<32x2xf32>, vector<32x14xf32>, vector<32x2xf32> -> vector<32x18xf32>
    %100 = vector.extract_strided_slice %85 {offsets = [0, 84], sizes = [32, 14], strides = [1, 1]} : vector<32x98xf32> to vector<32x14xf32>
    %101 = tpu.concatenate %87, %100, %87 in 1 : vector<32x2xf32>, vector<32x14xf32>, vector<32x2xf32> -> vector<32x18xf32>
    %102 = tpu.concatenate %86, %89, %91, %93, %95, %97, %99, %101, %86 in 1 : vector<32x18xf32>, vector<32x18xf32>, vector<32x18xf32>, vector<32x18xf32>, vector<32x18xf32>, vector<32x18xf32>, vector<32x18xf32>, vector<32x18xf32>, vector<32x18xf32> -> vector<32x162xf32>
    %103 = vector.extract_strided_slice %102 {offsets = [0, 0], sizes = [32, 14], strides = [1, 1]} : vector<32x162xf32> to vector<32x14xf32>
    %104 = vector.extract_strided_slice %102 {offsets = [0, 2], sizes = [32, 14], strides = [1, 1]} : vector<32x162xf32> to vector<32x14xf32>
    %105 = vector.extract_strided_slice %102 {offsets = [0, 4], sizes = [32, 14], strides = [1, 1]} : vector<32x162xf32> to vector<32x14xf32>
    %106 = vector.extract_strided_slice %102 {offsets = [0, 18], sizes = [32, 14], strides = [1, 1]} : vector<32x162xf32> to vector<32x14xf32>
    %107 = vector.extract_strided_slice %102 {offsets = [0, 20], sizes = [32, 14], strides = [1, 1]} : vector<32x162xf32> to vector<32x14xf32>
    %108 = vector.extract_strided_slice %102 {offsets = [0, 22], sizes = [32, 14], strides = [1, 1]} : vector<32x162xf32> to vector<32x14xf32>
    %109 = vector.extract_strided_slice %102 {offsets = [0, 36], sizes = [32, 14], strides = [1, 1]} : vector<32x162xf32> to vector<32x14xf32>
    %110 = vector.extract_strided_slice %102 {offsets = [0, 38], sizes = [32, 14], strides = [1, 1]} : vector<32x162xf32> to vector<32x14xf32>
    %111 = vector.extract_strided_slice %102 {offsets = [0, 40], sizes = [32, 14], strides = [1, 1]} : vector<32x162xf32> to vector<32x14xf32>
    %112 = vector.extract_strided_slice %102 {offsets = [0, 54], sizes = [32, 14], strides = [1, 1]} : vector<32x162xf32> to vector<32x14xf32>
    %113 = vector.extract_strided_slice %102 {offsets = [0, 56], sizes = [32, 14], strides = [1, 1]} : vector<32x162xf32> to vector<32x14xf32>
    %114 = vector.extract_strided_slice %102 {offsets = [0, 58], sizes = [32, 14], strides = [1, 1]} : vector<32x162xf32> to vector<32x14xf32>
    %115 = vector.extract_strided_slice %102 {offsets = [0, 72], sizes = [32, 14], strides = [1, 1]} : vector<32x162xf32> to vector<32x14xf32>
    %116 = vector.extract_strided_slice %102 {offsets = [0, 74], sizes = [32, 14], strides = [1, 1]} : vector<32x162xf32> to vector<32x14xf32>
    %117 = vector.extract_strided_slice %102 {offsets = [0, 76], sizes = [32, 14], strides = [1, 1]} : vector<32x162xf32> to vector<32x14xf32>
    %118 = vector.extract_strided_slice %102 {offsets = [0, 90], sizes = [32, 14], strides = [1, 1]} : vector<32x162xf32> to vector<32x14xf32>
    %119 = vector.extract_strided_slice %102 {offsets = [0, 92], sizes = [32, 14], strides = [1, 1]} : vector<32x162xf32> to vector<32x14xf32>
    %120 = vector.extract_strided_slice %102 {offsets = [0, 94], sizes = [32, 14], strides = [1, 1]} : vector<32x162xf32> to vector<32x14xf32>
    %121 = vector.extract_strided_slice %102 {offsets = [0, 108], sizes = [32, 14], strides = [1, 1]} : vector<32x162xf32> to vector<32x14xf32>
    %122 = vector.extract_strided_slice %102 {offsets = [0, 110], sizes = [32, 14], strides = [1, 1]} : vector<32x162xf32> to vector<32x14xf32>
    %123 = vector.extract_strided_slice %102 {offsets = [0, 112], sizes = [32, 14], strides = [1, 1]} : vector<32x162xf32> to vector<32x14xf32>
    %124 = vector.extract_strided_slice %102 {offsets = [0, 126], sizes = [32, 14], strides = [1, 1]} : vector<32x162xf32> to vector<32x14xf32>
    %125 = vector.extract_strided_slice %102 {offsets = [0, 128], sizes = [32, 14], strides = [1, 1]} : vector<32x162xf32> to vector<32x14xf32>
    %126 = vector.extract_strided_slice %102 {offsets = [0, 130], sizes = [32, 14], strides = [1, 1]} : vector<32x162xf32> to vector<32x14xf32>
    %127 = vector.extract_strided_slice %102 {offsets = [0, 144], sizes = [32, 14], strides = [1, 1]} : vector<32x162xf32> to vector<32x14xf32>
    %128 = vector.extract_strided_slice %102 {offsets = [0, 146], sizes = [32, 14], strides = [1, 1]} : vector<32x162xf32> to vector<32x14xf32>
    %129 = vector.extract_strided_slice %102 {offsets = [0, 148], sizes = [32, 14], strides = [1, 1]} : vector<32x162xf32> to vector<32x14xf32>
    %130 = tpu.concatenate %103, %106, %109, %112, %115, %118, %121 in 1 : vector<32x14xf32>, vector<32x14xf32>, vector<32x14xf32>, vector<32x14xf32>, vector<32x14xf32>, vector<32x14xf32>, vector<32x14xf32> -> vector<32x98xf32>
    %131 = tpu.concatenate %104, %107, %110, %113, %116, %119, %122 in 1 : vector<32x14xf32>, vector<32x14xf32>, vector<32x14xf32>, vector<32x14xf32>, vector<32x14xf32>, vector<32x14xf32>, vector<32x14xf32> -> vector<32x98xf32>
    %132 = tpu.concatenate %105, %108, %111, %114, %117, %120, %123 in 1 : vector<32x14xf32>, vector<32x14xf32>, vector<32x14xf32>, vector<32x14xf32>, vector<32x14xf32>, vector<32x14xf32>, vector<32x14xf32> -> vector<32x98xf32>
    %133 = tpu.concatenate %106, %109, %112, %115, %118, %121, %124 in 1 : vector<32x14xf32>, vector<32x14xf32>, vector<32x14xf32>, vector<32x14xf32>, vector<32x14xf32>, vector<32x14xf32>, vector<32x14xf32> -> vector<32x98xf32>
    %134 = tpu.concatenate %107, %110, %113, %116, %119, %122, %125 in 1 : vector<32x14xf32>, vector<32x14xf32>, vector<32x14xf32>, vector<32x14xf32>, vector<32x14xf32>, vector<32x14xf32>, vector<32x14xf32> -> vector<32x98xf32>
    %135 = tpu.concatenate %108, %111, %114, %117, %120, %123, %126 in 1 : vector<32x14xf32>, vector<32x14xf32>, vector<32x14xf32>, vector<32x14xf32>, vector<32x14xf32>, vector<32x14xf32>, vector<32x14xf32> -> vector<32x98xf32>
    %136 = tpu.concatenate %109, %112, %115, %118, %121, %124, %127 in 1 : vector<32x14xf32>, vector<32x14xf32>, vector<32x14xf32>, vector<32x14xf32>, vector<32x14xf32>, vector<32x14xf32>, vector<32x14xf32> -> vector<32x98xf32>
    %137 = tpu.concatenate %110, %113, %116, %119, %122, %125, %128 in 1 : vector<32x14xf32>, vector<32x14xf32>, vector<32x14xf32>, vector<32x14xf32>, vector<32x14xf32>, vector<32x14xf32>, vector<32x14xf32> -> vector<32x98xf32>
    %138 = tpu.concatenate %111, %114, %117, %120, %123, %126, %129 in 1 : vector<32x14xf32>, vector<32x14xf32>, vector<32x14xf32>, vector<32x14xf32>, vector<32x14xf32>, vector<32x14xf32>, vector<32x14xf32> -> vector<32x98xf32>
    %139 = tpu.concatenate %134, %133, %131, %130 in 0 : vector<32x98xf32>, vector<32x98xf32>, vector<32x98xf32>, vector<32x98xf32> -> vector<128x98xf32>
    %140 = arith.truncf %139 : vector<128x98xf32> to vector<128x98xbf16>
    %c0_17 = arith.constant 0 : index
    %c0_18 = arith.constant 0 : index
    %c0_19 = arith.constant 0 : index
    %141 = vector.load %arg6[%c0_17, %c0_18, %c0_19] : memref<4x16x128xbf16, #tpu.memory_space<vmem>>, vector<1x16x128xbf16>
    %142 = vector.shape_cast %141 : vector<1x16x128xbf16> to vector<16x128xbf16>
    %cst_20 = arith.constant dense<0.000000e+00> : vector<16x98xf32>
    %143 = tpu.matmul %142, %140, %cst_20 {dimension_numbers = #tpu.dot_dimension_numbers<[1], [0], [0], [1], [0, 0, 1, 1], [], []>} : vector<16x128xbf16>, vector<128x98xbf16>, vector<16x98xf32> -> vector<16x98xf32>
    %c0_21 = arith.constant 0 : index
    %c0_22 = arith.constant 0 : index
    %144 = vector.load %arg7[%c0_21, %c0_22] : memref<16x1xf32, #tpu.memory_space<vmem>>, vector<16x1xf32>
    %145 = vector.broadcast %144 : vector<16x1xf32> to vector<16x98xf32>
    %146 = arith.addf %143, %145 : vector<16x98xf32>
    %147 = tpu.concatenate %135, %134, %132, %131 in 0 : vector<32x98xf32>, vector<32x98xf32>, vector<32x98xf32>, vector<32x98xf32> -> vector<128x98xf32>
    %148 = arith.truncf %147 : vector<128x98xf32> to vector<128x98xbf16>
    %c1 = arith.constant 1 : index
    %c0_23 = arith.constant 0 : index
    %c0_24 = arith.constant 0 : index
    %149 = vector.load %arg6[%c1, %c0_23, %c0_24] : memref<4x16x128xbf16, #tpu.memory_space<vmem>>, vector<1x16x128xbf16>
    %150 = vector.shape_cast %149 : vector<1x16x128xbf16> to vector<16x128xbf16>
    %cst_25 = arith.constant dense<0.000000e+00> : vector<16x98xf32>
    %151 = tpu.matmul %150, %148, %cst_25 {dimension_numbers = #tpu.dot_dimension_numbers<[1], [0], [0], [1], [0, 0, 1, 1], [], []>} : vector<16x128xbf16>, vector<128x98xbf16>, vector<16x98xf32> -> vector<16x98xf32>
    %c0_26 = arith.constant 0 : index
    %c0_27 = arith.constant 0 : index
    %152 = vector.load %arg7[%c0_26, %c0_27] : memref<16x1xf32, #tpu.memory_space<vmem>>, vector<16x1xf32>
    %153 = vector.broadcast %152 : vector<16x1xf32> to vector<16x98xf32>
    %154 = arith.addf %151, %153 : vector<16x98xf32>
    %155 = tpu.concatenate %137, %136, %134, %133 in 0 : vector<32x98xf32>, vector<32x98xf32>, vector<32x98xf32>, vector<32x98xf32> -> vector<128x98xf32>
    %156 = arith.truncf %155 : vector<128x98xf32> to vector<128x98xbf16>
    %c2 = arith.constant 2 : index
    %c0_28 = arith.constant 0 : index
    %c0_29 = arith.constant 0 : index
    %157 = vector.load %arg6[%c2, %c0_28, %c0_29] : memref<4x16x128xbf16, #tpu.memory_space<vmem>>, vector<1x16x128xbf16>
    %158 = vector.shape_cast %157 : vector<1x16x128xbf16> to vector<16x128xbf16>
    %cst_30 = arith.constant dense<0.000000e+00> : vector<16x98xf32>
    %159 = tpu.matmul %158, %156, %cst_30 {dimension_numbers = #tpu.dot_dimension_numbers<[1], [0], [0], [1], [0, 0, 1, 1], [], []>} : vector<16x128xbf16>, vector<128x98xbf16>, vector<16x98xf32> -> vector<16x98xf32>
    %c0_31 = arith.constant 0 : index
    %c0_32 = arith.constant 0 : index
    %160 = vector.load %arg7[%c0_31, %c0_32] : memref<16x1xf32, #tpu.memory_space<vmem>>, vector<16x1xf32>
    %161 = vector.broadcast %160 : vector<16x1xf32> to vector<16x98xf32>
    %162 = arith.addf %159, %161 : vector<16x98xf32>
    %163 = tpu.concatenate %138, %137, %135, %134 in 0 : vector<32x98xf32>, vector<32x98xf32>, vector<32x98xf32>, vector<32x98xf32> -> vector<128x98xf32>
    %164 = arith.truncf %163 : vector<128x98xf32> to vector<128x98xbf16>
    %c3 = arith.constant 3 : index
    %c0_33 = arith.constant 0 : index
    %c0_34 = arith.constant 0 : index
    %165 = vector.load %arg6[%c3, %c0_33, %c0_34] : memref<4x16x128xbf16, #tpu.memory_space<vmem>>, vector<1x16x128xbf16>
    %166 = vector.shape_cast %165 : vector<1x16x128xbf16> to vector<16x128xbf16>
    %cst_35 = arith.constant dense<0.000000e+00> : vector<16x98xf32>
    %167 = tpu.matmul %166, %164, %cst_35 {dimension_numbers = #tpu.dot_dimension_numbers<[1], [0], [0], [1], [0, 0, 1, 1], [], []>} : vector<16x128xbf16>, vector<128x98xbf16>, vector<16x98xf32> -> vector<16x98xf32>
    %c0_36 = arith.constant 0 : index
    %c0_37 = arith.constant 0 : index
    %168 = vector.load %arg7[%c0_36, %c0_37] : memref<16x1xf32, #tpu.memory_space<vmem>>, vector<16x1xf32>
    %169 = vector.broadcast %168 : vector<16x1xf32> to vector<16x98xf32>
    %170 = arith.addf %167, %169 : vector<16x98xf32>
    %cst_38 = arith.constant dense<0.000000e+00> : vector<16xf32>
    %171 = vector.multi_reduction <add>, %146, %cst_38 [1] : vector<16x98xf32> to vector<16xf32>
    %172 = vector.shape_cast %171 : vector<16xf32> to vector<16x1xf32>
    %173 = arith.mulf %146, %146 : vector<16x98xf32>
    %cst_39 = arith.constant dense<0.000000e+00> : vector<16xf32>
    %174 = vector.multi_reduction <add>, %173, %cst_39 [1] : vector<16x98xf32> to vector<16xf32>
    %175 = vector.shape_cast %174 : vector<16xf32> to vector<16x1xf32>
    %cst_40 = arith.constant dense<0.000000e+00> : vector<16xf32>
    %176 = vector.multi_reduction <add>, %154, %cst_40 [1] : vector<16x98xf32> to vector<16xf32>
    %177 = vector.shape_cast %176 : vector<16xf32> to vector<16x1xf32>
    %178 = arith.mulf %154, %154 : vector<16x98xf32>
    %cst_41 = arith.constant dense<0.000000e+00> : vector<16xf32>
    %179 = vector.multi_reduction <add>, %178, %cst_41 [1] : vector<16x98xf32> to vector<16xf32>
    %180 = vector.shape_cast %179 : vector<16xf32> to vector<16x1xf32>
    %181 = arith.addf %172, %177 : vector<16x1xf32>
    %182 = arith.addf %175, %180 : vector<16x1xf32>
    %cst_42 = arith.constant dense<0.000000e+00> : vector<16xf32>
    %183 = vector.multi_reduction <add>, %162, %cst_42 [1] : vector<16x98xf32> to vector<16xf32>
    %184 = vector.shape_cast %183 : vector<16xf32> to vector<16x1xf32>
    %185 = arith.mulf %162, %162 : vector<16x98xf32>
    %cst_43 = arith.constant dense<0.000000e+00> : vector<16xf32>
    %186 = vector.multi_reduction <add>, %185, %cst_43 [1] : vector<16x98xf32> to vector<16xf32>
    %187 = vector.shape_cast %186 : vector<16xf32> to vector<16x1xf32>
    %188 = arith.addf %181, %184 : vector<16x1xf32>
    %189 = arith.addf %182, %187 : vector<16x1xf32>
    %cst_44 = arith.constant dense<0.000000e+00> : vector<16xf32>
    %190 = vector.multi_reduction <add>, %170, %cst_44 [1] : vector<16x98xf32> to vector<16xf32>
    %191 = vector.shape_cast %190 : vector<16xf32> to vector<16x1xf32>
    %192 = arith.mulf %170, %170 : vector<16x98xf32>
    %cst_45 = arith.constant dense<0.000000e+00> : vector<16xf32>
    %193 = vector.multi_reduction <add>, %192, %cst_45 [1] : vector<16x98xf32> to vector<16xf32>
    %194 = vector.shape_cast %193 : vector<16xf32> to vector<16x1xf32>
    %195 = arith.addf %188, %191 : vector<16x1xf32>
    %196 = arith.addf %189, %194 : vector<16x1xf32>
    %cst_46 = arith.constant 3.920000e+02 : f32
    %197 = vector.broadcast %cst_46 : f32 to vector<16x1xf32>
    %198 = arith.divf %195, %197 : vector<16x1xf32>
    %cst_47 = arith.constant 3.920000e+02 : f32
    %199 = vector.broadcast %cst_47 : f32 to vector<16x1xf32>
    %200 = arith.divf %196, %199 : vector<16x1xf32>
    %201 = arith.mulf %198, %198 : vector<16x1xf32>
    %202 = arith.subf %200, %201 : vector<16x1xf32>
    %cst_48 = arith.constant 9.99999974E-6 : f32
    %203 = vector.broadcast %cst_48 : f32 to vector<16x1xf32>
    %204 = arith.addf %202, %203 : vector<16x1xf32>
    %205 = math.rsqrt %204 : vector<16x1xf32>
    %206 = vector.broadcast %198 : vector<16x1xf32> to vector<16x98xf32>
    %207 = arith.subf %146, %206 : vector<16x98xf32>
    %208 = vector.broadcast %205 : vector<16x1xf32> to vector<16x98xf32>
    %209 = arith.mulf %207, %208 : vector<16x98xf32>
    %c0_49 = arith.constant 0 : index
    %c0_50 = arith.constant 0 : index
    %210 = vector.load %arg8[%c0_49, %c0_50] : memref<16x1xf32, #tpu.memory_space<vmem>>, vector<16x1xf32>
    %211 = vector.broadcast %210 : vector<16x1xf32> to vector<16x98xf32>
    %212 = arith.mulf %209, %211 : vector<16x98xf32>
    %c0_51 = arith.constant 0 : index
    %c0_52 = arith.constant 0 : index
    %213 = vector.load %arg9[%c0_51, %c0_52] : memref<16x1xf32, #tpu.memory_space<vmem>>, vector<16x1xf32>
    %214 = vector.broadcast %213 : vector<16x1xf32> to vector<16x98xf32>
    %215 = arith.addf %212, %214 : vector<16x98xf32>
    %cst_53 = arith.constant 0.000000e+00 : f32
    %216 = vector.broadcast %cst_53 : f32 to vector<16x98xf32>
    %217 = arith.maximumf %215, %216 : vector<16x98xf32>
    %218 = vector.broadcast %198 : vector<16x1xf32> to vector<16x98xf32>
    %219 = arith.subf %154, %218 : vector<16x98xf32>
    %220 = vector.broadcast %205 : vector<16x1xf32> to vector<16x98xf32>
    %221 = arith.mulf %219, %220 : vector<16x98xf32>
    %c0_54 = arith.constant 0 : index
    %c0_55 = arith.constant 0 : index
    %222 = vector.load %arg8[%c0_54, %c0_55] : memref<16x1xf32, #tpu.memory_space<vmem>>, vector<16x1xf32>
    %223 = vector.broadcast %222 : vector<16x1xf32> to vector<16x98xf32>
    %224 = arith.mulf %221, %223 : vector<16x98xf32>
    %c0_56 = arith.constant 0 : index
    %c0_57 = arith.constant 0 : index
    %225 = vector.load %arg9[%c0_56, %c0_57] : memref<16x1xf32, #tpu.memory_space<vmem>>, vector<16x1xf32>
    %226 = vector.broadcast %225 : vector<16x1xf32> to vector<16x98xf32>
    %227 = arith.addf %224, %226 : vector<16x98xf32>
    %cst_58 = arith.constant 0.000000e+00 : f32
    %228 = vector.broadcast %cst_58 : f32 to vector<16x98xf32>
    %229 = arith.maximumf %227, %228 : vector<16x98xf32>
    %230 = vector.broadcast %198 : vector<16x1xf32> to vector<16x98xf32>
    %231 = arith.subf %162, %230 : vector<16x98xf32>
    %232 = vector.broadcast %205 : vector<16x1xf32> to vector<16x98xf32>
    %233 = arith.mulf %231, %232 : vector<16x98xf32>
    %c0_59 = arith.constant 0 : index
    %c0_60 = arith.constant 0 : index
    %234 = vector.load %arg8[%c0_59, %c0_60] : memref<16x1xf32, #tpu.memory_space<vmem>>, vector<16x1xf32>
    %235 = vector.broadcast %234 : vector<16x1xf32> to vector<16x98xf32>
    %236 = arith.mulf %233, %235 : vector<16x98xf32>
    %c0_61 = arith.constant 0 : index
    %c0_62 = arith.constant 0 : index
    %237 = vector.load %arg9[%c0_61, %c0_62] : memref<16x1xf32, #tpu.memory_space<vmem>>, vector<16x1xf32>
    %238 = vector.broadcast %237 : vector<16x1xf32> to vector<16x98xf32>
    %239 = arith.addf %236, %238 : vector<16x98xf32>
    %cst_63 = arith.constant 0.000000e+00 : f32
    %240 = vector.broadcast %cst_63 : f32 to vector<16x98xf32>
    %241 = arith.maximumf %239, %240 : vector<16x98xf32>
    %242 = vector.broadcast %198 : vector<16x1xf32> to vector<16x98xf32>
    %243 = arith.subf %170, %242 : vector<16x98xf32>
    %244 = vector.broadcast %205 : vector<16x1xf32> to vector<16x98xf32>
    %245 = arith.mulf %243, %244 : vector<16x98xf32>
    %c0_64 = arith.constant 0 : index
    %c0_65 = arith.constant 0 : index
    %246 = vector.load %arg8[%c0_64, %c0_65] : memref<16x1xf32, #tpu.memory_space<vmem>>, vector<16x1xf32>
    %247 = vector.broadcast %246 : vector<16x1xf32> to vector<16x98xf32>
    %248 = arith.mulf %245, %247 : vector<16x98xf32>
    %c0_66 = arith.constant 0 : index
    %c0_67 = arith.constant 0 : index
    %249 = vector.load %arg9[%c0_66, %c0_67] : memref<16x1xf32, #tpu.memory_space<vmem>>, vector<16x1xf32>
    %250 = vector.broadcast %249 : vector<16x1xf32> to vector<16x98xf32>
    %251 = arith.addf %248, %250 : vector<16x98xf32>
    %cst_68 = arith.constant 0.000000e+00 : f32
    %252 = vector.broadcast %cst_68 : f32 to vector<16x98xf32>
    %253 = arith.maximumf %251, %252 : vector<16x98xf32>
    %cst_69 = arith.constant 0.000000e+00 : f32
    %254 = vector.broadcast %cst_69 : f32 to vector<16x18xf32>
    %cst_70 = arith.constant 0.000000e+00 : f32
    %255 = vector.broadcast %cst_70 : f32 to vector<16x2xf32>
    %256 = vector.extract_strided_slice %217 {offsets = [0, 0], sizes = [16, 14], strides = [1, 1]} : vector<16x98xf32> to vector<16x14xf32>
    %257 = tpu.concatenate %255, %256, %255 in 1 : vector<16x2xf32>, vector<16x14xf32>, vector<16x2xf32> -> vector<16x18xf32>
    %258 = vector.extract_strided_slice %217 {offsets = [0, 14], sizes = [16, 14], strides = [1, 1]} : vector<16x98xf32> to vector<16x14xf32>
    %259 = tpu.concatenate %255, %258, %255 in 1 : vector<16x2xf32>, vector<16x14xf32>, vector<16x2xf32> -> vector<16x18xf32>
    %260 = vector.extract_strided_slice %217 {offsets = [0, 28], sizes = [16, 14], strides = [1, 1]} : vector<16x98xf32> to vector<16x14xf32>
    %261 = tpu.concatenate %255, %260, %255 in 1 : vector<16x2xf32>, vector<16x14xf32>, vector<16x2xf32> -> vector<16x18xf32>
    %262 = vector.extract_strided_slice %217 {offsets = [0, 42], sizes = [16, 14], strides = [1, 1]} : vector<16x98xf32> to vector<16x14xf32>
    %263 = tpu.concatenate %255, %262, %255 in 1 : vector<16x2xf32>, vector<16x14xf32>, vector<16x2xf32> -> vector<16x18xf32>
    %264 = vector.extract_strided_slice %217 {offsets = [0, 56], sizes = [16, 14], strides = [1, 1]} : vector<16x98xf32> to vector<16x14xf32>
    %265 = tpu.concatenate %255, %264, %255 in 1 : vector<16x2xf32>, vector<16x14xf32>, vector<16x2xf32> -> vector<16x18xf32>
    %266 = vector.extract_strided_slice %217 {offsets = [0, 70], sizes = [16, 14], strides = [1, 1]} : vector<16x98xf32> to vector<16x14xf32>
    %267 = tpu.concatenate %255, %266, %255 in 1 : vector<16x2xf32>, vector<16x14xf32>, vector<16x2xf32> -> vector<16x18xf32>
    %268 = vector.extract_strided_slice %217 {offsets = [0, 84], sizes = [16, 14], strides = [1, 1]} : vector<16x98xf32> to vector<16x14xf32>
    %269 = tpu.concatenate %255, %268, %255 in 1 : vector<16x2xf32>, vector<16x14xf32>, vector<16x2xf32> -> vector<16x18xf32>
    %270 = tpu.concatenate %254, %257, %259, %261, %263, %265, %267, %269, %254 in 1 : vector<16x18xf32>, vector<16x18xf32>, vector<16x18xf32>, vector<16x18xf32>, vector<16x18xf32>, vector<16x18xf32>, vector<16x18xf32>, vector<16x18xf32>, vector<16x18xf32> -> vector<16x162xf32>
    %271 = vector.extract_strided_slice %270 {offsets = [0, 20], sizes = [16, 14], strides = [1, 1]} : vector<16x162xf32> to vector<16x14xf32>
    %272 = vector.extract_strided_slice %270 {offsets = [0, 22], sizes = [16, 14], strides = [1, 1]} : vector<16x162xf32> to vector<16x14xf32>
    %273 = vector.extract_strided_slice %270 {offsets = [0, 38], sizes = [16, 14], strides = [1, 1]} : vector<16x162xf32> to vector<16x14xf32>
    %274 = vector.extract_strided_slice %270 {offsets = [0, 40], sizes = [16, 14], strides = [1, 1]} : vector<16x162xf32> to vector<16x14xf32>
    %275 = vector.extract_strided_slice %270 {offsets = [0, 56], sizes = [16, 14], strides = [1, 1]} : vector<16x162xf32> to vector<16x14xf32>
    %276 = vector.extract_strided_slice %270 {offsets = [0, 58], sizes = [16, 14], strides = [1, 1]} : vector<16x162xf32> to vector<16x14xf32>
    %277 = vector.extract_strided_slice %270 {offsets = [0, 74], sizes = [16, 14], strides = [1, 1]} : vector<16x162xf32> to vector<16x14xf32>
    %278 = vector.extract_strided_slice %270 {offsets = [0, 76], sizes = [16, 14], strides = [1, 1]} : vector<16x162xf32> to vector<16x14xf32>
    %279 = vector.extract_strided_slice %270 {offsets = [0, 92], sizes = [16, 14], strides = [1, 1]} : vector<16x162xf32> to vector<16x14xf32>
    %280 = vector.extract_strided_slice %270 {offsets = [0, 94], sizes = [16, 14], strides = [1, 1]} : vector<16x162xf32> to vector<16x14xf32>
    %281 = vector.extract_strided_slice %270 {offsets = [0, 110], sizes = [16, 14], strides = [1, 1]} : vector<16x162xf32> to vector<16x14xf32>
    %282 = vector.extract_strided_slice %270 {offsets = [0, 112], sizes = [16, 14], strides = [1, 1]} : vector<16x162xf32> to vector<16x14xf32>
    %283 = vector.extract_strided_slice %270 {offsets = [0, 128], sizes = [16, 14], strides = [1, 1]} : vector<16x162xf32> to vector<16x14xf32>
    %284 = vector.extract_strided_slice %270 {offsets = [0, 130], sizes = [16, 14], strides = [1, 1]} : vector<16x162xf32> to vector<16x14xf32>
    %285 = vector.extract_strided_slice %270 {offsets = [0, 146], sizes = [16, 14], strides = [1, 1]} : vector<16x162xf32> to vector<16x14xf32>
    %286 = vector.extract_strided_slice %270 {offsets = [0, 148], sizes = [16, 14], strides = [1, 1]} : vector<16x162xf32> to vector<16x14xf32>
    %cst_71 = arith.constant 0.000000e+00 : f32
    %287 = vector.broadcast %cst_71 : f32 to vector<16x18xf32>
    %cst_72 = arith.constant 0.000000e+00 : f32
    %288 = vector.broadcast %cst_72 : f32 to vector<16x2xf32>
    %289 = vector.extract_strided_slice %229 {offsets = [0, 0], sizes = [16, 14], strides = [1, 1]} : vector<16x98xf32> to vector<16x14xf32>
    %290 = tpu.concatenate %288, %289, %288 in 1 : vector<16x2xf32>, vector<16x14xf32>, vector<16x2xf32> -> vector<16x18xf32>
    %291 = vector.extract_strided_slice %229 {offsets = [0, 14], sizes = [16, 14], strides = [1, 1]} : vector<16x98xf32> to vector<16x14xf32>
    %292 = tpu.concatenate %288, %291, %288 in 1 : vector<16x2xf32>, vector<16x14xf32>, vector<16x2xf32> -> vector<16x18xf32>
    %293 = vector.extract_strided_slice %229 {offsets = [0, 28], sizes = [16, 14], strides = [1, 1]} : vector<16x98xf32> to vector<16x14xf32>
    %294 = tpu.concatenate %288, %293, %288 in 1 : vector<16x2xf32>, vector<16x14xf32>, vector<16x2xf32> -> vector<16x18xf32>
    %295 = vector.extract_strided_slice %229 {offsets = [0, 42], sizes = [16, 14], strides = [1, 1]} : vector<16x98xf32> to vector<16x14xf32>
    %296 = tpu.concatenate %288, %295, %288 in 1 : vector<16x2xf32>, vector<16x14xf32>, vector<16x2xf32> -> vector<16x18xf32>
    %297 = vector.extract_strided_slice %229 {offsets = [0, 56], sizes = [16, 14], strides = [1, 1]} : vector<16x98xf32> to vector<16x14xf32>
    %298 = tpu.concatenate %288, %297, %288 in 1 : vector<16x2xf32>, vector<16x14xf32>, vector<16x2xf32> -> vector<16x18xf32>
    %299 = vector.extract_strided_slice %229 {offsets = [0, 70], sizes = [16, 14], strides = [1, 1]} : vector<16x98xf32> to vector<16x14xf32>
    %300 = tpu.concatenate %288, %299, %288 in 1 : vector<16x2xf32>, vector<16x14xf32>, vector<16x2xf32> -> vector<16x18xf32>
    %301 = vector.extract_strided_slice %229 {offsets = [0, 84], sizes = [16, 14], strides = [1, 1]} : vector<16x98xf32> to vector<16x14xf32>
    %302 = tpu.concatenate %288, %301, %288 in 1 : vector<16x2xf32>, vector<16x14xf32>, vector<16x2xf32> -> vector<16x18xf32>
    %303 = tpu.concatenate %287, %290, %292, %294, %296, %298, %300, %302, %287 in 1 : vector<16x18xf32>, vector<16x18xf32>, vector<16x18xf32>, vector<16x18xf32>, vector<16x18xf32>, vector<16x18xf32>, vector<16x18xf32>, vector<16x18xf32>, vector<16x18xf32> -> vector<16x162xf32>
    %304 = vector.extract_strided_slice %303 {offsets = [0, 18], sizes = [16, 14], strides = [1, 1]} : vector<16x162xf32> to vector<16x14xf32>
    %305 = vector.extract_strided_slice %303 {offsets = [0, 20], sizes = [16, 14], strides = [1, 1]} : vector<16x162xf32> to vector<16x14xf32>
    %306 = vector.extract_strided_slice %303 {offsets = [0, 36], sizes = [16, 14], strides = [1, 1]} : vector<16x162xf32> to vector<16x14xf32>
    %307 = vector.extract_strided_slice %303 {offsets = [0, 38], sizes = [16, 14], strides = [1, 1]} : vector<16x162xf32> to vector<16x14xf32>
    %308 = vector.extract_strided_slice %303 {offsets = [0, 54], sizes = [16, 14], strides = [1, 1]} : vector<16x162xf32> to vector<16x14xf32>
    %309 = vector.extract_strided_slice %303 {offsets = [0, 56], sizes = [16, 14], strides = [1, 1]} : vector<16x162xf32> to vector<16x14xf32>
    %310 = vector.extract_strided_slice %303 {offsets = [0, 72], sizes = [16, 14], strides = [1, 1]} : vector<16x162xf32> to vector<16x14xf32>
    %311 = vector.extract_strided_slice %303 {offsets = [0, 74], sizes = [16, 14], strides = [1, 1]} : vector<16x162xf32> to vector<16x14xf32>
    %312 = vector.extract_strided_slice %303 {offsets = [0, 90], sizes = [16, 14], strides = [1, 1]} : vector<16x162xf32> to vector<16x14xf32>
    %313 = vector.extract_strided_slice %303 {offsets = [0, 92], sizes = [16, 14], strides = [1, 1]} : vector<16x162xf32> to vector<16x14xf32>
    %314 = vector.extract_strided_slice %303 {offsets = [0, 108], sizes = [16, 14], strides = [1, 1]} : vector<16x162xf32> to vector<16x14xf32>
    %315 = vector.extract_strided_slice %303 {offsets = [0, 110], sizes = [16, 14], strides = [1, 1]} : vector<16x162xf32> to vector<16x14xf32>
    %316 = vector.extract_strided_slice %303 {offsets = [0, 126], sizes = [16, 14], strides = [1, 1]} : vector<16x162xf32> to vector<16x14xf32>
    %317 = vector.extract_strided_slice %303 {offsets = [0, 128], sizes = [16, 14], strides = [1, 1]} : vector<16x162xf32> to vector<16x14xf32>
    %318 = vector.extract_strided_slice %303 {offsets = [0, 144], sizes = [16, 14], strides = [1, 1]} : vector<16x162xf32> to vector<16x14xf32>
    %319 = vector.extract_strided_slice %303 {offsets = [0, 146], sizes = [16, 14], strides = [1, 1]} : vector<16x162xf32> to vector<16x14xf32>
    %cst_73 = arith.constant 0.000000e+00 : f32
    %320 = vector.broadcast %cst_73 : f32 to vector<16x18xf32>
    %cst_74 = arith.constant 0.000000e+00 : f32
    %321 = vector.broadcast %cst_74 : f32 to vector<16x2xf32>
    %322 = vector.extract_strided_slice %241 {offsets = [0, 0], sizes = [16, 14], strides = [1, 1]} : vector<16x98xf32> to vector<16x14xf32>
    %323 = tpu.concatenate %321, %322, %321 in 1 : vector<16x2xf32>, vector<16x14xf32>, vector<16x2xf32> -> vector<16x18xf32>
    %324 = vector.extract_strided_slice %241 {offsets = [0, 14], sizes = [16, 14], strides = [1, 1]} : vector<16x98xf32> to vector<16x14xf32>
    %325 = tpu.concatenate %321, %324, %321 in 1 : vector<16x2xf32>, vector<16x14xf32>, vector<16x2xf32> -> vector<16x18xf32>
    %326 = vector.extract_strided_slice %241 {offsets = [0, 28], sizes = [16, 14], strides = [1, 1]} : vector<16x98xf32> to vector<16x14xf32>
    %327 = tpu.concatenate %321, %326, %321 in 1 : vector<16x2xf32>, vector<16x14xf32>, vector<16x2xf32> -> vector<16x18xf32>
    %328 = vector.extract_strided_slice %241 {offsets = [0, 42], sizes = [16, 14], strides = [1, 1]} : vector<16x98xf32> to vector<16x14xf32>
    %329 = tpu.concatenate %321, %328, %321 in 1 : vector<16x2xf32>, vector<16x14xf32>, vector<16x2xf32> -> vector<16x18xf32>
    %330 = vector.extract_strided_slice %241 {offsets = [0, 56], sizes = [16, 14], strides = [1, 1]} : vector<16x98xf32> to vector<16x14xf32>
    %331 = tpu.concatenate %321, %330, %321 in 1 : vector<16x2xf32>, vector<16x14xf32>, vector<16x2xf32> -> vector<16x18xf32>
    %332 = vector.extract_strided_slice %241 {offsets = [0, 70], sizes = [16, 14], strides = [1, 1]} : vector<16x98xf32> to vector<16x14xf32>
    %333 = tpu.concatenate %321, %332, %321 in 1 : vector<16x2xf32>, vector<16x14xf32>, vector<16x2xf32> -> vector<16x18xf32>
    %334 = vector.extract_strided_slice %241 {offsets = [0, 84], sizes = [16, 14], strides = [1, 1]} : vector<16x98xf32> to vector<16x14xf32>
    %335 = tpu.concatenate %321, %334, %321 in 1 : vector<16x2xf32>, vector<16x14xf32>, vector<16x2xf32> -> vector<16x18xf32>
    %336 = tpu.concatenate %320, %323, %325, %327, %329, %331, %333, %335, %320 in 1 : vector<16x18xf32>, vector<16x18xf32>, vector<16x18xf32>, vector<16x18xf32>, vector<16x18xf32>, vector<16x18xf32>, vector<16x18xf32>, vector<16x18xf32>, vector<16x18xf32> -> vector<16x162xf32>
    %337 = vector.extract_strided_slice %336 {offsets = [0, 2], sizes = [16, 14], strides = [1, 1]} : vector<16x162xf32> to vector<16x14xf32>
    %338 = vector.extract_strided_slice %336 {offsets = [0, 4], sizes = [16, 14], strides = [1, 1]} : vector<16x162xf32> to vector<16x14xf32>
    %339 = vector.extract_strided_slice %336 {offsets = [0, 20], sizes = [16, 14], strides = [1, 1]} : vector<16x162xf32> to vector<16x14xf32>
    %340 = vector.extract_strided_slice %336 {offsets = [0, 22], sizes = [16, 14], strides = [1, 1]} : vector<16x162xf32> to vector<16x14xf32>
    %341 = vector.extract_strided_slice %336 {offsets = [0, 38], sizes = [16, 14], strides = [1, 1]} : vector<16x162xf32> to vector<16x14xf32>
    %342 = vector.extract_strided_slice %336 {offsets = [0, 40], sizes = [16, 14], strides = [1, 1]} : vector<16x162xf32> to vector<16x14xf32>
    %343 = vector.extract_strided_slice %336 {offsets = [0, 56], sizes = [16, 14], strides = [1, 1]} : vector<16x162xf32> to vector<16x14xf32>
    %344 = vector.extract_strided_slice %336 {offsets = [0, 58], sizes = [16, 14], strides = [1, 1]} : vector<16x162xf32> to vector<16x14xf32>
    %345 = vector.extract_strided_slice %336 {offsets = [0, 74], sizes = [16, 14], strides = [1, 1]} : vector<16x162xf32> to vector<16x14xf32>
    %346 = vector.extract_strided_slice %336 {offsets = [0, 76], sizes = [16, 14], strides = [1, 1]} : vector<16x162xf32> to vector<16x14xf32>
    %347 = vector.extract_strided_slice %336 {offsets = [0, 92], sizes = [16, 14], strides = [1, 1]} : vector<16x162xf32> to vector<16x14xf32>
    %348 = vector.extract_strided_slice %336 {offsets = [0, 94], sizes = [16, 14], strides = [1, 1]} : vector<16x162xf32> to vector<16x14xf32>
    %349 = vector.extract_strided_slice %336 {offsets = [0, 110], sizes = [16, 14], strides = [1, 1]} : vector<16x162xf32> to vector<16x14xf32>
    %350 = vector.extract_strided_slice %336 {offsets = [0, 112], sizes = [16, 14], strides = [1, 1]} : vector<16x162xf32> to vector<16x14xf32>
    %351 = vector.extract_strided_slice %336 {offsets = [0, 128], sizes = [16, 14], strides = [1, 1]} : vector<16x162xf32> to vector<16x14xf32>
    %352 = vector.extract_strided_slice %336 {offsets = [0, 130], sizes = [16, 14], strides = [1, 1]} : vector<16x162xf32> to vector<16x14xf32>
    %cst_75 = arith.constant 0.000000e+00 : f32
    %353 = vector.broadcast %cst_75 : f32 to vector<16x18xf32>
    %cst_76 = arith.constant 0.000000e+00 : f32
    %354 = vector.broadcast %cst_76 : f32 to vector<16x2xf32>
    %355 = vector.extract_strided_slice %253 {offsets = [0, 0], sizes = [16, 14], strides = [1, 1]} : vector<16x98xf32> to vector<16x14xf32>
    %356 = tpu.concatenate %354, %355, %354 in 1 : vector<16x2xf32>, vector<16x14xf32>, vector<16x2xf32> -> vector<16x18xf32>
    %357 = vector.extract_strided_slice %253 {offsets = [0, 14], sizes = [16, 14], strides = [1, 1]} : vector<16x98xf32> to vector<16x14xf32>
    %358 = tpu.concatenate %354, %357, %354 in 1 : vector<16x2xf32>, vector<16x14xf32>, vector<16x2xf32> -> vector<16x18xf32>
    %359 = vector.extract_strided_slice %253 {offsets = [0, 28], sizes = [16, 14], strides = [1, 1]} : vector<16x98xf32> to vector<16x14xf32>
    %360 = tpu.concatenate %354, %359, %354 in 1 : vector<16x2xf32>, vector<16x14xf32>, vector<16x2xf32> -> vector<16x18xf32>
    %361 = vector.extract_strided_slice %253 {offsets = [0, 42], sizes = [16, 14], strides = [1, 1]} : vector<16x98xf32> to vector<16x14xf32>
    %362 = tpu.concatenate %354, %361, %354 in 1 : vector<16x2xf32>, vector<16x14xf32>, vector<16x2xf32> -> vector<16x18xf32>
    %363 = vector.extract_strided_slice %253 {offsets = [0, 56], sizes = [16, 14], strides = [1, 1]} : vector<16x98xf32> to vector<16x14xf32>
    %364 = tpu.concatenate %354, %363, %354 in 1 : vector<16x2xf32>, vector<16x14xf32>, vector<16x2xf32> -> vector<16x18xf32>
    %365 = vector.extract_strided_slice %253 {offsets = [0, 70], sizes = [16, 14], strides = [1, 1]} : vector<16x98xf32> to vector<16x14xf32>
    %366 = tpu.concatenate %354, %365, %354 in 1 : vector<16x2xf32>, vector<16x14xf32>, vector<16x2xf32> -> vector<16x18xf32>
    %367 = vector.extract_strided_slice %253 {offsets = [0, 84], sizes = [16, 14], strides = [1, 1]} : vector<16x98xf32> to vector<16x14xf32>
    %368 = tpu.concatenate %354, %367, %354 in 1 : vector<16x2xf32>, vector<16x14xf32>, vector<16x2xf32> -> vector<16x18xf32>
    %369 = tpu.concatenate %353, %356, %358, %360, %362, %364, %366, %368, %353 in 1 : vector<16x18xf32>, vector<16x18xf32>, vector<16x18xf32>, vector<16x18xf32>, vector<16x18xf32>, vector<16x18xf32>, vector<16x18xf32>, vector<16x18xf32>, vector<16x18xf32> -> vector<16x162xf32>
    %370 = vector.extract_strided_slice %369 {offsets = [0, 0], sizes = [16, 14], strides = [1, 1]} : vector<16x162xf32> to vector<16x14xf32>
    %371 = vector.extract_strided_slice %369 {offsets = [0, 2], sizes = [16, 14], strides = [1, 1]} : vector<16x162xf32> to vector<16x14xf32>
    %372 = vector.extract_strided_slice %369 {offsets = [0, 18], sizes = [16, 14], strides = [1, 1]} : vector<16x162xf32> to vector<16x14xf32>
    %373 = vector.extract_strided_slice %369 {offsets = [0, 20], sizes = [16, 14], strides = [1, 1]} : vector<16x162xf32> to vector<16x14xf32>
    %374 = vector.extract_strided_slice %369 {offsets = [0, 36], sizes = [16, 14], strides = [1, 1]} : vector<16x162xf32> to vector<16x14xf32>
    %375 = vector.extract_strided_slice %369 {offsets = [0, 38], sizes = [16, 14], strides = [1, 1]} : vector<16x162xf32> to vector<16x14xf32>
    %376 = vector.extract_strided_slice %369 {offsets = [0, 54], sizes = [16, 14], strides = [1, 1]} : vector<16x162xf32> to vector<16x14xf32>
    %377 = vector.extract_strided_slice %369 {offsets = [0, 56], sizes = [16, 14], strides = [1, 1]} : vector<16x162xf32> to vector<16x14xf32>
    %378 = vector.extract_strided_slice %369 {offsets = [0, 72], sizes = [16, 14], strides = [1, 1]} : vector<16x162xf32> to vector<16x14xf32>
    %379 = vector.extract_strided_slice %369 {offsets = [0, 74], sizes = [16, 14], strides = [1, 1]} : vector<16x162xf32> to vector<16x14xf32>
    %380 = vector.extract_strided_slice %369 {offsets = [0, 90], sizes = [16, 14], strides = [1, 1]} : vector<16x162xf32> to vector<16x14xf32>
    %381 = vector.extract_strided_slice %369 {offsets = [0, 92], sizes = [16, 14], strides = [1, 1]} : vector<16x162xf32> to vector<16x14xf32>
    %382 = vector.extract_strided_slice %369 {offsets = [0, 108], sizes = [16, 14], strides = [1, 1]} : vector<16x162xf32> to vector<16x14xf32>
    %383 = vector.extract_strided_slice %369 {offsets = [0, 110], sizes = [16, 14], strides = [1, 1]} : vector<16x162xf32> to vector<16x14xf32>
    %384 = vector.extract_strided_slice %369 {offsets = [0, 126], sizes = [16, 14], strides = [1, 1]} : vector<16x162xf32> to vector<16x14xf32>
    %385 = vector.extract_strided_slice %369 {offsets = [0, 128], sizes = [16, 14], strides = [1, 1]} : vector<16x162xf32> to vector<16x14xf32>
    %386 = tpu.concatenate %370, %372, %374, %376, %378, %380, %382 in 1 : vector<16x14xf32>, vector<16x14xf32>, vector<16x14xf32>, vector<16x14xf32>, vector<16x14xf32>, vector<16x14xf32>, vector<16x14xf32> -> vector<16x98xf32>
    %387 = tpu.concatenate %337, %339, %341, %343, %345, %347, %349 in 1 : vector<16x14xf32>, vector<16x14xf32>, vector<16x14xf32>, vector<16x14xf32>, vector<16x14xf32>, vector<16x14xf32>, vector<16x14xf32> -> vector<16x98xf32>
    %388 = tpu.concatenate %371, %373, %375, %377, %379, %381, %383 in 1 : vector<16x14xf32>, vector<16x14xf32>, vector<16x14xf32>, vector<16x14xf32>, vector<16x14xf32>, vector<16x14xf32>, vector<16x14xf32> -> vector<16x98xf32>
    %389 = tpu.concatenate %338, %340, %342, %344, %346, %348, %350 in 1 : vector<16x14xf32>, vector<16x14xf32>, vector<16x14xf32>, vector<16x14xf32>, vector<16x14xf32>, vector<16x14xf32>, vector<16x14xf32> -> vector<16x98xf32>
    %390 = tpu.concatenate %304, %306, %308, %310, %312, %314, %316 in 1 : vector<16x14xf32>, vector<16x14xf32>, vector<16x14xf32>, vector<16x14xf32>, vector<16x14xf32>, vector<16x14xf32>, vector<16x14xf32> -> vector<16x98xf32>
    %391 = tpu.concatenate %271, %273, %275, %277, %279, %281, %283 in 1 : vector<16x14xf32>, vector<16x14xf32>, vector<16x14xf32>, vector<16x14xf32>, vector<16x14xf32>, vector<16x14xf32>, vector<16x14xf32> -> vector<16x98xf32>
    %392 = tpu.concatenate %305, %307, %309, %311, %313, %315, %317 in 1 : vector<16x14xf32>, vector<16x14xf32>, vector<16x14xf32>, vector<16x14xf32>, vector<16x14xf32>, vector<16x14xf32>, vector<16x14xf32> -> vector<16x98xf32>
    %393 = tpu.concatenate %272, %274, %276, %278, %280, %282, %284 in 1 : vector<16x14xf32>, vector<16x14xf32>, vector<16x14xf32>, vector<16x14xf32>, vector<16x14xf32>, vector<16x14xf32>, vector<16x14xf32> -> vector<16x98xf32>
    %394 = tpu.concatenate %372, %374, %376, %378, %380, %382, %384 in 1 : vector<16x14xf32>, vector<16x14xf32>, vector<16x14xf32>, vector<16x14xf32>, vector<16x14xf32>, vector<16x14xf32>, vector<16x14xf32> -> vector<16x98xf32>
    %395 = tpu.concatenate %339, %341, %343, %345, %347, %349, %351 in 1 : vector<16x14xf32>, vector<16x14xf32>, vector<16x14xf32>, vector<16x14xf32>, vector<16x14xf32>, vector<16x14xf32>, vector<16x14xf32> -> vector<16x98xf32>
    %396 = tpu.concatenate %373, %375, %377, %379, %381, %383, %385 in 1 : vector<16x14xf32>, vector<16x14xf32>, vector<16x14xf32>, vector<16x14xf32>, vector<16x14xf32>, vector<16x14xf32>, vector<16x14xf32> -> vector<16x98xf32>
    %397 = tpu.concatenate %340, %342, %344, %346, %348, %350, %352 in 1 : vector<16x14xf32>, vector<16x14xf32>, vector<16x14xf32>, vector<16x14xf32>, vector<16x14xf32>, vector<16x14xf32>, vector<16x14xf32> -> vector<16x98xf32>
    %398 = tpu.concatenate %306, %308, %310, %312, %314, %316, %318 in 1 : vector<16x14xf32>, vector<16x14xf32>, vector<16x14xf32>, vector<16x14xf32>, vector<16x14xf32>, vector<16x14xf32>, vector<16x14xf32> -> vector<16x98xf32>
    %399 = tpu.concatenate %273, %275, %277, %279, %281, %283, %285 in 1 : vector<16x14xf32>, vector<16x14xf32>, vector<16x14xf32>, vector<16x14xf32>, vector<16x14xf32>, vector<16x14xf32>, vector<16x14xf32> -> vector<16x98xf32>
    %400 = tpu.concatenate %307, %309, %311, %313, %315, %317, %319 in 1 : vector<16x14xf32>, vector<16x14xf32>, vector<16x14xf32>, vector<16x14xf32>, vector<16x14xf32>, vector<16x14xf32>, vector<16x14xf32> -> vector<16x98xf32>
    %401 = tpu.concatenate %274, %276, %278, %280, %282, %284, %286 in 1 : vector<16x14xf32>, vector<16x14xf32>, vector<16x14xf32>, vector<16x14xf32>, vector<16x14xf32>, vector<16x14xf32>, vector<16x14xf32> -> vector<16x98xf32>
    %c0_77 = arith.constant 0 : index
    %c0_78 = arith.constant 0 : index
    %c0_79 = arith.constant 0 : index
    %402 = vector.load %arg10[%c0_77, %c0_78, %c0_79] : memref<4x3x64xbf16, #tpu.memory_space<vmem>>, vector<1x3x64xbf16>
    %403 = vector.shape_cast %402 : vector<1x3x64xbf16> to vector<3x64xbf16>
    %404 = tpu.concatenate %391, %390, %387, %386 in 0 : vector<16x98xf32>, vector<16x98xf32>, vector<16x98xf32>, vector<16x98xf32> -> vector<64x98xf32>
    %405 = arith.truncf %404 : vector<64x98xf32> to vector<64x98xbf16>
    %cst_80 = arith.constant dense<0.000000e+00> : vector<3x98xf32>
    %406 = tpu.matmul %403, %405, %cst_80 {dimension_numbers = #tpu.dot_dimension_numbers<[1], [0], [0], [1], [0, 0, 1, 1], [], []>} : vector<3x64xbf16>, vector<64x98xbf16>, vector<3x98xf32> -> vector<3x98xf32>
    %c0_81 = arith.constant 0 : index
    %c0_82 = arith.constant 0 : index
    %407 = vector.load %arg11[%c0_81, %c0_82] : memref<3x1xf32, #tpu.memory_space<vmem>>, vector<3x1xf32>
    %408 = vector.broadcast %407 : vector<3x1xf32> to vector<3x98xf32>
    %409 = arith.addf %406, %408 : vector<3x98xf32>
    %410 = math.tanh %409 : vector<3x98xf32>
    %411 = tpu.concatenate %392, %391, %388, %387 in 0 : vector<16x98xf32>, vector<16x98xf32>, vector<16x98xf32>, vector<16x98xf32> -> vector<64x98xf32>
    %412 = arith.truncf %411 : vector<64x98xf32> to vector<64x98xbf16>
    %cst_83 = arith.constant dense<0.000000e+00> : vector<3x98xf32>
    %413 = tpu.matmul %403, %412, %cst_83 {dimension_numbers = #tpu.dot_dimension_numbers<[1], [0], [0], [1], [0, 0, 1, 1], [], []>} : vector<3x64xbf16>, vector<64x98xbf16>, vector<3x98xf32> -> vector<3x98xf32>
    %c0_84 = arith.constant 0 : index
    %c0_85 = arith.constant 0 : index
    %414 = vector.load %arg11[%c0_84, %c0_85] : memref<3x1xf32, #tpu.memory_space<vmem>>, vector<3x1xf32>
    %415 = vector.broadcast %414 : vector<3x1xf32> to vector<3x98xf32>
    %416 = arith.addf %413, %415 : vector<3x98xf32>
    %417 = math.tanh %416 : vector<3x98xf32>
    %418 = tpu.concatenate %395, %394, %391, %390 in 0 : vector<16x98xf32>, vector<16x98xf32>, vector<16x98xf32>, vector<16x98xf32> -> vector<64x98xf32>
    %419 = arith.truncf %418 : vector<64x98xf32> to vector<64x98xbf16>
    %cst_86 = arith.constant dense<0.000000e+00> : vector<3x98xf32>
    %420 = tpu.matmul %403, %419, %cst_86 {dimension_numbers = #tpu.dot_dimension_numbers<[1], [0], [0], [1], [0, 0, 1, 1], [], []>} : vector<3x64xbf16>, vector<64x98xbf16>, vector<3x98xf32> -> vector<3x98xf32>
    %c0_87 = arith.constant 0 : index
    %c0_88 = arith.constant 0 : index
    %421 = vector.load %arg11[%c0_87, %c0_88] : memref<3x1xf32, #tpu.memory_space<vmem>>, vector<3x1xf32>
    %422 = vector.broadcast %421 : vector<3x1xf32> to vector<3x98xf32>
    %423 = arith.addf %420, %422 : vector<3x98xf32>
    %424 = math.tanh %423 : vector<3x98xf32>
    %425 = tpu.concatenate %396, %395, %392, %391 in 0 : vector<16x98xf32>, vector<16x98xf32>, vector<16x98xf32>, vector<16x98xf32> -> vector<64x98xf32>
    %426 = arith.truncf %425 : vector<64x98xf32> to vector<64x98xbf16>
    %cst_89 = arith.constant dense<0.000000e+00> : vector<3x98xf32>
    %427 = tpu.matmul %403, %426, %cst_89 {dimension_numbers = #tpu.dot_dimension_numbers<[1], [0], [0], [1], [0, 0, 1, 1], [], []>} : vector<3x64xbf16>, vector<64x98xbf16>, vector<3x98xf32> -> vector<3x98xf32>
    %c0_90 = arith.constant 0 : index
    %c0_91 = arith.constant 0 : index
    %428 = vector.load %arg11[%c0_90, %c0_91] : memref<3x1xf32, #tpu.memory_space<vmem>>, vector<3x1xf32>
    %429 = vector.broadcast %428 : vector<3x1xf32> to vector<3x98xf32>
    %430 = arith.addf %427, %429 : vector<3x98xf32>
    %431 = math.tanh %430 : vector<3x98xf32>
    %c1_92 = arith.constant 1 : index
    %c0_93 = arith.constant 0 : index
    %c0_94 = arith.constant 0 : index
    %432 = vector.load %arg10[%c1_92, %c0_93, %c0_94] : memref<4x3x64xbf16, #tpu.memory_space<vmem>>, vector<1x3x64xbf16>
    %433 = vector.shape_cast %432 : vector<1x3x64xbf16> to vector<3x64xbf16>
    %434 = tpu.concatenate %392, %391, %388, %387 in 0 : vector<16x98xf32>, vector<16x98xf32>, vector<16x98xf32>, vector<16x98xf32> -> vector<64x98xf32>
    %435 = arith.truncf %434 : vector<64x98xf32> to vector<64x98xbf16>
    %cst_95 = arith.constant dense<0.000000e+00> : vector<3x98xf32>
    %436 = tpu.matmul %433, %435, %cst_95 {dimension_numbers = #tpu.dot_dimension_numbers<[1], [0], [0], [1], [0, 0, 1, 1], [], []>} : vector<3x64xbf16>, vector<64x98xbf16>, vector<3x98xf32> -> vector<3x98xf32>
    %c0_96 = arith.constant 0 : index
    %c0_97 = arith.constant 0 : index
    %437 = vector.load %arg11[%c0_96, %c0_97] : memref<3x1xf32, #tpu.memory_space<vmem>>, vector<3x1xf32>
    %438 = vector.broadcast %437 : vector<3x1xf32> to vector<3x98xf32>
    %439 = arith.addf %436, %438 : vector<3x98xf32>
    %440 = math.tanh %439 : vector<3x98xf32>
    %441 = tpu.concatenate %393, %392, %389, %388 in 0 : vector<16x98xf32>, vector<16x98xf32>, vector<16x98xf32>, vector<16x98xf32> -> vector<64x98xf32>
    %442 = arith.truncf %441 : vector<64x98xf32> to vector<64x98xbf16>
    %cst_98 = arith.constant dense<0.000000e+00> : vector<3x98xf32>
    %443 = tpu.matmul %433, %442, %cst_98 {dimension_numbers = #tpu.dot_dimension_numbers<[1], [0], [0], [1], [0, 0, 1, 1], [], []>} : vector<3x64xbf16>, vector<64x98xbf16>, vector<3x98xf32> -> vector<3x98xf32>
    %c0_99 = arith.constant 0 : index
    %c0_100 = arith.constant 0 : index
    %444 = vector.load %arg11[%c0_99, %c0_100] : memref<3x1xf32, #tpu.memory_space<vmem>>, vector<3x1xf32>
    %445 = vector.broadcast %444 : vector<3x1xf32> to vector<3x98xf32>
    %446 = arith.addf %443, %445 : vector<3x98xf32>
    %447 = math.tanh %446 : vector<3x98xf32>
    %448 = tpu.concatenate %396, %395, %392, %391 in 0 : vector<16x98xf32>, vector<16x98xf32>, vector<16x98xf32>, vector<16x98xf32> -> vector<64x98xf32>
    %449 = arith.truncf %448 : vector<64x98xf32> to vector<64x98xbf16>
    %cst_101 = arith.constant dense<0.000000e+00> : vector<3x98xf32>
    %450 = tpu.matmul %433, %449, %cst_101 {dimension_numbers = #tpu.dot_dimension_numbers<[1], [0], [0], [1], [0, 0, 1, 1], [], []>} : vector<3x64xbf16>, vector<64x98xbf16>, vector<3x98xf32> -> vector<3x98xf32>
    %c0_102 = arith.constant 0 : index
    %c0_103 = arith.constant 0 : index
    %451 = vector.load %arg11[%c0_102, %c0_103] : memref<3x1xf32, #tpu.memory_space<vmem>>, vector<3x1xf32>
    %452 = vector.broadcast %451 : vector<3x1xf32> to vector<3x98xf32>
    %453 = arith.addf %450, %452 : vector<3x98xf32>
    %454 = math.tanh %453 : vector<3x98xf32>
    %455 = tpu.concatenate %397, %396, %393, %392 in 0 : vector<16x98xf32>, vector<16x98xf32>, vector<16x98xf32>, vector<16x98xf32> -> vector<64x98xf32>
    %456 = arith.truncf %455 : vector<64x98xf32> to vector<64x98xbf16>
    %cst_104 = arith.constant dense<0.000000e+00> : vector<3x98xf32>
    %457 = tpu.matmul %433, %456, %cst_104 {dimension_numbers = #tpu.dot_dimension_numbers<[1], [0], [0], [1], [0, 0, 1, 1], [], []>} : vector<3x64xbf16>, vector<64x98xbf16>, vector<3x98xf32> -> vector<3x98xf32>
    %c0_105 = arith.constant 0 : index
    %c0_106 = arith.constant 0 : index
    %458 = vector.load %arg11[%c0_105, %c0_106] : memref<3x1xf32, #tpu.memory_space<vmem>>, vector<3x1xf32>
    %459 = vector.broadcast %458 : vector<3x1xf32> to vector<3x98xf32>
    %460 = arith.addf %457, %459 : vector<3x98xf32>
    %461 = math.tanh %460 : vector<3x98xf32>
    %c2_107 = arith.constant 2 : index
    %c0_108 = arith.constant 0 : index
    %c0_109 = arith.constant 0 : index
    %462 = vector.load %arg10[%c2_107, %c0_108, %c0_109] : memref<4x3x64xbf16, #tpu.memory_space<vmem>>, vector<1x3x64xbf16>
    %463 = vector.shape_cast %462 : vector<1x3x64xbf16> to vector<3x64xbf16>
    %464 = tpu.concatenate %395, %394, %391, %390 in 0 : vector<16x98xf32>, vector<16x98xf32>, vector<16x98xf32>, vector<16x98xf32> -> vector<64x98xf32>
    %465 = arith.truncf %464 : vector<64x98xf32> to vector<64x98xbf16>
    %cst_110 = arith.constant dense<0.000000e+00> : vector<3x98xf32>
    %466 = tpu.matmul %463, %465, %cst_110 {dimension_numbers = #tpu.dot_dimension_numbers<[1], [0], [0], [1], [0, 0, 1, 1], [], []>} : vector<3x64xbf16>, vector<64x98xbf16>, vector<3x98xf32> -> vector<3x98xf32>
    %c0_111 = arith.constant 0 : index
    %c0_112 = arith.constant 0 : index
    %467 = vector.load %arg11[%c0_111, %c0_112] : memref<3x1xf32, #tpu.memory_space<vmem>>, vector<3x1xf32>
    %468 = vector.broadcast %467 : vector<3x1xf32> to vector<3x98xf32>
    %469 = arith.addf %466, %468 : vector<3x98xf32>
    %470 = math.tanh %469 : vector<3x98xf32>
    %471 = tpu.concatenate %396, %395, %392, %391 in 0 : vector<16x98xf32>, vector<16x98xf32>, vector<16x98xf32>, vector<16x98xf32> -> vector<64x98xf32>
    %472 = arith.truncf %471 : vector<64x98xf32> to vector<64x98xbf16>
    %cst_113 = arith.constant dense<0.000000e+00> : vector<3x98xf32>
    %473 = tpu.matmul %463, %472, %cst_113 {dimension_numbers = #tpu.dot_dimension_numbers<[1], [0], [0], [1], [0, 0, 1, 1], [], []>} : vector<3x64xbf16>, vector<64x98xbf16>, vector<3x98xf32> -> vector<3x98xf32>
    %c0_114 = arith.constant 0 : index
    %c0_115 = arith.constant 0 : index
    %474 = vector.load %arg11[%c0_114, %c0_115] : memref<3x1xf32, #tpu.memory_space<vmem>>, vector<3x1xf32>
    %475 = vector.broadcast %474 : vector<3x1xf32> to vector<3x98xf32>
    %476 = arith.addf %473, %475 : vector<3x98xf32>
    %477 = math.tanh %476 : vector<3x98xf32>
    %478 = tpu.concatenate %399, %398, %395, %394 in 0 : vector<16x98xf32>, vector<16x98xf32>, vector<16x98xf32>, vector<16x98xf32> -> vector<64x98xf32>
    %479 = arith.truncf %478 : vector<64x98xf32> to vector<64x98xbf16>
    %cst_116 = arith.constant dense<0.000000e+00> : vector<3x98xf32>
    %480 = tpu.matmul %463, %479, %cst_116 {dimension_numbers = #tpu.dot_dimension_numbers<[1], [0], [0], [1], [0, 0, 1, 1], [], []>} : vector<3x64xbf16>, vector<64x98xbf16>, vector<3x98xf32> -> vector<3x98xf32>
    %c0_117 = arith.constant 0 : index
    %c0_118 = arith.constant 0 : index
    %481 = vector.load %arg11[%c0_117, %c0_118] : memref<3x1xf32, #tpu.memory_space<vmem>>, vector<3x1xf32>
    %482 = vector.broadcast %481 : vector<3x1xf32> to vector<3x98xf32>
    %483 = arith.addf %480, %482 : vector<3x98xf32>
    %484 = math.tanh %483 : vector<3x98xf32>
    %485 = tpu.concatenate %400, %399, %396, %395 in 0 : vector<16x98xf32>, vector<16x98xf32>, vector<16x98xf32>, vector<16x98xf32> -> vector<64x98xf32>
    %486 = arith.truncf %485 : vector<64x98xf32> to vector<64x98xbf16>
    %cst_119 = arith.constant dense<0.000000e+00> : vector<3x98xf32>
    %487 = tpu.matmul %463, %486, %cst_119 {dimension_numbers = #tpu.dot_dimension_numbers<[1], [0], [0], [1], [0, 0, 1, 1], [], []>} : vector<3x64xbf16>, vector<64x98xbf16>, vector<3x98xf32> -> vector<3x98xf32>
    %c0_120 = arith.constant 0 : index
    %c0_121 = arith.constant 0 : index
    %488 = vector.load %arg11[%c0_120, %c0_121] : memref<3x1xf32, #tpu.memory_space<vmem>>, vector<3x1xf32>
    %489 = vector.broadcast %488 : vector<3x1xf32> to vector<3x98xf32>
    %490 = arith.addf %487, %489 : vector<3x98xf32>
    %491 = math.tanh %490 : vector<3x98xf32>
    %c3_122 = arith.constant 3 : index
    %c0_123 = arith.constant 0 : index
    %c0_124 = arith.constant 0 : index
    %492 = vector.load %arg10[%c3_122, %c0_123, %c0_124] : memref<4x3x64xbf16, #tpu.memory_space<vmem>>, vector<1x3x64xbf16>
    %493 = vector.shape_cast %492 : vector<1x3x64xbf16> to vector<3x64xbf16>
    %494 = tpu.concatenate %396, %395, %392, %391 in 0 : vector<16x98xf32>, vector<16x98xf32>, vector<16x98xf32>, vector<16x98xf32> -> vector<64x98xf32>
    %495 = arith.truncf %494 : vector<64x98xf32> to vector<64x98xbf16>
    %cst_125 = arith.constant dense<0.000000e+00> : vector<3x98xf32>
    %496 = tpu.matmul %493, %495, %cst_125 {dimension_numbers = #tpu.dot_dimension_numbers<[1], [0], [0], [1], [0, 0, 1, 1], [], []>} : vector<3x64xbf16>, vector<64x98xbf16>, vector<3x98xf32> -> vector<3x98xf32>
    %c0_126 = arith.constant 0 : index
    %c0_127 = arith.constant 0 : index
    %497 = vector.load %arg11[%c0_126, %c0_127] : memref<3x1xf32, #tpu.memory_space<vmem>>, vector<3x1xf32>
    %498 = vector.broadcast %497 : vector<3x1xf32> to vector<3x98xf32>
    %499 = arith.addf %496, %498 : vector<3x98xf32>
    %500 = math.tanh %499 : vector<3x98xf32>
    %501 = tpu.concatenate %397, %396, %393, %392 in 0 : vector<16x98xf32>, vector<16x98xf32>, vector<16x98xf32>, vector<16x98xf32> -> vector<64x98xf32>
    %502 = arith.truncf %501 : vector<64x98xf32> to vector<64x98xbf16>
    %cst_128 = arith.constant dense<0.000000e+00> : vector<3x98xf32>
    %503 = tpu.matmul %493, %502, %cst_128 {dimension_numbers = #tpu.dot_dimension_numbers<[1], [0], [0], [1], [0, 0, 1, 1], [], []>} : vector<3x64xbf16>, vector<64x98xbf16>, vector<3x98xf32> -> vector<3x98xf32>
    %c0_129 = arith.constant 0 : index
    %c0_130 = arith.constant 0 : index
    %504 = vector.load %arg11[%c0_129, %c0_130] : memref<3x1xf32, #tpu.memory_space<vmem>>, vector<3x1xf32>
    %505 = vector.broadcast %504 : vector<3x1xf32> to vector<3x98xf32>
    %506 = arith.addf %503, %505 : vector<3x98xf32>
    %507 = math.tanh %506 : vector<3x98xf32>
    %508 = tpu.concatenate %400, %399, %396, %395 in 0 : vector<16x98xf32>, vector<16x98xf32>, vector<16x98xf32>, vector<16x98xf32> -> vector<64x98xf32>
    %509 = arith.truncf %508 : vector<64x98xf32> to vector<64x98xbf16>
    %cst_131 = arith.constant dense<0.000000e+00> : vector<3x98xf32>
    %510 = tpu.matmul %493, %509, %cst_131 {dimension_numbers = #tpu.dot_dimension_numbers<[1], [0], [0], [1], [0, 0, 1, 1], [], []>} : vector<3x64xbf16>, vector<64x98xbf16>, vector<3x98xf32> -> vector<3x98xf32>
    %c0_132 = arith.constant 0 : index
    %c0_133 = arith.constant 0 : index
    %511 = vector.load %arg11[%c0_132, %c0_133] : memref<3x1xf32, #tpu.memory_space<vmem>>, vector<3x1xf32>
    %512 = vector.broadcast %511 : vector<3x1xf32> to vector<3x98xf32>
    %513 = arith.addf %510, %512 : vector<3x98xf32>
    %514 = math.tanh %513 : vector<3x98xf32>
    %515 = tpu.concatenate %401, %400, %397, %396 in 0 : vector<16x98xf32>, vector<16x98xf32>, vector<16x98xf32>, vector<16x98xf32> -> vector<64x98xf32>
    %516 = arith.truncf %515 : vector<64x98xf32> to vector<64x98xbf16>
    %cst_134 = arith.constant dense<0.000000e+00> : vector<3x98xf32>
    %517 = tpu.matmul %493, %516, %cst_134 {dimension_numbers = #tpu.dot_dimension_numbers<[1], [0], [0], [1], [0, 0, 1, 1], [], []>} : vector<3x64xbf16>, vector<64x98xbf16>, vector<3x98xf32> -> vector<3x98xf32>
    %c0_135 = arith.constant 0 : index
    %c0_136 = arith.constant 0 : index
    %518 = vector.load %arg11[%c0_135, %c0_136] : memref<3x1xf32, #tpu.memory_space<vmem>>, vector<3x1xf32>
    %519 = vector.broadcast %518 : vector<3x1xf32> to vector<3x98xf32>
    %520 = arith.addf %517, %519 : vector<3x98xf32>
    %521 = math.tanh %520 : vector<3x98xf32>
    %522 = tpu.concatenate %410, %417, %424, %431, %440, %447, %454, %461, %470, %477, %484, %491, %500, %507, %514, %521 in 0 : vector<3x98xf32>, vector<3x98xf32>, vector<3x98xf32>, vector<3x98xf32>, vector<3x98xf32>, vector<3x98xf32>, vector<3x98xf32>, vector<3x98xf32>, vector<3x98xf32>, vector<3x98xf32>, vector<3x98xf32>, vector<3x98xf32>, vector<3x98xf32>, vector<3x98xf32>, vector<3x98xf32>, vector<3x98xf32> -> vector<48x98xf32>
    %cst_137 = arith.constant 0.000000e+00 : f32
    %523 = vector.broadcast %cst_137 : f32 to vector<48x30xf32>
    %524 = tpu.concatenate %522, %523 in 1 : vector<48x98xf32>, vector<48x30xf32> -> vector<48x128xf32>
    %c0_138 = arith.constant 0 : index
    %c0_139 = arith.constant 0 : index
    %525 = vector.load %arg12[%c0_138, %c0_139] : memref<48x128xf32, #tpu.memory_space<vmem>>, vector<48x128xf32>
    tpu.vector_store %arg12[%c0_138, %c0_139], %524 {strides = array<i32>} : memref<48x128xf32, #tpu.memory_space<vmem>>, vector<48x128xf32>,
    return
  }
  func.func @transform_0(%arg0: i32) -> (i32, i32) {
    %c0_i32 = arith.constant 0 : i32
    %c0_i32_0 = arith.constant 0 : i32
    %c0_i32_1 = arith.constant 0 : i32
    return %c0_i32, %c0_i32_0 : i32, i32
  }
  func.func @transform_1(%arg0: i32) -> (i32, i32) {
    %c0_i32 = arith.constant 0 : i32
    %c0_i32_0 = arith.constant 0 : i32
    %c0_i32_1 = arith.constant 0 : i32
    return %c0_i32, %c0_i32_0 : i32, i32
  }
  func.func @transform_2(%arg0: i32) -> (i32, i32) {
    %c0_i32 = arith.constant 0 : i32
    %c0_i32_0 = arith.constant 0 : i32
    %c0_i32_1 = arith.constant 0 : i32
    return %c0_i32, %c0_i32_0 : i32, i32
  }
  func.func @transform_3(%arg0: i32) -> (i32, i32) {
    %c0_i32 = arith.constant 0 : i32
    %c0_i32_0 = arith.constant 0 : i32
    %c0_i32_1 = arith.constant 0 : i32
    return %c0_i32, %c0_i32_0 : i32, i32
  }
  func.func @transform_4(%arg0: i32) -> (i32, i32) {
    %c0_i32 = arith.constant 0 : i32
    %c0_i32_0 = arith.constant 0 : i32
    %c0_i32_1 = arith.constant 0 : i32
    return %c0_i32, %c0_i32_0 : i32, i32
  }
  func.func @transform_5(%arg0: i32) -> (i32, i32, i32) {
    %c0_i32 = arith.constant 0 : i32
    %c0_i32_0 = arith.constant 0 : i32
    %c0_i32_1 = arith.constant 0 : i32
    %c0_i32_2 = arith.constant 0 : i32
    return %c0_i32, %c0_i32_0, %c0_i32_1 : i32, i32, i32
  }
  func.func @transform_6(%arg0: i32) -> (i32, i32) {
    %c0_i32 = arith.constant 0 : i32
    %c0_i32_0 = arith.constant 0 : i32
    %c0_i32_1 = arith.constant 0 : i32
    return %c0_i32, %c0_i32_0 : i32, i32
  }
  func.func @transform_7(%arg0: i32) -> (i32, i32) {
    %c0_i32 = arith.constant 0 : i32
    %c0_i32_0 = arith.constant 0 : i32
    %c0_i32_1 = arith.constant 0 : i32
    return %c0_i32, %c0_i32_0 : i32, i32
  }
  func.func @transform_8(%arg0: i32) -> (i32, i32) {
    %c0_i32 = arith.constant 0 : i32
    %c0_i32_0 = arith.constant 0 : i32
    %c0_i32_1 = arith.constant 0 : i32
    return %c0_i32, %c0_i32_0 : i32, i32
  }
  func.func @transform_9(%arg0: i32) -> (i32, i32, i32) {
    %c0_i32 = arith.constant 0 : i32
    %c0_i32_0 = arith.constant 0 : i32
    %c0_i32_1 = arith.constant 0 : i32
    %c0_i32_2 = arith.constant 0 : i32
    return %c0_i32, %c0_i32_0, %c0_i32_1 : i32, i32, i32
  }
  func.func @transform_10(%arg0: i32) -> (i32, i32) {
    %c0_i32 = arith.constant 0 : i32
    %c0_i32_0 = arith.constant 0 : i32
    %c0_i32_1 = arith.constant 0 : i32
    return %c0_i32, %c0_i32_0 : i32, i32
  }
  func.func @transform_11(%arg0: i32) -> (i32, i32) {
    %c0_i32 = arith.constant 0 : i32
    %c0_i32_0 = arith.constant 0 : i32
    %c0_i32_1 = arith.constant 0 : i32
    return %c0_i32, %c0_i32_0 : i32, i32
  }
}

module attributes {stable_mosaic.version = 11 : i64} {
  func.func @_encoder_vq_kernel(%arg0: i32, %arg1: memref<48x1568xbf16, #tpu.memory_space<vmem>>, %arg2: memref<1x1568xf32, #tpu.memory_space<vmem>>, %arg3: memref<16x48xbf16, #tpu.memory_space<vmem>>, %arg4: memref<16x1xf32, #tpu.memory_space<vmem>>, %arg5: memref<32x256xbf16, #tpu.memory_space<vmem>>, %arg6: memref<32x1xf32, #tpu.memory_space<vmem>>, %arg7: memref<32x1xf32, #tpu.memory_space<vmem>>, %arg8: memref<32x1xf32, #tpu.memory_space<vmem>>, %arg9: memref<32x1568xbf16, #tpu.memory_space<vmem>>, %arg10: memref<32x1xf32, #tpu.memory_space<vmem>>, %arg11: memref<64x32xf32, #tpu.memory_space<vmem>>, %arg12: memref<32x64xf32, #tpu.memory_space<vmem>>, %arg13: memref<64x1xf32, #tpu.memory_space<vmem>>, %arg14: memref<64x2xf32, #tpu.memory_space<vmem>>) attributes {dimension_semantics = [#tpu.dimension_semantics<arbitrary>], iteration_bounds = array<i64: 1>, scalar_prefetch = 0 : i64, scratch_operands = 0 : i64, tpu.core_type = #tpu.core_type<tc>, window_params = [{pipeline_mode = #tpu.pipeline_mode<synchronous>, transform_indices = @transform_0, window_bounds = array<i64: 48, 1568>}, {pipeline_mode = #tpu.pipeline_mode<synchronous>, transform_indices = @transform_1, window_bounds = array<i64: 1, 1568>}, {pipeline_mode = #tpu.pipeline_mode<synchronous>, transform_indices = @transform_2, window_bounds = array<i64: 16, 48>}, {pipeline_mode = #tpu.pipeline_mode<synchronous>, transform_indices = @transform_3, window_bounds = array<i64: 16, 1>}, {pipeline_mode = #tpu.pipeline_mode<synchronous>, transform_indices = @transform_4, window_bounds = array<i64: 32, 256>}, {pipeline_mode = #tpu.pipeline_mode<synchronous>, transform_indices = @transform_5, window_bounds = array<i64: 32, 1>}, {pipeline_mode = #tpu.pipeline_mode<synchronous>, transform_indices = @transform_6, window_bounds = array<i64: 32, 1>}, {pipeline_mode = #tpu.pipeline_mode<synchronous>, transform_indices = @transform_7, window_bounds = array<i64: 32, 1>}, {pipeline_mode = #tpu.pipeline_mode<synchronous>, transform_indices = @transform_8, window_bounds = array<i64: 32, 1568>}, {pipeline_mode = #tpu.pipeline_mode<synchronous>, transform_indices = @transform_9, window_bounds = array<i64: 32, 1>}, {pipeline_mode = #tpu.pipeline_mode<synchronous>, transform_indices = @transform_10, window_bounds = array<i64: 64, 32>}, {pipeline_mode = #tpu.pipeline_mode<synchronous>, transform_indices = @transform_11, window_bounds = array<i64: 32, 64>}, {pipeline_mode = #tpu.pipeline_mode<synchronous>, transform_indices = @transform_12, window_bounds = array<i64: 64, 1>}, {pipeline_mode = #tpu.pipeline_mode<synchronous>, transform_indices = @transform_13, window_bounds = array<i64: 64, 2>}]} {
    %c0 = arith.constant 0 : index
    %c0_0 = arith.constant 0 : index
    %0 = vector.load %arg3[%c0, %c0_0] : memref<16x48xbf16, #tpu.memory_space<vmem>>, vector<16x48xbf16>
    %c0_1 = arith.constant 0 : index
    %c0_2 = arith.constant 0 : index
    %1 = vector.load %arg1[%c0_1, %c0_2] : memref<48x1568xbf16, #tpu.memory_space<vmem>>, vector<48x1568xbf16>
    %cst = arith.constant dense<0.000000e+00> : vector<16x1568xf32>
    %2 = tpu.matmul %0, %1, %cst {dimension_numbers = #tpu.dot_dimension_numbers<[1], [0], [0], [1], [0, 0, 1, 1], [], []>} : vector<16x48xbf16>, vector<48x1568xbf16>, vector<16x1568xf32> -> vector<16x1568xf32>
    %c0_3 = arith.constant 0 : index
    %c0_4 = arith.constant 0 : index
    %3 = vector.load %arg4[%c0_3, %c0_4] : memref<16x1xf32, #tpu.memory_space<vmem>>, vector<16x1xf32>
    %4 = vector.broadcast %3 : vector<16x1xf32> to vector<16x1568xf32>
    %5 = arith.addf %2, %4 : vector<16x1568xf32>
    %cst_5 = arith.constant 0.000000e+00 : f32
    %6 = vector.broadcast %cst_5 : f32 to vector<16x1568xf32>
    %7 = arith.cmpf ogt, %5, %6 : vector<16x1568xf32>
    %cst_6 = arith.constant 2.000000e-01 : f32
    %8 = vector.broadcast %cst_6 : f32 to vector<16x1568xf32>
    %9 = arith.mulf %8, %5 : vector<16x1568xf32>
    %10 = arith.select %7, %5, %9 : vector<16x1568xi1>, vector<16x1568xf32>
    %c0_7 = arith.constant 0 : index
    %c0_8 = arith.constant 0 : index
    %11 = vector.load %arg2[%c0_7, %c0_8] : memref<1x1568xf32, #tpu.memory_space<vmem>>, vector<1x1568xf32>
    %12 = vector.broadcast %11 : vector<1x1568xf32> to vector<16x1568xf32>
    %13 = arith.mulf %10, %12 : vector<16x1568xf32>
    %14 = vector.extract_strided_slice %13 {offsets = [0, 0], sizes = [16, 98], strides = [1, 1]} : vector<16x1568xf32> to vector<16x98xf32>
    %15 = vector.extract_strided_slice %13 {offsets = [0, 98], sizes = [16, 98], strides = [1, 1]} : vector<16x1568xf32> to vector<16x98xf32>
    %16 = vector.extract_strided_slice %13 {offsets = [0, 196], sizes = [16, 98], strides = [1, 1]} : vector<16x1568xf32> to vector<16x98xf32>
    %17 = vector.extract_strided_slice %13 {offsets = [0, 294], sizes = [16, 98], strides = [1, 1]} : vector<16x1568xf32> to vector<16x98xf32>
    %18 = vector.extract_strided_slice %13 {offsets = [0, 392], sizes = [16, 98], strides = [1, 1]} : vector<16x1568xf32> to vector<16x98xf32>
    %19 = vector.extract_strided_slice %13 {offsets = [0, 490], sizes = [16, 98], strides = [1, 1]} : vector<16x1568xf32> to vector<16x98xf32>
    %20 = vector.extract_strided_slice %13 {offsets = [0, 588], sizes = [16, 98], strides = [1, 1]} : vector<16x1568xf32> to vector<16x98xf32>
    %21 = vector.extract_strided_slice %13 {offsets = [0, 686], sizes = [16, 98], strides = [1, 1]} : vector<16x1568xf32> to vector<16x98xf32>
    %22 = vector.extract_strided_slice %13 {offsets = [0, 784], sizes = [16, 98], strides = [1, 1]} : vector<16x1568xf32> to vector<16x98xf32>
    %23 = vector.extract_strided_slice %13 {offsets = [0, 882], sizes = [16, 98], strides = [1, 1]} : vector<16x1568xf32> to vector<16x98xf32>
    %24 = vector.extract_strided_slice %13 {offsets = [0, 980], sizes = [16, 98], strides = [1, 1]} : vector<16x1568xf32> to vector<16x98xf32>
    %25 = vector.extract_strided_slice %13 {offsets = [0, 1078], sizes = [16, 98], strides = [1, 1]} : vector<16x1568xf32> to vector<16x98xf32>
    %26 = vector.extract_strided_slice %13 {offsets = [0, 1176], sizes = [16, 98], strides = [1, 1]} : vector<16x1568xf32> to vector<16x98xf32>
    %27 = vector.extract_strided_slice %13 {offsets = [0, 1274], sizes = [16, 98], strides = [1, 1]} : vector<16x1568xf32> to vector<16x98xf32>
    %28 = vector.extract_strided_slice %13 {offsets = [0, 1372], sizes = [16, 98], strides = [1, 1]} : vector<16x1568xf32> to vector<16x98xf32>
    %29 = vector.extract_strided_slice %13 {offsets = [0, 1470], sizes = [16, 98], strides = [1, 1]} : vector<16x1568xf32> to vector<16x98xf32>
    %30 = tpu.concatenate %14, %15, %16, %17, %18, %19, %20, %21, %22, %23, %24, %25, %26, %27, %28, %29 in 0 : vector<16x98xf32>, vector<16x98xf32>, vector<16x98xf32>, vector<16x98xf32>, vector<16x98xf32>, vector<16x98xf32>, vector<16x98xf32>, vector<16x98xf32>, vector<16x98xf32>, vector<16x98xf32>, vector<16x98xf32>, vector<16x98xf32>, vector<16x98xf32>, vector<16x98xf32>, vector<16x98xf32>, vector<16x98xf32> -> vector<256x98xf32>
    %c0_9 = arith.constant 0 : index
    %c0_10 = arith.constant 0 : index
    %31 = vector.load %arg5[%c0_9, %c0_10] : memref<32x256xbf16, #tpu.memory_space<vmem>>, vector<32x256xbf16>
    %32 = arith.truncf %30 : vector<256x98xf32> to vector<256x98xbf16>
    %cst_11 = arith.constant dense<0.000000e+00> : vector<32x98xf32>
    %33 = tpu.matmul %31, %32, %cst_11 {dimension_numbers = #tpu.dot_dimension_numbers<[1], [0], [0], [1], [0, 0, 1, 1], [], []>} : vector<32x256xbf16>, vector<256x98xbf16>, vector<32x98xf32> -> vector<32x98xf32>
    %c0_12 = arith.constant 0 : index
    %c0_13 = arith.constant 0 : index
    %34 = vector.load %arg6[%c0_12, %c0_13] : memref<32x1xf32, #tpu.memory_space<vmem>>, vector<32x1xf32>
    %35 = vector.broadcast %34 : vector<32x1xf32> to vector<32x98xf32>
    %36 = arith.addf %33, %35 : vector<32x98xf32>
    %cst_14 = arith.constant dense<0.000000e+00> : vector<32xf32>
    %37 = vector.multi_reduction <add>, %36, %cst_14 [1] : vector<32x98xf32> to vector<32xf32>
    %38 = vector.shape_cast %37 : vector<32xf32> to vector<32x1xf32>
    %39 = arith.mulf %36, %36 : vector<32x98xf32>
    %cst_15 = arith.constant dense<0.000000e+00> : vector<32xf32>
    %40 = vector.multi_reduction <add>, %39, %cst_15 [1] : vector<32x98xf32> to vector<32xf32>
    %41 = vector.shape_cast %40 : vector<32xf32> to vector<32x1xf32>
    %cst_16 = arith.constant 9.800000e+01 : f32
    %42 = vector.broadcast %cst_16 : f32 to vector<32x1xf32>
    %43 = arith.divf %38, %42 : vector<32x1xf32>
    %cst_17 = arith.constant 9.800000e+01 : f32
    %44 = vector.broadcast %cst_17 : f32 to vector<32x1xf32>
    %45 = arith.divf %41, %44 : vector<32x1xf32>
    %46 = arith.mulf %43, %43 : vector<32x1xf32>
    %47 = arith.subf %45, %46 : vector<32x1xf32>
    %cst_18 = arith.constant 9.99999974E-6 : f32
    %48 = vector.broadcast %cst_18 : f32 to vector<32x1xf32>
    %49 = arith.addf %47, %48 : vector<32x1xf32>
    %50 = math.rsqrt %49 : vector<32x1xf32>
    %51 = vector.broadcast %43 : vector<32x1xf32> to vector<32x98xf32>
    %52 = arith.subf %36, %51 : vector<32x98xf32>
    %53 = vector.broadcast %50 : vector<32x1xf32> to vector<32x98xf32>
    %54 = arith.mulf %52, %53 : vector<32x98xf32>
    %c0_19 = arith.constant 0 : index
    %c0_20 = arith.constant 0 : index
    %55 = vector.load %arg7[%c0_19, %c0_20] : memref<32x1xf32, #tpu.memory_space<vmem>>, vector<32x1xf32>
    %56 = vector.broadcast %55 : vector<32x1xf32> to vector<32x98xf32>
    %57 = arith.mulf %54, %56 : vector<32x98xf32>
    %c0_21 = arith.constant 0 : index
    %c0_22 = arith.constant 0 : index
    %58 = vector.load %arg8[%c0_21, %c0_22] : memref<32x1xf32, #tpu.memory_space<vmem>>, vector<32x1xf32>
    %59 = vector.broadcast %58 : vector<32x1xf32> to vector<32x98xf32>
    %60 = arith.addf %57, %59 : vector<32x98xf32>
    %cst_23 = arith.constant 0.000000e+00 : f32
    %61 = vector.broadcast %cst_23 : f32 to vector<32x98xf32>
    %62 = arith.cmpf ogt, %60, %61 : vector<32x98xf32>
    %cst_24 = arith.constant 2.000000e-01 : f32
    %63 = vector.broadcast %cst_24 : f32 to vector<32x98xf32>
    %64 = arith.mulf %63, %60 : vector<32x98xf32>
    %65 = arith.select %62, %60, %64 : vector<32x98xi1>, vector<32x98xf32>
    %66 = vector.extract_strided_slice %65 {offsets = [0, 0], sizes = [32, 2], strides = [1, 1]} : vector<32x98xf32> to vector<32x2xf32>
    %67 = vector.extract_strided_slice %65 {offsets = [0, 2], sizes = [32, 2], strides = [1, 1]} : vector<32x98xf32> to vector<32x2xf32>
    %68 = vector.extract_strided_slice %65 {offsets = [0, 4], sizes = [32, 2], strides = [1, 1]} : vector<32x98xf32> to vector<32x2xf32>
    %69 = vector.extract_strided_slice %65 {offsets = [0, 6], sizes = [32, 2], strides = [1, 1]} : vector<32x98xf32> to vector<32x2xf32>
    %70 = vector.extract_strided_slice %65 {offsets = [0, 8], sizes = [32, 2], strides = [1, 1]} : vector<32x98xf32> to vector<32x2xf32>
    %71 = vector.extract_strided_slice %65 {offsets = [0, 10], sizes = [32, 2], strides = [1, 1]} : vector<32x98xf32> to vector<32x2xf32>
    %72 = vector.extract_strided_slice %65 {offsets = [0, 12], sizes = [32, 2], strides = [1, 1]} : vector<32x98xf32> to vector<32x2xf32>
    %73 = vector.extract_strided_slice %65 {offsets = [0, 14], sizes = [32, 2], strides = [1, 1]} : vector<32x98xf32> to vector<32x2xf32>
    %74 = vector.extract_strided_slice %65 {offsets = [0, 16], sizes = [32, 2], strides = [1, 1]} : vector<32x98xf32> to vector<32x2xf32>
    %75 = vector.extract_strided_slice %65 {offsets = [0, 18], sizes = [32, 2], strides = [1, 1]} : vector<32x98xf32> to vector<32x2xf32>
    %76 = vector.extract_strided_slice %65 {offsets = [0, 20], sizes = [32, 2], strides = [1, 1]} : vector<32x98xf32> to vector<32x2xf32>
    %77 = vector.extract_strided_slice %65 {offsets = [0, 22], sizes = [32, 2], strides = [1, 1]} : vector<32x98xf32> to vector<32x2xf32>
    %78 = vector.extract_strided_slice %65 {offsets = [0, 24], sizes = [32, 2], strides = [1, 1]} : vector<32x98xf32> to vector<32x2xf32>
    %79 = vector.extract_strided_slice %65 {offsets = [0, 26], sizes = [32, 2], strides = [1, 1]} : vector<32x98xf32> to vector<32x2xf32>
    %80 = vector.extract_strided_slice %65 {offsets = [0, 28], sizes = [32, 2], strides = [1, 1]} : vector<32x98xf32> to vector<32x2xf32>
    %81 = vector.extract_strided_slice %65 {offsets = [0, 30], sizes = [32, 2], strides = [1, 1]} : vector<32x98xf32> to vector<32x2xf32>
    %82 = vector.extract_strided_slice %65 {offsets = [0, 32], sizes = [32, 2], strides = [1, 1]} : vector<32x98xf32> to vector<32x2xf32>
    %83 = vector.extract_strided_slice %65 {offsets = [0, 34], sizes = [32, 2], strides = [1, 1]} : vector<32x98xf32> to vector<32x2xf32>
    %84 = vector.extract_strided_slice %65 {offsets = [0, 36], sizes = [32, 2], strides = [1, 1]} : vector<32x98xf32> to vector<32x2xf32>
    %85 = vector.extract_strided_slice %65 {offsets = [0, 38], sizes = [32, 2], strides = [1, 1]} : vector<32x98xf32> to vector<32x2xf32>
    %86 = vector.extract_strided_slice %65 {offsets = [0, 40], sizes = [32, 2], strides = [1, 1]} : vector<32x98xf32> to vector<32x2xf32>
    %87 = vector.extract_strided_slice %65 {offsets = [0, 42], sizes = [32, 2], strides = [1, 1]} : vector<32x98xf32> to vector<32x2xf32>
    %88 = vector.extract_strided_slice %65 {offsets = [0, 44], sizes = [32, 2], strides = [1, 1]} : vector<32x98xf32> to vector<32x2xf32>
    %89 = vector.extract_strided_slice %65 {offsets = [0, 46], sizes = [32, 2], strides = [1, 1]} : vector<32x98xf32> to vector<32x2xf32>
    %90 = vector.extract_strided_slice %65 {offsets = [0, 48], sizes = [32, 2], strides = [1, 1]} : vector<32x98xf32> to vector<32x2xf32>
    %91 = vector.extract_strided_slice %65 {offsets = [0, 50], sizes = [32, 2], strides = [1, 1]} : vector<32x98xf32> to vector<32x2xf32>
    %92 = vector.extract_strided_slice %65 {offsets = [0, 52], sizes = [32, 2], strides = [1, 1]} : vector<32x98xf32> to vector<32x2xf32>
    %93 = vector.extract_strided_slice %65 {offsets = [0, 54], sizes = [32, 2], strides = [1, 1]} : vector<32x98xf32> to vector<32x2xf32>
    %94 = vector.extract_strided_slice %65 {offsets = [0, 56], sizes = [32, 2], strides = [1, 1]} : vector<32x98xf32> to vector<32x2xf32>
    %95 = vector.extract_strided_slice %65 {offsets = [0, 58], sizes = [32, 2], strides = [1, 1]} : vector<32x98xf32> to vector<32x2xf32>
    %96 = vector.extract_strided_slice %65 {offsets = [0, 60], sizes = [32, 2], strides = [1, 1]} : vector<32x98xf32> to vector<32x2xf32>
    %97 = vector.extract_strided_slice %65 {offsets = [0, 62], sizes = [32, 2], strides = [1, 1]} : vector<32x98xf32> to vector<32x2xf32>
    %98 = vector.extract_strided_slice %65 {offsets = [0, 64], sizes = [32, 2], strides = [1, 1]} : vector<32x98xf32> to vector<32x2xf32>
    %99 = vector.extract_strided_slice %65 {offsets = [0, 66], sizes = [32, 2], strides = [1, 1]} : vector<32x98xf32> to vector<32x2xf32>
    %100 = vector.extract_strided_slice %65 {offsets = [0, 68], sizes = [32, 2], strides = [1, 1]} : vector<32x98xf32> to vector<32x2xf32>
    %101 = vector.extract_strided_slice %65 {offsets = [0, 70], sizes = [32, 2], strides = [1, 1]} : vector<32x98xf32> to vector<32x2xf32>
    %102 = vector.extract_strided_slice %65 {offsets = [0, 72], sizes = [32, 2], strides = [1, 1]} : vector<32x98xf32> to vector<32x2xf32>
    %103 = vector.extract_strided_slice %65 {offsets = [0, 74], sizes = [32, 2], strides = [1, 1]} : vector<32x98xf32> to vector<32x2xf32>
    %104 = vector.extract_strided_slice %65 {offsets = [0, 76], sizes = [32, 2], strides = [1, 1]} : vector<32x98xf32> to vector<32x2xf32>
    %105 = vector.extract_strided_slice %65 {offsets = [0, 78], sizes = [32, 2], strides = [1, 1]} : vector<32x98xf32> to vector<32x2xf32>
    %106 = vector.extract_strided_slice %65 {offsets = [0, 80], sizes = [32, 2], strides = [1, 1]} : vector<32x98xf32> to vector<32x2xf32>
    %107 = vector.extract_strided_slice %65 {offsets = [0, 82], sizes = [32, 2], strides = [1, 1]} : vector<32x98xf32> to vector<32x2xf32>
    %108 = vector.extract_strided_slice %65 {offsets = [0, 84], sizes = [32, 2], strides = [1, 1]} : vector<32x98xf32> to vector<32x2xf32>
    %109 = vector.extract_strided_slice %65 {offsets = [0, 86], sizes = [32, 2], strides = [1, 1]} : vector<32x98xf32> to vector<32x2xf32>
    %110 = vector.extract_strided_slice %65 {offsets = [0, 88], sizes = [32, 2], strides = [1, 1]} : vector<32x98xf32> to vector<32x2xf32>
    %111 = vector.extract_strided_slice %65 {offsets = [0, 90], sizes = [32, 2], strides = [1, 1]} : vector<32x98xf32> to vector<32x2xf32>
    %112 = vector.extract_strided_slice %65 {offsets = [0, 92], sizes = [32, 2], strides = [1, 1]} : vector<32x98xf32> to vector<32x2xf32>
    %113 = vector.extract_strided_slice %65 {offsets = [0, 94], sizes = [32, 2], strides = [1, 1]} : vector<32x98xf32> to vector<32x2xf32>
    %114 = vector.extract_strided_slice %65 {offsets = [0, 96], sizes = [32, 2], strides = [1, 1]} : vector<32x98xf32> to vector<32x2xf32>
    %115 = tpu.concatenate %66, %67, %68, %69, %70, %71, %72, %73, %74, %75, %76, %77, %78, %79, %80, %81 in 0 : vector<32x2xf32>, vector<32x2xf32>, vector<32x2xf32>, vector<32x2xf32>, vector<32x2xf32>, vector<32x2xf32>, vector<32x2xf32>, vector<32x2xf32>, vector<32x2xf32>, vector<32x2xf32>, vector<32x2xf32>, vector<32x2xf32>, vector<32x2xf32>, vector<32x2xf32>, vector<32x2xf32>, vector<32x2xf32> -> vector<512x2xf32>
    %116 = tpu.concatenate %82, %83, %84, %85, %86, %87, %88, %89, %90, %91, %92, %93, %94, %95, %96, %97 in 0 : vector<32x2xf32>, vector<32x2xf32>, vector<32x2xf32>, vector<32x2xf32>, vector<32x2xf32>, vector<32x2xf32>, vector<32x2xf32>, vector<32x2xf32>, vector<32x2xf32>, vector<32x2xf32>, vector<32x2xf32>, vector<32x2xf32>, vector<32x2xf32>, vector<32x2xf32>, vector<32x2xf32>, vector<32x2xf32> -> vector<512x2xf32>
    %117 = tpu.concatenate %98, %99, %100, %101, %102, %103, %104, %105, %106, %107, %108, %109, %110, %111, %112, %113 in 0 : vector<32x2xf32>, vector<32x2xf32>, vector<32x2xf32>, vector<32x2xf32>, vector<32x2xf32>, vector<32x2xf32>, vector<32x2xf32>, vector<32x2xf32>, vector<32x2xf32>, vector<32x2xf32>, vector<32x2xf32>, vector<32x2xf32>, vector<32x2xf32>, vector<32x2xf32>, vector<32x2xf32>, vector<32x2xf32> -> vector<512x2xf32>
    %118 = tpu.concatenate %115, %116, %117, %114 in 0 : vector<512x2xf32>, vector<512x2xf32>, vector<512x2xf32>, vector<32x2xf32> -> vector<1568x2xf32>
    %c0_25 = arith.constant 0 : index
    %c0_26 = arith.constant 0 : index
    %119 = vector.load %arg9[%c0_25, %c0_26] : memref<32x1568xbf16, #tpu.memory_space<vmem>>, vector<32x1568xbf16>
    %120 = arith.truncf %118 : vector<1568x2xf32> to vector<1568x2xbf16>
    %cst_27 = arith.constant dense<0.000000e+00> : vector<32x2xf32>
    %121 = tpu.matmul %119, %120, %cst_27 {dimension_numbers = #tpu.dot_dimension_numbers<[1], [0], [0], [1], [0, 0, 1, 1], [], []>} : vector<32x1568xbf16>, vector<1568x2xbf16>, vector<32x2xf32> -> vector<32x2xf32>
    %c0_28 = arith.constant 0 : index
    %c0_29 = arith.constant 0 : index
    %122 = vector.load %arg10[%c0_28, %c0_29] : memref<32x1xf32, #tpu.memory_space<vmem>>, vector<32x1xf32>
    %123 = vector.broadcast %122 : vector<32x1xf32> to vector<32x2xf32>
    %124 = arith.addf %121, %123 : vector<32x2xf32>
    %c0_30 = arith.constant 0 : index
    %c0_31 = arith.constant 0 : index
    %125 = vector.load %arg11[%c0_30, %c0_31] : memref<64x32xf32, #tpu.memory_space<vmem>>, vector<64x32xf32>
    %cst_32 = arith.constant dense<0.000000e+00> : vector<64x2xf32>
    %126 = tpu.matmul %125, %124, %cst_32 {dimension_numbers = #tpu.dot_dimension_numbers<[1], [0], [0], [1], [0, 0, 1, 1], [], []>} : vector<64x32xf32>, vector<32x2xf32>, vector<64x2xf32> -> vector<64x2xf32>
    %127 = arith.mulf %124, %124 : vector<32x2xf32>
    %cst_33 = arith.constant dense<0.000000e+00> : vector<2xf32>
    %128 = vector.multi_reduction <add>, %127, %cst_33 [0] : vector<32x2xf32> to vector<2xf32>
    %129 = vector.shape_cast %128 : vector<2xf32> to vector<1x2xf32>
    %c0_34 = arith.constant 0 : index
    %c0_35 = arith.constant 0 : index
    %130 = vector.load %arg13[%c0_34, %c0_35] : memref<64x1xf32, #tpu.memory_space<vmem>>, vector<64x1xf32>
    %cst_36 = arith.constant 2.000000e+00 : f32
    %131 = vector.broadcast %cst_36 : f32 to vector<64x2xf32>
    %132 = arith.mulf %131, %126 : vector<64x2xf32>
    %133 = vector.broadcast %130 : vector<64x1xf32> to vector<64x2xf32>
    %134 = arith.subf %133, %132 : vector<64x2xf32>
    %135 = vector.broadcast %129 : vector<1x2xf32> to vector<64x2xf32>
    %136 = arith.addf %134, %135 : vector<64x2xf32>
    %cst_37 = arith.constant dense<0x7F800000> : vector<2xf32>
    %137 = vector.multi_reduction <minimumf>, %136, %cst_37 [0] : vector<64x2xf32> to vector<2xf32>
    %138 = vector.shape_cast %137 : vector<2xf32> to vector<1x2xf32>
    %139 = tpu.iota {dimensions = array<i32: 0>} : vector<64x2xi32>
    %140 = vector.broadcast %138 : vector<1x2xf32> to vector<64x2xf32>
    %141 = arith.cmpf oeq, %136, %140 : vector<64x2xf32>
    %c64_i32 = arith.constant 64 : i32
    %142 = vector.broadcast %c64_i32 : i32 to vector<64x2xi32>
    %143 = arith.select %141, %139, %142 : vector<64x2xi1>, vector<64x2xi32>
    %cst_38 = arith.constant dense<2147483647> : vector<2xi32>
    %144 = vector.multi_reduction <minsi>, %143, %cst_38 [0] : vector<64x2xi32> to vector<2xi32>
    %145 = vector.shape_cast %144 : vector<2xi32> to vector<1x2xi32>
    %146 = vector.broadcast %145 : vector<1x2xi32> to vector<64x2xi32>
    %147 = arith.cmpi eq, %139, %146 : vector<64x2xi32>
    %148 = arith.extui %147 : vector<64x2xi1> to vector<64x2xi32>
    %149 = arith.sitofp %148 : vector<64x2xi32> to vector<64x2xf32>
    %c0_39 = arith.constant 0 : index
    %c0_40 = arith.constant 0 : index
    %150 = vector.load %arg12[%c0_39, %c0_40] : memref<32x64xf32, #tpu.memory_space<vmem>>, vector<32x64xf32>
    %cst_41 = arith.constant dense<0.000000e+00> : vector<32x2xf32>
    %151 = tpu.matmul %150, %149, %cst_41 {dimension_numbers = #tpu.dot_dimension_numbers<[1], [0], [0], [1], [0, 0, 1, 1], [], []>} : vector<32x64xf32>, vector<64x2xf32>, vector<32x2xf32> -> vector<32x2xf32>
    %152 = tpu.concatenate %124, %151 in 0 : vector<32x2xf32>, vector<32x2xf32> -> vector<64x2xf32>
    %c0_42 = arith.constant 0 : index
    %c0_43 = arith.constant 0 : index
    %153 = vector.load %arg14[%c0_42, %c0_43] : memref<64x2xf32, #tpu.memory_space<vmem>>, vector<64x2xf32>
    tpu.vector_store %arg14[%c0_42, %c0_43], %152 {strides = array<i32>} : memref<64x2xf32, #tpu.memory_space<vmem>>, vector<64x2xf32>,
    return
  }
  func.func @transform_0(%arg0: i32) -> (i32, i32) {
    %c0_i32 = arith.constant 0 : i32
    %c0_i32_0 = arith.constant 0 : i32
    %c0_i32_1 = arith.constant 0 : i32
    return %c0_i32, %c0_i32_0 : i32, i32
  }
  func.func @transform_1(%arg0: i32) -> (i32, i32) {
    %c0_i32 = arith.constant 0 : i32
    %c0_i32_0 = arith.constant 0 : i32
    %c0_i32_1 = arith.constant 0 : i32
    return %c0_i32, %c0_i32_0 : i32, i32
  }
  func.func @transform_2(%arg0: i32) -> (i32, i32) {
    %c0_i32 = arith.constant 0 : i32
    %c0_i32_0 = arith.constant 0 : i32
    %c0_i32_1 = arith.constant 0 : i32
    return %c0_i32, %c0_i32_0 : i32, i32
  }
  func.func @transform_3(%arg0: i32) -> (i32, i32) {
    %c0_i32 = arith.constant 0 : i32
    %c0_i32_0 = arith.constant 0 : i32
    %c0_i32_1 = arith.constant 0 : i32
    return %c0_i32, %c0_i32_0 : i32, i32
  }
  func.func @transform_4(%arg0: i32) -> (i32, i32) {
    %c0_i32 = arith.constant 0 : i32
    %c0_i32_0 = arith.constant 0 : i32
    %c0_i32_1 = arith.constant 0 : i32
    return %c0_i32, %c0_i32_0 : i32, i32
  }
  func.func @transform_5(%arg0: i32) -> (i32, i32) {
    %c0_i32 = arith.constant 0 : i32
    %c0_i32_0 = arith.constant 0 : i32
    %c0_i32_1 = arith.constant 0 : i32
    return %c0_i32, %c0_i32_0 : i32, i32
  }
  func.func @transform_6(%arg0: i32) -> (i32, i32) {
    %c0_i32 = arith.constant 0 : i32
    %c0_i32_0 = arith.constant 0 : i32
    %c0_i32_1 = arith.constant 0 : i32
    return %c0_i32, %c0_i32_0 : i32, i32
  }
  func.func @transform_7(%arg0: i32) -> (i32, i32) {
    %c0_i32 = arith.constant 0 : i32
    %c0_i32_0 = arith.constant 0 : i32
    %c0_i32_1 = arith.constant 0 : i32
    return %c0_i32, %c0_i32_0 : i32, i32
  }
  func.func @transform_8(%arg0: i32) -> (i32, i32) {
    %c0_i32 = arith.constant 0 : i32
    %c0_i32_0 = arith.constant 0 : i32
    %c0_i32_1 = arith.constant 0 : i32
    return %c0_i32, %c0_i32_0 : i32, i32
  }
  func.func @transform_9(%arg0: i32) -> (i32, i32) {
    %c0_i32 = arith.constant 0 : i32
    %c0_i32_0 = arith.constant 0 : i32
    %c0_i32_1 = arith.constant 0 : i32
    return %c0_i32, %c0_i32_0 : i32, i32
  }
  func.func @transform_10(%arg0: i32) -> (i32, i32) {
    %c0_i32 = arith.constant 0 : i32
    %c0_i32_0 = arith.constant 0 : i32
    %c0_i32_1 = arith.constant 0 : i32
    return %c0_i32, %c0_i32_0 : i32, i32
  }
  func.func @transform_11(%arg0: i32) -> (i32, i32) {
    %c0_i32 = arith.constant 0 : i32
    %c0_i32_0 = arith.constant 0 : i32
    %c0_i32_1 = arith.constant 0 : i32
    return %c0_i32, %c0_i32_0 : i32, i32
  }
  func.func @transform_12(%arg0: i32) -> (i32, i32) {
    %c0_i32 = arith.constant 0 : i32
    %c0_i32_0 = arith.constant 0 : i32
    %c0_i32_1 = arith.constant 0 : i32
    return %c0_i32, %c0_i32_0 : i32, i32
  }
  func.func @transform_13(%arg0: i32) -> (i32, i32) {
    %c0_i32 = arith.constant 0 : i32
    %c0_i32_0 = arith.constant 0 : i32
    %c0_i32_1 = arith.constant 0 : i32
    return %c0_i32, %c0_i32_0 : i32, i32
  }
}

</mosaic_0001>

<bundles_post_ra>
// kernel: vqvae_gan_forward.2
= control target key start
LH: loop header
LB: loop body
LE: loop exit
PB: predicated region body
PF: predicated region fallthrough
CT: control target
= control target key end

     0   :  { %v4031_v1 = vmov 0   ;;  %vm304_vm0 = vcmask 392192   ;;  %v4032_v41 = vmov 0.0   ;;  %vm4033_vm1 = vmmov 0   ;;  %s4034_s21 = smov 22   ;;  %s4036_s24 = smov 52   ;;  %s5283_s0 = inlined_call_operand.vmem [shape: bf16[48,1568], index: 0, kind: input, shape index: {}]   ;;  %s5284_s2 = inlined_call_operand.vmem [shape: bf16[16,48], index: 2, kind: input, shape index: {}]   ;;  %s5285_s3 = inlined_call_operand.vmem [shape: f32[16,1], index: 3, kind: input, shape index: {}]   ;;  %s5286_s1 = inlined_call_operand.vmem [shape: f32[1,1568], index: 1, kind: input, shape index: {}]   ;;  %s5287_s5 = inlined_call_operand.vmem [shape: f32[32,1], index: 5, kind: input, shape index: {}]   ;;  %s5288_s4 = inlined_call_operand.vmem [shape: bf16[32,256], index: 4, kind: input, shape index: {}]   ;;  %s5289_s6 = inlined_call_operand.vmem [shape: f32[32,1], index: 6, kind: input, shape index: {}]   ;;  %s5290_s7 = inlined_call_operand.vmem [shape: f32[32,1], index: 7, kind: input, shape index: {}]   ;;  %s5291_s8 = inlined_call_operand.vmem [shape: bf16[32,1568], index: 8, kind: input, shape index: {}]   ;;  %s5292_s9 = inlined_call_operand.vmem [shape: f32[32,1], index: 9, kind: input, shape index: {}]   ;;  %s5293_s12 = inlined_call_operand.vmem [shape: f32[64,1], index: 12, kind: input, shape index: {}]   ;;  %s5294_s10 = inlined_call_operand.vmem [shape: f32[64,32], index: 10, kind: input, shape index: {}]   ;;  %s5295_s13 = inlined_call_operand.vmem [shape: f32[64,2], index: 13, kind: output, shape index: {}]   ;;  %s5296_s11 = inlined_call_operand.vmem [shape: f32[32,64], index: 11, kind: input, shape index: {}]  }
   0x1   :  { %v3921_v0 = vld [vmem:[%s5283_s0 + $0xd4] ss:$52 sps:$4 sm:$0xff]   ;;  %340 = vmatprep.mubr.bf16.mxu0 %v4031_v1  ;;  %383 = vmatprep.mubr.bf16.mxu1 %v4031_v1  ;;  %v3923_v2 = vld [vmem:[%s5283_s0 + $0xdc] ss:$52 sps:$4 sm:$0xff]   ;;  %v3926_v4 = vld [vmem:[%s5283_s0 + $0xd8] ss:$52 sps:$4 sm:$0xff]   ;;  %v689_v45 = vlaneseq }
   0x2   :  { %3304 = vset.pattern.permute.xlu0 %v4031_v1  ;;  %3440 = vset.pattern.permute.xlu1 %v4031_v1  ;;  %v3925_v3 = vld [vmem:[%s5283_s0 + $0xd0] ss:$52 sps:$4 sm:$0xff]   ;;  %v3927_v5 = vld [vmem:[%s5283_s0 + $0x6c] ss:$52 sps:$4 sm:$0xff]   ;;  %v3929_v6 = vld [vmem:[%s5283_s0 + $0x74] ss:$52 sps:$4 sm:$0xff]  }
   0x3   :  { %318 = vmatprep.subr.bf16.mxu0 %v3921_v0  ;;  %361 = vmatprep.subr.bf16.mxu1 %v3923_v2  ;;  %v3931_v7 = vld [vmem:[%s5283_s0 + $0x68] ss:$52 sps:$4 sm:$0xff]   ;;  %v3932_v8 = vld [vmem:[%s5283_s0 + $0x70] ss:$52 sps:$4 sm:$0xff]   ;;  %v3935_v10 = vld [vmem:[%s5283_s0 + $0xc] ss:$52 sps:$4 sm:$0xff]  }
   0x4   :  { %319 = vmatpush1.bf16.msra.mxu0 %v3925_v3  ;;  %362 = vmatpush1.bf16.msra.mxu1 %v3926_v4  ;;  %v3933_v9 = vld [vmem:[%s5283_s0 + $0x4] ss:$52 sps:$4 sm:$0xff]   ;;  %v3937_v11 = vld [vmem:[%s5283_s0] ss:$52 sps:$4 sm:$0xff]   ;;  %v3938_v12 = vld [vmem:[%s5283_s0 + $0x8] ss:$52 sps:$4 sm:$0xff]  }
   0x5   :  { %320 = vmatprep.subr.bf16.mxu0 %v3927_v5  ;;  %363 = vmatprep.subr.bf16.mxu1 %v3929_v6  ;;  %v3942_v13 = vld [vmem:[%s5283_s0 + $0xe4] ss:$52 sps:$4 sm:$0xff]   ;;  %v3945_v15 = vld [vmem:[%s5283_s0 + $0xec] ss:$52 sps:$4 sm:$0xff]   ;;  %v3943_v17 = vld [vmem:[%s5283_s0 + $0xe8] ss:$52 sps:$4 sm:$0xff]  }
   0x6   :  { %v4181_v14 = vld [vmem:[%s5284_s2] sm:$0xff]   ;;  %v3948_v18 = vld [vmem:[%s5283_s0 + $0x7c] ss:$52 sps:$4 sm:$0xff]   ;;  %v3946_v20 = vld [vmem:[%s5283_s0 + $0x78] ss:$52 sps:$4 sm:$0xff]   ;;  %v4289_v48 = vshrl.u32 %v689_v45, 7 }
   0x7   :  { %v3940_v16 = vld [vmem:[%s5283_s0 + $0xe0] ss:$52 sps:$4 sm:$0xff]   ;;  %v3951_v19 = vld [vmem:[%s5283_s0 + $0x84] ss:$52 sps:$4 sm:$0xff]   ;;  %v3957_v23 = vld [vmem:[%s5283_s0 + $0x1c] ss:$52 sps:$4 sm:$0xff]  }
   0x8   :  { %321 = vmatpush1.bf16.msra.mxu0 %v3931_v7  ;;  %364 = vmatpush1.bf16.msra.mxu1 %v3932_v8  ;;  %v3949_v21 = vld [vmem:[%s5283_s0 + $0x80] ss:$52 sps:$4 sm:$0xff]   ;;  %v3952_v24 = vld [vmem:[%s5283_s0 + $0x10] ss:$52 sps:$4 sm:$0xff]   ;;  %v3955_v25 = vld [vmem:[%s5283_s0 + $0x18] ss:$52 sps:$4 sm:$0xff]  }
   0x9   :  { %322 = vmatprep.subr.bf16.mxu0 %v3933_v9  ;;  %365 = vmatprep.subr.bf16.mxu1 %v3935_v10  ;;  %v3954_v22 = vld [vmem:[%s5283_s0 + $0x14] ss:$52 sps:$4 sm:$0xff]   ;;  %v3963_v27 = vld [vmem:[%s5283_s0 + $0xfc] ss:$52 sps:$4 sm:$0xff]   ;;  %v3961_v29 = vld [vmem:[%s5283_s0 + $0xf8] ss:$52 sps:$4 sm:$0xff]  }
   0xa   :  { %v3960_v26 = vld [vmem:[%s5283_s0 + $0xf4] ss:$52 sps:$4 sm:$0xff]   ;;  %v3958_v28 = vld [vmem:[%s5283_s0 + $0xf0] ss:$52 sps:$4 sm:$0xff]   ;;  %v3966_v30 = vld [vmem:[%s5283_s0 + $0x8c] ss:$52 sps:$4 sm:$0xff]  }
   0xb   :  { %v3969_v31 = vld [vmem:[%s5283_s0 + $0x94] ss:$52 sps:$4 sm:$0xff]   ;;  %v3967_v33 = vld [vmem:[%s5283_s0 + $0x90] ss:$52 sps:$4 sm:$0xff]   ;;  %v3975_v36 = vld [vmem:[%s5283_s0 + $0x2c] ss:$52 sps:$4 sm:$0xff]  }
   0xc   :  { %323 = vmatpush1.bf16.msra.mxu0 %v3937_v11  ;;  %366 = vmatpush1.bf16.msra.mxu1 %v3938_v12  ;;  %v3964_v32 = vld [vmem:[%s5283_s0 + $0x88] ss:$52 sps:$4 sm:$0xff]   ;;  %v89_v34 = vld [vmem:[%s5285_s3] sm:$0xff]  ;;  %v3977_v42 = vld [vmem:[%s5283_s0 + $0x98] ss:$52 sps:$4 sm:$0xff]   ;;  %v691_v54 = vsub.s32 0, %v4289_v48 }
   0xd   :  { %404 = vmatprep.subr.bf16.mxu0 %v3942_v13  ;;  %447 = vmatprep.subr.bf16.mxu1 %v3945_v15  ;;  %v3972_v35 = vld [vmem:[%s5283_s0 + $0x24] ss:$52 sps:$4 sm:$0xff]   ;;  %v3970_v37 = vld [vmem:[%s5283_s0 + $0x20] ss:$52 sps:$4 sm:$0xff]   ;;  %v3973_v38 = vld [vmem:[%s5283_s0 + $0x28] ss:$52 sps:$4 sm:$0xff]  }
   0xe   :  { %93 = vperm.xlu0 %3304, %v89_v34   ;;  %v90_v39 = vld [vmem:[%s5285_s3 + $0x8] sm:$0xff]  ;;  %v3976_v40 = vld [vmem:[%s5283_s0 + $0x100] ss:$52 sps:$4 sm:$0xff]   ;;  %v3978_v43 = vld [vmem:[%s5283_s0 + $0x30] ss:$52 sps:$4 sm:$0xff]   ;;  %v703_v2 = vsub.s32 3, %v4289_v48 }
   0xf   :  { %2915 = vmatmul.mubr.msk.bf16.vlgmr.msra.gmra.mxu0 %vm304_vm0, %v4181_v14  ;;  %2916 = vmatmul.mubr.msk.bf16.vlgmr.msra.gmra.mxu1 %vm304_vm0, %v4181_v14  ;;  %v4300_v56 = vld [vmem:[%s5286_s1] sm:$0xff]  ;;  %v715_v3 = vsub.s32 6, %v4289_v48  ;;  %v707_v7 = vsub.s32 4, %v4289_v48  ;;  %s4037_s25 = smov 36   ;;  %s4038_s2 = smov 6  }
  0x10   :  { %405 = vmatpush1.bf16.msra.mxu0 %v3940_v16  ;;  %448 = vmatpush1.bf16.msra.mxu1 %v3943_v17  ;;  %v692_v60 = vrot.slane %v4300_v56, %v691_v54  ;;  %v704_v16 = vrot.slane %v4300_v56, %v703_v2  ;;  %s4039_s26 = smov 104   ;;  %s4040_s27 = smov 66  }
  0x11   :  { %406 = vmatprep.subr.bf16.mxu0 %v3948_v18  ;;  %449 = vmatprep.subr.bf16.mxu1 %v3951_v19  ;;  %v711_v18 = vsub.s32 5, %v4289_v48  ;;  %s4041_s28 = smov 74   ;;  %s4042_s29 = smov 90  }
  0x12   :  { %426 = vmatprep.mubr.bf16.mxu0 %v4031_v1  ;;  %469 = vmatprep.mubr.bf16.mxu1 %v4031_v1  ;;  %s4043_s30 = smov 120   ;;  %s4044_s14 = smov 44  }
  0x13   :  { %98 = vperm.xlu0 %3304, %v90_v39   ;;  %s4045_s15 = smov 60   ;;  %s4046_s16 = smov 14  }
  0x14   :  { %407 = vmatpush1.bf16.msra.mxu0 %v3946_v20  ;;  %450 = vmatpush1.bf16.msra.mxu1 %v3949_v21  ;;  %v716_v20 = vrot.slane %v4300_v56, %v715_v3  ;;  %s4047_s17 = smov 30   ;;  %s4048_s3 = smov 112  }
  0x15   :  { %408 = vmatprep.subr.bf16.mxu0 %v3954_v22  ;;  %451 = vmatprep.subr.bf16.mxu1 %v3957_v23  ;;  %s4057_s18 = smov 126   ;;  %s4058_s19 = smov 118  }
  0x16   :  { %s4060_s0 = smov 102   ;;  %s4061_s20 = smov 96  }
  0x18   :  { %409 = vmatpush1.bf16.msra.mxu0 %v3952_v24  ;;  %452 = vmatpush1.bf16.msra.mxu1 %v3955_v25  ;;  %v708_v24 = vrot.slane %v4300_v56, %v707_v7 }
  0x19   :  { %490 = vmatprep.subr.bf16.mxu0 %v3960_v26  ;;  %533 = vmatprep.subr.bf16.mxu1 %v3963_v27 }
  0x1b   :  { %2917 = vmatmul.mubr.msk.bf16.vlgmr.msra.gmra.mxu0 %vm304_vm0, %v4181_v14  ;;  %2918 = vmatmul.mubr.msk.bf16.vlgmr.msra.gmra.mxu1 %vm304_vm0, %v4181_v14 }
  0x1c   :  { %491 = vmatpush1.bf16.msra.mxu0 %v3958_v28  ;;  %534 = vmatpush1.bf16.msra.mxu1 %v3961_v29 }
  0x1d   :  { %492 = vmatprep.subr.bf16.mxu0 %v3966_v30  ;;  %535 = vmatprep.subr.bf16.mxu1 %v3969_v31 }
  0x1e   :  { %512 = vmatprep.mubr.bf16.mxu0 %v4031_v1  ;;  %555 = vmatprep.mubr.bf16.mxu1 %v4031_v1 }
  0x20   :  { %493 = vmatpush1.bf16.msra.mxu0 %v3964_v32  ;;  %536 = vmatpush1.bf16.msra.mxu1 %v3967_v33  ;;  %v712_v33 = vrot.slane %v4300_v56, %v711_v18 }
  0x21   :  { %494 = vmatprep.subr.bf16.mxu0 %v3972_v35  ;;  %537 = vmatprep.subr.bf16.mxu1 %v3975_v36 }
  0x24   :  { %495 = vmatpush1.bf16.msra.mxu0 %v3970_v37  ;;  %538 = vmatpush1.bf16.msra.mxu1 %v3973_v38 }
  0x25   :  { %3210 = vmatprep.subr.bf16.mxu0 %v4032_v41 }
  0x27   :  { %2919 = vmatmul.mubr.msk.bf16.vlgmr.msra.gmra.mxu0 %vm304_vm0, %v4181_v14  ;;  %2920 = vmatmul.mubr.msk.bf16.vlgmr.msra.gmra.mxu1 %vm304_vm0, %v4181_v14 }
  0x28   :  { %3211 = vmatpush3.bf16.msra.mxu0 %v3976_v40  ;;  %3216 = vmatprep.mubr.msk.bf16.mxu0 %vm4033_vm1, %v4032_v41 }
  0x29   :  { %3212 = vmatprep.subr.bf16.mxu0 %v4032_v41 }
  0x2c   :  { %3213 = vmatpush3.bf16.msra.mxu0 %v3977_v42 }
  0x2d   :  { %3214 = vmatprep.subr.bf16.mxu0 %v4032_v41 }
  0x30   :  { %3215 = vmatpush3.bf16.msra.mxu0 %v3978_v43 }
  0x33   :  { %3217 = vmatmul.mubr.msk.bf16.vlgmr.msra.gmra.mxu0 %vm304_vm0, %v4181_v14 }
  0x89   :  { %v4285_v44 = vpop.permute.xlu0 %93 }
  0x8e   :  { %v4292_v50 = vpop.permute.xlu0 %98 }
  0xcf   :  { %v342_v46 = vpop.f32.mrf.mxu0  ;;  %v4287_v47 = vpop.f32.mrf.mxu1 }
  0xd0   :  { %v343_v49 = vadd.f32 %v342_v46, %v4285_v44 }
  0xd1   :  { %v4294_v51 = vpop.f32.mrf.mxu0  ;;  %v387_v52 = vpop.f32.mrf.mxu1 }
  0xd2   :  { %v633_v55 = vmul.f32 0.2, %v343_v49  ;;  %vm607_vm2 = vcmp.gt.f32.partialorder %v343_v49, 0.0  ;;  %v388_v62 = vadd.f32 %v387_v52, %v4285_v44 }
  0xd3   :  { %v346_v53 = vpop.f32.mrf.mxu0  ;;  %v4303_v58 = vpop.f32.mrf.mxu1 }
  0xd4   :  { %v347_v57 = vadd.f32 %v346_v53, %v4292_v50  ;;  %v659_v61 = vsel %vm607_vm2, %v343_v49, %v633_v55  ;;  %v636_v10 = vmul.f32 0.2, %v388_v62  ;;  %vm610_vm4 = vcmp.gt.f32.partialorder %v388_v62, 0.0 }
  0xd5   :  { %v391_v0 = vpop.f32.mrf.mxu1  ;;  %v4309_v1 = vpop.f32.mrf.mxu0  ;;  %v4315_v8 = vmul.f32 %v692_v60, %v659_v61 }
  0xd6   :  { %vm620_vm3 = vcmp.gt.f32.partialorder %v347_v57, 0.0  ;;  %v646_v59 = vmul.f32 0.2, %v347_v57  ;;  %v392_v4 = vadd.f32 %v391_v0, %v4292_v50  ;;  %v662_v25 = vsel %vm610_vm4, %v388_v62, %v636_v10  ;;  %v4351_v62 = vld [vmem:[%s5286_s1 + $0x8] sm:$0x1f]  ;;  %s4035_s1 = smov 82  }
  0xd7   :  { %v4338_v38 = vmul.f32 %v704_v16, %v662_v25  ;;  %v695_v10 = vsub.s32 1, %v4289_v48 }
  0xd8   :  { %v672_v63 = vsel %vm620_vm3, %v347_v57, %v646_v59  ;;  %v649_v19 = vmul.f32 0.2, %v392_v4  ;;  %vm623_vm6 = vcmp.gt.f32.partialorder %v392_v4, 0.0 }
  0xd9   :  { %v4317_v9 = vmul.f32 %v692_v60, %v672_v63 }
  0xda   :  { %v675_v34 = vsel %vm623_vm6, %v392_v4, %v649_v19 }
  0xdb   :  { %v428_v5 = vpop.f32.mrf.mxu0  ;;  %v471_v6 = vpop.f32.mrf.mxu1  ;;  %v984_v15 = vpack.c.bf16 %v4317_v9, %v4315_v8  ;;  %v4343_v46 = vmul.f32 %v704_v16, %v675_v34 }
  0xdc   :  { %v429_v11 = vadd.f32 %v428_v5, %v4285_v44  ;;  %v472_v12 = vadd.f32 %v471_v6, %v4285_v44  ;;  %v699_v5 = vsub.s32 2, %v4289_v48 }
  0xdd   :  { %v430_v13 = vpop.f32.mrf.mxu0  ;;  %v4321_v14 = vpop.f32.mrf.mxu1 }
  0xde   :  { %vm611_vm5 = vcmp.gt.f32.partialorder %v429_v11, 0.0  ;;  %v637_v17 = vmul.f32 0.2, %v429_v11  ;;  %v431_v21 = vadd.f32 %v430_v13, %v4285_v44  ;;  %v639_v29 = vmul.f32 0.2, %v472_v12 }
  0xdf   :  { %v432_v22 = vpop.f32.mrf.mxu0  ;;  %v475_v23 = vpop.f32.mrf.mxu1  ;;  %vm613_vm8 = vcmp.gt.f32.partialorder %v472_v12, 0.0  ;;  %v732_v19 = vrot.slane %v4351_v62, %v699_v5 }
  0xe0   :  { %v433_v26 = vadd.f32 %v432_v22, %v4292_v50  ;;  %v476_v27 = vadd.f32 %v475_v23, %v4292_v50  ;;  %v663_v28 = vsel %vm611_vm5, %v429_v11, %v637_v17  ;;  %vm612_vm7 = vcmp.gt.f32.partialorder %v431_v21, 0.0 }
  0xe1   :  { %v638_v30 = vmul.f32 0.2, %v431_v21  ;;  %v434_v31 = vpop.f32.mrf.mxu0  ;;  %v758_v39 = vmul.f32 %v708_v24, %v663_v28  ;;  %v665_v41 = vsel %vm613_vm8, %v472_v12, %v639_v29  ;;  %v4340_v43 = vpop.f32.mrf.mxu1  ;;  %v736_v29 = vrot.slane %v4351_v62, %v703_v2 }
  0xe2   :  { %vm624_vm9 = vcmp.gt.f32.partialorder %v433_v26, 0.0  ;;  %v650_v32 = vmul.f32 0.2, %v433_v26  ;;  %v652_v36 = vmul.f32 0.2, %v476_v27  ;;  %v435_v37 = vadd.f32 %v434_v31, %v4292_v50 }
  0xe3   :  { %v664_v35 = vsel %vm612_vm7, %v431_v21, %v638_v30  ;;  %vm626_vm10 = vcmp.gt.f32.partialorder %v476_v27, 0.0  ;;  %v3305_v45 = vpack.i.bf16 %v758_v39, %v4338_v38  ;;  %v4345_v60 = vmul.f32 %v716_v20, %v665_v41 }
  0xe4   :  { %v676_v40 = vsel %vm624_vm9, %v433_v26, %v650_v32  ;;  %vm625_vm11 = vcmp.gt.f32.partialorder %v435_v37, 0.0  ;;  %v651_v42 = vmul.f32 0.2, %v435_v37  ;;  %v759_v52 = vmul.f32 %v712_v33, %v664_v35 }
  0xe5   :  { %v771_v49 = vmul.f32 %v708_v24, %v676_v40  ;;  %v678_v53 = vsel %vm626_vm10, %v476_v27, %v652_v36  ;;  %3306 = vrot.lane.b32.xlu0 %v3305_v45, %s4034_s21 }
  0xe6   :  { %v677_v55 = vsel %vm625_vm11, %v435_v37, %v651_v42  ;;  %v4355_v6 = vmul.f32 %v716_v20, %v678_v53  ;;  %v3310_v11 = vpack.i.bf16 %v4345_v60, %v759_v52  ;;  %v728_v20 = vrot.slane %v4351_v62, %v695_v10 }
  0xe7   :  { %v514_v57 = vpop.f32.mrf.mxu0  ;;  %v557_v59 = vpop.f32.mrf.mxu1  ;;  %v3320_v63 = vpack.i.bf16 %v771_v49, %v4343_v46  ;;  %v772_v4 = vmul.f32 %v712_v33, %v677_v55  ;;  %v3315_v28 = vpack.i.bf16 %v759_v52, %v758_v39 }
  0xe8   :  { %v558_v61 = vadd.f32 %v557_v59, %v4285_v44  ;;  %v515_v2 = vadd.f32 %v514_v57, %v4285_v44 }
  0xe9   :  { %v516_v0 = vpop.f32.mrf.mxu0  ;;  %v559_v3 = vpop.f32.mrf.mxu1  ;;  %3321 = vrot.lane.b32.xlu1 %v3320_v63, %s4034_s21  ;;  %3311 = vrot.lane.b32.xlu0 %v3310_v11, %s4035_s1  ;;  %v3325_v22 = vpack.i.bf16 %v4355_v6, %v772_v4  ;;  %v3330_v36 = vpack.i.bf16 %v772_v4, %v771_v49  ;;  %v740_v49 = vrot.slane %v4351_v62, %v707_v7 }
  0xea   :  { %v643_v12 = vmul.f32 0.2, %v558_v61  ;;  %v517_v13 = vadd.f32 %v516_v0, %v4285_v44  ;;  %v560_v16 = vadd.f32 %v559_v3, %v4285_v44  ;;  %vm617_vm12 = vcmp.gt.f32.partialorder %v558_v61, 0.0 }
  0xeb   :  { %v4361_v17 = vpop.f32.mrf.mxu0  ;;  %v561_v18 = vpop.f32.mrf.mxu1  ;;  %v386_v11 = vadd.f32 %v4287_v47, %v4285_v44  ;;  %vm615_vm3 = vcmp.gt.f32.partialorder %v515_v2, 0.0  ;;  %v724_v7 = vrot.slane %v4351_v62, %v691_v54  ;;  %v345_v54 = vadd.f32 %v4294_v51, %v4285_v44 }
  0xec   :  { %v562_v21 = vadd.f32 %v561_v18, %v4292_v50  ;;  %vm616_vm13 = vcmp.gt.f32.partialorder %v517_v13, 0.0  ;;  %v642_v23 = vmul.f32 0.2, %v517_v13  ;;  %vm618_vm14 = vcmp.gt.f32.partialorder %v560_v16, 0.0 }
  0xed   :  { %v644_v24 = vmul.f32 0.2, %v560_v16  ;;  %v520_v25 = vpop.f32.mrf.mxu0  ;;  %v563_v26 = vpop.f32.mrf.mxu1  ;;  %3326 = vrot.lane.b32.xlu1 %v3325_v22, %s4035_s1  ;;  %v669_v30 = vsel %vm617_vm12, %v558_v61, %v643_v12  ;;  %3316 = vrot.lane.b32.xlu0 %v3315_v28, %s4036_s24  ;;  %v641_v12 = vmul.f32 0.2, %v515_v2  ;;  %vm609_vm5 = vcmp.gt.f32.partialorder %v386_v11, 0.0 }
  0xee   :  { %vm630_vm15 = vcmp.gt.f32.partialorder %v562_v21, 0.0  ;;  %v656_v27 = vmul.f32 0.2, %v562_v21  ;;  %v521_v32 = vadd.f32 %v520_v25, %v4292_v50  ;;  %v564_v33 = vadd.f32 %v563_v26, %v4292_v50 }
  0xef   :  { %v670_v31 = vsel %vm618_vm14, %v560_v16, %v644_v24  ;;  %v668_v34 = vsel %vm616_vm13, %v517_v13, %v642_v23  ;;  %v764_v40 = vmul.f32 %v732_v19, %v669_v30  ;;  %v635_v23 = vmul.f32 0.2, %v386_v11 }
  0xf0   :  { %v682_v35 = vsel %vm630_vm15, %v562_v21, %v656_v27  ;;  %vm629_vm0 = vcmp.gt.f32.partialorder %v521_v32, 0.0  ;;  %v655_v37 = vmul.f32 0.2, %v521_v32  ;;  %vm631_vm1 = vcmp.gt.f32.partialorder %v564_v33, 0.0 }
  0xf1   :  { %v657_v39 = vmul.f32 0.2, %v564_v33  ;;  %3331 = vrot.lane.b32.xlu1 %v3330_v36, %s4036_s24  ;;  %v765_v41 = vmul.f32 %v736_v29, %v670_v31  ;;  %v763_v42 = vmul.f32 %v728_v20, %v668_v34  ;;  %v777_v61 = vmul.f32 %v732_v19, %v682_v35 }
  0xf2   :  { %v681_v45 = vsel %vm629_vm0, %v521_v32, %v655_v37  ;;  %v474_v24 = vadd.f32 %v4321_v14, %v4285_v44  ;;  %v667_v25 = vsel %vm615_vm3, %v515_v2, %v641_v12  ;;  %v519_v62 = vadd.f32 %v4361_v17, %v4292_v50 }
  0xf3   :  { %v683_v52 = vsel %vm631_vm1, %v564_v33, %v657_v39  ;;  %v600_v53 = vpop.f32.mrf.mxu0  ;;  %v3335_v59 = vpack.i.bf16 %v765_v41, %v764_v40  ;;  %v4382_v3 = vmul.f32 %v728_v20, %v681_v45  ;;  %v3340_v19 = vpack.i.bf16 %v764_v40, %v763_v42 }
  0xf4   :  { %v601_v55 = vadd.f32 %v600_v53, %v4285_v44  ;;  %v778_v63 = vmul.f32 %v736_v29, %v683_v52  ;;  %v719_v28 = vsub.s32 7, %v4289_v48  ;;  %v762_v30 = vmul.f32 %v724_v7, %v667_v25 }
  0xf5   :  { %v3218_v0 = vpop.f32.mrf.mxu0  ;;  %3336 = vrot.lane.b32.xlu0 %v3335_v59, %s4037_s25  ;;  %v3350_v22 = vpack.i.bf16 %v777_v61, %v4382_v3  ;;  %v3355_v27 = vpack.i.bf16 %v4382_v3, %v763_v42  ;;  %v700_v31 = vrot.slane %v4300_v56, %v699_v5  ;;  %v661_v32 = vsel %vm609_vm5, %v386_v11, %v635_v23  ;;  %v1185_v23 = vld [vmem:[%s5290_s7 + $0x10] sm:$0xff] }
  0xf6   :  { %vm619_vm2 = vcmp.gt.f32.partialorder %v601_v55, 0.0  ;;  %v645_v4 = vmul.f32 0.2, %v601_v55  ;;  %v3345_v57 = vpack.i.bf16 %v778_v63, %v777_v61  ;;  %v640_v33 = vmul.f32 0.2, %v474_v24 }
  0xf7   :  { %v603_v13 = vpop.f32.mrf.mxu0  ;;  %vm614_vm6 = vcmp.gt.f32.partialorder %v474_v24, 0.0  ;;  %v3375_v44 = vpack.i.bf16 %v763_v42, %v762_v30  ;;  %v634_v51 = vmul.f32 0.2, %v345_v54  ;;  %v390_v17 = vadd.f32 %v4303_v58, %v4292_v50 }
  0xf8   :  { %v671_v16 = vsel %vm619_vm2, %v601_v55, %v645_v4  ;;  %v604_v18 = vadd.f32 %v603_v13, %v4292_v50  ;;  %3346 = vrot.lane.b32.xlu1 %v3345_v57, %s4037_s25  ;;  %v654_v34 = vmul.f32 0.2, %v519_v62  ;;  %v720_v35 = vrot.slane %v4300_v56, %v719_v28 }
  0xf9   :  { %v3219_v21 = vpop.f32.mrf.mxu0  ;;  %3341 = vrot.lane.b32.xlu0 %v3340_v19, %s4038_s2  ;;  %v766_v47 = vmul.f32 %v740_v49, %v671_v16  ;;  %vm608_vm7 = vcmp.gt.f32.partialorder %v345_v54, 0.0  ;;  %vm628_vm8 = vcmp.gt.f32.partialorder %v519_v62, 0.0  ;;  %v756_v5 = vmul.f32 %v700_v31, %v661_v32 }
  0xfa   :  { %vm632_vm4 = vcmp.gt.f32.partialorder %v604_v18, 0.0  ;;  %v658_v20 = vmul.f32 0.2, %v604_v18  ;;  %v666_v37 = vsel %vm614_vm6, %v474_v24, %v640_v33  ;;  %v696_v40 = vrot.slane %v4300_v56, %v695_v10  ;;  %v1001_v21 = vld [vmem:[%s5287_s5 + $0x8] sm:$0xff]  ;;  %v1155_v24 = vld [vmem:[%s5289_s6] sm:$0xff] }
  0xfb   :  { %v3360_v29 = vpack.i.bf16 %v766_v47, %v765_v41  ;;  %v3385_v39 = vpack.i.bf16 %v4338_v38, %v756_v5  ;;  %v660_v41 = vsel %vm608_vm7, %v345_v54, %v634_v51  ;;  %v648_v58 = vmul.f32 0.2, %v390_v17  ;;  %v1158_v47 = vld [vmem:[%s5289_s6 + $0x18] sm:$0xff] }
  0xfc   :  { %v684_v26 = vsel %vm632_vm4, %v604_v18, %v658_v20  ;;  %3351 = vrot.lane.b32.xlu1 %v3350_v22, %s4038_s2  ;;  %v478_v2 = vadd.f32 %v4340_v43, %v4292_v50  ;;  %v680_v42 = vsel %vm628_vm8, %v519_v62, %v654_v34  ;;  %vm622_vm9 = vcmp.gt.f32.partialorder %v390_v17, 0.0  ;;  %v1003_v18 = vld [vmem:[%s5287_s5 + $0x18] sm:$0xff]  ;;  %v1002_v20 = vld [vmem:[%s5287_s5 + $0x10] sm:$0xff]  ;;  %v1000_v22 = vld [vmem:[%s5287_s5] sm:$0xff]  ;;  %s4059_s5 = smov 110  }
  0xfd   :  { %3356 = vrot.lane.b32.xlu0 %v3355_v27, %s4039_s26  ;;  %v779_v14 = vmul.f32 %v740_v49, %v684_v26  ;;  %v3370_v45 = vpack.i.bf16 %v4343_v46, %v4338_v38  ;;  %v761_v52 = vmul.f32 %v720_v35, %v666_v37  ;;  %v349_v53 = vadd.f32 %v4309_v1, %v4292_v50 }
  0xfe   :  { %v775_v10 = vmul.f32 %v724_v7, %v680_v42  ;;  %v755_v55 = vmul.f32 %v696_v40, %v660_v41  ;;  %v674_v59 = vsel %vm622_vm9, %v390_v17, %v648_v58  ;;  %v653_v61 = vmul.f32 0.2, %v478_v2  ;;  %v1186_v7 = vld [vmem:[%s5290_s7 + $0x18] sm:$0xff] }
  0xff   :  { %v3365_v36 = vpack.i.bf16 %v779_v14, %v778_v63  ;;  %v3395_v56 = vpack.i.bf16 %v762_v30, %v761_v52  ;;  %vm627_vm10 = vcmp.gt.f32.partialorder %v478_v2, 0.0  ;;  %v647_v63 = vmul.f32 0.2, %v349_v53 }
 0x100   :  { %3361 = vrot.lane.b32.xlu1 %v3360_v29, %s4040_s27  ;;  %v3380_v43 = vpack.i.bf16 %v4382_v3, %v775_v10  ;;  %vm621_vm11 = vcmp.gt.f32.partialorder %v349_v53, 0.0  ;;  %v3405_v38 = vpack.i.bf16 %v756_v5, %v755_v55  ;;  %v769_v0 = vmul.f32 %v700_v31, %v674_v59 }
 0x101   :  { %3376 = vrot.lane.b32.xlu0 %v3375_v44, %s4041_s28  ;;  %v679_v50 = vsel %vm627_vm10, %v478_v2, %v653_v61  ;;  %v673_v49 = vsel %vm621_vm11, %v349_v53, %v647_v63  ;;  %v3415_v4 = vpack.i.bf16 %v761_v52, %v4345_v60  ;;  %v3425_v12 = vpack.i.bf16 %v755_v55, %v4315_v8 }
 0x102   :  { %v3390_v1 = vpack.i.bf16 %v4343_v46, %v769_v0  ;;  %v774_v57 = vmul.f32 %v720_v35, %v679_v50  ;;  %v768_v3 = vmul.f32 %v696_v40, %v673_v49  ;;  %v3435_v16 = vpack.i.bf16 %v4355_v6, %v4345_v60  ;;  %v3981_v60 = vld [vmem:[%s5288_s4 + $0x4] ss:$8 sps:$4 sm:$0xff]  }
 0x103   :  { %1076 = vmatprep.mubr.bf16.mxu1 %v3981_v60  ;;  %vm873_vm12 = vcmask 670720   ;;  %vm858_vm13 = vcmask 424960   ;;  %vm975_vm14 = vcmask 539648   ;;  %vm960_vm15 = vcmask 293888  }
 0x104   :  { %3366 = vrot.lane.b32.xlu1 %v3365_v36, %s4040_s27  ;;  %v3400_v11 = vpack.i.bf16 %v775_v10, %v774_v57  ;;  %v3410_v13 = vpack.i.bf16 %v769_v0, %v768_v3  ;;  %v3420_v46 = vpack.i.bf16 %v774_v57, %v4355_v6  ;;  %v3430_v19 = vpack.i.bf16 %v768_v3, %v4317_v9  ;;  %v1157_v6 = vld [vmem:[%s5289_s6 + $0x10] sm:$0xff] }
 0x105   :  { %3386 = vrot.lane.b32.xlu0 %v3385_v39, %s4042_s29  ;;  %vm945_vm0 = vcmask 48128   ;;  %vm843_vm1 = vcmask 179200   ;;  %vm924_vm2 = vcmask 605184   ;;  %vm822_vm3 = vcmask 736256  }
 0x106   :  { %vm909_vm4 = vcmask 359424   ;;  %vm807_vm5 = vcmask 490496   ;;  %vm894_vm6 = vcmask 113664   ;;  %vm792_vm7 = vcmask 244736  }
 0x107   :  { %vm1093_vm8 = vcmask 801792  }
 0x108   :  { %3371 = vrot.lane.b32.xlu1 %v3370_v45, %s4043_s30 }
 0x109   :  { %3396 = vrot.lane.b32.xlu0 %v3395_v56, %s4044_s14 }
 0x10c   :  { %3381 = vrot.lane.b32.xlu1 %v3380_v43, %s4041_s28  ;;  %s4051_s28 = smov 106  }
 0x10d   :  { %3406 = vrot.lane.b32.xlu0 %v3405_v38, %s4045_s15 }
 0x110   :  { %3391 = vrot.lane.b32.xlu1 %v3390_v1, %s4042_s29  ;;  %s4052_s29 = smov 98  }
 0x111   :  { %3416 = vrot.lane.b32.xlu0 %v3415_v4, %s4046_s16 }
 0x114   :  { %3401 = vrot.lane.b32.xlu1 %v3400_v11, %s4044_s14  ;;  %s4053_s14 = smov 124  }
 0x115   :  { %3426 = vrot.lane.b32.xlu0 %v3425_v12, %s4047_s17 }
 0x118   :  { %3411 = vrot.lane.b32.xlu1 %v3410_v13, %s4045_s15  ;;  %s4054_s15 = smov 116  }
 0x119   :  { %3436 = vrot.lane.b32.xlu0 %v3435_v16, %s4048_s3 }
 0x11c   :  { %3421 = vrot.lane.b32.xlu1 %v3420_v46, %s4046_s16  ;;  %s4055_s16 = smov 108  }
 0x11d   :  { %1021 = vperm.xlu0 %3304, %v1003_v18  }
 0x120   :  { %3431 = vrot.lane.b32.xlu1 %v3430_v19, %s4047_s17  ;;  %s4056_s17 = smov 100  }
 0x121   :  { %1011 = vperm.xlu0 %3304, %v1001_v21  }
 0x124   :  { %1016 = vperm.xlu1 %3440, %v1002_v20  }
 0x125   :  { %1171 = vperm.xlu0 %3304, %v1157_v6  }
 0x128   :  { %1006 = vperm.xlu1 %3440, %v1000_v22  }
 0x129   :  { %1204 = vperm.xlu0 %3304, %v1186_v7  }
 0x12c   :  { %1176 = vperm.xlu1 %3440, %v1158_v47  }
 0x130   :  { %1199 = vperm.xlu1 %3440, %v1185_v23  }
 0x134   :  { %1161 = vperm.xlu1 %3440, %v1155_v24  }
 0x157   :  { %v4458_v25 = vpop.permute.xlu0 %3306 }
 0x158   :  { %v3309_v18 = vunpack.i.h.bf16 %v4458_v25  ;;  %v3308_v19 = vunpack.i.l.bf16 %v4458_v25 }
 0x15b   :  { %v4460_v26 = vpop.permute.xlu1 %3321  ;;  %v3312_v27 = vpop.permute.xlu0 %3311 }
 0x15c   :  { %v3314_v37 = vunpack.i.h.bf16 %v3312_v27  ;;  %v3313_v39 = vunpack.i.l.bf16 %v3312_v27  ;;  %v3324_v3 = vunpack.i.h.bf16 %v4460_v26  ;;  %v3323_v12 = vunpack.i.l.bf16 %v4460_v26 }
 0x15d   :  { %v844_v27 = vsel %vm843_vm1, %v3308_v19, %v3309_v18 }
 0x15e   :  { %v874_v63 = vsel %vm873_vm12, %v3313_v39, %v3314_v37  ;;  %v845_v22 = vsel %vm843_vm1, %v3323_v12, %v3324_v3 }
 0x15f   :  { %v3327_v54 = vpop.permute.xlu1 %3326  ;;  %v3317_v62 = vpop.permute.xlu0 %3316 }
 0x160   :  { %v3329_v44 = vunpack.i.h.bf16 %v3327_v54  ;;  %v3328_v51 = vunpack.i.l.bf16 %v3327_v54  ;;  %v3319_v38 = vunpack.i.h.bf16 %v3317_v62  ;;  %v3318_v0 = vunpack.i.l.bf16 %v3317_v62 }
 0x162   :  { %v875_v45 = vsel %vm873_vm12, %v3328_v51, %v3329_v44  ;;  %v859_v60 = vsel %vm858_vm13, %v3318_v0, %v3319_v38 }
 0x163   :  { %v3332_v28 = vpop.permute.xlu1 %3331  ;;  %v991_v57 = vpack.c.bf16 %v875_v45, %v874_v63 }
 0x164   :  { %v3334_v52 = vunpack.i.h.bf16 %v3332_v28  ;;  %v3333_v53 = vunpack.i.l.bf16 %v3332_v28 }
 0x166   :  { %v860_v13 = vsel %vm858_vm13, %v3333_v53, %v3334_v52  ;;  %vm2083_vm13 = vcmask 261120  }
 0x167   :  { %v3337_v29 = vpop.permute.xlu0 %3336  ;;  %v990_v7 = vpack.c.bf16 %v860_v13, %v859_v60 }
 0x168   :  { %v3339_v41 = vunpack.i.h.bf16 %v3337_v29  ;;  %v3338_v58 = vunpack.i.l.bf16 %v3337_v29 }
 0x16a   :  { %v3347_v30 = vpop.permute.xlu1 %3346  ;;  %v961_v11 = vsel %vm960_vm15, %v3338_v58, %v3339_v41 }
 0x16b   :  { %v3342_v14 = vpop.permute.xlu0 %3341  ;;  %v3349_v17 = vunpack.i.h.bf16 %v3347_v30  ;;  %v3348_v34 = vunpack.i.l.bf16 %v3347_v30 }
 0x16c   :  { %v3344_v49 = vunpack.i.h.bf16 %v3342_v14  ;;  %v3343_v4 = vunpack.i.l.bf16 %v3342_v14 }
 0x16d   :  { %v962_v10 = vsel %vm960_vm15, %v3348_v34, %v3349_v17  ;;  %vm2765_vm15 = vcmask 523264  }
 0x16e   :  { %v3352_v31 = vpop.permute.xlu1 %3351  ;;  %v998_v46 = vpack.c.bf16 %v962_v10, %v961_v11  ;;  %v946_v20 = vsel %vm945_vm0, %v3343_v4, %v3344_v49 }
 0x16f   :  { %v4462_v32 = vpop.permute.xlu0 %3356  ;;  %v3354_v55 = vunpack.i.h.bf16 %v3352_v31  ;;  %v3353_v59 = vunpack.i.l.bf16 %v3352_v31  ;;  %v989_v31 = vpack.c.bf16 %v845_v22, %v844_v27  ;;  %v3982_v27 = vld [vmem:[%s5288_s4 + $0x14] ss:$8 sps:$4 sm:$0xff]  }
 0x170   :  { %v3359_v47 = vunpack.i.h.bf16 %v4462_v32  ;;  %v3358_v23 = vunpack.i.l.bf16 %v4462_v32 }
 0x171   :  { %v947_v21 = vsel %vm945_vm0, %v3353_v59, %v3354_v55 }
 0x172   :  { %v3362_v33 = vpop.permute.xlu1 %3361  ;;  %v997_v26 = vpack.c.bf16 %v947_v21, %v946_v20  ;;  %v996_v32 = vpack.c.bf16 %v3359_v47, %v3358_v23 }
 0x173   :  { %v4464_v35 = vpop.permute.xlu0 %3376  ;;  %v3364_v36 = vunpack.i.h.bf16 %v3362_v33  ;;  %v3363_v5 = vunpack.i.l.bf16 %v3362_v33 }
 0x174   :  { %v3379_v62 = vunpack.i.h.bf16 %v4464_v35  ;;  %v3378_v28 = vunpack.i.l.bf16 %v4464_v35 }
 0x175   :  { %v976_v61 = vsel %vm975_vm14, %v3363_v5, %v3364_v36 }
 0x176   :  { %v3367_v40 = vpop.permute.xlu1 %3366  ;;  %v925_v35 = vsel %vm924_vm2, %v3378_v28, %v3379_v62 }
 0x177   :  { %v3369_v2 = vunpack.i.h.bf16 %v3367_v40  ;;  %v3368_v42 = vunpack.i.l.bf16 %v3367_v40  ;;  %v4467_v56 = vpop.permute.xlu0 %3386 }
 0x178   :  { %v3389_v34 = vunpack.i.h.bf16 %v4467_v56  ;;  %v3388_v36 = vunpack.i.l.bf16 %v4467_v56 }
 0x179   :  { %v977_v43 = vsel %vm975_vm14, %v3368_v42, %v3369_v2  ;;  %vm2574_vm14 = vcmask 15360  }
 0x17a   :  { %v3372_v50 = vpop.permute.xlu1 %3371  ;;  %v999_v1 = vpack.c.bf16 %v977_v43, %v976_v61  ;;  %v823_v56 = vsel %vm822_vm3, %v3388_v36, %v3389_v34 }
 0x17b   :  { %v4477_v16 = vpop.permute.xlu0 %3396  ;;  %v3374_v29 = vunpack.i.h.bf16 %v3372_v50  ;;  %v3373_v30 = vunpack.i.l.bf16 %v3372_v50 }
 0x17c   :  { %2986 = vmatprep.subr.bf16.mxu1 %v999_v1  ;;  %v3399_v39 = vunpack.i.h.bf16 %v4477_v16  ;;  %v3398_v40 = vunpack.i.l.bf16 %v4477_v16 }
 0x17d   :  { %2987 = vmatpush3.bf16.msra.mxu1 %v991_v57  ;;  %v988_v5 = vpack.c.bf16 %v3374_v29, %v3373_v30 }
 0x17e   :  { %v3382_v6 = vpop.permute.xlu1 %3381  ;;  %2988 = vmatprep.subr.bf16.mxu1 %v998_v46  ;;  %v910_v63 = vsel %vm909_vm4, %v3398_v40, %v3399_v39 }
 0x17f   :  { %v3407_v24 = vpop.permute.xlu0 %3406  ;;  %v3384_v25 = vunpack.i.h.bf16 %v3382_v6  ;;  %v3383_v54 = vunpack.i.l.bf16 %v3382_v6 }
 0x180   :  { %v3409_v45 = vunpack.i.h.bf16 %v3407_v24  ;;  %v3408_v52 = vunpack.i.l.bf16 %v3407_v24 }
 0x181   :  { %2989 = vmatpush3.bf16.msra.mxu1 %v990_v7  ;;  %v926_v17 = vsel %vm924_vm2, %v3383_v54, %v3384_v25  ;;  %v3984_v25 = vld [vmem:[%s5288_s4 + $0x10] ss:$8 sps:$4 sm:$0xff]  }
 0x182   :  { %v3392_v14 = vpop.permute.xlu1 %3391  ;;  %2990 = vmatprep.subr.bf16.mxu1 %v997_v26  ;;  %v995_v42 = vpack.c.bf16 %v926_v17, %v925_v35  ;;  %v808_v0 = vsel %vm807_vm5, %v3408_v52, %v3409_v45  ;;  %v3979_v26 = vld [vmem:[%s5288_s4] ss:$8 sps:$4 sm:$0xff]  }
 0x183   :  { %v3394_v33 = vunpack.i.h.bf16 %v3392_v14  ;;  %v3393_v44 = vunpack.i.l.bf16 %v3392_v14  ;;  %v3417_v51 = vpop.permute.xlu0 %3416 }
 0x184   :  { %v3419_v50 = vunpack.i.h.bf16 %v3417_v51  ;;  %v3418_v1 = vunpack.i.l.bf16 %v3417_v51 }
 0x185   :  { %2991 = vmatpush3.bf16.msra.mxu1 %v989_v31  ;;  %v824_v2 = vsel %vm822_vm3, %v3393_v44, %v3394_v33 }
 0x186   :  { %v3402_v37 = vpop.permute.xlu1 %3401  ;;  %2992 = vmatprep.subr.bf16.mxu1 %v996_v32  ;;  %v987_v43 = vpack.c.bf16 %v824_v2, %v823_v56  ;;  %v895_v46 = vsel %vm894_vm6, %v3418_v1, %v3419_v50 }
 0x187   :  { %v3404_v41 = vunpack.i.h.bf16 %v3402_v37  ;;  %v3403_v58 = vunpack.i.l.bf16 %v3402_v37  ;;  %v3427_v10 = vpop.permute.xlu0 %3426 }
 0x188   :  { %v3429_v13 = vunpack.i.h.bf16 %v3427_v10  ;;  %v3428_v16 = vunpack.i.l.bf16 %v3427_v10  ;;  %v1183_v10 = vld [vmem:[%s5290_s7] sm:$0xff] }
 0x189   :  { %2993 = vmatpush3.bf16.msra.mxu1 %v988_v5  ;;  %v911_v53 = vsel %vm909_vm4, %v3403_v58, %v3404_v41 }
 0x18a   :  { %2994 = vmatprep.subr.bf16.mxu1 %v995_v42  ;;  %v3412_v55 = vpop.permute.xlu1 %3411  ;;  %v994_v38 = vpack.c.bf16 %v911_v53, %v910_v63  ;;  %v793_v22 = vsel %vm792_vm7, %v3428_v16, %v3429_v13 }
 0x18b   :  { %v3414_v59 = vunpack.i.h.bf16 %v3412_v55  ;;  %v3413_v61 = vunpack.i.l.bf16 %v3412_v55  ;;  %v3437_v12 = vpop.permute.xlu0 %3436  ;;  %v1156_v55 = vld [vmem:[%s5289_s6 + $0x8] sm:$0xff]  ;;  %s4049_s6 = smov 122  }
 0x18c   :  { %v3439_v60 = vunpack.i.h.bf16 %v3437_v12  ;;  %v3438_v6 = vunpack.i.l.bf16 %v3437_v12 }
 0x18d   :  { %v809_v49 = vsel %vm807_vm5, %v3413_v61, %v3414_v59  ;;  %2995 = vmatpush3.bf16.msra.mxu1 %v987_v43  ;;  %v1184_v59 = vld [vmem:[%s5290_s7 + $0x8] sm:$0xff]  ;;  %s4050_s7 = smov 114  }
 0x18e   :  { %2996 = vmatprep.subr.bf16.mxu1 %v994_v38  ;;  %v3422_v4 = vpop.permute.xlu1 %3421  ;;  %v986_v57 = vpack.c.bf16 %v809_v49, %v808_v0  ;;  %v992_v24 = vpack.c.bf16 %v3439_v60, %v3438_v6 }
 0x18f   :  { %v3424_v11 = vunpack.i.h.bf16 %v3422_v4  ;;  %v3423_v3 = vunpack.i.l.bf16 %v3422_v4 }
 0x191   :  { %2997 = vmatpush3.bf16.msra.mxu1 %v986_v57  ;;  %v896_v18 = vsel %vm894_vm6, %v3423_v3, %v3424_v11 }
 0x192   :  { %v3432_v19 = vpop.permute.xlu1 %3431  ;;  %v993_v21 = vpack.c.bf16 %v896_v18, %v895_v46 }
 0x193   :  { %v3434_v7 = vunpack.i.h.bf16 %v3432_v19  ;;  %v3433_v20 = vunpack.i.l.bf16 %v3432_v19 }
 0x194   :  { %2998 = vmatprep.subr.bf16.mxu1 %v993_v21 }
 0x195   :  { %v794_v47 = vsel %vm792_vm7, %v3433_v20, %v3434_v7 }
 0x196   :  { %v985_v23 = vpack.c.bf16 %v794_v47, %v793_v22 }
 0x198   :  { %2999 = vmatpush3.bf16.msra.mxu1 %v985_v23  ;;  %v1022_v28 = vpop.permute.xlu0 %1021 }
 0x199   :  { %3000 = vmatprep.subr.bf16.mxu1 %v992_v24 }
 0x19c   :  { %3001 = vmatpush3.bf16.msra.mxu1 %v984_v15  ;;  %v1012_v51 = vpop.permute.xlu0 %1011 }
 0x19f   :  { %1077 = vmatmul.mubr.bf16.vlgmr.msra.gmra.mxu1 %v3979_v26  ;;  %v1017_v54 = vpop.permute.xlu1 %1016 }
 0x1a0   :  { %1084 = vmatprep.mubr.bf16.mxu1 %v3982_v27  ;;  %v4545_v38 = vpop.permute.xlu0 %1171 }
 0x1a3   :  { %v1007_v14 = vpop.permute.xlu1 %1006 }
 0x1a4   :  { %v4549_v50 = vpop.permute.xlu0 %1204 }
 0x1a7   :  { %1085 = vmatmul.mubr.bf16.gmra.mxu1 %v3984_v25  ;;  %v4543_v63 = vpop.permute.xlu1 %1176 }
 0x1ab   :  { %v4547_v0 = vpop.permute.xlu1 %1199 }
 0x1af   :  { %v1162_v1 = vpop.permute.xlu1 %1161 }
 0x25f   :  { %v3002_v62 = vpop.f32.mrf.mxu1 }
 0x261   :  { %v3003_v29 = vpop.f32.mrf.mxu1 }
 0x262   :  { %v3004_v30 = vadd.f32 %v3003_v29, %v3002_v62 }
 0x263   :  { %v3005_v31 = vpop.f32.mrf.mxu1 }
 0x264   :  { %v4506_v8 = vadd.f32 %v3004_v30, %v1007_v14 }
 0x265   :  { %v3006_v9 = vpop.f32.mrf.mxu1 }
 0x266   :  { %v3007_v15 = vadd.f32 %v3006_v9, %v3005_v31  ;;  %v1094_v33 = vsel %vm1093_vm8, %v4506_v8, 0.0  ;;  %v1106_v44 = vmul.f32 %v4506_v8, %v4506_v8 }
 0x267   :  { %v3008_v32 = vpop.f32.mrf.mxu1  ;;  %1095 = vadd.xlane.f32.xlu0 %v1094_v33 }
 0x268   :  { %v4512_v17 = vadd.f32 %v3007_v15, %v1012_v51  ;;  %v1110_v37 = vsel %vm1093_vm8, %v1106_v44, 0.0 }
 0x269   :  { %v3009_v34 = vpop.f32.mrf.mxu1 }
 0x26a   :  { %v3010_v36 = vadd.f32 %v3009_v34, %v3008_v32  ;;  %v1097_v5 = vsel %vm1093_vm8, %v4512_v17, 0.0  ;;  %v1107_v35 = vmul.f32 %v4512_v17, %v4512_v17 }
 0x26b   :  { %v3011_v39 = vpop.f32.mrf.mxu1  ;;  %1098 = vadd.xlane.f32.xlu1 %v1097_v5  ;;  %1111 = vadd.xlane.f32.xlu0 %v1110_v37 }
 0x26c   :  { %v4519_v40 = vadd.f32 %v3010_v36, %v1017_v54  ;;  %v1113_v2 = vsel %vm1093_vm8, %v1107_v35, 0.0 }
 0x26d   :  { %v3012_v41 = vpop.f32.mrf.mxu1 }
 0x26e   :  { %v3013_v58 = vadd.f32 %v3012_v41, %v3011_v39  ;;  %v1108_v42 = vmul.f32 %v4519_v40, %v4519_v40  ;;  %v1100_v53 = vsel %vm1093_vm8, %v4519_v40, 0.0 }
 0x26f   :  { %1114 = vadd.xlane.f32.xlu1 %v1113_v2 }
 0x270   :  { %v4524_v45 = vadd.f32 %v3013_v58, %v1022_v28  ;;  %v1116_v52 = vsel %vm1093_vm8, %v1108_v42, 0.0 }
 0x271   :  { %1117 = vadd.xlane.f32.xlu0 %v1116_v52 }
 0x272   :  { %v1103_v56 = vsel %vm1093_vm8, %v4524_v45, 0.0  ;;  %v1109_v61 = vmul.f32 %v4524_v45, %v4524_v45 }
 0x273   :  { %1101 = vadd.xlane.f32.xlu1 %v1100_v53 }
 0x274   :  { %v1119_v43 = vsel %vm1093_vm8, %v1109_v61, 0.0 }
 0x275   :  { %1104 = vadd.xlane.f32.xlu0 %v1103_v56 }
 0x284   :  { %1189 = vperm.xlu1 %3440, %v1183_v10  }
 0x28b   :  { %1166 = vperm.xlu0 %3304, %v1156_v55  }
 0x28f   :  { %1194 = vperm.xlu0 %3304, %v1184_v59  }
 0x2a8   :  { %1120 = vadd.xlane.f32.xlu1 %v1119_v43 }
 0x2f0   :  { %v1096_v49 = vpop.xlane.xlu0 %1095 }
 0x2f1   :  { %v1123_v4 = vmul.f32 0.010204081, %v1096_v49 }
 0x2f3   :  { %v1131_v3 = vmul.f32 %v1123_v4, %v1123_v4  ;;  %v1147_v47 = vsub.f32 %v4506_v8, %v1123_v4 }
 0x2f4   :  { %v1099_v57 = vpop.xlane.xlu1 %1098  ;;  %v1112_v11 = vpop.xlane.xlu0 %1111 }
 0x2f5   :  { %v1124_v12 = vmul.f32 0.010204081, %v1099_v57  ;;  %v1127_v13 = vmul.f32 0.010204081, %v1112_v11 }
 0x2f7   :  { %v1135_v16 = vsub.f32 %v1127_v13, %v1131_v3  ;;  %v1132_v18 = vmul.f32 %v1124_v12, %v1124_v12  ;;  %v1148_v27 = vsub.f32 %v4512_v17, %v1124_v12 }
 0x2f8   :  { %v1115_v46 = vpop.xlane.xlu1 %1114 }
 0x2f9   :  { %v1139_v19 = vadd.f32 1e-05, %v1135_v16  ;;  %v1128_v21 = vmul.f32 0.010204081, %v1115_v46 }
 0x2fa   :  { %v1118_v7 = vpop.xlane.xlu0 %1117 }
 0x2fb   :  { %4023 = vrsqrt.f32 %v1139_v19  ;;  %v1136_v60 = vsub.f32 %v1128_v21, %v1132_v18  ;;  %v1129_v34 = vmul.f32 0.010204081, %v1118_v7 }
 0x2fc   :  { %v1102_v20 = vpop.xlane.xlu1 %1101 }
 0x2fd   :  { %v1140_v6 = vadd.f32 1e-05, %v1136_v60  ;;  %v1125_v32 = vmul.f32 0.010204081, %v1102_v20 }
 0x2fe   :  { %v1105_v22 = vpop.xlane.xlu0 %1104 }
 0x2ff   :  { %4025 = vrsqrt.f32 %v1140_v6  ;;  %v1133_v17 = vmul.f32 %v1125_v32, %v1125_v32  ;;  %v1126_v37 = vmul.f32 0.010204081, %v1105_v22  ;;  %v1149_v52 = vsub.f32 %v4519_v40, %v1125_v32 }
 0x300   :  { %v1190_v62 = vpop.permute.xlu1 %1189 }
 0x301   :  { %v1137_v36 = vsub.f32 %v1129_v34, %v1133_v17  ;;  %v1134_v39 = vmul.f32 %v1126_v37, %v1126_v37  ;;  %v1150_v10 = vsub.f32 %v4524_v45, %v1126_v37 }
 0x303   :  { %v1141_v5 = vadd.f32 1e-05, %v1137_v36 }
 0x305   :  { %4027 = vrsqrt.f32 %v1141_v5 }
 0x306   :  { %v1167_v26 = vpop.permute.xlu0 %1166 }
 0x308   :  { %v4024_v23 = vpop.eup %4023 }
 0x309   :  { %v1151_v24 = vmul.f32 %v4024_v23, %v1147_v47 }
 0x30a   :  { %v1195_v14 = vpop.permute.xlu0 %1194 }
 0x30b   :  { %v1179_v25 = vmul.f32 %v1162_v1, %v1151_v24 }
 0x30c   :  { %v4026_v54 = vpop.eup %4025 }
 0x30d   :  { %v1207_v28 = vadd.f32 %v1190_v62, %v1179_v25  ;;  %v1152_v29 = vmul.f32 %v4026_v54, %v1148_v27 }
 0x30f   :  { %v1180_v30 = vmul.f32 %v1167_v26, %v1152_v29  ;;  %v1215_v31 = vmul.f32 0.2, %v1207_v28  ;;  %vm1211_vm9 = vcmp.gt.f32.partialorder %v1207_v28, 0.0 }
 0x311   :  { %v1208_v9 = vadd.f32 %v1195_v14, %v1180_v30  ;;  %v4553_v33 = vsel %vm1211_vm9, %v1207_v28, %v1215_v31 }
 0x312   :  { %v4028_v42 = vpop.eup %4027 }
 0x313   :  { %vm1212_vm10 = vcmp.gt.f32.partialorder %v1208_v9, 0.0  ;;  %v1216_v15 = vmul.f32 0.2, %v1208_v9  ;;  %v1153_v53 = vmul.f32 %v4028_v42, %v1149_v52 }
 0x315   :  { %v4555_v8 = vsel %vm1212_vm10, %v1208_v9, %v1216_v15  ;;  %v1181_v56 = vmul.f32 %v4545_v38, %v1153_v53 }
 0x316   :  { %v4559_v44 = vpack.i.bf16 %v4555_v8, %v4553_v33  ;;  %v1831_v51 = vpack.c.bf16 %v4555_v8, %v4553_v33  ;;  %v3988_v33 = vld [vmem:[%s5291_s8 + $0x8] ss:$52 sps:$4 sm:$0xff]  }
 0x317   :  { %v1209_v59 = vadd.f32 %v4547_v0, %v1181_v56  ;;  %v3990_v0 = vld [vmem:[%s5291_s8 + $0xc] ss:$52 sps:$4 sm:$0xff]   ;;  %v3994_v8 = vld [vmem:[%s5291_s8 + $0x74] ss:$52 sps:$4 sm:$0xff]  }
 0x318   :  { %3447 = vrot.lane.b32.xlu0 %v4559_v44, %s4049_s6  ;;  %3442 = vrot.lane.b32.xlu1 %v4559_v44, %s4050_s7 }
 0x319   :  { %v1217_v1 = vmul.f32 0.2, %v1209_v59  ;;  %vm1213_vm11 = vcmp.gt.f32.partialorder %v1209_v59, 0.0  ;;  %2171 = vmatprep.mubr.bf16.mxu1 %v3990_v0 }
 0x31b   :  { %v4601_v57 = vsel %vm1213_vm11, %v1209_v59, %v1217_v1 }
 0x31c   :  { %3457 = vrot.lane.b32.xlu0 %v4559_v44, %s4051_s28  ;;  %3452 = vrot.lane.b32.xlu1 %v4559_v44, %s4052_s29 }
 0x320   :  { %3467 = vrot.lane.b32.xlu0 %v4559_v44, %s4053_s14  ;;  %3462 = vrot.lane.b32.xlu1 %v4559_v44, %s4054_s15 }
 0x324   :  { %3477 = vrot.lane.b32.xlu0 %v4559_v44, %s4055_s16  ;;  %3472 = vrot.lane.b32.xlu1 %v4559_v44, %s4056_s17 }
 0x328   :  { %3487 = vrot.lane.b32.xlu0 %v4559_v44, %s4057_s18  ;;  %3482 = vrot.lane.b32.xlu1 %v4559_v44, %s4058_s19 }
 0x32c   :  { %3497 = vrot.lane.b32.xlu0 %v4559_v44, %s4059_s5  ;;  %3492 = vrot.lane.b32.xlu1 %v4559_v44, %s4060_s0 }
 0x330   :  { %3502 = vrot.lane.b32.xlu0 %v4559_v44, %s4043_s30  ;;  %3507 = vrot.lane.b32.xlu1 %v4559_v44, %s4039_s26 }
 0x331   :  { %v1121_v35 = vpop.xlane.xlu1 %1120 }
 0x332   :  { %v1130_v41 = vmul.f32 0.010204081, %v1121_v35 }
 0x334   :  { %v1138_v58 = vsub.f32 %v1130_v41, %v1134_v39  ;;  %3512 = vrot.lane.b32.xlu0 %v4559_v44, %s4048_s3 }
 0x336   :  { %v1142_v2 = vadd.f32 1e-05, %v1138_v58 }
 0x338   :  { %4029 = vrsqrt.f32 %v1142_v2  ;;  %3517 = vrot.lane.b32.xlu0 %v4559_v44, %s4061_s20 }
 0x345   :  { %v4030_v55 = vpop.eup %4029 }
 0x346   :  { %v1154_v61 = vmul.f32 %v4030_v55, %v1150_v10 }
 0x348   :  { %v1182_v43 = vmul.f32 %v4543_v63, %v1154_v61  ;;  %v3987_v63 = vld [vmem:[%s5291_s8 + $0x4] ss:$52 sps:$4 sm:$0xff]  }
 0x349   :  { %2122 = vmatprep.mubr.bf16.mxu0 %v3987_v63 }
 0x34a   :  { %v1210_v49 = vadd.f32 %v4549_v50, %v1182_v43 }
 0x34c   :  { %vm1214_vm12 = vcmp.gt.f32.partialorder %v1210_v49, 0.0  ;;  %v1218_v4 = vmul.f32 0.2, %v1210_v49 }
 0x34e   :  { %v4603_v40 = vsel %vm1214_vm12, %v1210_v49, %v1218_v4 }
 0x34f   :  { %v4607_v38 = vpack.i.bf16 %v4603_v40, %v4601_v57  ;;  %v1832_v45 = vpack.c.bf16 %v4603_v40, %v4601_v57  ;;  %v3991_v40 = vld [vmem:[%s5291_s8 + $0x6c] ss:$52 sps:$4 sm:$0xff]  }
 0x351   :  { %3527 = vrot.lane.b32.xlu0 %v4607_v38, %s4049_s6  ;;  %3522 = vrot.lane.b32.xlu1 %v4607_v38, %s4050_s7 }
 0x355   :  { %3537 = vrot.lane.b32.xlu0 %v4607_v38, %s4051_s28  ;;  %3532 = vrot.lane.b32.xlu1 %v4607_v38, %s4052_s29 }
 0x359   :  { %3547 = vrot.lane.b32.xlu0 %v4607_v38, %s4053_s14  ;;  %3542 = vrot.lane.b32.xlu1 %v4607_v38, %s4054_s15 }
 0x35d   :  { %3557 = vrot.lane.b32.xlu0 %v4607_v38, %s4055_s16  ;;  %3552 = vrot.lane.b32.xlu1 %v4607_v38, %s4056_s17 }
 0x361   :  { %3567 = vrot.lane.b32.xlu0 %v4607_v38, %s4057_s18  ;;  %3562 = vrot.lane.b32.xlu1 %v4607_v38, %s4058_s19  ;;  %s4063_s19 = smov 32  }
 0x365   :  { %3577 = vrot.lane.b32.xlu0 %v4607_v38, %s4059_s5  ;;  %3572 = vrot.lane.b32.xlu1 %v4607_v38, %s4060_s0 }
 0x369   :  { %3587 = vrot.lane.b32.xlu0 %v4607_v38, %s4039_s26  ;;  %3582 = vrot.lane.b32.xlu1 %v4607_v38, %s4043_s30  ;;  %s4062_s26 = smov 64  }
 0x36d   :  { %3597 = vrot.lane.b32.xlu0 %v4607_v38, %s4061_s20  ;;  %3592 = vrot.lane.b32.xlu1 %v4607_v38, %s4048_s3 }
 0x38a   :  { %v4649_v50 = vpop.permute.xlu0 %3447  ;;  %v4651_v11 = vpop.permute.xlu1 %3442 }
 0x38b   :  { %v3450_v3 = vunpack.i.h.bf16 %v4649_v50  ;;  %v3449_v12 = vunpack.i.l.bf16 %v4649_v50  ;;  %v3445_v13 = vunpack.i.h.bf16 %v4651_v11  ;;  %v3444_v16 = vunpack.i.l.bf16 %v4651_v11  ;;  %3607 = vrot.lane.b32.xlu0 %v4649_v50, %s4061_s20  ;;  %3602 = vrot.lane.b32.xlu1 %v4651_v11, %s4061_s20 }
 0x38d   :  { %v4661_v19 = vpack.c.bf16 %v3450_v3, %v3449_v12 }
 0x38e   :  { %v4657_v46 = vpop.permute.xlu0 %3457  ;;  %v4659_v18 = vpop.permute.xlu1 %3452 }
 0x38f   :  { %v3460_v21 = vunpack.i.h.bf16 %v4657_v46  ;;  %v3459_v60 = vunpack.i.l.bf16 %v4657_v46  ;;  %v3455_v6 = vunpack.i.h.bf16 %v4659_v18  ;;  %v3454_v7 = vunpack.i.l.bf16 %v4659_v18  ;;  %3617 = vrot.lane.b32.xlu0 %v4657_v46, %s4061_s20  ;;  %3612 = vrot.lane.b32.xlu1 %v4659_v18, %s4061_s20 }
 0x391   :  { %v4673_v47 = vpack.c.bf16 %v3460_v21, %v3459_v60 }
 0x392   :  { %v3468_v20 = vpop.permute.xlu0 %3467  ;;  %v4671_v22 = vpop.permute.xlu1 %3462 }
 0x393   :  { %v3470_v23 = vunpack.i.h.bf16 %v3468_v20  ;;  %v3469_v24 = vunpack.i.l.bf16 %v3468_v20  ;;  %v3465_v26 = vunpack.i.h.bf16 %v4671_v22  ;;  %v3464_v27 = vunpack.i.l.bf16 %v4671_v22  ;;  %3627 = vrot.lane.b32.xlu0 %v3468_v20, %s4061_s20  ;;  %3622 = vrot.lane.b32.xlu1 %v4671_v22, %s4061_s20 }
 0x395   :  { %v4683_v62 = vpack.c.bf16 %v3470_v23, %v3469_v24 }
 0x396   :  { %v3478_v25 = vpop.permute.xlu0 %3477  ;;  %v4681_v54 = vpop.permute.xlu1 %3472 }
 0x397   :  { %v3480_v28 = vunpack.i.h.bf16 %v3478_v25  ;;  %v3479_v29 = vunpack.i.l.bf16 %v3478_v25  ;;  %v3475_v30 = vunpack.i.h.bf16 %v4681_v54  ;;  %v3474_v14 = vunpack.i.l.bf16 %v4681_v54  ;;  %3637 = vrot.lane.b32.xlu0 %v3478_v25, %s4061_s20  ;;  %3632 = vrot.lane.b32.xlu1 %v4681_v54, %s4061_s20 }
 0x399   :  { %v4692_v15 = vpack.c.bf16 %v3480_v28, %v3479_v29 }
 0x39a   :  { %v3488_v31 = vpop.permute.xlu0 %3487  ;;  %v4690_v9 = vpop.permute.xlu1 %3482 }
 0x39b   :  { %v3490_v32 = vunpack.i.h.bf16 %v3488_v31  ;;  %v3489_v17 = vunpack.i.l.bf16 %v3488_v31  ;;  %v3485_v34 = vunpack.i.h.bf16 %v4690_v9  ;;  %v3484_v36 = vunpack.i.l.bf16 %v4690_v9  ;;  %3647 = vrot.lane.b32.xlu0 %v3488_v31, %s4061_s20  ;;  %3642 = vrot.lane.b32.xlu1 %v4690_v9, %s4061_s20 }
 0x39d   :  { %v4701_v35 = vpack.c.bf16 %v3490_v32, %v3489_v17 }
 0x39e   :  { %v3498_v5 = vpop.permute.xlu0 %3497  ;;  %v4699_v37 = vpop.permute.xlu1 %3492 }
 0x39f   :  { %v3500_v39 = vunpack.i.h.bf16 %v3498_v5  ;;  %v3499_v41 = vunpack.i.l.bf16 %v3498_v5  ;;  %v3495_v58 = vunpack.i.h.bf16 %v4699_v37  ;;  %v3494_v2 = vunpack.i.l.bf16 %v4699_v37  ;;  %3657 = vrot.lane.b32.xlu0 %v3498_v5, %s4061_s20  ;;  %3652 = vrot.lane.b32.xlu1 %v4699_v37, %s4061_s20 }
 0x3a1   :  { %v4708_v42 = vpack.c.bf16 %v3500_v39, %v3499_v41 }
 0x3a2   :  { %v4710_v52 = vpop.permute.xlu0 %3502  ;;  %v4712_v53 = vpop.permute.xlu1 %3507 }
 0x3a3   :  { %v3505_v56 = vunpack.i.h.bf16 %v4710_v52  ;;  %v3504_v10 = vunpack.i.l.bf16 %v4710_v52  ;;  %v3510_v55 = vunpack.i.h.bf16 %v4712_v53  ;;  %v3509_v59 = vunpack.i.l.bf16 %v4712_v53  ;;  %3662 = vrot.lane.b32.xlu1 %v4710_v52, %s4061_s20 }
 0x3a5   :  { %v1855_v57 = vpack.c.bf16 %v3510_v55, %v3509_v59 }
 0x3a6   :  { %v4721_v61 = vpop.permute.xlu0 %3512 }
 0x3a7   :  { %v3515_v43 = vunpack.i.h.bf16 %v4721_v61  ;;  %v3514_v1 = vunpack.i.l.bf16 %v4721_v61  ;;  %3672 = vrot.lane.b32.xlu0 %v4721_v61, %s4061_s20  ;;  %3667 = vrot.lane.b32.xlu1 %v4712_v53, %s4061_s20 }
 0x3a9   :  { %v4727_v49 = vpack.c.bf16 %v3515_v43, %v3514_v1 }
 0x3aa   :  { %v4747_v4 = vpop.permute.xlu0 %3517 }
 0x3ab   :  { %3682 = vrot.lane.b32.xlu0 %v4649_v50, %s4062_s26  ;;  %3677 = vrot.lane.b32.xlu1 %v4651_v11, %s4062_s26 }
 0x3af   :  { %3692 = vrot.lane.b32.xlu0 %v4657_v46, %s4062_s26  ;;  %3687 = vrot.lane.b32.xlu1 %v4659_v18, %s4062_s26  ;;  %v1843_v18 = vpack.c.bf16 %v3465_v26, %v3464_v27 }
 0x3b3   :  { %3702 = vrot.lane.b32.xlu0 %v3468_v20, %s4062_s26  ;;  %3697 = vrot.lane.b32.xlu1 %v4671_v22, %s4062_s26 }
 0x3b7   :  { %3712 = vrot.lane.b32.xlu0 %v3478_v25, %s4062_s26  ;;  %3707 = vrot.lane.b32.xlu1 %v4681_v54, %s4062_s26  ;;  %v1841_v54 = vpack.c.bf16 %v3485_v34, %v3484_v36  ;;  %v1857_v34 = vpack.c.bf16 %v3495_v58, %v3494_v2  ;;  %v3985_v2 = vld [vmem:[%s5291_s8] ss:$52 sps:$4 sm:$0xff]  }
 0x3bb   :  { %3722 = vrot.lane.b32.xlu0 %v3488_v31, %s4062_s26  ;;  %3717 = vrot.lane.b32.xlu1 %v4690_v9, %s4062_s26  ;;  %v1845_v31 = vpack.c.bf16 %v3445_v13, %v3444_v16  ;;  %v1861_v13 = vpack.c.bf16 %v3455_v6, %v3454_v7 }
 0x3bf   :  { %3732 = vrot.lane.b32.xlu0 %v3498_v5, %s4062_s26  ;;  %3727 = vrot.lane.b32.xlu1 %v4699_v37, %s4062_s26 }
 0x3c3   :  { %v4752_v63 = vpop.permute.xlu0 %3527  ;;  %v4755_v0 = vpop.permute.xlu1 %3522 }
 0x3c4   :  { %v3530_v50 = vunpack.i.h.bf16 %v4752_v63  ;;  %v3529_v3 = vunpack.i.l.bf16 %v4752_v63  ;;  %v3525_v12 = vunpack.i.h.bf16 %v4755_v0  ;;  %v3524_v46 = vunpack.i.l.bf16 %v4755_v0  ;;  %3742 = vrot.lane.b32.xlu0 %v4752_v63, %s4061_s20  ;;  %3737 = vrot.lane.b32.xlu1 %v4755_v0, %s4061_s20 }
 0x3c6   :  { %v1838_v21 = vpack.c.bf16 %v3530_v50, %v3529_v3  ;;  %v1846_v23 = vpack.c.bf16 %v3525_v12, %v3524_v46 }
 0x3c7   :  { %v4763_v60 = vpop.permute.xlu0 %3537  ;;  %v4765_v20 = vpop.permute.xlu1 %3532 }
 0x3c8   :  { %v3540_v24 = vunpack.i.h.bf16 %v4763_v60  ;;  %v3539_v25 = vunpack.i.l.bf16 %v4763_v60  ;;  %v3535_v28 = vunpack.i.h.bf16 %v4765_v20  ;;  %v3534_v29 = vunpack.i.l.bf16 %v4765_v20  ;;  %3014 = vmatprep.subr.bf16.mxu0 %v1846_v23  ;;  %3752 = vrot.lane.b32.xlu0 %v4763_v60, %s4061_s20 }
 0x3c9   :  { %3015 = vmatpush3.bf16.msra.mxu0 %v1838_v21  ;;  %3747 = vrot.lane.b32.xlu1 %v4765_v20, %s4061_s20 }
 0x3ca   :  { %v1854_v32 = vpack.c.bf16 %v3540_v24, %v3539_v25  ;;  %3016 = vmatprep.subr.bf16.mxu0 %v1845_v31  ;;  %v1862_v39 = vpack.c.bf16 %v3535_v28, %v3534_v29 }
 0x3cb   :  { %v4779_v17 = vpop.permute.xlu0 %3547  ;;  %v4781_v5 = vpop.permute.xlu1 %3542 }
 0x3cc   :  { %v3550_v41 = vunpack.i.h.bf16 %v4779_v17  ;;  %v3549_v43 = vunpack.i.l.bf16 %v4779_v17  ;;  %v3545_v1 = vunpack.i.h.bf16 %v4781_v5  ;;  %v3544_v50 = vunpack.i.l.bf16 %v4781_v5  ;;  %3042 = vmatprep.subr.bf16.mxu1 %v1862_v39  ;;  %3762 = vrot.lane.b32.xlu0 %v4779_v17, %s4061_s20 }
 0x3cd   :  { %3017 = vmatpush3.bf16.msra.mxu0 %v4661_v19  ;;  %3043 = vmatpush3.bf16.msra.mxu1 %v1854_v32 }
 0x3ce   :  { %v1836_v11 = vpack.c.bf16 %v3550_v41, %v3549_v43  ;;  %v1844_v12 = vpack.c.bf16 %v3545_v1, %v3544_v50  ;;  %3044 = vmatprep.subr.bf16.mxu1 %v1861_v13  ;;  %3757 = vrot.lane.b32.xlu1 %v4781_v5, %s4061_s20 }
 0x3cf   :  { %v4796_v16 = vpop.permute.xlu0 %3557  ;;  %v4798_v3 = vpop.permute.xlu1 %3552 }
 0x3d0   :  { %v3560_v46 = vunpack.i.h.bf16 %v4796_v16  ;;  %v3559_v21 = vunpack.i.l.bf16 %v4796_v16  ;;  %v3555_v23 = vunpack.i.h.bf16 %v4798_v3  ;;  %v3554_v19 = vunpack.i.l.bf16 %v4798_v3  ;;  %3018 = vmatprep.subr.bf16.mxu0 %v1844_v12  ;;  %3772 = vrot.lane.b32.xlu0 %v4796_v16, %s4061_s20 }
 0x3d1   :  { %3019 = vmatpush3.bf16.msra.mxu0 %v1836_v11  ;;  %3045 = vmatpush3.bf16.msra.mxu1 %v4673_v47  ;;  %v1859_v47 = vpack.c.bf16 %v3475_v30, %v3474_v14 }
 0x3d2   :  { %v1852_v6 = vpack.c.bf16 %v3560_v46, %v3559_v21  ;;  %3020 = vmatprep.subr.bf16.mxu0 %v1843_v18  ;;  %v1860_v25 = vpack.c.bf16 %v3555_v23, %v3554_v19  ;;  %3767 = vrot.lane.b32.xlu1 %v4798_v3, %s4061_s20  ;;  %v2591_v18 = vld [vmem:[%s5293_s12 + $0x18] sm:$0xff] }
 0x3d3   :  { %v4813_v7 = vpop.permute.xlu0 %3567  ;;  %v4815_v24 = vpop.permute.xlu1 %3562 }
 0x3d4   :  { %v3570_v28 = vunpack.i.h.bf16 %v4813_v7  ;;  %v3569_v29 = vunpack.i.l.bf16 %v4813_v7  ;;  %v3565_v31 = vunpack.i.h.bf16 %v4815_v24  ;;  %v3564_v32 = vunpack.i.l.bf16 %v4815_v24  ;;  %3046 = vmatprep.subr.bf16.mxu1 %v1860_v25  ;;  %3782 = vrot.lane.b32.xlu0 %v4813_v7, %s4061_s20  ;;  %v2593_v25 = vld [vmem:[%s5293_s12 + $0x28] sm:$0xff] }
 0x3d5   :  { %3021 = vmatpush3.bf16.msra.mxu0 %v4683_v62  ;;  %3047 = vmatpush3.bf16.msra.mxu1 %v1852_v6 }
 0x3d6   :  { %v1834_v22 = vpack.c.bf16 %v3570_v28, %v3569_v29  ;;  %v1842_v39 = vpack.c.bf16 %v3565_v31, %v3564_v32  ;;  %3048 = vmatprep.subr.bf16.mxu1 %v1859_v47  ;;  %3777 = vrot.lane.b32.xlu1 %v4815_v24, %s4061_s20  ;;  %v2590_v29 = vld [vmem:[%s5293_s12 + $0x10] sm:$0xff]  ;;  %v2595_v32 = vld [vmem:[%s5293_s12 + $0x38] sm:$0xff]  ;;  %v2592_v47 = vld [vmem:[%s5293_s12 + $0x20] sm:$0xff] }
 0x3d7   :  { %v4830_v26 = vpop.permute.xlu0 %3577  ;;  %v4832_v27 = vpop.permute.xlu1 %3572 }
 0x3d8   :  { %v3580_v41 = vunpack.i.h.bf16 %v4830_v26  ;;  %v3579_v43 = vunpack.i.l.bf16 %v4830_v26  ;;  %v3575_v1 = vunpack.i.h.bf16 %v4832_v27  ;;  %v3574_v62 = vunpack.i.l.bf16 %v4832_v27  ;;  %3022 = vmatprep.subr.bf16.mxu0 %v1842_v39  ;;  %3792 = vrot.lane.b32.xlu0 %v4830_v26, %s4061_s20  ;;  %v2594_v39 = vld [vmem:[%s5293_s12 + $0x30] sm:$0xff] }
 0x3d9   :  { %3023 = vmatpush3.bf16.msra.mxu0 %v1834_v22  ;;  %3049 = vmatpush3.bf16.msra.mxu1 %v4692_v15 }
 0x3da   :  { %v1850_v30 = vpack.c.bf16 %v3580_v41, %v3579_v43  ;;  %3024 = vmatprep.subr.bf16.mxu0 %v1841_v54  ;;  %v1858_v11 = vpack.c.bf16 %v3575_v1, %v3574_v62  ;;  %3787 = vrot.lane.b32.xlu1 %v4832_v27, %s4061_s20 }
 0x3db   :  { %v4847_v14 = vpop.permute.xlu0 %3587  ;;  %v4849_v50 = vpop.permute.xlu1 %3582 }
 0x3dc   :  { %v3585_v13 = vunpack.i.h.bf16 %v4849_v50  ;;  %v3584_v12 = vunpack.i.l.bf16 %v4849_v50  ;;  %3050 = vmatprep.subr.bf16.mxu1 %v1858_v11  ;;  %v3590_v9 = vunpack.i.h.bf16 %v4847_v14  ;;  %v3589_v15 = vunpack.i.l.bf16 %v4847_v14  ;;  %3797 = vrot.lane.b32.xlu0 %v4607_v38, %s4062_s26 }
 0x3dd   :  { %3025 = vmatpush3.bf16.msra.mxu0 %v4701_v35  ;;  %3051 = vmatpush3.bf16.msra.mxu1 %v1850_v30  ;;  %v1839_v35 = vpack.c.bf16 %v3505_v56, %v3504_v10 }
 0x3de   :  { %v1840_v46 = vpack.c.bf16 %v3585_v13, %v3584_v12  ;;  %3052 = vmatprep.subr.bf16.mxu1 %v1857_v34  ;;  %3802 = vrot.lane.b32.xlu1 %v4710_v52, %s4062_s26  ;;  %v1856_v37 = vpack.c.bf16 %v3590_v9, %v3589_v15  ;;  %v4002_v52 = vld [vmem:[%s5291_s8 + $0x1c] ss:$52 sps:$4 sm:$0xff]  }
 0x3df   :  { %v3593_v36 = vpop.permute.xlu1 %3592  ;;  %v4933_v56 = vpop.permute.xlu0 %3597 }
 0x3e0   :  { %v3595_v21 = vunpack.i.h.bf16 %v3593_v36  ;;  %v3594_v23 = vunpack.i.l.bf16 %v3593_v36  ;;  %3026 = vmatprep.subr.bf16.mxu0 %v1840_v46  ;;  %3817 = vrot.lane.b32.xlu0 %v3593_v36, %s4061_s20 }
 0x3e1   :  { %3027 = vmatpush3.bf16.msra.mxu0 %v1832_v45  ;;  %3053 = vmatpush3.bf16.msra.mxu1 %v4708_v42  ;;  %v3999_v45 = vld [vmem:[%s5291_s8 + $0x14] ss:$52 sps:$4 sm:$0xff]   ;;  %v3996_v42 = vld [vmem:[%s5291_s8 + $0x70] ss:$52 sps:$4 sm:$0xff]  }
 0x3e2   :  { %v1848_v58 = vpack.c.bf16 %v3595_v21, %v3594_v23  ;;  %3028 = vmatprep.subr.bf16.mxu0 %v1839_v35  ;;  %3054 = vmatprep.subr.bf16.mxu1 %v1856_v37 }
 0x3e3   :  { %3807 = vrot.lane.b32.xlu1 %v4849_v50, %s4061_s20 }
 0x3e4   :  { %3827 = vrot.lane.b32.xlu0 %v4752_v63, %s4062_s26 }
 0x3e5   :  { %3029 = vmatpush3.bf16.msra.mxu0 %v1831_v51  ;;  %3055 = vmatpush3.bf16.msra.mxu1 %v1848_v58  ;;  %v3993_v51 = vld [vmem:[%s5291_s8 + $0x68] ss:$52 sps:$4 sm:$0xff]  }
 0x3e6   :  { %3056 = vmatprep.subr.bf16.mxu1 %v1855_v57 }
 0x3e7   :  { %3812 = vrot.lane.b32.xlu1 %v4847_v14, %s4061_s20 }
 0x3e8   :  { %2123 = vmatmul.mubr.bf16.vlgmr.msra.gmra.mxu0 %v3985_v2  ;;  %3837 = vrot.lane.b32.xlu0 %v4763_v60, %s4062_s26 }
 0x3e9   :  { %2130 = vmatprep.mubr.bf16.mxu0 %v3991_v40  ;;  %3057 = vmatpush3.bf16.msra.mxu1 %v4727_v49 }
 0x3eb   :  { %3822 = vrot.lane.b32.xlu1 %v4755_v0, %s4062_s26 }
 0x3ec   :  { %2172 = vmatmul.mubr.bf16.vlgmr.msra.gmra.mxu1 %v3988_v33  ;;  %3847 = vrot.lane.b32.xlu0 %v4779_v17, %s4062_s26 }
 0x3ed   :  { %2179 = vmatprep.mubr.bf16.mxu1 %v3994_v8 }
 0x3ef   :  { %3832 = vrot.lane.b32.xlu1 %v4765_v20, %s4062_s26 }
 0x3f0   :  { %2131 = vmatmul.mubr.bf16.gmra.mxu0 %v3993_v51  ;;  %3857 = vrot.lane.b32.xlu0 %v4796_v16, %s4062_s26  ;;  %v2589_v16 = vld [vmem:[%s5293_s12 + $0x8] sm:$0xff] }
 0x3f1   :  { %2220 = vmatprep.mubr.bf16.mxu0 %v3999_v45 }
 0x3f3   :  { %3842 = vrot.lane.b32.xlu1 %v4781_v5, %s4062_s26 }
 0x3f4   :  { %2180 = vmatmul.mubr.bf16.gmra.mxu1 %v3996_v42  ;;  %3867 = vrot.lane.b32.xlu0 %v4813_v7, %s4062_s26  ;;  %v2588_v7 = vld [vmem:[%s5293_s12] sm:$0xff] }
 0x3f5   :  { %2269 = vmatprep.mubr.bf16.mxu1 %v4002_v52 }
 0x3f7   :  { %3852 = vrot.lane.b32.xlu1 %v4798_v3, %s4062_s26 }
 0x3f8   :  { %3877 = vrot.lane.b32.xlu0 %v4830_v26, %s4062_s26 }
 0x3fb   :  { %3862 = vrot.lane.b32.xlu1 %v4815_v24, %s4062_s26 }
 0x3fc   :  { %3882 = vrot.lane.b32.xlu0 %v4559_v44, %s4062_s26 }
 0x3fd   :  { %v4941_v10 = vpop.permute.xlu0 %3607  ;;  %v4943_v55 = vpop.permute.xlu1 %3602 }
 0x3fe   :  { %v3605_v13 = vunpack.i.h.bf16 %v4943_v55  ;;  %v3604_v12 = vunpack.i.l.bf16 %v4943_v55  ;;  %v3610_v23 = vunpack.i.h.bf16 %v4941_v10  ;;  %v3609_v35 = vunpack.i.l.bf16 %v4941_v10 }
 0x3ff   :  { %3872 = vrot.lane.b32.xlu1 %v4832_v27, %s4062_s26 }
 0x400   :  { %3902 = vrot.lane.b32.xlu0 %v3593_v36, %s4062_s26  ;;  %v1877_v2 = vpack.c.bf16 %v3605_v13, %v3604_v12  ;;  %v1869_v55 = vpack.c.bf16 %v3610_v23, %v3609_v35 }
 0x401   :  { %v4948_v59 = vpop.permute.xlu0 %3617  ;;  %v4950_v49 = vpop.permute.xlu1 %3612 }
 0x402   :  { %v3615_v8 = vunpack.i.h.bf16 %v4950_v49  ;;  %v3614_v51 = vunpack.i.l.bf16 %v4950_v49  ;;  %v3619_v10 = vunpack.i.l.bf16 %v4948_v59 }
 0x403   :  { %3887 = vrot.lane.b32.xlu1 %v4849_v50, %s4062_s26 }
 0x404   :  { %3907 = vrot.lane.b32.xlu0 %v4721_v61, %s4062_s26  ;;  %v1931_v61 = vld [vmem:[%s5292_s9 + $0x10] sm:$0xff] }
 0x405   :  { %v4956_v63 = vpop.permute.xlu0 %3627  ;;  %v4958_v0 = vpop.permute.xlu1 %3622 }
 0x407   :  { %3892 = vrot.lane.b32.xlu1 %v4847_v14, %s4062_s26 }
 0x408   :  { %3917 = vrot.lane.b32.xlu0 %v4559_v44, %s4063_s19  ;;  %v1929_v44 = vld [vmem:[%s5292_s9] sm:$0xff] }
 0x409   :  { %v4963_v60 = vpop.permute.xlu0 %3637  ;;  %v4965_v20 = vpop.permute.xlu1 %3632 }
 0x40b   :  { %3897 = vrot.lane.b32.xlu1 %v4712_v53, %s4062_s26  ;;  %v1932_v53 = vld [vmem:[%s5292_s9 + $0x18] sm:$0xff] }
 0x40c   :  { %1945 = vperm.xlu0 %3304, %v1931_v61   ;;  %v3620_v61 = vunpack.i.h.bf16 %v4948_v59  ;;  %v3629_v59 = vunpack.i.l.bf16 %v4956_v63 }
 0x40d   :  { %v4971_v17 = vpop.permute.xlu1 %3642  ;;  %v4979_v5 = vpop.permute.xlu0 %3647 }
 0x40e   :  { %v1885_v12 = vpack.c.bf16 %v3620_v61, %v3619_v10 }
 0x40f   :  { %3912 = vrot.lane.b32.xlu1 %v4607_v38, %s4063_s19  ;;  %v1930_v38 = vld [vmem:[%s5292_s9 + $0x8] sm:$0xff] }
 0x410   :  { %1935 = vperm.xlu0 %3304, %v1929_v44  }
 0x411   :  { %v4984_v3 = vpop.permute.xlu1 %3652  ;;  %v4989_v19 = vpop.permute.xlu0 %3657 }
 0x413   :  { %1950 = vperm.xlu1 %3440, %v1932_v53  }
 0x414   :  { %2611 = vperm.xlu0 %3304, %v2589_v16   ;;  %v3625_v16 = vunpack.i.h.bf16 %v4958_v0 }
 0x415   :  { %v4994_v6 = vpop.permute.xlu1 %3662 }
 0x417   :  { %1940 = vperm.xlu1 %3440, %v1930_v38   ;;  %v3624_v38 = vunpack.i.l.bf16 %v4958_v0 }
 0x418   :  { %2621 = vperm.xlu0 %3304, %v2591_v18  }
 0x419   :  { %v4999_v24 = vpop.permute.xlu0 %3672  ;;  %v5004_v28 = vpop.permute.xlu1 %3667 }
 0x41b   :  { %2606 = vperm.xlu1 %3440, %v2588_v7  }
 0x41c   :  { %2631 = vperm.xlu0 %3304, %v2593_v25   ;;  %v1893_v25 = vpack.c.bf16 %v3615_v8, %v3614_v51 }
 0x41d   :  { %v5009_v31 = vpop.permute.xlu0 %3682  ;;  %v5014_v22 = vpop.permute.xlu1 %3677 }
 0x41f   :  { %2616 = vperm.xlu1 %3440, %v2590_v29  }
 0x420   :  { %2641 = vperm.xlu0 %3304, %v2595_v32  }
 0x421   :  { %v5019_v26 = vpop.permute.xlu0 %3692  ;;  %v5021_v27 = vpop.permute.xlu1 %3687 }
 0x423   :  { %2626 = vperm.xlu1 %3440, %v2592_v47  }
 0x425   :  { %v5026_v41 = vpop.permute.xlu0 %3702  ;;  %v5028_v43 = vpop.permute.xlu1 %3697 }
 0x427   :  { %2636 = vperm.xlu1 %3440, %v2594_v39   ;;  %v3630_v39 = vunpack.i.h.bf16 %v4956_v63  ;;  %v3640_v63 = vunpack.i.h.bf16 %v4963_v60 }
 0x429   :  { %v5030_v1 = vpop.permute.xlu0 %3712  ;;  %v5032_v62 = vpop.permute.xlu1 %3707 }
 0x42d   :  { %v5034_v54 = vpop.permute.xlu0 %3722  ;;  %v5036_v30 = vpop.permute.xlu1 %3717 }
 0x431   :  { %v5038_v14 = vpop.permute.xlu0 %3732  ;;  %v5040_v50 = vpop.permute.xlu1 %3727 }
 0x436   :  { %v3743_v11 = vpop.permute.xlu0 %3742  ;;  %v3738_v34 = vpop.permute.xlu1 %3737 }
 0x437   :  { %v3745_v9 = vunpack.i.h.bf16 %v3743_v11  ;;  %v3744_v15 = vunpack.i.l.bf16 %v3743_v11  ;;  %v3740_v36 = vunpack.i.h.bf16 %v3738_v34  ;;  %v3739_v46 = vunpack.i.l.bf16 %v3738_v34 }
 0x439   :  { %v1870_v21 = vpack.c.bf16 %v3745_v9, %v3744_v15  ;;  %v1878_v37 = vpack.c.bf16 %v3740_v36, %v3739_v46  ;;  %v1875_v9 = vpack.c.bf16 %v3625_v16, %v3624_v38  ;;  %v3635_v36 = vunpack.i.h.bf16 %v4965_v20 }
 0x43a   :  { %v3753_v58 = vpop.permute.xlu0 %3752  ;;  %v3634_v46 = vunpack.i.l.bf16 %v4965_v20 }
 0x43b   :  { %v3755_v57 = vunpack.i.h.bf16 %v3753_v58  ;;  %v3754_v40 = vunpack.i.l.bf16 %v3753_v58  ;;  %v3748_v33 = vpop.permute.xlu1 %3747  ;;  %3070 = vmatprep.subr.bf16.mxu0 %v1878_v37  ;;  %v1867_v37 = vpack.c.bf16 %v3630_v39, %v3629_v59  ;;  %v3639_v58 = vunpack.i.l.bf16 %v4963_v60 }
 0x43c   :  { %v3750_v45 = vunpack.i.h.bf16 %v3748_v33  ;;  %v3749_v42 = vunpack.i.l.bf16 %v3748_v33  ;;  %3071 = vmatpush3.bf16.msra.mxu0 %v1870_v21  ;;  %v3644_v33 = vunpack.i.l.bf16 %v4971_v17  ;;  %v3650_v60 = vunpack.i.h.bf16 %v4979_v5 }
 0x43d   :  { %v1886_v52 = vpack.c.bf16 %v3755_v57, %v3754_v40  ;;  %3072 = vmatprep.subr.bf16.mxu0 %v1877_v2  ;;  %v3645_v40 = vunpack.i.h.bf16 %v4971_v17  ;;  %v1883_v61 = vpack.c.bf16 %v3640_v63, %v3639_v58 }
 0x43e   :  { %v1894_v44 = vpack.c.bf16 %v3750_v45, %v3749_v42  ;;  %v3763_v53 = vpop.permute.xlu0 %3762  ;;  %v1891_v45 = vpack.c.bf16 %v3635_v36, %v3634_v46  ;;  %v3665_v36 = vunpack.i.h.bf16 %v4994_v6  ;;  %v3664_v46 = vunpack.i.l.bf16 %v4994_v6 }
 0x43f   :  { %v3765_v18 = vunpack.i.h.bf16 %v3763_v53  ;;  %v3764_v7 = vunpack.i.l.bf16 %v3763_v53  ;;  %v3649_v53 = vunpack.i.l.bf16 %v4979_v5  ;;  %v1873_v16 = vpack.c.bf16 %v3645_v40, %v3644_v33 }
 0x440   :  { %v3758_v49 = vpop.permute.xlu1 %3757  ;;  %3098 = vmatprep.subr.bf16.mxu1 %v1894_v44  ;;  %3073 = vmatpush3.bf16.msra.mxu0 %v1869_v55  ;;  %v3660_v5 = vunpack.i.h.bf16 %v4989_v19 }
 0x441   :  { %v3760_v29 = vunpack.i.h.bf16 %v3758_v49  ;;  %v3759_v32 = vunpack.i.l.bf16 %v3758_v49  ;;  %v1868_v47 = vpack.c.bf16 %v3765_v18, %v3764_v7  ;;  %3099 = vmatpush3.bf16.msra.mxu1 %v1886_v52  ;;  %v3655_v7 = vunpack.i.h.bf16 %v4984_v3 }
 0x442   :  { %3100 = vmatprep.subr.bf16.mxu1 %v1893_v25  ;;  %v3773_v13 = vpop.permute.xlu0 %3772  ;;  %v3654_v49 = vunpack.i.l.bf16 %v4984_v3  ;;  %v1865_v59 = vpack.c.bf16 %v3650_v60, %v3649_v53  ;;  %v3600_v3 = vunpack.i.h.bf16 %v4933_v56  ;;  %v3679_v53 = vunpack.i.l.bf16 %v5014_v22 }
 0x443   :  { %v1876_v11 = vpack.c.bf16 %v3760_v29, %v3759_v32  ;;  %v3775_v0 = vunpack.i.h.bf16 %v3773_v13  ;;  %v3774_v15 = vunpack.i.l.bf16 %v3773_v13 }
 0x444   :  { %v3768_v34 = vpop.permute.xlu1 %3767 }
 0x445   :  { %v3770_v21 = vunpack.i.h.bf16 %v3768_v34  ;;  %v3769_v23 = vunpack.i.l.bf16 %v3768_v34  ;;  %3074 = vmatprep.subr.bf16.mxu0 %v1876_v11  ;;  %v1884_v35 = vpack.c.bf16 %v3775_v0, %v3774_v15  ;;  %3101 = vmatpush3.bf16.msra.mxu1 %v1885_v12  ;;  %v3659_v11 = vunpack.i.l.bf16 %v4989_v19 }
 0x446   :  { %3075 = vmatpush3.bf16.msra.mxu0 %v1868_v47  ;;  %v3783_v57 = vpop.permute.xlu0 %3782  ;;  %v1889_v12 = vpack.c.bf16 %v3655_v7, %v3654_v49  ;;  %v3684_v7 = vunpack.i.l.bf16 %v5009_v31  ;;  %v3690_v49 = vunpack.i.h.bf16 %v5021_v27 }
 0x447   :  { %v1892_v2 = vpack.c.bf16 %v3770_v21, %v3769_v23  ;;  %3076 = vmatprep.subr.bf16.mxu0 %v1875_v9  ;;  %v3785_v8 = vunpack.i.h.bf16 %v3783_v57  ;;  %v3784_v20 = vunpack.i.l.bf16 %v3783_v57  ;;  %v3599_v9 = vunpack.i.l.bf16 %v4933_v56 }
 0x448   :  { %v3778_v51 = vpop.permute.xlu1 %3777  ;;  %v1881_v15 = vpack.c.bf16 %v3660_v5, %v3659_v11  ;;  %v3520_v23 = vunpack.i.h.bf16 %v4747_v4  ;;  %v3670_v56 = vunpack.i.h.bf16 %v5004_v28 }
 0x449   :  { %v3780_v42 = vunpack.i.h.bf16 %v3778_v51  ;;  %v3779_v52 = vunpack.i.l.bf16 %v3778_v51  ;;  %3102 = vmatprep.subr.bf16.mxu1 %v1892_v2  ;;  %v1866_v55 = vpack.c.bf16 %v3785_v8, %v3784_v20  ;;  %v3669_v2 = vunpack.i.l.bf16 %v5004_v28 }
 0x44a   :  { %3077 = vmatpush3.bf16.msra.mxu0 %v1867_v37  ;;  %3103 = vmatpush3.bf16.msra.mxu1 %v1884_v35  ;;  %v3793_v44 = vpop.permute.xlu0 %3792  ;;  %v3519_v35 = vunpack.i.l.bf16 %v4747_v4  ;;  %v1864_v37 = vpack.c.bf16 %v3600_v3, %v3599_v9  ;;  %v1871_v8 = vpack.c.bf16 %v3665_v36, %v3664_v46  ;;  %v3675_v51 = vunpack.i.h.bf16 %v4999_v24  ;;  %v4006_v46 = vld [vmem:[%s5291_s8 + $0x84] ss:$52 sps:$4 sm:$0xff]  }
 0x44b   :  { %v1874_v10 = vpack.c.bf16 %v3780_v42, %v3779_v52  ;;  %3104 = vmatprep.subr.bf16.mxu1 %v1891_v45  ;;  %v3795_v17 = vunpack.i.h.bf16 %v3793_v44  ;;  %v3794_v38 = vunpack.i.l.bf16 %v3793_v44  ;;  %v3674_v45 = vunpack.i.l.bf16 %v4999_v24  ;;  %v3997_v24 = vld [vmem:[%s5291_s8 + $0x10] ss:$52 sps:$4 sm:$0xff]  }
 0x44c   :  { %v3788_v18 = vpop.permute.xlu1 %3787  ;;  %v1863_v4 = vpack.c.bf16 %v3520_v23, %v3519_v35  ;;  %v3680_v44 = vunpack.i.h.bf16 %v5014_v22  ;;  %v4003_v22 = vld [vmem:[%s5291_s8 + $0x7c] ss:$52 sps:$4 sm:$0xff]  }
 0x44d   :  { %v3790_v25 = vunpack.i.h.bf16 %v3788_v18  ;;  %v3789_v29 = vunpack.i.l.bf16 %v3788_v18  ;;  %3078 = vmatprep.subr.bf16.mxu0 %v1874_v10  ;;  %v1882_v32 = vpack.c.bf16 %v3795_v17, %v3794_v38  ;;  %v1879_v38 = vpack.c.bf16 %v3675_v51, %v3674_v45 }
 0x44e   :  { %3079 = vmatpush3.bf16.msra.mxu0 %v1866_v55  ;;  %3105 = vmatpush3.bf16.msra.mxu1 %v1883_v61  ;;  %v5064_v39 = vpop.permute.xlu0 %3797  ;;  %v1887_v55 = vpack.c.bf16 %v3670_v56, %v3669_v2  ;;  %v3685_v18 = vunpack.i.h.bf16 %v5009_v31  ;;  %v4000_v31 = vld [vmem:[%s5291_s8 + $0x18] ss:$52 sps:$4 sm:$0xff]   ;;  %v3709_v51 = vunpack.i.l.bf16 %v5032_v62 }
 0x44f   :  { %v1890_v47 = vpack.c.bf16 %v3790_v25, %v3789_v29  ;;  %3080 = vmatprep.subr.bf16.mxu0 %v1873_v16  ;;  %v4005_v2 = vld [vmem:[%s5291_s8 + $0x78] ss:$52 sps:$4 sm:$0xff]  }
 0x450   :  { %v5068_v13 = vpop.permute.xlu1 %3802 }
 0x451   :  { %3106 = vmatprep.subr.bf16.mxu1 %v1890_v47 }
 0x452   :  { %3081 = vmatpush3.bf16.msra.mxu0 %v1865_v59  ;;  %3107 = vmatpush3.bf16.msra.mxu1 %v1882_v32  ;;  %v3818_v0 = vpop.permute.xlu0 %3817  ;;  %v3689_v32 = vunpack.i.l.bf16 %v5021_v27  ;;  %v1901_v27 = vpack.c.bf16 %v3685_v18, %v3684_v7 }
 0x453   :  { %3108 = vmatprep.subr.bf16.mxu1 %v1889_v12  ;;  %v3820_v57 = vunpack.i.h.bf16 %v3818_v0  ;;  %v3819_v40 = vunpack.i.l.bf16 %v3818_v0  ;;  %v1909_v12 = vpack.c.bf16 %v3680_v44, %v3679_v53  ;;  %v3695_v0 = vunpack.i.h.bf16 %v5019_v26 }
 0x455   :  { %v3808_v34 = vpop.permute.xlu1 %3807  ;;  %v1880_v61 = vpack.c.bf16 %v3820_v57, %v3819_v40  ;;  %v3705_v40 = vunpack.i.h.bf16 %v5026_v41 }
 0x456   :  { %v3810_v21 = vunpack.i.h.bf16 %v3808_v34  ;;  %v3809_v19 = vunpack.i.l.bf16 %v3808_v34  ;;  %3109 = vmatpush3.bf16.msra.mxu1 %v1881_v15  ;;  %v3828_v58 = vpop.permute.xlu0 %3827  ;;  %v3694_v15 = vunpack.i.l.bf16 %v5019_v26  ;;  %v3699_v26 = vunpack.i.l.bf16 %v5028_v43 }
 0x457   :  { %v3830_v60 = vunpack.i.h.bf16 %v3828_v58  ;;  %v3829_v28 = vunpack.i.l.bf16 %v3828_v58 }
 0x458   :  { %v1872_v63 = vpack.c.bf16 %v3810_v21, %v3809_v19  ;;  %v1925_v21 = vpack.c.bf16 %v3690_v49, %v3689_v32  ;;  %v1917_v57 = vpack.c.bf16 %v3695_v0, %v3694_v15  ;;  %v3720_v49 = vunpack.i.h.bf16 %v5036_v30 }
 0x459   :  { %v3813_v33 = vpop.permute.xlu1 %3812  ;;  %v1902_v47 = vpack.c.bf16 %v3830_v60, %v3829_v28  ;;  %v3715_v28 = vunpack.i.h.bf16 %v5030_v1  ;;  %v3725_v32 = vunpack.i.h.bf16 %v5034_v54 }
 0x45a   :  { %v3815_v20 = vunpack.i.h.bf16 %v3813_v33  ;;  %v3814_v6 = vunpack.i.l.bf16 %v3813_v33  ;;  %3082 = vmatprep.subr.bf16.mxu0 %v1872_v63  ;;  %v3838_v52 = vpop.permute.xlu0 %3837  ;;  %v3700_v63 = vunpack.i.h.bf16 %v5028_v43  ;;  %v3704_v33 = vunpack.i.l.bf16 %v5026_v41  ;;  %v4008_v41 = vld [vmem:[%s5291_s8 + $0x80] ss:$52 sps:$4 sm:$0xff]  }
 0x45b   :  { %3083 = vmatpush3.bf16.msra.mxu0 %v1864_v37  ;;  %v3840_v59 = vunpack.i.h.bf16 %v3838_v52  ;;  %v3839_v5 = vunpack.i.l.bf16 %v3838_v52 }
 0x45c   :  { %v1888_v42 = vpack.c.bf16 %v3815_v20, %v3814_v6  ;;  %3084 = vmatprep.subr.bf16.mxu0 %v1871_v8  ;;  %v3710_v8 = vunpack.i.h.bf16 %v5032_v62  ;;  %v4011_v6 = vld [vmem:[%s5291_s8 + $0x24] ss:$52 sps:$4 sm:$0xff]   ;;  %v1899_v62 = vpack.c.bf16 %v3705_v40, %v3704_v33 }
 0x45d   :  { %v3823_v10 = vpop.permute.xlu1 %3822  ;;  %v1918_v19 = vpack.c.bf16 %v3840_v59, %v3839_v5  ;;  %v3730_v59 = vunpack.i.h.bf16 %v5040_v50 }
 0x45e   :  { %v3825_v16 = vunpack.i.h.bf16 %v3823_v10  ;;  %v3824_v17 = vunpack.i.l.bf16 %v3823_v10  ;;  %3110 = vmatprep.subr.bf16.mxu1 %v1888_v42  ;;  %v3848_v29 = vpop.permute.xlu0 %3847  ;;  %v3714_v10 = vunpack.i.l.bf16 %v5030_v1  ;;  %v3719_v1 = vunpack.i.l.bf16 %v5036_v30 }
 0x45f   :  { %3085 = vmatpush3.bf16.msra.mxu0 %v1863_v4  ;;  %3111 = vmatpush3.bf16.msra.mxu1 %v1880_v61  ;;  %v3850_v23 = vunpack.i.h.bf16 %v3848_v29  ;;  %v3849_v35 = vunpack.i.l.bf16 %v3848_v29 }
 0x460   :  { %v1910_v25 = vpack.c.bf16 %v3825_v16, %v3824_v17  ;;  %3112 = vmatprep.subr.bf16.mxu1 %v1887_v55  ;;  %v1907_v55 = vpack.c.bf16 %v3700_v63, %v3699_v26  ;;  %v4014_v16 = vld [vmem:[%s5291_s8 + $0x2c] ss:$52 sps:$4 sm:$0xff]   ;;  %v1923_v17 = vpack.c.bf16 %v3710_v8, %v3709_v51  ;;  %v1905_v0 = vpack.c.bf16 %v3720_v49, %v3719_v1  ;;  %v4018_v49 = vld [vmem:[%s5291_s8 + $0x94] ss:$52 sps:$4 sm:$0xff]  }
 0x461   :  { %v3833_v11 = vpop.permute.xlu1 %3832  ;;  %v1900_v45 = vpack.c.bf16 %v3850_v23, %v3849_v35  ;;  %v3805_v63 = vunpack.i.h.bf16 %v5068_v13  ;;  %v3804_v26 = vunpack.i.l.bf16 %v5068_v13 }
 0x462   :  { %v3835_v3 = vunpack.i.h.bf16 %v3833_v11  ;;  %v3834_v9 = vunpack.i.l.bf16 %v3833_v11  ;;  %2221 = vmatmul.mubr.bf16.vlgmr.msra.gmra.mxu0 %v3997_v24  ;;  %3126 = vmatprep.subr.bf16.mxu0 %v1910_v25  ;;  %v3858_v36 = vpop.permute.xlu0 %3857 }
 0x463   :  { %3113 = vmatpush3.bf16.msra.mxu1 %v1879_v38  ;;  %3127 = vmatpush3.bf16.msra.mxu0 %v1902_v47  ;;  %v3860_v4 = vunpack.i.h.bf16 %v3858_v36  ;;  %v3859_v42 = vunpack.i.l.bf16 %v3858_v36  ;;  %v3724_v47 = vunpack.i.l.bf16 %v5034_v54  ;;  %v3734_v54 = vunpack.i.l.bf16 %v5038_v14 }
 0x464   :  { %v1926_v34 = vpack.c.bf16 %v3835_v3, %v3834_v9  ;;  %3128 = vmatprep.subr.bf16.mxu0 %v1909_v12  ;;  %2228 = vmatprep.mubr.bf16.mxu0 %v4003_v22  ;;  %v1915_v22 = vpack.c.bf16 %v3715_v28, %v3714_v10  ;;  %v3729_v12 = vunpack.i.l.bf16 %v5040_v50  ;;  %v3800_v36 = vunpack.i.h.bf16 %v5064_v39  ;;  %v4009_v28 = vld [vmem:[%s5291_s8 + $0x20] ss:$52 sps:$4 sm:$0xff]  }
 0x465   :  { %v3843_v37 = vpop.permute.xlu1 %3842  ;;  %v1916_v24 = vpack.c.bf16 %v3860_v4, %v3859_v42 }
 0x466   :  { %v3845_v58 = vunpack.i.h.bf16 %v3843_v37  ;;  %v3844_v56 = vunpack.i.l.bf16 %v3843_v37  ;;  %2270 = vmatmul.mubr.bf16.vlgmr.msra.gmra.mxu1 %v4000_v31  ;;  %3154 = vmatprep.subr.bf16.mxu1 %v1926_v34  ;;  %v3868_v43 = vpop.permute.xlu0 %3867  ;;  %v3735_v34 = vunpack.i.h.bf16 %v5038_v14  ;;  %v1921_v23 = vpack.c.bf16 %v3730_v59, %v3729_v12  ;;  %v2433_v59 = vld [vmem:[%s5294_s10] sm:$0xff] }
 0x467   :  { %3129 = vmatpush3.bf16.msra.mxu0 %v1901_v27  ;;  %3155 = vmatpush3.bf16.msra.mxu1 %v1918_v19  ;;  %v3870_v38 = vunpack.i.h.bf16 %v3868_v43  ;;  %v3869_v18 = vunpack.i.l.bf16 %v3868_v43  ;;  %v1897_v19 = vpack.c.bf16 %v3725_v32, %v3724_v47  ;;  %v4020_v32 = vld [vmem:[%s5291_s8 + $0x90] ss:$52 sps:$4 sm:$0xff]   ;;  %v4022_v47 = vld [vmem:[%s5291_s8 + $0x98] ss:$52 sps:$4 sm:$0xff]  }
 0x468   :  { %v1908_v20 = vpack.c.bf16 %v3845_v58, %v3844_v56  ;;  %3156 = vmatprep.subr.bf16.mxu1 %v1925_v21  ;;  %2277 = vmatprep.mubr.bf16.mxu1 %v4006_v46  ;;  %v3799_v46 = vunpack.i.l.bf16 %v5064_v39  ;;  %v1913_v14 = vpack.c.bf16 %v3735_v34, %v3734_v54 }
 0x469   :  { %v3853_v52 = vpop.permute.xlu1 %3852  ;;  %v1898_v30 = vpack.c.bf16 %v3870_v38, %v3869_v18 }
 0x46a   :  { %v3855_v61 = vunpack.i.h.bf16 %v3853_v52  ;;  %v3854_v60 = vunpack.i.l.bf16 %v3853_v52  ;;  %2229 = vmatmul.mubr.bf16.gmra.mxu0 %v4005_v2  ;;  %3130 = vmatprep.subr.bf16.mxu0 %v1908_v20  ;;  %v3878_v53 = vpop.permute.xlu0 %3877  ;;  %v1896_v2 = vpack.c.bf16 %v3800_v36, %v3799_v46 }
 0x46b   :  { %3131 = vmatpush3.bf16.msra.mxu0 %v1900_v45  ;;  %3157 = vmatpush3.bf16.msra.mxu1 %v1917_v57  ;;  %v3880_v3 = vunpack.i.h.bf16 %v3878_v53  ;;  %v3879_v9 = vunpack.i.l.bf16 %v3878_v53 }
 0x46c   :  { %v1924_v44 = vpack.c.bf16 %v3855_v61, %v3854_v60  ;;  %3132 = vmatprep.subr.bf16.mxu0 %v1907_v55  ;;  %2318 = vmatprep.mubr.bf16.mxu0 %v4011_v6  ;;  %v1903_v6 = vpack.c.bf16 %v3805_v63, %v3804_v26 }
 0x46d   :  { %v3863_v7 = vpop.permute.xlu1 %3862  ;;  %v1914_v35 = vpack.c.bf16 %v3880_v3, %v3879_v9 }
 0x46e   :  { %v3865_v25 = vunpack.i.h.bf16 %v3863_v7  ;;  %v3864_v29 = vunpack.i.l.bf16 %v3863_v7  ;;  %2278 = vmatmul.mubr.bf16.gmra.mxu1 %v4008_v41  ;;  %3158 = vmatprep.subr.bf16.mxu1 %v1924_v44  ;;  %v3883_v11 = vpop.permute.xlu0 %3882  ;;  %v4012_v7 = vld [vmem:[%s5291_s8 + $0x28] ss:$52 sps:$4 sm:$0xff]  }
 0x46f   :  { %3133 = vmatpush3.bf16.msra.mxu0 %v1899_v62  ;;  %3159 = vmatpush3.bf16.msra.mxu1 %v1916_v24  ;;  %v3885_v39 = vunpack.i.h.bf16 %v3883_v11  ;;  %v3884_v40 = vunpack.i.l.bf16 %v3883_v11  ;;  %v4015_v62 = vld [vmem:[%s5291_s8 + $0x8c] ss:$52 sps:$4 sm:$0xff]  }
 0x470   :  { %v1906_v5 = vpack.c.bf16 %v3865_v25, %v3864_v29  ;;  %3160 = vmatprep.subr.bf16.mxu1 %v1923_v17  ;;  %2367 = vmatprep.mubr.bf16.mxu1 %v4014_v16  ;;  %v4017_v29 = vld [vmem:[%s5291_s8 + $0x88] ss:$52 sps:$4 sm:$0xff]  }
 0x471   :  { %v3873_v31 = vpop.permute.xlu1 %3872  ;;  %v1895_v4 = vpack.c.bf16 %v3885_v39, %v3884_v40 }
 0x472   :  { %v3875_v15 = vunpack.i.h.bf16 %v3873_v31  ;;  %v3874_v27 = vunpack.i.l.bf16 %v3873_v31  ;;  %3134 = vmatprep.subr.bf16.mxu0 %v1906_v5  ;;  %v3903_v50 = vpop.permute.xlu0 %3902 }
 0x473   :  { %3135 = vmatpush3.bf16.msra.mxu0 %v1898_v30  ;;  %3161 = vmatpush3.bf16.msra.mxu1 %v1915_v22  ;;  %v3905_v33 = vunpack.i.h.bf16 %v3903_v50  ;;  %v3904_v8 = vunpack.i.l.bf16 %v3903_v50  ;;  %v4021_v22 = vld [vmem:[%s5291_s8 + $0x30] ss:$52 sps:$4 sm:$0xff]  }
 0x474   :  { %v1922_v21 = vpack.c.bf16 %v3875_v15, %v3874_v27  ;;  %3136 = vmatprep.subr.bf16.mxu0 %v1905_v0 }
 0x475   :  { %v3888_v37 = vpop.permute.xlu1 %3887  ;;  %v1912_v42 = vpack.c.bf16 %v3905_v33, %v3904_v8 }
 0x476   :  { %v3890_v58 = vunpack.i.h.bf16 %v3888_v37  ;;  %v3889_v56 = vunpack.i.l.bf16 %v3888_v37  ;;  %3162 = vmatprep.subr.bf16.mxu1 %v1922_v21  ;;  %v3908_v20 = vpop.permute.xlu0 %3907 }
 0x477   :  { %3137 = vmatpush3.bf16.msra.mxu0 %v1897_v19  ;;  %3163 = vmatpush3.bf16.msra.mxu1 %v1914_v35  ;;  %v3910_v52 = vunpack.i.h.bf16 %v3908_v20  ;;  %v3909_v55 = vunpack.i.l.bf16 %v3908_v20 }
 0x478   :  { %v1904_v57 = vpack.c.bf16 %v3890_v58, %v3889_v56  ;;  %3164 = vmatprep.subr.bf16.mxu1 %v1921_v23 }
 0x479   :  { %v3893_v43 = vpop.permute.xlu1 %3892  ;;  %v1911_v53 = vpack.c.bf16 %v3910_v52, %v3909_v55 }
 0x47a   :  { %v3895_v51 = vunpack.i.h.bf16 %v3893_v43  ;;  %v3894_v45 = vunpack.i.l.bf16 %v3893_v43  ;;  %3138 = vmatprep.subr.bf16.mxu0 %v1904_v57  ;;  %v3918_v10 = vpop.permute.xlu0 %3917 }
 0x47b   :  { %3139 = vmatpush3.bf16.msra.mxu0 %v1896_v2  ;;  %3165 = vmatpush3.bf16.msra.mxu1 %v1913_v14  ;;  %v3920_v17 = vunpack.i.h.bf16 %v3918_v10  ;;  %v3919_v24 = vunpack.i.l.bf16 %v3918_v10 }
 0x47c   :  { %v1920_v13 = vpack.c.bf16 %v3895_v51, %v3894_v45  ;;  %3140 = vmatprep.subr.bf16.mxu0 %v1903_v6 }
 0x47d   :  { %v3898_v61 = vpop.permute.xlu1 %3897  ;;  %v1927_v25 = vpack.c.bf16 %v3920_v17, %v3919_v24 }
 0x47e   :  { %v3900_v60 = vunpack.i.h.bf16 %v3898_v61  ;;  %v3899_v41 = vunpack.i.l.bf16 %v3898_v61  ;;  %3166 = vmatprep.subr.bf16.mxu1 %v1920_v13 }
 0x47f   :  { %3141 = vmatpush3.bf16.msra.mxu0 %v1895_v4  ;;  %3167 = vmatpush3.bf16.msra.mxu1 %v1912_v42 }
 0x480   :  { %v1919_v44 = vpack.c.bf16 %v3900_v60, %v3899_v41 }
 0x481   :  { %v3913_v16 = vpop.permute.xlu1 %3912 }
 0x482   :  { %v3915_v38 = vunpack.i.h.bf16 %v3913_v16  ;;  %v3914_v18 = vunpack.i.l.bf16 %v3913_v16  ;;  %2319 = vmatmul.mubr.bf16.vlgmr.msra.gmra.mxu0 %v4009_v28  ;;  %3168 = vmatprep.subr.bf16.mxu1 %v1919_v44 }
 0x483   :  { %3169 = vmatpush3.bf16.msra.mxu1 %v1911_v53  ;;  %2326 = vmatprep.mubr.bf16.mxu0 %v4015_v62 }
 0x484   :  { %v1928_v1 = vpack.c.bf16 %v3915_v38, %v3914_v18 }
 0x486   :  { %2368 = vmatmul.mubr.bf16.vlgmr.msra.gmra.mxu1 %v4012_v7  ;;  %3220 = vmatprep.subr.bf16.mxu0 %v1928_v1 }
 0x487   :  { %3221 = vmatpush3.bf16.msra.mxu0 %v1928_v1  ;;  %2375 = vmatprep.mubr.bf16.mxu1 %v4018_v49  ;;  %v1946_v20 = vpop.permute.xlu0 %1945 }
 0x488   :  { %3222 = vmatprep.subr.bf16.mxu0 %v1927_v25 }
 0x48a   :  { %2327 = vmatmul.mubr.bf16.gmra.mxu0 %v4017_v29 }
 0x48b   :  { %3223 = vmatpush3.bf16.msra.mxu0 %v1927_v25  ;;  %3224 = vmatprep.mubr.msk.bf16.mxu0 %vm2083_vm13, %v4021_v22  ;;  %v1936_v55 = vpop.permute.xlu0 %1935 }
 0x48e   :  { %2376 = vmatmul.mubr.bf16.gmra.mxu1 %v4020_v32  ;;  %v1951_v45 = vpop.permute.xlu1 %1950 }
 0x492   :  { %3225 = vmatmul.mubr.msk.bf16.vlgmr.msra.gmra.mxu0 %vm2083_vm13, %v4022_v47  ;;  %v1941_v49 = vpop.permute.xlu1 %1940 }
 0x493   :  { %3236 = vmatprep.mubr.msk.f32.mxu0 %vm2083_vm13, %v2433_v59 }
 0x4a8   :  { %v3030_v5 = vpop.f32.mrf.mxu0 }
 0x4aa   :  { %v3031_v11 = vpop.f32.mrf.mxu0 }
 0x4ab   :  { %v3032_v13 = vadd.f32 %v3031_v11, %v3030_v5 }
 0x4ac   :  { %v3058_v12 = vpop.f32.mrf.mxu1  ;;  %v3033_v30 = vpop.f32.mrf.mxu0 }
 0x4ad   :  { %v2125_v44 = vadd.f32 %v3032_v13, %v1936_v55 }
 0x4ae   :  { %v3059_v3 = vpop.f32.mrf.mxu1  ;;  %v3034_v9 = vpop.f32.mrf.mxu0 }
 0x4af   :  { %v3060_v61 = vadd.f32 %v3059_v3, %v3058_v12  ;;  %v3035_v41 = vadd.f32 %v3034_v9, %v3033_v30 }
 0x4b0   :  { %v3061_v31 = vpop.f32.mrf.mxu1  ;;  %v3036_v0 = vpop.f32.mrf.mxu0 }
 0x4b1   :  { %v2174_v1 = vadd.f32 %v3060_v61, %v2125_v44  ;;  %v2128_v32 = vadd.f32 %v3035_v41, %v1941_v49 }
 0x4b2   :  { %v3062_v15 = vpop.f32.mrf.mxu1  ;;  %v3037_v27 = vpop.f32.mrf.mxu0 }
 0x4b3   :  { %v3038_v4 = vadd.f32 %v3037_v27, %v3036_v0  ;;  %v3063_v24 = vadd.f32 %v3062_v15, %v3061_v31 }
 0x4b4   :  { %v3064_v34 = vpop.f32.mrf.mxu1  ;;  %v3039_v54 = vpop.f32.mrf.mxu0 }
 0x4b5   :  { %v2133_v53 = vadd.f32 %v3038_v4, %v1946_v20  ;;  %v2177_v27 = vadd.f32 %v3063_v24, %v2128_v32  ;;  %v2438_v32 = vld [vmem:[%s5294_s10 + $0x28] sm:$0xff] }
 0x4b6   :  { %v3065_v36 = vpop.f32.mrf.mxu1  ;;  %v3040_v46 = vpop.f32.mrf.mxu0 }
 0x4b7   :  { %v3066_v60 = vadd.f32 %v3065_v36, %v3064_v34  ;;  %v3041_v28 = vadd.f32 %v3040_v46, %v3039_v54 }
 0x4b8   :  { %v3067_v21 = vpop.f32.mrf.mxu1 }
 0x4b9   :  { %v2182_v25 = vadd.f32 %v3066_v60, %v2133_v53  ;;  %v2136_v47 = vadd.f32 %v3041_v28, %v1951_v45 }
 0x4ba   :  { %v3068_v19 = vpop.f32.mrf.mxu1 }
 0x4bb   :  { %v3069_v38 = vadd.f32 %v3068_v19, %v3067_v21 }
 0x4bd   :  { %v2185_v31 = vadd.f32 %v3069_v38, %v2136_v47  ;;  %v2439_v47 = vld [vmem:[%s5294_s10 + $0x30] sm:$0xff] }
 0x522   :  { %v3086_v50 = vpop.f32.mrf.mxu0 }
 0x524   :  { %v3087_v23 = vpop.f32.mrf.mxu0 }
 0x525   :  { %v3088_v16 = vadd.f32 %v3087_v23, %v3086_v50 }
 0x526   :  { %v3114_v35 = vpop.f32.mrf.mxu1  ;;  %v3089_v37 = vpop.f32.mrf.mxu0 }
 0x527   :  { %v2223_v30 = vadd.f32 %v3088_v16, %v2174_v1  ;;  %v2435_v1 = vld [vmem:[%s5294_s10 + $0x10] sm:$0xff] }
 0x528   :  { %v3115_v63 = vpop.f32.mrf.mxu1  ;;  %v3090_v26 = vpop.f32.mrf.mxu0 }
 0x529   :  { %v3116_v29 = vadd.f32 %v3115_v63, %v3114_v35  ;;  %v3091_v59 = vadd.f32 %v3090_v26, %v3089_v37 }
 0x52a   :  { %v3117_v58 = vpop.f32.mrf.mxu1  ;;  %v3092_v56 = vpop.f32.mrf.mxu0 }
 0x52b   :  { %v2272_v36 = vadd.f32 %v3116_v29, %v2223_v30  ;;  %v2226_v19 = vadd.f32 %v3091_v59, %v2177_v27  ;;  %v2436_v29 = vld [vmem:[%s5294_s10 + $0x18] sm:$0xff] }
 0x52c   :  { %v3118_v14 = vpop.f32.mrf.mxu1  ;;  %v3093_v2 = vpop.f32.mrf.mxu0  ;;  %v2440_v59 = vld [vmem:[%s5294_s10 + $0x38] sm:$0xff] }
 0x52d   :  { %v3094_v17 = vadd.f32 %v3093_v2, %v3092_v56  ;;  %v3119_v15 = vadd.f32 %v3118_v14, %v3117_v58 }
 0x52e   :  { %v3120_v57 = vpop.f32.mrf.mxu1  ;;  %v3095_v39 = vpop.f32.mrf.mxu0 }
 0x52f   :  { %v2231_v3 = vadd.f32 %v3094_v17, %v2182_v25 }
 0x530   :  { %v3121_v40 = vpop.f32.mrf.mxu1  ;;  %v3096_v33 = vpop.f32.mrf.mxu0 }
 0x531   :  { %v3122_v22 = vadd.f32 %v3121_v40, %v3120_v57  ;;  %v3097_v5 = vadd.f32 %v3096_v33, %v3095_v39  ;;  %v2275_v39 = vadd.f32 %v3119_v15, %v2226_v19 }
 0x532   :  { %v3123_v8 = vpop.f32.mrf.mxu1 }
 0x533   :  { %v2280_v46 = vadd.f32 %v3122_v22, %v2231_v3  ;;  %v2234_v23 = vadd.f32 %v3097_v5, %v2185_v31  ;;  %v2437_v22 = vld [vmem:[%s5294_s10 + $0x20] sm:$0xff]  ;;  %v2607_v3 = vpop.permute.xlu1 %2606 }
 0x534   :  { %v3124_v6 = vpop.f32.mrf.mxu1  ;;  %v2761_v5 = vld [vmem:[%s5296_s11] sm:$0xff] }
 0x535   :  { %v3125_v21 = vadd.f32 %v3124_v6, %v3123_v8  ;;  %3264 = vmatprep.mubr.msk.f32.mxu1 %vm2765_vm15, %v2761_v5 }
 0x537   :  { %v2283_v20 = vadd.f32 %v3125_v21, %v2234_v23  ;;  %v2617_v15 = vpop.permute.xlu1 %2616 }
 0x542   :  { %v3142_v43 = vpop.f32.mrf.mxu0 }
 0x544   :  { %v3143_v51 = vpop.f32.mrf.mxu0 }
 0x545   :  { %v3144_v9 = vadd.f32 %v3143_v51, %v3142_v43 }
 0x546   :  { %v3145_v42 = vpop.f32.mrf.mxu0  ;;  %v3170_v52 = vpop.f32.mrf.mxu1 }
 0x547   :  { %v2321_v26 = vadd.f32 %v3144_v9, %v2272_v36 }
 0x548   :  { %v3146_v10 = vpop.f32.mrf.mxu0  ;;  %v3171_v62 = vpop.f32.mrf.mxu1 }
 0x549   :  { %v3172_v50 = vadd.f32 %v3171_v62, %v3170_v52  ;;  %v3147_v35 = vadd.f32 %v3146_v10, %v3145_v42 }
 0x54a   :  { %v3148_v18 = vpop.f32.mrf.mxu0  ;;  %v3173_v7 = vpop.f32.mrf.mxu1 }
 0x54b   :  { %v2370_v43 = vadd.f32 %v3172_v50, %v2321_v26  ;;  %v2324_v51 = vadd.f32 %v3147_v35, %v2275_v39  ;;  %v2627_v26 = vpop.permute.xlu1 %2626 }
 0x54c   :  { %v3149_v11 = vpop.f32.mrf.mxu0  ;;  %v3174_v12 = vpop.f32.mrf.mxu1 }
 0x54d   :  { %v3150_v0 = vadd.f32 %v3149_v11, %v3148_v18  ;;  %v3175_v58 = vadd.f32 %v3174_v12, %v3173_v7  ;;  %v2434_v7 = vld [vmem:[%s5294_s10 + $0x8] sm:$0xff]  ;;  %v2612_v12 = vpop.permute.xlu0 %2611 }
 0x54e   :  { %v3151_v34 = vpop.f32.mrf.mxu0  ;;  %v3176_v54 = vpop.f32.mrf.mxu1 }
 0x54f   :  { %v2329_v56 = vadd.f32 %v3150_v0, %v2280_v46  ;;  %v2373_v61 = vadd.f32 %v3175_v58, %v2324_v51 }
 0x550   :  { %v3152_v37 = vpop.f32.mrf.mxu0  ;;  %v3177_v63 = vpop.f32.mrf.mxu1 }
 0x551   :  { %v3153_v2 = vadd.f32 %v3152_v37, %v3151_v34  ;;  %v3178_v57 = vadd.f32 %v3177_v63, %v3176_v54  ;;  %v2622_v27 = vpop.permute.xlu0 %2621 }
 0x552   :  { %v3179_v40 = vpop.f32.mrf.mxu1  ;;  %v3226_v33 = vpop.f32.mrf.mxu0 }
 0x553   :  { %v2378_v14 = vadd.f32 %v3178_v57, %v2329_v56  ;;  %v2332_v45 = vadd.f32 %v3153_v2, %v2283_v20 }
 0x554   :  { %v3180_v8 = vpop.f32.mrf.mxu1  ;;  %v2418_v6 = vpop.f32.mrf.mxu0 }
 0x555   :  { %v2427_v13 = vadd.f32 %v3226_v33, %v2378_v14  ;;  %v3181_v4 = vadd.f32 %v3180_v8, %v3179_v40  ;;  %v2419_v42 = vadd.f32 %v2418_v6, %v2370_v43  ;;  %v2632_v21 = vpop.permute.xlu0 %2631 }
 0x556   :  { %v3227_v52 = vpop.f32.mrf.mxu0 }
 0x557   :  { %2865 = vst.msk [vmem:[%s5295_s13 + $0x10] sm:$0xff] %vm2574_vm14, %v2427_v13  ;;  %2863 = vst.msk [vmem:[%s5295_s13] sm:$0xff] %vm2574_vm14, %v2419_v42  ;;  %v2381_v55 = vadd.f32 %v3181_v4, %v2332_v45  ;;  %v2570_v41 = vmul.f32 %v2419_v42, %v2419_v42  ;;  %v2572_v62 = vmul.f32 %v2427_v13, %v2427_v13 }
 0x558   :  { %v2421_v60 = vpop.f32.mrf.mxu0 }
 0x559   :  { %v2430_v28 = vadd.f32 %v3227_v52, %v2381_v55  ;;  %v2422_v10 = vadd.f32 %v2421_v60, %v2373_v61  ;;  %v2575_v53 = vsel %vm2574_vm14, %v2570_v41, 0.0  ;;  %v2578_v38 = vsel %vm2574_vm14, %v2572_v62, 0.0  ;;  %v2642_v8 = vpop.permute.xlu0 %2641  ;;  %v2637_v55 = vpop.permute.xlu1 %2636 }
 0x55b   :  { %2866 = vst.msk [vmem:[%s5295_s13 + $0x18] sm:$0xff] %vm2574_vm14, %v2430_v28  ;;  %v2571_v44 = vmul.f32 %v2422_v10, %v2422_v10  ;;  %2864 = vst.msk [vmem:[%s5295_s13 + $0x8] sm:$0xff] %vm2574_vm14, %v2422_v10  ;;  %3228 = vmatprep.subr.mxu0 %v2430_v28  ;;  %v2573_v16 = vmul.f32 %v2430_v28, %v2430_v28 }
 0x55c   :  { %3229 = vmatpush3.msra.mxu0 %v2430_v28 }
 0x55d   :  { %v2576_v17 = vsel %vm2574_vm14, %v2571_v44, 0.0  ;;  %3230 = vmatprep.subr.mxu0 %v2427_v13  ;;  %v2580_v49 = vsel %vm2574_vm14, %v2573_v16, 0.0 }
 0x55e   :  { %v2577_v24 = vadd.f32 %v2576_v17, %v2575_v53  ;;  %3231 = vmatpush3.msra.mxu0 %v2427_v13 }
 0x55f   :  { %3232 = vmatprep.subr.mxu0 %v2422_v10 }
 0x560   :  { %v2579_v18 = vadd.f32 %v2578_v38, %v2577_v24  ;;  %3233 = vmatpush3.msra.mxu0 %v2422_v10 }
 0x561   :  { %3234 = vmatprep.subr.mxu0 %v2419_v42 }
 0x562   :  { %v2581_v25 = vadd.f32 %v2580_v49, %v2579_v18  ;;  %3235 = vmatpush3.msra.mxu0 %v2419_v42 }
 0x563   :  { %3237 = vmatmul.mubr.msk.f32.vlgmr.msra.gmra.mxu0 %vm2083_vm13, %v2434_v7 }
 0x564   :  { %3239 = vmatprep.mubr.msk.f32.mxu0 %vm2083_vm13, %v2435_v1  ;;  %v2582_v11 = vrot.slane %v2581_v25, 4 }
 0x566   :  { %v2583_v30 = vadd.f32 %v2582_v11, %v2581_v25 }
 0x567   :  { %3240 = vmatmul.mubr.msk.f32.gmra.mxu0 %vm2083_vm13, %v2436_v29 }
 0x568   :  { %3242 = vmatprep.mubr.msk.f32.mxu0 %vm2083_vm13, %v2437_v22  ;;  %v2584_v9 = vrot.slane %v2583_v30, 2 }
 0x56a   :  { %v2585_v34 = vadd.f32 %v2584_v9, %v2583_v30  ;;  %v2688_v9 = vadd.s32 48, %v4289_v48 }
 0x56b   :  { %3243 = vmatmul.mubr.msk.f32.gmra.mxu0 %vm2083_vm13, %v2438_v32 }
 0x56c   :  { %3245 = vmatprep.mubr.msk.f32.mxu0 %vm2083_vm13, %v2439_v47  ;;  %v2586_v50 = vrot.slane %v2585_v34, 1 }
 0x56e   :  { %v2587_v40 = vadd.f32 %v2586_v50, %v2585_v34  ;;  %v2687_v34 = vadd.s32 40, %v4289_v48 }
 0x56f   :  { %3246 = vmatmul.mubr.msk.f32.gmra.mxu0 %vm2083_vm13, %v2440_v59 }
 0x623   :  { %v3238_v0 = vpop.f32.mrf.mxu0 }
 0x624   :  { %v2597_v19 = vmul.f32 2.0, %v3238_v0 }
 0x625   :  { %v2531_v31 = vpop.f32.mrf.mxu0 }
 0x626   :  { %v2596_v36 = vmul.f32 2.0, %v2531_v31  ;;  %v2645_v33 = vsub.f32 %v2612_v12, %v2597_v19  ;;  %v5230_v31 = vadd.s32 24, %v4289_v48 }
 0x627   :  { %v3241_v54 = vpop.f32.mrf.mxu0 }
 0x628   :  { %v2599_v23 = vmul.f32 2.0, %v3241_v54  ;;  %v2644_v56 = vsub.f32 %v2607_v3, %v2596_v36  ;;  %v2653_v61 = vadd.f32 %v2645_v33, %v2587_v40  ;;  %v5223_v3 = vadd.s32 16, %v4289_v48 }
 0x629   :  { %v2541_v46 = vpop.f32.mrf.mxu0  ;;  %v2689_v54 = vadd.s32 56, %v4289_v48 }
 0x62a   :  { %v2598_v37 = vmul.f32 2.0, %v2541_v46  ;;  %v2647_v20 = vsub.f32 %v2622_v27, %v2599_v23  ;;  %v2652_v6 = vadd.f32 %v2644_v56, %v2587_v40  ;;  %v2661_v38 = vsel %vm2574_vm14, %v2653_v61, inf }
 0x62b   :  { %v3244_v35 = vpop.f32.mrf.mxu0  ;;  %v5227_v27 = vadd.s32 8, %v4289_v48 }
 0x62c   :  { %v2601_v63 = vmul.f32 2.0, %v3244_v35  ;;  %v2646_v14 = vsub.f32 %v2617_v15, %v2598_v37  ;;  %v2655_v60 = vadd.f32 %v2647_v20, %v2587_v40  ;;  %v2660_v44 = vsel %vm2574_vm14, %v2652_v6, inf }
 0x62d   :  { %v2551_v2 = vpop.f32.mrf.mxu0  ;;  %v5233_v15 = vadd.s32 32, %v4289_v48 }
 0x62e   :  { %v2649_v57 = vsub.f32 %v2632_v21, %v2601_v63  ;;  %v2600_v39 = vmul.f32 2.0, %v2551_v2  ;;  %v2654_v41 = vadd.f32 %v2646_v14, %v2587_v40  ;;  %v2663_v18 = vsel %vm2574_vm14, %v2655_v60, inf }
 0x62f   :  { %v3247_v58 = vpop.f32.mrf.mxu0 }
 0x630   :  { %v2648_v43 = vsub.f32 %v2627_v26, %v2600_v39  ;;  %v2603_v51 = vmul.f32 2.0, %v3247_v58  ;;  %v2657_v13 = vadd.f32 %v2649_v57, %v2587_v40  ;;  %v2662_v7 = vsel %vm2574_vm14, %v2654_v41, inf }
 0x631   :  { %v2561_v45 = vpop.f32.mrf.mxu0 }
 0x632   :  { %v2656_v4 = vadd.f32 %v2648_v43, %v2587_v40  ;;  %v2651_v42 = vsub.f32 %v2642_v8, %v2603_v51  ;;  %v2602_v52 = vmul.f32 2.0, %v2561_v45  ;;  %v2666_v53 = vsel %vm2574_vm14, %v2657_v13, inf }
 0x633   :  { %v2667_v1 = vmin.f32 %v2661_v38, %v2666_v53 }
 0x634   :  { %v2664_v28 = vsel %vm2574_vm14, %v2656_v4, inf  ;;  %v2659_v10 = vadd.f32 %v2651_v42, %v2587_v40  ;;  %v2650_v62 = vsub.f32 %v2637_v55, %v2602_v52 }
 0x635   :  { %v2665_v24 = vmin.f32 %v2660_v44, %v2664_v28  ;;  %v2764_v28 = vld [vmem:[%s5296_s11 + $0x18] sm:$0xff] }
 0x636   :  { %v2670_v16 = vsel %vm2574_vm14, %v2659_v10, inf  ;;  %v2658_v17 = vadd.f32 %v2650_v62, %v2587_v40 }
 0x637   :  { %v2671_v25 = vmin.f32 %v2663_v18, %v2670_v16  ;;  %v2672_v22 = vmin.f32 %v2665_v24, %v2667_v1 }
 0x638   :  { %v2668_v49 = vsel %vm2574_vm14, %v2658_v17, inf }
 0x639   :  { %v2669_v29 = vmin.f32 %v2662_v7, %v2668_v49 }
 0x63b   :  { %v2673_v32 = vmin.f32 %v2669_v29, %v2671_v25 }
 0x63d   :  { %v2674_v47 = vmin.f32 %v2672_v22, %v2673_v32 }
 0x63f   :  { %v2675_v59 = vrot.slane %v2674_v47, 4 }
 0x641   :  { %v2676_v5 = vmin.f32 %v2674_v47, %v2675_v59 }
 0x643   :  { %v2677_v11 = vrot.slane %v2676_v5, 2 }
 0x645   :  { %v2678_v12 = vmin.f32 %v2676_v5, %v2677_v11 }
 0x647   :  { %v2679_v30 = vrot.slane %v2678_v12, 1 }
 0x649   :  { %v2680_v0 = vmin.f32 %v2678_v12, %v2679_v30 }
 0x64b   :  { %vm2692_vm0 = vcmp.eq.f32.partialorder %v2654_v41, %v2680_v0  ;;  %vm2696_vm1 = vcmp.eq.f32.partialorder %v2658_v17, %v2680_v0  ;;  %vm2690_vm2 = vcmp.eq.f32.partialorder %v2652_v6, %v2680_v0  ;;  %vm2691_vm3 = vcmp.eq.f32.partialorder %v2653_v61, %v2680_v0  ;;  %v2763_v41 = vld [vmem:[%s5296_s11 + $0x10] sm:$0xff] }
 0x64c   :  { %v2700_v36 = vsel %vm2692_vm0, %v5223_v3, 64  ;;  %v2704_v46 = vsel %vm2696_vm1, %v2688_v9, 64  ;;  %vm2693_vm4 = vcmp.eq.f32.partialorder %v2655_v60, %v2680_v0  ;;  %vm2694_vm5 = vcmp.eq.f32.partialorder %v2656_v4, %v2680_v0  ;;  %v2762_v60 = vld [vmem:[%s5296_s11 + $0x8] sm:$0xff] }
 0x64d   :  { %v2708_v21 = vsel %vm2574_vm14, %v2700_v36, 2147483647  ;;  %v2716_v50 = vsel %vm2574_vm14, %v2704_v46, 2147483647  ;;  %vm2695_vm6 = vcmp.eq.f32.partialorder %v2657_v13, %v2680_v0  ;;  %vm2697_vm7 = vcmp.eq.f32.partialorder %v2659_v10, %v2680_v0 }
 0x64e   :  { %vm2717_vm8 = vcmp.lt.s32.totalorder %v2708_v21, %v2716_v50  ;;  %v2698_v19 = vsel %vm2690_vm2, %v4289_v48, 64  ;;  %v2699_v23 = vsel %vm2691_vm3, %v5227_v27, 64  ;;  %v2701_v35 = vsel %vm2693_vm4, %v5230_v31, 64 }
 0x64f   :  { %v2702_v37 = vsel %vm2694_vm5, %v5233_v15, 64  ;;  %v2703_v63 = vsel %vm2695_vm6, %v2687_v34, 64  ;;  %v2705_v26 = vsel %vm2697_vm7, %v2689_v54, 64  ;;  %v2706_v56 = vsel %vm2574_vm14, %v2698_v19, 2147483647 }
 0x650   :  { %v2707_v2 = vsel %vm2574_vm14, %v2699_v23, 2147483647  ;;  %v2709_v57 = vsel %vm2574_vm14, %v2701_v35, 2147483647  ;;  %v2718_v39 = vsel %vm2717_vm8, %v2708_v21, %v2716_v50  ;;  %v2710_v40 = vsel %vm2574_vm14, %v2702_v37, 2147483647 }
 0x651   :  { %v2713_v33 = vsel %vm2574_vm14, %v2703_v63, 2147483647  ;;  %v2719_v20 = vsel %vm2574_vm14, %v2705_v26, 2147483647  ;;  %vm2711_vm9 = vcmp.lt.s32.totalorder %v2706_v56, %v2710_v40  ;;  %v4064_v61 = vmov 1.0  }
 0x652   :  { %vm2714_vm10 = vcmp.lt.s32.totalorder %v2707_v2, %v2713_v33  ;;  %vm2720_vm11 = vcmp.lt.s32.totalorder %v2709_v57, %v2719_v20  ;;  %v2712_v58 = vsel %vm2711_vm9, %v2706_v56, %v2710_v40 }
 0x653   :  { %v2715_v14 = vsel %vm2714_vm10, %v2707_v2, %v2713_v33  ;;  %v2721_v43 = vsel %vm2720_vm11, %v2709_v57, %v2719_v20 }
 0x654   :  { %vm2722_vm12 = vcmp.lt.s32.totalorder %v2712_v58, %v2715_v14  ;;  %vm2724_vm13 = vcmp.lt.s32.totalorder %v2718_v39, %v2721_v43 }
 0x655   :  { %v2723_v51 = vsel %vm2722_vm12, %v2712_v58, %v2715_v14  ;;  %v2725_v8 = vsel %vm2724_vm13, %v2718_v39, %v2721_v43 }
 0x656   :  { %vm2726_vm0 = vcmp.lt.s32.totalorder %v2723_v51, %v2725_v8 }
 0x657   :  { %v2727_v6 = vsel %vm2726_vm0, %v2723_v51, %v2725_v8 }
 0x658   :  { %v2728_v45 = vrot.slane %v2727_v6, 4 }
 0x65a   :  { %vm2729_vm1 = vcmp.lt.s32.totalorder %v2727_v6, %v2728_v45 }
 0x65b   :  { %v2730_v13 = vsel %vm2729_vm1, %v2727_v6, %v2728_v45 }
 0x65c   :  { %v2731_v4 = vrot.slane %v2730_v13, 2 }
 0x65e   :  { %vm2732_vm2 = vcmp.lt.s32.totalorder %v2730_v13, %v2731_v4 }
 0x65f   :  { %v2733_v42 = vsel %vm2732_vm2, %v2730_v13, %v2731_v4 }
 0x660   :  { %v2734_v52 = vrot.slane %v2733_v42, 1 }
 0x662   :  { %vm2735_vm3 = vcmp.lt.s32.totalorder %v2733_v42, %v2734_v52 }
 0x663   :  { %v2736_v55 = vsel %vm2735_vm3, %v2733_v42, %v2734_v52 }
 0x664   :  { %vm2744_vm4 = vcmp.eq.s32.totalorder %v2689_v54, %v2736_v55  ;;  %vm2743_vm5 = vcmp.eq.s32.totalorder %v2688_v9, %v2736_v55  ;;  %vm2742_vm6 = vcmp.eq.s32.totalorder %v2687_v34, %v2736_v55  ;;  %vm2741_vm7 = vcmp.eq.s32.totalorder %v5233_v15, %v2736_v55 }
 0x665   :  { %3248 = vmatprep.subr.msk.mxu1 %vm2744_vm4, %v4064_v61  ;;  %vm2740_vm8 = vcmp.eq.s32.totalorder %v5230_v31, %v2736_v55  ;;  %vm2739_vm9 = vcmp.eq.s32.totalorder %v5223_v3, %v2736_v55  ;;  %vm2738_vm10 = vcmp.eq.s32.totalorder %v5227_v27, %v2736_v55  ;;  %vm2737_vm11 = vcmp.eq.s32.totalorder %v4289_v48, %v2736_v55 }
 0x666   :  { %3249 = vmatpush3.msk.msra.mxu1 %vm2744_vm4, %v4064_v61 }
 0x667   :  { %3250 = vmatprep.subr.msk.mxu1 %vm2743_vm5, %v4064_v61 }
 0x668   :  { %3251 = vmatpush3.msk.msra.mxu1 %vm2743_vm5, %v4064_v61 }
 0x669   :  { %3252 = vmatprep.subr.msk.mxu1 %vm2742_vm6, %v4064_v61 }
 0x66a   :  { %3253 = vmatpush3.msk.msra.mxu1 %vm2742_vm6, %v4064_v61 }
 0x66b   :  { %3254 = vmatprep.subr.msk.mxu1 %vm2741_vm7, %v4064_v61 }
 0x66c   :  { %3255 = vmatpush3.msk.msra.mxu1 %vm2741_vm7, %v4064_v61 }
 0x66d   :  { %3256 = vmatprep.subr.msk.mxu1 %vm2740_vm8, %v4064_v61 }
 0x66e   :  { %3257 = vmatpush3.msk.msra.mxu1 %vm2740_vm8, %v4064_v61 }
 0x66f   :  { %3258 = vmatprep.subr.msk.mxu1 %vm2739_vm9, %v4064_v61 }
 0x670   :  { %3259 = vmatpush3.msk.msra.mxu1 %vm2739_vm9, %v4064_v61 }
 0x671   :  { %3260 = vmatprep.subr.msk.mxu1 %vm2738_vm10, %v4064_v61 }
 0x672   :  { %3261 = vmatpush3.msk.msra.mxu1 %vm2738_vm10, %v4064_v61 }
 0x673   :  { %3262 = vmatprep.subr.msk.mxu1 %vm2737_vm11, %v4064_v61 }
 0x674   :  { %3263 = vmatpush3.msk.msra.mxu1 %vm2737_vm11, %v4064_v61 }
 0x675   :  { %3265 = vmatmul.mubr.msk.f32.vlgmr.msra.gmra.mxu1 %vm2765_vm15, %v2762_v60 }
 0x676   :  { %3267 = vmatprep.mubr.msk.f32.mxu1 %vm2765_vm15, %v2763_v41 }
 0x679   :  { %3268 = vmatmul.mubr.msk.f32.gmra.mxu1 %vm2765_vm15, %v2764_v28 }
 0x735   :  { %v3266_v48 = vpop.f32.mrf.mxu1 }
 0x736   :  { %2868 = vst.msk [vmem:[%s5295_s13 + $0x28] sm:$0xff] %vm2574_vm14, %v3266_v48 }
 0x737   :  { %v2844_v10 = vpop.f32.mrf.mxu1 }
 0x738   :  { %2867 = vst.msk [vmem:[%s5295_s13 + $0x20] sm:$0xff] %vm2574_vm14, %v2844_v10 }
 0x739   :  { %v3269_v62 = vpop.f32.mrf.mxu1 }
 0x73a   :  { %2870 = vst.msk [vmem:[%s5295_s13 + $0x38] sm:$0xff] %vm2574_vm14, %v3269_v62 }
 0x73b   :  { %v2854_v44 = vpop.f32.mrf.mxu1 }
 0x73c   :  { %2869 = vst.msk [vmem:[%s5295_s13 + $0x30] sm:$0xff] %vm2574_vm14, %v2854_v44 }

// kernel: vqvae_gan_forward.3
= control target key start
LH: loop header
LB: loop body
LE: loop exit
PB: predicated region body
PF: predicated region fallthrough
CT: control target
= control target key end

     0   :  { %vm731_vm0 = vcmask 261120   ;;  %s8833_s16 = smov 4   ;;  %s8834_s21 = smov 6   ;;  %vm2083_vm1 = vcmask 15360   ;;  %vm2088_vm2 = vcmask 31744   ;;  %vm2093_vm3 = vcmask 48128   ;;  %s12820_s0 = inlined_call_operand.vmem [shape: f32[32,2], index: 0, kind: input, shape index: {}]   ;;  %s12821_s1 = inlined_call_operand.vmem [shape: bf16[1568,32], index: 1, kind: input, shape index: {}]   ;;  %s12822_s2 = inlined_call_operand.vmem [shape: f32[32,1], index: 2, kind: input, shape index: {}]   ;;  %s12823_s3 = inlined_call_operand.vmem [shape: f32[32,1], index: 3, kind: input, shape index: {}]   ;;  %s12824_s4 = inlined_call_operand.vmem [shape: f32[32,1], index: 4, kind: input, shape index: {}]   ;;  %s12825_s5 = inlined_call_operand.vmem [shape: bf16[4,16,128], index: 5, kind: input, shape index: {}]   ;;  %s12826_s6 = inlined_call_operand.vmem [shape: f32[16,1], index: 6, kind: input, shape index: {}]   ;;  %s12827_s7 = inlined_call_operand.vmem [shape: f32[16,1], index: 7, kind: input, shape index: {}]   ;;  %s12828_s8 = inlined_call_operand.vmem [shape: f32[16,1], index: 8, kind: input, shape index: {}]   ;;  %s12829_s9 = inlined_call_operand.vmem [shape: bf16[4,3,64], index: 9, kind: input, shape index: {}]   ;;  %s12830_s10 = inlined_call_operand.vmem [shape: f32[3,1], index: 10, kind: input, shape index: {}]   ;;  %s12831_s11 = inlined_call_operand.vmem [shape: f32[48,128], index: 11, kind: output, shape index: {}]  }
   0x1   :  { %v41_v0 = vld [vmem:[%s12820_s0 + $0x10] sm:$0xff]  ;;  %v42_v1 = vld [vmem:[%s12820_s0 + $0x18] sm:$0xff]  ;;  %v39_v2 = vld [vmem:[%s12820_s0] sm:$0xff]  ;;  %s8835_s26 = smov 8   ;;  %s8836_s12 = smov 10   ;;  %vm2098_vm4 = vcmask 64512  }
   0x2   :  { %v44_v3 = vpack.c.bf16 %v42_v1, %v41_v0  ;;  %v40_v4 = vld [vmem:[%s12820_s0 + $0x8] sm:$0xff]  ;;  %v8686_v6 = vld [vmem:[%s12821_s1] sm:$0xff]   ;;  %v8688_v8 = vld [vmem:[%s12821_s1 + $0x10] sm:$0xff]   ;;  %s8832_s0 = smov 2   ;;  %s8837_s18 = smov 12   ;;  %vm2103_vm5 = vcmask 80896  }
   0x3   :  { %v43_v5 = vpack.c.bf16 %v40_v4, %v39_v2  ;;  %6896 = vmatprep.mubr.msk.bf16.mxu0 %vm731_vm0, %v8686_v6  ;;  %v8687_v7 = vld [vmem:[%s12821_s1 + $0x8] sm:$0xff]   ;;  %v8689_v9 = vld [vmem:[%s12821_s1 + $0x18] sm:$0xff]   ;;  %v8690_v10 = vld [vmem:[%s12821_s1 + $0x20] sm:$0xff]   ;;  %s8838_s24 = smov 14   ;;  %s8839_s30 = smov 16   ;;  %vm2108_vm6 = vcmask 97280  }
   0x4   :  { %6892 = vmatprep.subr.bf16.mxu0 %v44_v3  ;;  %v8691_v11 = vld [vmem:[%s12821_s1 + $0x28] sm:$0xff]   ;;  %v8692_v12 = vld [vmem:[%s12821_s1 + $0x30] sm:$0xff]   ;;  %v8693_v13 = vld [vmem:[%s12821_s1 + $0x38] sm:$0xff]   ;;  %s8840_s19 = smov 18   ;;  %s8841_s27 = smov 20   ;;  %vm2113_vm7 = vcmask 113664  }
   0x5   :  { %6893 = vmatpush3.bf16.msra.mxu0 %v44_v3  ;;  %v8694_v14 = vld [vmem:[%s12821_s1 + $0x40] sm:$0xff]   ;;  %v8695_v15 = vld [vmem:[%s12821_s1 + $0x48] sm:$0xff]   ;;  %v8696_v16 = vld [vmem:[%s12821_s1 + $0x50] sm:$0xff]   ;;  %s8842_s15 = smov 22   ;;  %s8843_s25 = smov 24   ;;  %vm2118_vm8 = vcmask 130048  }
   0x6   :  { %6894 = vmatprep.subr.bf16.mxu0 %v43_v5  ;;  %v8697_v17 = vld [vmem:[%s12821_s1 + $0x58] sm:$0xff]   ;;  %v8698_v18 = vld [vmem:[%s12821_s1 + $0x60] sm:$0xff]   ;;  %v8699_v19 = vld [vmem:[%s12821_s1 + $0x68] sm:$0xff]   ;;  %s8844_s17 = smov 26   ;;  %s8845_s29 = smov 28   ;;  %vm2123_vm9 = vcmask 146432  }
   0x7   :  { %v8700_v20 = vld [vmem:[%s12821_s1 + $0x70] sm:$0xff]   ;;  %v8701_v21 = vld [vmem:[%s12821_s1 + $0x78] sm:$0xff]   ;;  %v8702_v22 = vld [vmem:[%s12821_s1 + $0x80] sm:$0xff]   ;;  %vm2128_vm10 = vcmask 162816   ;;  %vm2133_vm11 = vcmask 179200   ;;  %vm2138_vm12 = vcmask 195584  }
   0x8   :  { %v8703_v23 = vld [vmem:[%s12821_s1 + $0x88] sm:$0xff]   ;;  %v8704_v24 = vld [vmem:[%s12821_s1 + $0x90] sm:$0xff]   ;;  %v8705_v25 = vld [vmem:[%s12821_s1 + $0x98] sm:$0xff]   ;;  %vm2143_vm13 = vcmask 211968   ;;  %vm2148_vm14 = vcmask 228352   ;;  %vm2153_vm15 = vcmask 244736  }
   0x9   :  { %6895 = vmatpush3.bf16.msra.mxu0 %v43_v5  ;;  %v8706_v26 = vld [vmem:[%s12821_s1 + $0xa0] sm:$0xff]   ;;  %v8707_v27 = vld [vmem:[%s12821_s1 + $0xa8] sm:$0xff]   ;;  %v8708_v28 = vld [vmem:[%s12821_s1 + $0xb0] sm:$0xff]   ;;  %s8850_s22 = smov 64   ;;  %s12832_s20 = smov 54  }
   0xa   :  { %v8709_v29 = vld [vmem:[%s12821_s1 + $0xb8] sm:$0xff]   ;;  %v8710_v30 = vld [vmem:[%s12821_s1 + $0xc0] sm:$0xff]   ;;  %v8711_v31 = vld [vmem:[%s12821_s1 + $0xc8] sm:$0xff]   ;;  %s8859_s23 = smov 72   ;;  %s12848_s28 = smov 90  }
   0xb   :  { %v8712_v32 = vld [vmem:[%s12821_s1 + $0xd0] sm:$0xff]   ;;  %v8713_v33 = vld [vmem:[%s12821_s1 + $0xd8] sm:$0xff]   ;;  %v8714_v34 = vld [vmem:[%s12821_s1 + $0xe0] sm:$0xff]   ;;  %s8861_s13 = smov 108   ;;  %s12844_s14 = smov 126  }
   0xc   :  { %6897 = vmatmul.mubr.msk.bf16.vlgmr.msra.gmra.mxu0 %vm731_vm0, %v8687_v7  ;;  %v8715_v35 = vld [vmem:[%s12821_s1 + $0xe8] sm:$0xff]   ;;  %v8716_v36 = vld [vmem:[%s12821_s1 + $0xf0] sm:$0xff]   ;;  %v8717_v37 = vld [vmem:[%s12821_s1 + $0xf8] sm:$0xff]  }
   0xd   :  { %6900 = vmatprep.mubr.msk.bf16.mxu0 %vm731_vm0, %v8688_v8  ;;  %v8718_v38 = vld [vmem:[%s12821_s1 + $0x100] sm:$0xff]   ;;  %v8719_v39 = vld [vmem:[%s12821_s1 + $0x108] sm:$0xff]   ;;  %v8720_v40 = vld [vmem:[%s12821_s1 + $0x110] sm:$0xff]  }
   0xe   :  { %v8721_v41 = vld [vmem:[%s12821_s1 + $0x118] sm:$0xff]   ;;  %v8722_v42 = vld [vmem:[%s12821_s1 + $0x120] sm:$0xff]   ;;  %v8723_v43 = vld [vmem:[%s12821_s1 + $0x128] sm:$0xff]  }
   0xf   :  { %v8724_v44 = vld [vmem:[%s12821_s1 + $0x130] sm:$0xff]   ;;  %v8725_v45 = vld [vmem:[%s12821_s1 + $0x138] sm:$0xff]   ;;  %v8726_v46 = vld [vmem:[%s12821_s1 + $0x140] sm:$0xff]  }
  0x10   :  { %v8727_v47 = vld [vmem:[%s12821_s1 + $0x148] sm:$0xff]   ;;  %v8728_v48 = vld [vmem:[%s12821_s1 + $0x150] sm:$0xff]   ;;  %v8729_v49 = vld [vmem:[%s12821_s1 + $0x158] sm:$0xff]  }
  0x11   :  { %v8730_v50 = vld [vmem:[%s12821_s1 + $0x160] sm:$0xff]   ;;  %v8731_v51 = vld [vmem:[%s12821_s1 + $0x168] sm:$0xff]   ;;  %v8732_v52 = vld [vmem:[%s12821_s1 + $0x170] sm:$0xff]  }
  0x12   :  { %v8733_v53 = vld [vmem:[%s12821_s1 + $0x178] sm:$0xff]   ;;  %v8734_v54 = vld [vmem:[%s12821_s1 + $0x180] sm:$0xff]   ;;  %v8735_v55 = vld [vmem:[%s12821_s1 + $0x188] sm:$0xff]  }
  0x13   :  { %v8736_v56 = vld [vmem:[%s12821_s1 + $0x190] sm:$0xff]   ;;  %v8737_v60 = vld [vmem:[%s12821_s1 + $0x198] sm:$0xff]   ;;  %v8738_v61 = vld [vmem:[%s12821_s1 + $0x1a0] sm:$0xff]  }
  0x14   :  { %6901 = vmatmul.mubr.msk.bf16.gmra.mxu0 %vm731_vm0, %v8689_v9  ;;  %v8739_v2 = vld [vmem:[%s12821_s1 + $0x1a8] sm:$0xff]   ;;  %v8740_v3 = vld [vmem:[%s12821_s1 + $0x1b0] sm:$0xff]   ;;  %v8741_v8 = vld [vmem:[%s12821_s1 + $0x1b8] sm:$0xff]  }
  0x15   :  { %6904 = vmatprep.mubr.msk.bf16.mxu0 %vm731_vm0, %v8690_v10  ;;  %v8742_v9 = vld [vmem:[%s12821_s1 + $0x1c0] sm:$0xff]  }
  0x1c   :  { %6905 = vmatmul.mubr.msk.bf16.gmra.mxu0 %vm731_vm0, %v8691_v11 }
  0x1d   :  { %6908 = vmatprep.mubr.msk.bf16.mxu0 %vm731_vm0, %v8692_v12 }
  0x24   :  { %6909 = vmatmul.mubr.msk.bf16.gmra.mxu0 %vm731_vm0, %v8693_v13 }
  0x25   :  { %6912 = vmatprep.mubr.msk.bf16.mxu0 %vm731_vm0, %v8694_v14  ;;  %v8743_v14 = vld [vmem:[%s12821_s1 + $0x1c8] sm:$0xff]  }
  0x2c   :  { %6913 = vmatmul.mubr.msk.bf16.gmra.mxu0 %vm731_vm0, %v8695_v15  ;;  %v8744_v15 = vld [vmem:[%s12821_s1 + $0x1d0] sm:$0xff]  }
  0x2d   :  { %6916 = vmatprep.mubr.msk.bf16.mxu0 %vm731_vm0, %v8696_v16 }
  0x34   :  { %6917 = vmatmul.mubr.msk.bf16.gmra.mxu0 %vm731_vm0, %v8697_v17 }
  0x35   :  { %6920 = vmatprep.mubr.msk.bf16.mxu0 %vm731_vm0, %v8698_v18 }
  0x3c   :  { %6921 = vmatmul.mubr.msk.bf16.gmra.mxu0 %vm731_vm0, %v8699_v19 }
  0x3d   :  { %6924 = vmatprep.mubr.msk.bf16.mxu0 %vm731_vm0, %v8700_v20  ;;  %v8745_v20 = vld [vmem:[%s12821_s1 + $0x1d8] sm:$0xff]  }
  0x44   :  { %6925 = vmatmul.mubr.msk.bf16.gmra.mxu0 %vm731_vm0, %v8701_v21  ;;  %v8746_v21 = vld [vmem:[%s12821_s1 + $0x1e0] sm:$0xff]  }
  0x45   :  { %6928 = vmatprep.mubr.msk.bf16.mxu0 %vm731_vm0, %v8702_v22 }
  0x4c   :  { %6929 = vmatmul.mubr.msk.bf16.gmra.mxu0 %vm731_vm0, %v8703_v23 }
  0x4d   :  { %6932 = vmatprep.mubr.msk.bf16.mxu0 %vm731_vm0, %v8704_v24 }
  0x54   :  { %6933 = vmatmul.mubr.msk.bf16.gmra.mxu0 %vm731_vm0, %v8705_v25 }
  0x55   :  { %6936 = vmatprep.mubr.msk.bf16.mxu0 %vm731_vm0, %v8706_v26  ;;  %v8747_v26 = vld [vmem:[%s12821_s1 + $0x1e8] sm:$0xff]  }
  0x5c   :  { %6937 = vmatmul.mubr.msk.bf16.gmra.mxu0 %vm731_vm0, %v8707_v27  ;;  %v8748_v27 = vld [vmem:[%s12821_s1 + $0x1f0] sm:$0xff]  }
  0x5d   :  { %6940 = vmatprep.mubr.msk.bf16.mxu0 %vm731_vm0, %v8708_v28 }
  0x64   :  { %6941 = vmatmul.mubr.msk.bf16.gmra.mxu0 %vm731_vm0, %v8709_v29 }
  0x65   :  { %6944 = vmatprep.mubr.msk.bf16.mxu0 %vm731_vm0, %v8710_v30 }
  0x6c   :  { %6945 = vmatmul.mubr.msk.bf16.gmra.mxu0 %vm731_vm0, %v8711_v31 }
  0x6d   :  { %6948 = vmatprep.mubr.msk.bf16.mxu0 %vm731_vm0, %v8712_v32  ;;  %v8749_v32 = vld [vmem:[%s12821_s1 + $0x1f8] sm:$0xff]  }
  0x74   :  { %6949 = vmatmul.mubr.msk.bf16.gmra.mxu0 %vm731_vm0, %v8713_v33  ;;  %v8750_v33 = vld [vmem:[%s12821_s1 + $0x200] sm:$0xff]  }
  0x75   :  { %6952 = vmatprep.mubr.msk.bf16.mxu0 %vm731_vm0, %v8714_v34 }
  0x7c   :  { %6953 = vmatmul.mubr.msk.bf16.gmra.mxu0 %vm731_vm0, %v8715_v35 }
  0x7d   :  { %6956 = vmatprep.mubr.msk.bf16.mxu0 %vm731_vm0, %v8716_v36 }
  0x84   :  { %6957 = vmatmul.mubr.msk.bf16.gmra.mxu0 %vm731_vm0, %v8717_v37 }
  0x85   :  { %6960 = vmatprep.mubr.msk.bf16.mxu0 %vm731_vm0, %v8718_v38  ;;  %v8751_v38 = vld [vmem:[%s12821_s1 + $0x208] sm:$0xff]  }
  0x8c   :  { %6961 = vmatmul.mubr.msk.bf16.gmra.mxu0 %vm731_vm0, %v8719_v39  ;;  %v8752_v39 = vld [vmem:[%s12821_s1 + $0x210] sm:$0xff]  }
  0x8d   :  { %6964 = vmatprep.mubr.msk.bf16.mxu0 %vm731_vm0, %v8720_v40 }
  0x94   :  { %6965 = vmatmul.mubr.msk.bf16.gmra.mxu0 %vm731_vm0, %v8721_v41 }
  0x95   :  { %6968 = vmatprep.mubr.msk.bf16.mxu0 %vm731_vm0, %v8722_v42 }
  0x9c   :  { %6969 = vmatmul.mubr.msk.bf16.gmra.mxu0 %vm731_vm0, %v8723_v43 }
  0x9d   :  { %6972 = vmatprep.mubr.msk.bf16.mxu0 %vm731_vm0, %v8724_v44  ;;  %v8753_v44 = vld [vmem:[%s12821_s1 + $0x218] sm:$0xff]  }
  0xa4   :  { %6973 = vmatmul.mubr.msk.bf16.gmra.mxu0 %vm731_vm0, %v8725_v45  ;;  %v8754_v45 = vld [vmem:[%s12821_s1 + $0x220] sm:$0xff]  }
  0xa5   :  { %6976 = vmatprep.mubr.msk.bf16.mxu0 %vm731_vm0, %v8726_v46 }
  0xac   :  { %6977 = vmatmul.mubr.msk.bf16.gmra.mxu0 %vm731_vm0, %v8727_v47 }
  0xad   :  { %6980 = vmatprep.mubr.msk.bf16.mxu0 %vm731_vm0, %v8728_v48 }
  0xb4   :  { %6981 = vmatmul.mubr.msk.bf16.gmra.mxu0 %vm731_vm0, %v8729_v49 }
  0xb5   :  { %6984 = vmatprep.mubr.msk.bf16.mxu0 %vm731_vm0, %v8730_v50  ;;  %v8755_v50 = vld [vmem:[%s12821_s1 + $0x228] sm:$0xff]  }
  0xbc   :  { %6985 = vmatmul.mubr.msk.bf16.gmra.mxu0 %vm731_vm0, %v8731_v51  ;;  %v8756_v51 = vld [vmem:[%s12821_s1 + $0x230] sm:$0xff]  }
  0xbd   :  { %6988 = vmatprep.mubr.msk.bf16.mxu0 %vm731_vm0, %v8732_v52 }
  0xc4   :  { %6989 = vmatmul.mubr.msk.bf16.gmra.mxu0 %vm731_vm0, %v8733_v53 }
  0xc5   :  { %6992 = vmatprep.mubr.msk.bf16.mxu0 %vm731_vm0, %v8734_v54 }
  0xcc   :  { %v9161_v57 = vpop.f32.mrf.mxu0  ;;  %6993 = vmatmul.mubr.msk.bf16.gmra.mxu0 %vm731_vm0, %v8735_v55 }
  0xcd   :  { %12898 = vst [vmem:[#allocation2_spill] sm:$0xff] %v9161_v57  ;;  %6996 = vmatprep.mubr.msk.bf16.mxu0 %vm731_vm0, %v8736_v56  ;;  %v8757_v56 = vld [vmem:[%s12821_s1 + $0x238] sm:$0xff]  }
  0xce   :  { %v9165_v58 = vpop.f32.mrf.mxu0 }
  0xcf   :  { %12899 = vst [vmem:[#allocation3_spill] sm:$0xff] %v9165_v58 }
  0xd0   :  { %v9167_v59 = vpop.f32.mrf.mxu0 }
  0xd1   :  { %12900 = vst [vmem:[#allocation4_spill] sm:$0xff] %v9167_v59 }
  0xd2   :  { %v9175_v62 = vpop.f32.mrf.mxu0 }
  0xd3   :  { %12901 = vst [vmem:[#allocation5_spill] sm:$0xff] %v9175_v62 }
  0xd4   :  { %v6902_v63 = vpop.f32.mrf.mxu0  ;;  %6997 = vmatmul.mubr.msk.bf16.gmra.mxu0 %vm731_vm0, %v8737_v60  ;;  %v8758_v60 = vld [vmem:[%s12821_s1 + $0x240] sm:$0xff]  }
  0xd5   :  { %1851 = vrot.lane.b32.xlu1 %v6902_v63, %s8832_s0  ;;  %7000 = vmatprep.mubr.msk.bf16.mxu0 %vm731_vm0, %v8738_v61 }
  0xd6   :  { %v1076_v0 = vpop.f32.mrf.mxu0 }
  0xd7   :  { %1847 = vrot.lane.b32.xlu0 %v1076_v0, %s8832_s0 }
  0xd8   :  { %v6903_v1 = vpop.f32.mrf.mxu0 }
  0xd9   :  { %1853 = vrot.lane.b32.xlu1 %v6903_v1, %s8832_s0 }
  0xda   :  { %v1079_v4 = vpop.f32.mrf.mxu0 }
  0xdb   :  { %1849 = vrot.lane.b32.xlu0 %v1079_v4, %s8832_s0 }
  0xdc   :  { %v6906_v5 = vpop.f32.mrf.mxu0  ;;  %7001 = vmatmul.mubr.msk.bf16.gmra.mxu0 %vm731_vm0, %v8739_v2  ;;  %v8759_v2 = vld [vmem:[%s12821_s1 + $0x248] sm:$0xff]  }
  0xdd   :  { %7004 = vmatprep.mubr.msk.bf16.mxu0 %vm731_vm0, %v8740_v3  ;;  %v8760_v3 = vld [vmem:[%s12821_s1 + $0x250] sm:$0xff]  }
  0xde   :  { %v1092_v6 = vpop.f32.mrf.mxu0 }
  0xdf   :  { %1867 = vrot.lane.b32.xlu0 %v6906_v5, %s8833_s16 }
  0xe0   :  { %v6907_v7 = vpop.f32.mrf.mxu0 }
  0xe1   :  { %1869 = vrot.lane.b32.xlu1 %v6907_v7, %s8833_s16 }
  0xe2   :  { %v1095_v10 = vpop.f32.mrf.mxu0 }
  0xe3   :  { %1863 = vrot.lane.b32.xlu0 %v1092_v6, %s8833_s16 }
  0xe4   :  { %v6910_v11 = vpop.f32.mrf.mxu0  ;;  %7005 = vmatmul.mubr.msk.bf16.gmra.mxu0 %vm731_vm0, %v8741_v8  ;;  %v8761_v8 = vld [vmem:[%s12821_s1 + $0x258] sm:$0xff]  }
  0xe5   :  { %1865 = vrot.lane.b32.xlu1 %v1095_v10, %s8833_s16  ;;  %7008 = vmatprep.mubr.msk.bf16.mxu0 %vm731_vm0, %v8742_v9  ;;  %v8762_v9 = vld [vmem:[%s12821_s1 + $0x260] sm:$0xff]  }
  0xe6   :  { %v1108_v12 = vpop.f32.mrf.mxu0 }
  0xe7   :  { %1883 = vrot.lane.b32.xlu0 %v6910_v11, %s8834_s21 }
  0xe8   :  { %v6911_v13 = vpop.f32.mrf.mxu0 }
  0xe9   :  { %1885 = vrot.lane.b32.xlu1 %v6911_v13, %s8834_s21 }
  0xea   :  { %v1111_v16 = vpop.f32.mrf.mxu0 }
  0xeb   :  { %1879 = vrot.lane.b32.xlu0 %v1108_v12, %s8834_s21 }
  0xec   :  { %v6914_v17 = vpop.f32.mrf.mxu0  ;;  %7009 = vmatmul.mubr.msk.bf16.gmra.mxu0 %vm731_vm0, %v8743_v14  ;;  %v8763_v14 = vld [vmem:[%s12821_s1 + $0x268] sm:$0xff]  }
  0xed   :  { %1881 = vrot.lane.b32.xlu1 %v1111_v16, %s8834_s21  ;;  %7012 = vmatprep.mubr.msk.bf16.mxu0 %vm731_vm0, %v8744_v15  ;;  %v8764_v15 = vld [vmem:[%s12821_s1 + $0x270] sm:$0xff]  }
  0xee   :  { %v1124_v18 = vpop.f32.mrf.mxu0 }
  0xef   :  { %1899 = vrot.lane.b32.xlu0 %v6914_v17, %s8835_s26 }
  0xf0   :  { %v6915_v19 = vpop.f32.mrf.mxu0 }
  0xf1   :  { %1901 = vrot.lane.b32.xlu1 %v6915_v19, %s8835_s26 }
  0xf2   :  { %v1127_v22 = vpop.f32.mrf.mxu0 }
  0xf3   :  { %1895 = vrot.lane.b32.xlu0 %v1124_v18, %s8835_s26 }
  0xf4   :  { %v6918_v23 = vpop.f32.mrf.mxu0  ;;  %7013 = vmatmul.mubr.msk.bf16.gmra.mxu0 %vm731_vm0, %v8745_v20  ;;  %v8765_v20 = vld [vmem:[%s12821_s1 + $0x278] sm:$0xff]  }
  0xf5   :  { %1897 = vrot.lane.b32.xlu1 %v1127_v22, %s8835_s26  ;;  %7016 = vmatprep.mubr.msk.bf16.mxu0 %vm731_vm0, %v8746_v21  ;;  %v8766_v21 = vld [vmem:[%s12821_s1 + $0x280] sm:$0xff]  }
  0xf6   :  { %v1140_v24 = vpop.f32.mrf.mxu0 }
  0xf7   :  { %1915 = vrot.lane.b32.xlu0 %v6918_v23, %s8836_s12 }
  0xf8   :  { %v6919_v25 = vpop.f32.mrf.mxu0 }
  0xf9   :  { %1917 = vrot.lane.b32.xlu1 %v6919_v25, %s8836_s12 }
  0xfa   :  { %v1143_v28 = vpop.f32.mrf.mxu0 }
  0xfb   :  { %1911 = vrot.lane.b32.xlu0 %v1140_v24, %s8836_s12 }
  0xfc   :  { %v6922_v29 = vpop.f32.mrf.mxu0  ;;  %7017 = vmatmul.mubr.msk.bf16.gmra.mxu0 %vm731_vm0, %v8747_v26  ;;  %v8767_v26 = vld [vmem:[%s12821_s1 + $0x288] sm:$0xff]  }
  0xfd   :  { %1913 = vrot.lane.b32.xlu1 %v1143_v28, %s8836_s12  ;;  %7020 = vmatprep.mubr.msk.bf16.mxu0 %vm731_vm0, %v8748_v27 }
  0xfe   :  { %v1156_v30 = vpop.f32.mrf.mxu0 }
  0xff   :  { %1931 = vrot.lane.b32.xlu0 %v6922_v29, %s8837_s18  ;;  %v8768_v29 = vld [vmem:[%s12821_s1 + $0x290] sm:$0xff]  }
 0x100   :  { %v6923_v31 = vpop.f32.mrf.mxu0 }
 0x101   :  { %1933 = vrot.lane.b32.xlu1 %v6923_v31, %s8837_s18 }
 0x102   :  { %v1159_v34 = vpop.f32.mrf.mxu0 }
 0x103   :  { %1927 = vrot.lane.b32.xlu0 %v1156_v30, %s8837_s18 }
 0x104   :  { %v6926_v35 = vpop.f32.mrf.mxu0  ;;  %7021 = vmatmul.mubr.msk.bf16.gmra.mxu0 %vm731_vm0, %v8749_v32 }
 0x105   :  { %1929 = vrot.lane.b32.xlu1 %v1159_v34, %s8837_s18  ;;  %7024 = vmatprep.mubr.msk.bf16.mxu0 %vm731_vm0, %v8750_v33 }
 0x106   :  { %v1172_v36 = vpop.f32.mrf.mxu0 }
 0x107   :  { %1947 = vrot.lane.b32.xlu0 %v6926_v35, %s8838_s24 }
 0x108   :  { %v6927_v37 = vpop.f32.mrf.mxu0 }
 0x109   :  { %1949 = vrot.lane.b32.xlu1 %v6927_v37, %s8838_s24 }
 0x10a   :  { %v1175_v40 = vpop.f32.mrf.mxu0 }
 0x10b   :  { %1943 = vrot.lane.b32.xlu0 %v1172_v36, %s8838_s24  ;;  %v8769_v36 = vld [vmem:[%s12821_s1 + $0x298] sm:$0xff]  }
 0x10c   :  { %v6930_v41 = vpop.f32.mrf.mxu0  ;;  %7025 = vmatmul.mubr.msk.bf16.gmra.mxu0 %vm731_vm0, %v8751_v38  ;;  %v8770_v38 = vld [vmem:[%s12821_s1 + $0x2a0] sm:$0xff]  }
 0x10d   :  { %1945 = vrot.lane.b32.xlu1 %v1175_v40, %s8838_s24  ;;  %7028 = vmatprep.mubr.msk.bf16.mxu0 %vm731_vm0, %v8752_v39 }
 0x10e   :  { %v1188_v42 = vpop.f32.mrf.mxu0 }
 0x10f   :  { %1963 = vrot.lane.b32.xlu0 %v6930_v41, %s8839_s30 }
 0x110   :  { %v6931_v43 = vpop.f32.mrf.mxu0 }
 0x111   :  { %1965 = vrot.lane.b32.xlu1 %v6931_v43, %s8839_s30 }
 0x112   :  { %v1191_v46 = vpop.f32.mrf.mxu0 }
 0x113   :  { %1959 = vrot.lane.b32.xlu0 %v1188_v42, %s8839_s30 }
 0x114   :  { %v6934_v47 = vpop.f32.mrf.mxu0  ;;  %7029 = vmatmul.mubr.msk.bf16.gmra.mxu0 %vm731_vm0, %v8753_v44 }
 0x115   :  { %1961 = vrot.lane.b32.xlu1 %v1191_v46, %s8839_s30  ;;  %7032 = vmatprep.mubr.msk.bf16.mxu0 %vm731_vm0, %v8754_v45  ;;  %v8771_v45 = vld [vmem:[%s12821_s1 + $0x2a8] sm:$0xff]  }
 0x116   :  { %v1204_v48 = vpop.f32.mrf.mxu0 }
 0x117   :  { %1979 = vrot.lane.b32.xlu0 %v6934_v47, %s8840_s19 }
 0x118   :  { %v6935_v49 = vpop.f32.mrf.mxu0 }
 0x119   :  { %1981 = vrot.lane.b32.xlu1 %v6935_v49, %s8840_s19  ;;  %v8772_v49 = vld [vmem:[%s12821_s1 + $0x2b0] sm:$0xff]  }
 0x11a   :  { %v1207_v52 = vpop.f32.mrf.mxu0 }
 0x11b   :  { %1975 = vrot.lane.b32.xlu0 %v1204_v48, %s8840_s19 }
 0x11c   :  { %v6938_v53 = vpop.f32.mrf.mxu0  ;;  %7033 = vmatmul.mubr.msk.bf16.gmra.mxu0 %vm731_vm0, %v8755_v50 }
 0x11d   :  { %1977 = vrot.lane.b32.xlu1 %v1207_v52, %s8840_s19  ;;  %7036 = vmatprep.mubr.msk.bf16.mxu0 %vm731_vm0, %v8756_v51 }
 0x11e   :  { %v1220_v54 = vpop.f32.mrf.mxu0 }
 0x11f   :  { %1995 = vrot.lane.b32.xlu0 %v6938_v53, %s8841_s27 }
 0x120   :  { %v6939_v55 = vpop.f32.mrf.mxu0 }
 0x121   :  { %1997 = vrot.lane.b32.xlu1 %v6939_v55, %s8841_s27  ;;  %v8773_v55 = vld [vmem:[%s12821_s1 + $0x2b8] sm:$0xff]  }
 0x122   :  { %v1223_v61 = vpop.f32.mrf.mxu0 }
 0x123   :  { %1991 = vrot.lane.b32.xlu0 %v1220_v54, %s8841_s27 }
 0x124   :  { %v6942_v63 = vpop.f32.mrf.mxu0  ;;  %7037 = vmatmul.mubr.msk.bf16.gmra.mxu0 %vm731_vm0, %v8757_v56 }
 0x125   :  { %1993 = vrot.lane.b32.xlu1 %v1223_v61, %s8841_s27  ;;  %7040 = vmatprep.mubr.msk.bf16.mxu0 %vm731_vm0, %v8758_v60  ;;  %v8774_v60 = vld [vmem:[%s12821_s1 + $0x2c0] sm:$0xff]  }
 0x126   :  { %v9299_v0 = vpop.f32.mrf.mxu0 }
 0x127   :  { %2011 = vrot.lane.b32.xlu0 %v6942_v63, %s8842_s15 }
 0x128   :  { %v6943_v1 = vpop.f32.mrf.mxu0 }
 0x129   :  { %2013 = vrot.lane.b32.xlu1 %v6943_v1, %s8842_s15 }
 0x12a   :  { %v9309_v4 = vpop.f32.mrf.mxu0 }
 0x12c   :  { %v6946_v5 = vpop.f32.mrf.mxu0  ;;  %7041 = vmatmul.mubr.msk.bf16.gmra.mxu0 %vm731_vm0, %v8759_v2 }
 0x12d   :  { %2027 = vrot.lane.b32.xlu0 %v6946_v5, %s8843_s25  ;;  %7044 = vmatprep.mubr.msk.bf16.mxu0 %vm731_vm0, %v8760_v3  ;;  %v8775_v5 = vld [vmem:[%s12821_s1 + $0x2c8] sm:$0xff]  }
 0x12e   :  { %v9314_v6 = vpop.f32.mrf.mxu0 }
 0x130   :  { %v6947_v7 = vpop.f32.mrf.mxu0 }
 0x131   :  { %2029 = vrot.lane.b32.xlu1 %v6947_v7, %s8843_s25 }
 0x132   :  { %v9323_v10 = vpop.f32.mrf.mxu0 }
 0x134   :  { %v6950_v11 = vpop.f32.mrf.mxu0  ;;  %7045 = vmatmul.mubr.msk.bf16.gmra.mxu0 %vm731_vm0, %v8761_v8 }
 0x135   :  { %2043 = vrot.lane.b32.xlu0 %v6950_v11, %s8844_s17  ;;  %7048 = vmatprep.mubr.msk.bf16.mxu0 %vm731_vm0, %v8762_v9  ;;  %v8776_v9 = vld [vmem:[%s12821_s1 + $0x2d0] sm:$0xff]  }
 0x136   :  { %v9328_v12 = vpop.f32.mrf.mxu0 }
 0x138   :  { %v6951_v13 = vpop.f32.mrf.mxu0 }
 0x139   :  { %2045 = vrot.lane.b32.xlu1 %v6951_v13, %s8844_s17 }
 0x13a   :  { %v9337_v16 = vpop.f32.mrf.mxu0 }
 0x13c   :  { %v6954_v17 = vpop.f32.mrf.mxu0  ;;  %7049 = vmatmul.mubr.msk.bf16.gmra.mxu0 %vm731_vm0, %v8763_v14 }
 0x13d   :  { %2059 = vrot.lane.b32.xlu0 %v6954_v17, %s8845_s29  ;;  %7052 = vmatprep.mubr.msk.bf16.mxu0 %vm731_vm0, %v8764_v15 }
 0x13e   :  { %v9342_v18 = vpop.f32.mrf.mxu0 }
 0x13f   :  { %12902 = vst [vmem:[#allocation6_spill] sm:$0xff] %v9342_v18 }
 0x140   :  { %v9344_v19 = vpop.f32.mrf.mxu0 }
 0x142   :  { %v9352_v22 = vpop.f32.mrf.mxu0 }
 0x144   :  { %v9354_v23 = vpop.f32.mrf.mxu0  ;;  %7053 = vmatmul.mubr.msk.bf16.gmra.mxu0 %vm731_vm0, %v8765_v20  ;;  %v8777_v20 = vld [vmem:[%s12821_s1 + $0x2d8] sm:$0xff]  }
 0x145   :  { %7056 = vmatprep.mubr.msk.bf16.mxu0 %vm731_vm0, %v8766_v21 }
 0x146   :  { %v9358_v24 = vpop.f32.mrf.mxu0 }
 0x147   :  { %12903 = vst [vmem:[#allocation7_spill] sm:$0xff] %v9358_v24  ;;  %v9365_v27 = vpop.permute.xlu1 %1851 }
 0x148   :  { %v9360_v25 = vpop.f32.mrf.mxu0  ;;  %12904 = vst [vmem:[#allocation8_spill] sm:$0xff] %v9365_v27 }
 0x149   :  { %v9367_v28 = vpop.permute.xlu0 %1847 }
 0x14a   :  { %12905 = vst [vmem:[#allocation9_spill] sm:$0xff] %v9367_v28  ;;  %v9372_v30 = vpop.f32.mrf.mxu0 }
 0x14b   :  { %12906 = vst [vmem:[#allocation10_spill] sm:$0xff] %v9372_v30  ;;  %v9382_v34 = vpop.permute.xlu1 %1853 }
 0x14c   :  { %v9374_v31 = vpop.f32.mrf.mxu0  ;;  %7057 = vmatmul.mubr.msk.bf16.gmra.mxu0 %vm731_vm0, %v8767_v26  ;;  %12908 = vst [vmem:[#allocation12_spill] sm:$0xff] %v9382_v34 }
 0x14d   :  { %v9377_v32 = vpop.permute.xlu0 %1849  ;;  %7060 = vmatprep.mubr.msk.bf16.mxu0 %vm731_vm0, %v8768_v29  ;;  %v8778_v29 = vld [vmem:[%s12821_s1 + $0x2e0] sm:$0xff]  }
 0x14e   :  { %12907 = vst [vmem:[#allocation11_spill] sm:$0xff] %v9377_v32  ;;  %v9380_v33 = vpop.f32.mrf.mxu0 }
 0x150   :  { %v9384_v35 = vpop.f32.mrf.mxu0 }
 0x151   :  { %v9389_v37 = vpop.permute.xlu0 %1867 }
 0x152   :  { %12909 = vst [vmem:[#allocation13_spill] sm:$0xff] %v9389_v37  ;;  %v9394_v39 = vpop.f32.mrf.mxu0 }
 0x153   :  { %v9396_v40 = vpop.permute.xlu1 %1869 }
 0x154   :  { %12910 = vst [vmem:[#allocation14_spill] sm:$0xff] %v9396_v40  ;;  %v6966_v41 = vpop.f32.mrf.mxu0  ;;  %7061 = vmatmul.mubr.msk.bf16.gmra.mxu0 %vm731_vm0, %v8769_v36 }
 0x155   :  { %v9399_v42 = vpop.permute.xlu0 %1863  ;;  %2166 = vrot.lane.b32.xlu0 %v6966_v41, %s8832_s0  ;;  %7064 = vmatprep.mubr.msk.bf16.mxu0 %vm731_vm0, %v8770_v38 }
 0x156   :  { %12911 = vst [vmem:[#allocation15_spill] sm:$0xff] %v9399_v42  ;;  %v1332_v43 = vpop.f32.mrf.mxu0 }
 0x157   :  { %v9406_v46 = vpop.permute.xlu1 %1865 }
 0x158   :  { %v6967_v44 = vpop.f32.mrf.mxu0  ;;  %12912 = vst [vmem:[#allocation16_spill] sm:$0xff] %v9406_v46 }
 0x159   :  { %v9408_v47 = vpop.permute.xlu0 %1883  ;;  %2162 = vrot.lane.b32.xlu0 %v1332_v43, %s8832_s0  ;;  %2168 = vrot.lane.b32.xlu1 %v6967_v44, %s8832_s0 }
 0x15a   :  { %12913 = vst [vmem:[#allocation17_spill] sm:$0xff] %v9408_v47  ;;  %v1335_v48 = vpop.f32.mrf.mxu0 }
 0x15b   :  { %v9421_v53 = vpop.permute.xlu1 %1885 }
 0x15c   :  { %v6970_v50 = vpop.f32.mrf.mxu0  ;;  %7065 = vmatmul.mubr.msk.bf16.gmra.mxu0 %vm731_vm0, %v8771_v45  ;;  %12915 = vst [vmem:[#allocation19_spill] sm:$0xff] %v9421_v53  ;;  %v8779_v45 = vld [vmem:[%s12821_s1 + $0x2e8] sm:$0xff]  }
 0x15d   :  { %v9416_v51 = vpop.permute.xlu0 %1879  ;;  %2164 = vrot.lane.b32.xlu1 %v1335_v48, %s8832_s0  ;;  %2182 = vrot.lane.b32.xlu0 %v6970_v50, %s8833_s16 }
 0x15e   :  { %12914 = vst [vmem:[#allocation18_spill] sm:$0xff] %v9416_v51  ;;  %v1348_v52 = vpop.f32.mrf.mxu0  ;;  %7068 = vmatprep.mubr.msk.bf16.mxu0 %vm731_vm0, %v8772_v49  ;;  %v8780_v49 = vld [vmem:[%s12821_s1 + $0x2f0] sm:$0xff]  }
 0x15f   :  { %v9434_v1 = vpop.permute.xlu1 %1881 }
 0x160   :  { %v6971_v54 = vpop.f32.mrf.mxu0  ;;  %12917 = vst [vmem:[#allocation21_spill] sm:$0xff] %v9434_v1 }
 0x161   :  { %2178 = vrot.lane.b32.xlu0 %v1348_v52, %s8833_s16  ;;  %2184 = vrot.lane.b32.xlu1 %v6971_v54, %s8833_s16  ;;  %v9431_v61 = vpop.permute.xlu0 %1899 }
 0x162   :  { %v1351_v56 = vpop.f32.mrf.mxu0  ;;  %12916 = vst [vmem:[#allocation20_spill] sm:$0xff] %v9431_v61 }
 0x163   :  { %v9449_v11 = vpop.permute.xlu1 %1901 }
 0x164   :  { %v6974_v63 = vpop.f32.mrf.mxu0  ;;  %7069 = vmatmul.mubr.msk.bf16.gmra.mxu0 %vm731_vm0, %v8773_v55  ;;  %12919 = vst [vmem:[#allocation23_spill] sm:$0xff] %v9449_v11 }
 0x165   :  { %2180 = vrot.lane.b32.xlu1 %v1351_v56, %s8833_s16  ;;  %2198 = vrot.lane.b32.xlu0 %v6974_v63, %s8834_s21  ;;  %v9442_v7 = vpop.permute.xlu0 %1895 }
 0x166   :  { %v1364_v2 = vpop.f32.mrf.mxu0  ;;  %7072 = vmatprep.mubr.msk.bf16.mxu0 %vm731_vm0, %v8774_v60  ;;  %12918 = vst [vmem:[#allocation22_spill] sm:$0xff] %v9442_v7  ;;  %v8781_v60 = vld [vmem:[%s12821_s1 + $0x2f8] sm:$0xff]  }
 0x167   :  { %v9460_v21 = vpop.permute.xlu1 %1897 }
 0x168   :  { %v6975_v3 = vpop.f32.mrf.mxu0  ;;  %12921 = vst [vmem:[#allocation25_spill] sm:$0xff] %v9460_v21 }
 0x169   :  { %2194 = vrot.lane.b32.xlu0 %v1364_v2, %s8834_s21  ;;  %2200 = vrot.lane.b32.xlu1 %v6975_v3, %s8834_s21  ;;  %v9455_v15 = vpop.permute.xlu0 %1915  ;;  %v8782_v3 = vld [vmem:[%s12821_s1 + $0x300] sm:$0xff]  }
 0x16a   :  { %v1367_v8 = vpop.f32.mrf.mxu0  ;;  %12920 = vst [vmem:[#allocation24_spill] sm:$0xff] %v9455_v15 }
 0x16b   :  { %v9473_v43 = vpop.permute.xlu1 %1917 }
 0x16c   :  { %v6978_v13 = vpop.f32.mrf.mxu0  ;;  %7073 = vmatmul.mubr.msk.bf16.gmra.mxu0 %vm731_vm0, %v8775_v5  ;;  %12923 = vst [vmem:[#allocation27_spill] sm:$0xff] %v9473_v43 }
 0x16d   :  { %2196 = vrot.lane.b32.xlu1 %v1367_v8, %s8834_s21  ;;  %2214 = vrot.lane.b32.xlu0 %v6978_v13, %s8835_s26  ;;  %v9468_v38 = vpop.permute.xlu0 %1911 }
 0x16e   :  { %v1380_v14 = vpop.f32.mrf.mxu0  ;;  %7076 = vmatprep.mubr.msk.bf16.mxu0 %vm731_vm0, %v8776_v9  ;;  %12922 = vst [vmem:[#allocation26_spill] sm:$0xff] %v9468_v38 }
 0x16f   :  { %v9486_v54 = vpop.permute.xlu1 %1913 }
 0x170   :  { %v6979_v17 = vpop.f32.mrf.mxu0  ;;  %12925 = vst [vmem:[#allocation29_spill] sm:$0xff] %v9486_v54 }
 0x171   :  { %2210 = vrot.lane.b32.xlu0 %v1380_v14, %s8835_s26  ;;  %2216 = vrot.lane.b32.xlu1 %v6979_v17, %s8835_s26  ;;  %v9483_v50 = vpop.permute.xlu0 %1931  ;;  %v8783_v17 = vld [vmem:[%s12821_s1 + $0x308] sm:$0xff]   ;;  %s8846_s1 = smov 30  }
 0x172   :  { %v1383_v26 = vpop.f32.mrf.mxu0  ;;  %12924 = vst [vmem:[#allocation28_spill] sm:$0xff] %v9483_v50 }
 0x173   :  { %v9501_v5 = vpop.permute.xlu1 %1933 }
 0x174   :  { %v6982_v36 = vpop.f32.mrf.mxu0  ;;  %7077 = vmatmul.mubr.msk.bf16.gmra.mxu0 %vm731_vm0, %v8777_v20  ;;  %12927 = vst [vmem:[#allocation31_spill] sm:$0xff] %v9501_v5 }
 0x175   :  { %2212 = vrot.lane.b32.xlu1 %v1383_v26, %s8835_s26  ;;  %2230 = vrot.lane.b32.xlu0 %v6982_v36, %s8836_s12  ;;  %v9494_v63 = vpop.permute.xlu0 %1927 }
 0x176   :  { %v1396_v41 = vpop.f32.mrf.mxu0  ;;  %7080 = vmatprep.mubr.msk.bf16.mxu0 %vm731_vm0, %v8778_v29  ;;  %12926 = vst [vmem:[#allocation30_spill] sm:$0xff] %v9494_v63 }
 0x177   :  { %v9512_v20 = vpop.permute.xlu1 %1929 }
 0x178   :  { %v6983_v44 = vpop.f32.mrf.mxu0  ;;  %12929 = vst [vmem:[#allocation33_spill] sm:$0xff] %v9512_v20 }
 0x179   :  { %2226 = vrot.lane.b32.xlu0 %v1396_v41, %s8836_s12  ;;  %2232 = vrot.lane.b32.xlu1 %v6983_v44, %s8836_s12  ;;  %v9507_v13 = vpop.permute.xlu0 %1947 }
 0x17a   :  { %v1399_v48 = vpop.f32.mrf.mxu0  ;;  %12928 = vst [vmem:[#allocation32_spill] sm:$0xff] %v9507_v13 }
 0x17b   :  { %v9521_v44 = vpop.permute.xlu1 %1949 }
 0x17c   :  { %v6986_v52 = vpop.f32.mrf.mxu0  ;;  %7081 = vmatmul.mubr.msk.bf16.gmra.mxu0 %vm731_vm0, %v8779_v45  ;;  %12931 = vst [vmem:[#allocation35_spill] sm:$0xff] %v9521_v44 }
 0x17d   :  { %2228 = vrot.lane.b32.xlu1 %v1399_v48, %s8836_s12  ;;  %2246 = vrot.lane.b32.xlu0 %v6986_v52, %s8837_s18  ;;  %v9517_v36 = vpop.permute.xlu0 %1943 }
 0x17e   :  { %v1412_v55 = vpop.f32.mrf.mxu0  ;;  %7084 = vmatprep.mubr.msk.bf16.mxu0 %vm731_vm0, %v8780_v49  ;;  %12930 = vst [vmem:[#allocation34_spill] sm:$0xff] %v9517_v36 }
 0x180   :  { %v6987_v56 = vpop.f32.mrf.mxu0 }
 0x181   :  { %2242 = vrot.lane.b32.xlu0 %v1412_v55, %s8837_s18  ;;  %2248 = vrot.lane.b32.xlu1 %v6987_v56, %s8837_s18  ;;  %v9525_v49 = vpop.permute.xlu0 %1963  ;;  %v9527_v55 = vpop.permute.xlu1 %1945 }
 0x182   :  { %v1415_v2 = vpop.f32.mrf.mxu0  ;;  %12932 = vst [vmem:[#allocation36_spill] sm:$0xff] %v9525_v49  ;;  %12933 = vst [vmem:[#allocation37_spill] sm:$0xff] %v9527_v55 }
 0x184   :  { %v6990_v8 = vpop.f32.mrf.mxu0  ;;  %7085 = vmatmul.mubr.msk.bf16.gmra.mxu0 %vm731_vm0, %v8781_v60 }
 0x185   :  { %2244 = vrot.lane.b32.xlu1 %v1415_v2, %s8837_s18  ;;  %2262 = vrot.lane.b32.xlu0 %v6990_v8, %s8838_s24  ;;  %v9531_v2 = vpop.permute.xlu0 %1959  ;;  %v9535_v8 = vpop.permute.xlu1 %1965 }
 0x186   :  { %v1428_v9 = vpop.f32.mrf.mxu0  ;;  %7088 = vmatprep.mubr.msk.bf16.mxu0 %vm731_vm0, %v8782_v3  ;;  %12934 = vst [vmem:[#allocation38_spill] sm:$0xff] %v9531_v2  ;;  %12935 = vst [vmem:[#allocation39_spill] sm:$0xff] %v9535_v8 }
 0x188   :  { %v6991_v14 = vpop.f32.mrf.mxu0 }
 0x189   :  { %2258 = vrot.lane.b32.xlu0 %v1428_v9, %s8838_s24  ;;  %2264 = vrot.lane.b32.xlu1 %v6991_v14, %s8838_s24 }
 0x18a   :  { %v1431_v26 = vpop.f32.mrf.mxu0 }
 0x18c   :  { %v6994_v29 = vpop.f32.mrf.mxu0  ;;  %7089 = vmatmul.mubr.msk.bf16.gmra.mxu0 %vm731_vm0, %v8783_v17  ;;  %v9539_v17 = vpop.permute.xlu0 %1979 }
 0x18d   :  { %2260 = vrot.lane.b32.xlu1 %v1431_v26, %s8838_s24  ;;  %2278 = vrot.lane.b32.xlu0 %v6994_v29, %s8839_s30  ;;  %12936 = vst [vmem:[#allocation40_spill] sm:$0xff] %v9539_v17  ;;  %v9541_v29 = vpop.permute.xlu1 %1961 }
 0x18e   :  { %v1444_v41 = vpop.f32.mrf.mxu0  ;;  %12937 = vst [vmem:[#allocation41_spill] sm:$0xff] %v9541_v29 }
 0x190   :  { %v6995_v45 = vpop.f32.mrf.mxu0 }
 0x191   :  { %2274 = vrot.lane.b32.xlu0 %v1444_v41, %s8839_s30  ;;  %2280 = vrot.lane.b32.xlu1 %v6995_v45, %s8839_s30 }
 0x192   :  { %v1447_v48 = vpop.f32.mrf.mxu0 }
 0x194   :  { %v6998_v52 = vpop.f32.mrf.mxu0 }
 0x195   :  { %2276 = vrot.lane.b32.xlu1 %v1447_v48, %s8839_s30  ;;  %2294 = vrot.lane.b32.xlu0 %v6998_v52, %s8840_s19  ;;  %v9545_v48 = vpop.permute.xlu0 %1975 }
 0x196   :  { %v1460_v56 = vpop.f32.mrf.mxu0  ;;  %12938 = vst [vmem:[#allocation42_spill] sm:$0xff] %v9545_v48 }
 0x198   :  { %v6999_v60 = vpop.f32.mrf.mxu0 }
 0x199   :  { %2290 = vrot.lane.b32.xlu0 %v1460_v56, %s8840_s19  ;;  %2296 = vrot.lane.b32.xlu1 %v6999_v60, %s8840_s19  ;;  %v9549_v56 = vpop.permute.xlu1 %1981 }
 0x19a   :  { %v1463_v3 = vpop.f32.mrf.mxu0  ;;  %12939 = vst [vmem:[#allocation43_spill] sm:$0xff] %v9549_v56 }
 0x19c   :  { %v7002_v9 = vpop.f32.mrf.mxu0 }
 0x19d   :  { %2292 = vrot.lane.b32.xlu1 %v1463_v3, %s8840_s19  ;;  %2310 = vrot.lane.b32.xlu0 %v7002_v9, %s8841_s27  ;;  %v9553_v9 = vpop.permute.xlu0 %1995 }
 0x19e   :  { %v1476_v14 = vpop.f32.mrf.mxu0  ;;  %12940 = vst [vmem:[#allocation44_spill] sm:$0xff] %v9553_v9 }
 0x1a0   :  { %v7003_v26 = vpop.f32.mrf.mxu0 }
 0x1a1   :  { %2306 = vrot.lane.b32.xlu0 %v1476_v14, %s8841_s27  ;;  %2312 = vrot.lane.b32.xlu1 %v7003_v26, %s8841_s27  ;;  %v9555_v26 = vpop.permute.xlu1 %1977  ;;  %v9559_v48 = vpop.permute.xlu0 %1991 }
 0x1a2   :  { %v1479_v41 = vpop.f32.mrf.mxu0  ;;  %12941 = vst [vmem:[#allocation45_spill] sm:$0xff] %v9555_v26  ;;  %12942 = vst [vmem:[#allocation46_spill] sm:$0xff] %v9559_v48 }
 0x1a4   :  { %v7006_v45 = vpop.f32.mrf.mxu0 }
 0x1a5   :  { %2308 = vrot.lane.b32.xlu1 %v1479_v41, %s8841_s27  ;;  %2326 = vrot.lane.b32.xlu0 %v7006_v45, %s8842_s15 }
 0x1a6   :  { %v1492_v52 = vpop.f32.mrf.mxu0 }
 0x1a8   :  { %v7007_v60 = vpop.f32.mrf.mxu0 }
 0x1a9   :  { %2322 = vrot.lane.b32.xlu0 %v1492_v52, %s8842_s15  ;;  %2328 = vrot.lane.b32.xlu1 %v7007_v60, %s8842_s15  ;;  %v9563_v60 = vpop.permute.xlu1 %1997 }
 0x1aa   :  { %v1495_v3 = vpop.f32.mrf.mxu0  ;;  %12943 = vst [vmem:[#allocation47_spill] sm:$0xff] %v9563_v60 }
 0x1ac   :  { %v7010_v14 = vpop.f32.mrf.mxu0 }
 0x1ad   :  { %2324 = vrot.lane.b32.xlu1 %v1495_v3, %s8842_s15  ;;  %2342 = vrot.lane.b32.xlu0 %v7010_v14, %s8843_s25  ;;  %v9567_v3 = vpop.permute.xlu0 %2011  ;;  %v9569_v56 = vpop.permute.xlu1 %1993 }
 0x1ae   :  { %v1508_v41 = vpop.f32.mrf.mxu0  ;;  %12944 = vst [vmem:[#allocation48_spill] sm:$0xff] %v9567_v3  ;;  %12945 = vst [vmem:[#allocation49_spill] sm:$0xff] %v9569_v56 }
 0x1b0   :  { %v7011_v45 = vpop.f32.mrf.mxu0 }
 0x1b1   :  { %2338 = vrot.lane.b32.xlu0 %v1508_v41, %s8843_s25  ;;  %2344 = vrot.lane.b32.xlu1 %v7011_v45, %s8843_s25  ;;  %v9573_v45 = vpop.permute.xlu0 %2027 }
 0x1b2   :  { %v1511_v52 = vpop.f32.mrf.mxu0  ;;  %12946 = vst [vmem:[#allocation50_spill] sm:$0xff] %v9573_v45 }
 0x1b4   :  { %v7014_v29 = vpop.f32.mrf.mxu0 }
 0x1b5   :  { %2340 = vrot.lane.b32.xlu1 %v1511_v52, %s8843_s25  ;;  %2358 = vrot.lane.b32.xlu0 %v7014_v29, %s8844_s17  ;;  %v9577_v29 = vpop.permute.xlu1 %2013  ;;  %v9579_v60 = vpop.permute.xlu0 %2043 }
 0x1b6   :  { %v1524_v26 = vpop.f32.mrf.mxu0  ;;  %12947 = vst [vmem:[#allocation51_spill] sm:$0xff] %v9577_v29  ;;  %12948 = vst [vmem:[#allocation52_spill] sm:$0xff] %v9579_v60 }
 0x1b8   :  { %v7015_v14 = vpop.f32.mrf.mxu0 }
 0x1b9   :  { %2354 = vrot.lane.b32.xlu0 %v1524_v26, %s8844_s17  ;;  %2360 = vrot.lane.b32.xlu1 %v7015_v14, %s8844_s17  ;;  %v9583_v14 = vpop.permute.xlu1 %2029  ;;  %v9585_v56 = vpop.permute.xlu0 %2059 }
 0x1ba   :  { %v1527_v41 = vpop.f32.mrf.mxu0  ;;  %12949 = vst [vmem:[#allocation53_spill] sm:$0xff] %v9583_v14  ;;  %12950 = vst [vmem:[#allocation54_spill] sm:$0xff] %v9585_v56 }
 0x1bc   :  { %v7018_v48 = vpop.f32.mrf.mxu0 }
 0x1bd   :  { %2356 = vrot.lane.b32.xlu1 %v1527_v41, %s8844_s17  ;;  %2374 = vrot.lane.b32.xlu0 %v7018_v48, %s8845_s29  ;;  %v9589_v41 = vpop.permute.xlu1 %2045 }
 0x1be   :  { %v1540_v52 = vpop.f32.mrf.mxu0  ;;  %12951 = vst [vmem:[#allocation55_spill] sm:$0xff] %v9589_v41 }
 0x1c0   :  { %v7019_v2 = vpop.f32.mrf.mxu0 }
 0x1c1   :  { %2370 = vrot.lane.b32.xlu0 %v1540_v52, %s8845_s29  ;;  %2376 = vrot.lane.b32.xlu1 %v7019_v2, %s8845_s29 }
 0x1c2   :  { %v1543_v26 = vpop.f32.mrf.mxu0 }
 0x1c4   :  { %v7022_v55 = vpop.f32.mrf.mxu0 }
 0x1c5   :  { %2372 = vrot.lane.b32.xlu1 %v1543_v26, %s8845_s29  ;;  %2390 = vrot.lane.b32.xlu0 %v7022_v55, %s8846_s1  ;;  %v8847_v26 = vmov 0  }
 0x1c6   :  { %v1556_v48 = vpop.f32.mrf.mxu0  ;;  %7419 = vset.pattern.permute.xlu0 %v8847_v26  ;;  %7420 = vset.pattern.permute.xlu1 %v8847_v26 }
 0x1c7   :  { %v9591_v29 = vpop.permute.xlu0 %2166 }
 0x1c8   :  { %v7023_v60 = vpop.f32.mrf.mxu0 }
 0x1c9   :  { %2386 = vrot.lane.b32.xlu0 %v1556_v48, %s8846_s1  ;;  %2392 = vrot.lane.b32.xlu1 %v7023_v60, %s8846_s1 }
 0x1ca   :  { %v1559_v2 = vpop.f32.mrf.mxu0 }
 0x1cb   :  { %v9595_v52 = vpop.permute.xlu0 %2162  ;;  %v9597_v14 = vpop.permute.xlu1 %2168 }
 0x1cc   :  { %v9599_v56 = vpop.f32.mrf.mxu0 }
 0x1cd   :  { %12952 = vst [vmem:[#allocation56_spill] sm:$0xff] %v9599_v56  ;;  %2388 = vrot.lane.b32.xlu1 %v1559_v2, %s8846_s1 }
 0x1ce   :  { %v9602_v55 = vpop.f32.mrf.mxu0 }
 0x1cf   :  { %12953 = vst [vmem:[#allocation57_spill] sm:$0xff] %v9602_v55  ;;  %v9604_v41 = vpop.permute.xlu1 %2164  ;;  %v9606_v45 = vpop.permute.xlu0 %2182 }
 0x1d0   :  { %v9608_v48 = vpop.f32.mrf.mxu0 }
 0x1d1   :  { %12954 = vst [vmem:[#allocation58_spill] sm:$0xff] %v9608_v48 }
 0x1d2   :  { %v9610_v60 = vpop.f32.mrf.mxu0 }
 0x1d3   :  { %12955 = vst [vmem:[#allocation59_spill] sm:$0xff] %v9610_v60  ;;  %v9612_v8 = vpop.permute.xlu0 %2178  ;;  %v9614_v36 = vpop.permute.xlu1 %2184 }
 0x1d4   :  { %v7030_v20 = vpop.f32.mrf.mxu0 }
 0x1d5   :  { %2466 = vrot.lane.b32.xlu0 %v7030_v20, %s8832_s0 }
 0x1d6   :  { %v1588_v26 = vpop.f32.mrf.mxu0 }
 0x1d7   :  { %v9617_v3 = vpop.permute.xlu1 %2180  ;;  %v9619_v2 = vpop.permute.xlu0 %2198 }
 0x1d8   :  { %v7031_v44 = vpop.f32.mrf.mxu0 }
 0x1d9   :  { %2462 = vrot.lane.b32.xlu0 %v1588_v26, %s8832_s0  ;;  %2468 = vrot.lane.b32.xlu1 %v7031_v44, %s8832_s0 }
 0x1da   :  { %v1591_v63 = vpop.f32.mrf.mxu0 }
 0x1db   :  { %v9623_v54 = vpop.permute.xlu0 %2194  ;;  %v9625_v9 = vpop.permute.xlu1 %2200 }
 0x1dc   :  { %12956 = vst [vmem:[#allocation60_spill] sm:$0xff] %v9623_v54  ;;  %v7034_v5 = vpop.f32.mrf.mxu0 }
 0x1dd   :  { %2464 = vrot.lane.b32.xlu1 %v1591_v63, %s8832_s0  ;;  %2482 = vrot.lane.b32.xlu0 %v7034_v5, %s8833_s16 }
 0x1de   :  { %v1604_v20 = vpop.f32.mrf.mxu0 }
 0x1df   :  { %v9629_v38 = vpop.permute.xlu1 %2196  ;;  %v9631_v21 = vpop.permute.xlu0 %2214 }
 0x1e0   :  { %v7035_v17 = vpop.f32.mrf.mxu0 }
 0x1e1   :  { %2478 = vrot.lane.b32.xlu0 %v1604_v20, %s8833_s16  ;;  %2484 = vrot.lane.b32.xlu1 %v7035_v17, %s8833_s16 }
 0x1e2   :  { %v1607_v44 = vpop.f32.mrf.mxu0 }
 0x1e3   :  { %v9635_v26 = vpop.permute.xlu0 %2210  ;;  %v9637_v43 = vpop.permute.xlu1 %2216 }
 0x1e4   :  { %12957 = vst [vmem:[#allocation61_spill] sm:$0xff] %v9635_v26  ;;  %v7038_v7 = vpop.f32.mrf.mxu0 }
 0x1e5   :  { %2480 = vrot.lane.b32.xlu1 %v1607_v44, %s8833_s16  ;;  %2498 = vrot.lane.b32.xlu0 %v7038_v7, %s8834_s21  ;;  %s12852_s16 = smov 120  }
 0x1e6   :  { %v1620_v63 = vpop.f32.mrf.mxu0 }
 0x1e7   :  { %v9641_v5 = vpop.permute.xlu1 %2212  ;;  %v9643_v1 = vpop.permute.xlu0 %2230 }
 0x1e8   :  { %v7039_v49 = vpop.f32.mrf.mxu0 }
 0x1e9   :  { %2494 = vrot.lane.b32.xlu0 %v1620_v63, %s8834_s21  ;;  %2500 = vrot.lane.b32.xlu1 %v7039_v49, %s8834_s21 }
 0x1ea   :  { %v1623_v17 = vpop.f32.mrf.mxu0 }
 0x1eb   :  { %v9647_v20 = vpop.permute.xlu0 %2226  ;;  %v9649_v11 = vpop.permute.xlu1 %2232 }
 0x1ec   :  { %12958 = vst [vmem:[#allocation62_spill] sm:$0xff] %v9647_v20  ;;  %v7042_v51 = vpop.f32.mrf.mxu0 }
 0x1ed   :  { %2496 = vrot.lane.b32.xlu1 %v1623_v17, %s8834_s21  ;;  %2514 = vrot.lane.b32.xlu0 %v7042_v51, %s8835_s26  ;;  %s12834_s21 = smov 112  }
 0x1ee   :  { %v1636_v7 = vpop.f32.mrf.mxu0 }
 0x1ef   :  { %v9653_v44 = vpop.permute.xlu1 %2228  ;;  %v9655_v46 = vpop.permute.xlu0 %2246 }
 0x1f0   :  { %v7043_v13 = vpop.f32.mrf.mxu0 }
 0x1f1   :  { %2510 = vrot.lane.b32.xlu0 %v1636_v7, %s8835_s26  ;;  %2516 = vrot.lane.b32.xlu1 %v7043_v13, %s8835_s26 }
 0x1f2   :  { %v1639_v49 = vpop.f32.mrf.mxu0 }
 0x1f3   :  { %v9659_v63 = vpop.permute.xlu0 %2242  ;;  %v9661_v53 = vpop.permute.xlu1 %2248 }
 0x1f4   :  { %12959 = vst [vmem:[#allocation63_spill] sm:$0xff] %v9659_v63  ;;  %v7046_v42 = vpop.f32.mrf.mxu0 }
 0x1f5   :  { %2512 = vrot.lane.b32.xlu1 %v1639_v49, %s8835_s26  ;;  %2530 = vrot.lane.b32.xlu0 %v7046_v42, %s8836_s12  ;;  %s12838_s26 = smov 104  }
 0x1f6   :  { %v1652_v51 = vpop.f32.mrf.mxu0 }
 0x1f7   :  { %v9665_v17 = vpop.permute.xlu1 %2244  ;;  %v9667_v62 = vpop.permute.xlu0 %2262 }
 0x1f8   :  { %v7047_v32 = vpop.f32.mrf.mxu0 }
 0x1f9   :  { %2526 = vrot.lane.b32.xlu0 %v1652_v51, %s8836_s12  ;;  %2532 = vrot.lane.b32.xlu1 %v7047_v32, %s8836_s12 }
 0x1fa   :  { %v1655_v13 = vpop.f32.mrf.mxu0 }
 0x1fb   :  { %v9671_v7 = vpop.permute.xlu0 %2258  ;;  %v9673_v50 = vpop.permute.xlu1 %2264 }
 0x1fc   :  { %12960 = vst [vmem:[#allocation64_spill] sm:$0xff] %v9671_v7  ;;  %v7050_v40 = vpop.f32.mrf.mxu0 }
 0x1fd   :  { %2528 = vrot.lane.b32.xlu1 %v1655_v13, %s8836_s12  ;;  %2546 = vrot.lane.b32.xlu0 %v7050_v40, %s8837_s18  ;;  %s8867_s12 = smov 114  }
 0x1fe   :  { %v1668_v42 = vpop.f32.mrf.mxu0 }
 0x1ff   :  { %v9677_v49 = vpop.permute.xlu1 %2260  ;;  %v9679_v58 = vpop.permute.xlu0 %2278 }
 0x200   :  { %v7051_v28 = vpop.f32.mrf.mxu0 }
 0x201   :  { %2542 = vrot.lane.b32.xlu0 %v1668_v42, %s8837_s18  ;;  %2548 = vrot.lane.b32.xlu1 %v7051_v28, %s8837_s18 }
 0x202   :  { %v1671_v32 = vpop.f32.mrf.mxu0 }
 0x203   :  { %v9683_v51 = vpop.permute.xlu0 %2274  ;;  %v9685_v15 = vpop.permute.xlu1 %2280 }
 0x204   :  { %12961 = vst [vmem:[#allocation65_spill] sm:$0xff] %v9683_v51  ;;  %v7054_v59 = vpop.f32.mrf.mxu0 }
 0x205   :  { %2544 = vrot.lane.b32.xlu1 %v1671_v32, %s8837_s18  ;;  %2562 = vrot.lane.b32.xlu0 %v7054_v59, %s8838_s24  ;;  %s8848_s18 = smov 32  }
 0x206   :  { %v1684_v40 = vpop.f32.mrf.mxu0 }
 0x207   :  { %v9689_v13 = vpop.permute.xlu1 %2276  ;;  %v9691_v34 = vpop.permute.xlu0 %2294 }
 0x208   :  { %v7055_v61 = vpop.f32.mrf.mxu0 }
 0x209   :  { %2558 = vrot.lane.b32.xlu0 %v1684_v40, %s8838_s24  ;;  %2564 = vrot.lane.b32.xlu1 %v7055_v61, %s8838_s24 }
 0x20a   :  { %v1687_v28 = vpop.f32.mrf.mxu0 }
 0x20b   :  { %v9695_v42 = vpop.permute.xlu0 %2290  ;;  %v9697_v47 = vpop.permute.xlu1 %2296 }
 0x20c   :  { %12962 = vst [vmem:[#allocation66_spill] sm:$0xff] %v9695_v42  ;;  %v7058_v37 = vpop.f32.mrf.mxu0 }
 0x20d   :  { %2560 = vrot.lane.b32.xlu1 %v1687_v28, %s8838_s24  ;;  %2578 = vrot.lane.b32.xlu0 %v7058_v37, %s8839_s30  ;;  %s8869_s24 = smov 94  }
 0x20e   :  { %v1700_v59 = vpop.f32.mrf.mxu0 }
 0x20f   :  { %v9701_v32 = vpop.permute.xlu1 %2292  ;;  %v9703_v57 = vpop.permute.xlu0 %2310 }
 0x210   :  { %v7059_v27 = vpop.f32.mrf.mxu0 }
 0x211   :  { %2574 = vrot.lane.b32.xlu0 %v1700_v59, %s8839_s30  ;;  %2580 = vrot.lane.b32.xlu1 %v7059_v27, %s8839_s30 }
 0x212   :  { %v1703_v61 = vpop.f32.mrf.mxu0 }
 0x213   :  { %v9707_v40 = vpop.permute.xlu0 %2306  ;;  %v9709_v60 = vpop.permute.xlu1 %2312 }
 0x214   :  { %12963 = vst [vmem:[#allocation67_spill] sm:$0xff] %v9707_v40  ;;  %v7062_v48 = vpop.f32.mrf.mxu0 }
 0x215   :  { %2576 = vrot.lane.b32.xlu1 %v1703_v61, %s8839_s30  ;;  %2594 = vrot.lane.b32.xlu0 %v7062_v48, %s8840_s19  ;;  %s12854_s30 = smov 124  }
 0x216   :  { %v1716_v37 = vpop.f32.mrf.mxu0 }
 0x217   :  { %v9713_v28 = vpop.permute.xlu1 %2308  ;;  %v9715_v55 = vpop.permute.xlu0 %2326 }
 0x218   :  { %12964 = vst [vmem:[#allocation68_spill] sm:$0xff] %v9713_v28  ;;  %v7063_v56 = vpop.f32.mrf.mxu0 }
 0x219   :  { %2590 = vrot.lane.b32.xlu0 %v1716_v37, %s8840_s19  ;;  %2596 = vrot.lane.b32.xlu1 %v7063_v56, %s8840_s19 }
 0x21a   :  { %v1719_v27 = vpop.f32.mrf.mxu0 }
 0x21b   :  { %v9719_v59 = vpop.permute.xlu0 %2322  ;;  %v9721_v24 = vpop.permute.xlu1 %2328 }
 0x21c   :  { %12965 = vst [vmem:[#allocation69_spill] sm:$0xff] %v9719_v59  ;;  %v7066_v40 = vpop.f32.mrf.mxu0 }
 0x21d   :  { %2592 = vrot.lane.b32.xlu1 %v1719_v27, %s8840_s19  ;;  %2610 = vrot.lane.b32.xlu0 %v7066_v40, %s8841_s27 }
 0x21e   :  { %v1732_v48 = vpop.f32.mrf.mxu0 }
 0x21f   :  { %v9725_v61 = vpop.permute.xlu1 %2324  ;;  %v9727_v42 = vpop.permute.xlu0 %2342 }
 0x220   :  { %12966 = vst [vmem:[#allocation70_spill] sm:$0xff] %v9725_v61  ;;  %v7067_v51 = vpop.f32.mrf.mxu0 }
 0x221   :  { %2606 = vrot.lane.b32.xlu0 %v1732_v48, %s8841_s27  ;;  %2612 = vrot.lane.b32.xlu1 %v7067_v51, %s8841_s27 }
 0x222   :  { %v1735_v56 = vpop.f32.mrf.mxu0 }
 0x223   :  { %v9731_v37 = vpop.permute.xlu0 %2338  ;;  %v9733_v59 = vpop.permute.xlu1 %2344 }
 0x224   :  { %12967 = vst [vmem:[#allocation71_spill] sm:$0xff] %v9731_v37  ;;  %v7070_v7 = vpop.f32.mrf.mxu0 }
 0x225   :  { %2608 = vrot.lane.b32.xlu1 %v1735_v56, %s8841_s27  ;;  %2626 = vrot.lane.b32.xlu0 %v7070_v7, %s8842_s15  ;;  %s8853_s27 = smov 102  }
 0x226   :  { %v1748_v40 = vpop.f32.mrf.mxu0 }
 0x227   :  { %v9737_v27 = vpop.permute.xlu1 %2340  ;;  %v9739_v63 = vpop.permute.xlu0 %2358 }
 0x228   :  { %12968 = vst [vmem:[#allocation72_spill] sm:$0xff] %v9737_v27  ;;  %v7071_v20 = vpop.f32.mrf.mxu0 }
 0x229   :  { %2622 = vrot.lane.b32.xlu0 %v1748_v40, %s8842_s15  ;;  %2628 = vrot.lane.b32.xlu1 %v7071_v20, %s8842_s15 }
 0x22a   :  { %v1751_v51 = vpop.f32.mrf.mxu0 }
 0x22b   :  { %v9743_v48 = vpop.permute.xlu0 %2354  ;;  %v9745_v37 = vpop.permute.xlu1 %2360 }
 0x22c   :  { %12969 = vst [vmem:[#allocation73_spill] sm:$0xff] %v9743_v48  ;;  %v7074_v18 = vpop.f32.mrf.mxu0 }
 0x22d   :  { %2624 = vrot.lane.b32.xlu1 %v1751_v51, %s8842_s15  ;;  %2642 = vrot.lane.b32.xlu0 %v7074_v18, %s8843_s25 }
 0x22e   :  { %v1764_v7 = vpop.f32.mrf.mxu0 }
 0x22f   :  { %v9749_v56 = vpop.permute.xlu1 %2356  ;;  %v9751_v27 = vpop.permute.xlu0 %2374 }
 0x230   :  { %12970 = vst [vmem:[#allocation74_spill] sm:$0xff] %v9749_v56  ;;  %v7075_v30 = vpop.f32.mrf.mxu0 }
 0x231   :  { %2638 = vrot.lane.b32.xlu0 %v1764_v7, %s8843_s25  ;;  %2644 = vrot.lane.b32.xlu1 %v7075_v30, %s8843_s25 }
 0x232   :  { %v1767_v20 = vpop.f32.mrf.mxu0 }
 0x233   :  { %v9755_v48 = vpop.permute.xlu1 %2376  ;;  %v9759_v18 = vpop.permute.xlu0 %2370 }
 0x234   :  { %v7078_v40 = vpop.f32.mrf.mxu0  ;;  %12971 = vst [vmem:[#allocation75_spill] sm:$0xff] %v9759_v18 }
 0x235   :  { %2640 = vrot.lane.b32.xlu1 %v1767_v20, %s8843_s25  ;;  %2658 = vrot.lane.b32.xlu0 %v7078_v40, %s8844_s17 }
 0x236   :  { %v1780_v51 = vpop.f32.mrf.mxu0 }
 0x237   :  { %v9763_v7 = vpop.permute.xlu1 %2372  ;;  %v9765_v61 = vpop.permute.xlu0 %2390 }
 0x238   :  { %v7079_v26 = vpop.f32.mrf.mxu0  ;;  %12972 = vst [vmem:[#allocation76_spill] sm:$0xff] %v9763_v7 }
 0x239   :  { %2654 = vrot.lane.b32.xlu0 %v1780_v51, %s8844_s17  ;;  %2660 = vrot.lane.b32.xlu1 %v7079_v26, %s8844_s17 }
 0x23a   :  { %v1783_v56 = vpop.f32.mrf.mxu0 }
 0x23b   :  { %v9769_v54 = vpop.permute.xlu1 %2392  ;;  %v9773_v26 = vpop.permute.xlu0 %2386 }
 0x23c   :  { %v7082_v30 = vpop.f32.mrf.mxu0  ;;  %12973 = vst [vmem:[#allocation77_spill] sm:$0xff] %v9773_v26 }
 0x23d   :  { %2656 = vrot.lane.b32.xlu1 %v1783_v56, %s8844_s17  ;;  %2674 = vrot.lane.b32.xlu0 %v7082_v30, %s8845_s29 }
 0x23e   :  { %v1796_v20 = vpop.f32.mrf.mxu0 }
 0x23f   :  { %v9777_v56 = vpop.permute.xlu1 %2388 }
 0x240   :  { %v7083_v40 = vpop.f32.mrf.mxu0 }
 0x241   :  { %2670 = vrot.lane.b32.xlu0 %v1796_v20, %s8845_s29  ;;  %2676 = vrot.lane.b32.xlu1 %v7083_v40, %s8845_s29  ;;  %v2822_v20 = vld [vmem:[%s12822_s2 + $0x10] sm:$0xff] }
 0x242   :  { %v1799_v51 = vpop.f32.mrf.mxu0 }
 0x244   :  { %v7086_v18 = vpop.f32.mrf.mxu0 }
 0x245   :  { %2672 = vrot.lane.b32.xlu1 %v1799_v51, %s8845_s29  ;;  %2690 = vrot.lane.b32.xlu0 %v7086_v18, %s8846_s1  ;;  %v2401_v18 = vsel %vm2083_vm1, %v9384_v35, %v9597_v14 }
 0x246   :  { %v1812_v7 = vpop.f32.mrf.mxu0 }
 0x247   :  { %v9779_v30 = vpop.permute.xlu0 %2466 }
 0x248   :  { %12974 = vst [vmem:[#allocation78_spill] sm:$0xff] %v9779_v30  ;;  %v7087_v28 = vpop.f32.mrf.mxu0 }
 0x249   :  { %2686 = vrot.lane.b32.xlu0 %v1812_v7, %s8846_s1  ;;  %2692 = vrot.lane.b32.xlu1 %v7087_v28, %s8846_s1  ;;  %v2405_v28 = vsel %vm2088_vm2, %v2401_v18, %v9614_v36  ;;  %v2823_v36 = vld [vmem:[%s12822_s2 + $0x18] sm:$0xff] }
 0x24a   :  { %v1815_v51 = vpop.f32.mrf.mxu0 }
 0x24b   :  { %v9786_v40 = vpop.permute.xlu0 %2462  ;;  %v9788_v26 = vpop.permute.xlu1 %2468 }
 0x24c   :  { %12975 = vst [vmem:[#allocation79_spill] sm:$0xff] %v9788_v26  ;;  %v2409_v26 = vsel %vm2093_vm3, %v2405_v28, %v9625_v9 }
 0x24d   :  { %2836 = vperm.xlu0 %7419, %v2822_v20   ;;  %2688 = vrot.lane.b32.xlu1 %v1815_v51, %s8846_s1  ;;  %v2413_v20 = vsel %vm2098_vm4, %v2409_v26, %v9637_v43 }
 0x24e   :  { %v2417_v35 = vsel %vm2103_vm5, %v2413_v20, %v9649_v11  ;;  %v12976_v20 = vld [vmem:[#allocation68_spill] sm:$0xff] }
 0x24f   :  { %v9796_v7 = vpop.permute.xlu1 %2464  ;;  %v9798_v30 = vpop.permute.xlu0 %2482  ;;  %v2421_v9 = vsel %vm2108_vm6, %v2417_v35, %v9661_v53  ;;  %v2400_v53 = vsel %vm2083_vm1, %v9374_v31, %v9591_v29 }
 0x251   :  { %2009 = vrot.lane.b32.xlu0 %v9309_v4, %s8842_s15  ;;  %2061 = vrot.lane.b32.xlu1 %v9344_v19, %s8845_s29  ;;  %v2425_v4 = vsel %vm2113_vm7, %v2421_v9, %v9673_v50  ;;  %v2404_v50 = vsel %vm2088_vm2, %v2400_v53, %v9606_v45  ;;  %v12978_v9 = vld [vmem:[#allocation70_spill] sm:$0xff] }
 0x252   :  { %v2429_v19 = vsel %vm2118_vm8, %v2425_v4, %v9685_v15  ;;  %v12980_v4 = vld [vmem:[#allocation72_spill] sm:$0xff]  ;;  %v12982_v53 = vld [vmem:[#allocation6_spill] sm:$0xff] }
 0x253   :  { %v9815_v14 = vpop.permute.xlu0 %2478  ;;  %v9817_v43 = vpop.permute.xlu1 %2484  ;;  %v2433_v11 = vsel %vm2123_vm9, %v2429_v19, %v9697_v47 }
 0x254   :  { %v2437_v26 = vsel %vm2128_vm10, %v2433_v11, %v9709_v60  ;;  %v12983_v11 = vld [vmem:[#allocation62_spill] sm:$0xff] }
 0x255   :  { %2077 = vrot.lane.b32.xlu0 %v9360_v25, %s8846_s1  ;;  %2841 = vperm.xlu1 %7420, %v2823_v36   ;;  %v2408_v25 = vsel %vm2093_vm3, %v2404_v50, %v9619_v2  ;;  %v2441_v31 = vsel %vm2133_vm11, %v2437_v26, %v9721_v24  ;;  %v12977_v36 = vld [vmem:[#allocation60_spill] sm:$0xff]  ;;  %v12984_v26 = vld [vmem:[#allocation74_spill] sm:$0xff] }
 0x256   :  { %v2412_v47 = vsel %vm2098_vm4, %v2408_v25, %v9631_v21  ;;  %v2445_v45 = vsel %vm2138_vm12, %v2441_v31, %v9733_v59  ;;  %v2820_v31 = vld [vmem:[%s12822_s2] sm:$0xff] }
 0x257   :  { %v9834_v15 = vpop.permute.xlu1 %2480  ;;  %v9836_v51 = vpop.permute.xlu0 %2498  ;;  %v2416_v29 = vsel %vm2103_vm5, %v2412_v47, %v9643_v1  ;;  %v2449_v24 = vsel %vm2143_vm13, %v2445_v45, %v9745_v37  ;;  %v12985_v45 = vld [vmem:[#allocation63_spill] sm:$0xff] }
 0x258   :  { %v2420_v60 = vsel %vm2108_vm6, %v2416_v29, %v9655_v46  ;;  %v2453_v21 = vsel %vm2148_vm14, %v2449_v24, %v9755_v48  ;;  %v12986_v24 = vld [vmem:[#allocation76_spill] sm:$0xff] }
 0x259   :  { %2025 = vrot.lane.b32.xlu0 %v9323_v10, %s8843_s25  ;;  %2007 = vrot.lane.b32.xlu1 %v9299_v0, %s8842_s15  ;;  %v2424_v0 = vsel %vm2113_vm7, %v2420_v60, %v9667_v62  ;;  %v2457_v1 = vsel %vm2153_vm15, %v2453_v21, %v9769_v54  ;;  %s8854_s15 = smov 74  }
 0x25a   :  { %v2428_v59 = vsel %vm2118_vm8, %v2424_v0, %v9679_v58 }
 0x25b   :  { %v9858_v2 = vpop.permute.xlu0 %2494  ;;  %v9860_v10 = vpop.permute.xlu1 %2500  ;;  %v2432_v46 = vsel %vm2123_vm9, %v2428_v59, %v9691_v34 }
 0x25c   :  { %v2436_v37 = vsel %vm2128_vm10, %v2432_v46, %v9703_v57  ;;  %v2399_v57 = vsel %vm2083_vm1, %v9394_v39, %v9604_v41  ;;  %v2821_v41 = vld [vmem:[%s12822_s2 + $0x8] sm:$0xff]  ;;  %s8849_s2 = smov 96  }
 0x25d   :  { %2768 = vrot.lane.b32.xlu0 %v2457_v1, %s8848_s18  ;;  %2075 = vrot.lane.b32.xlu1 %v9354_v23, %s8846_s1  ;;  %v2440_v54 = vsel %vm2133_vm11, %v2436_v37, %v9715_v55  ;;  %v2403_v34 = vsel %vm2088_vm2, %v2399_v57, %v9617_v3  ;;  %v12987_v1 = vld [vmem:[#allocation64_spill] sm:$0xff]  ;;  %v12988_v37 = vld [vmem:[#allocation65_spill] sm:$0xff] }
 0x25e   :  { %v2444_v58 = vsel %vm2138_vm12, %v2440_v54, %v9727_v42 }
 0x25f   :  { %v9875_v48 = vpop.permute.xlu1 %2496  ;;  %v9877_v62 = vpop.permute.xlu0 %2514  ;;  %v2448_v23 = vsel %vm2143_vm13, %v2444_v58, %v9739_v63  ;;  %v12989_v58 = vld [vmem:[#allocation66_spill] sm:$0xff] }
 0x260   :  { %v2452_v55 = vsel %vm2148_vm14, %v2448_v23, %v9751_v27  ;;  %v7090_v27 = vpop.f32.mrf.mxu0 }
 0x261   :  { %2041 = vrot.lane.b32.xlu0 %v9337_v16, %s8844_s17  ;;  %2023 = vrot.lane.b32.xlu1 %v9314_v6, %s8843_s25  ;;  %v2407_v6 = vsel %vm2093_vm3, %v2403_v34, %v9629_v38  ;;  %v2456_v16 = vsel %vm2153_vm15, %v2452_v55, %v9765_v61  ;;  %v12990_v34 = vld [vmem:[#allocation67_spill] sm:$0xff]  ;;  %s8855_s25 = smov 60  }
 0x262   :  { %v2411_v39 = vsel %vm2098_vm4, %v2407_v6, %v9641_v5  ;;  %v9958_v47 = vpop.f32.mrf.mxu0 }
 0x263   :  { %v9896_v42 = vpop.permute.xlu0 %2510  ;;  %v9898_v18 = vpop.permute.xlu1 %2516  ;;  %v2415_v3 = vsel %vm2103_vm5, %v2411_v39, %v9653_v44  ;;  %v2398_v44 = vsel %vm2083_vm1, %v9380_v33, %v9595_v52  ;;  %v12979_v52 = vld [vmem:[#allocation61_spill] sm:$0xff] }
 0x264   :  { %v2419_v38 = vsel %vm2108_vm6, %v2415_v3, %v9665_v17  ;;  %v2402_v28 = vsel %vm2088_vm2, %v2398_v44, %v9612_v8  ;;  %v12981_v8 = vld [vmem:[#allocation10_spill] sm:$0xff]  ;;  %v7091_v23 = vpop.f32.mrf.mxu0  ;;  %v12991_v39 = vld [vmem:[#allocation69_spill] sm:$0xff]  ;;  %v12992_v3 = vld [vmem:[#allocation71_spill] sm:$0xff] }
 0x265   :  { %2057 = vrot.lane.b32.xlu0 %v9352_v22, %s8845_s29  ;;  %2766 = vrot.lane.b32.xlu1 %v2456_v16, %s8848_s18  ;;  %v2423_v5 = vsel %vm2113_vm7, %v2419_v38, %v9677_v49  ;;  %v12993_v38 = vld [vmem:[#allocation7_spill] sm:$0xff] }
 0x266   :  { %v2427_v22 = vsel %vm2118_vm8, %v2423_v5, %v9689_v13  ;;  %v12994_v5 = vld [vmem:[#allocation73_spill] sm:$0xff]  ;;  %v1831_v44 = vpop.f32.mrf.mxu0 }
 0x267   :  { %v9916_v63 = vpop.permute.xlu1 %2512  ;;  %v9918_v61 = vpop.permute.xlu0 %2530  ;;  %v2431_v17 = vsel %vm2123_vm9, %v2427_v22, %v9701_v32 }
 0x268   :  { %v2435_v49 = vsel %vm2128_vm10, %v2431_v17, %v12976_v20  ;;  %v12995_v17 = vld [vmem:[#allocation75_spill] sm:$0xff] }
 0x269   :  { %2831 = vperm.xlu0 %7419, %v2821_v41   ;;  %2039 = vrot.lane.b32.xlu1 %v9328_v12, %s8844_s17  ;;  %v2406_v12 = vsel %vm2093_vm3, %v2402_v28, %v12977_v36  ;;  %v2439_v33 = vsel %vm2133_vm11, %v2435_v49, %v12978_v9  ;;  %v12996_v36 = vld [vmem:[#allocation77_spill] sm:$0xff]  ;;  %v2912_v9 = vld [vmem:[%s12823_s3 + $0x10] sm:$0xff]  ;;  %s8856_s17 = smov 46  }
 0x26a   :  { %v2410_v32 = vsel %vm2098_vm4, %v2406_v12, %v12979_v52  ;;  %v2443_v19 = vsel %vm2138_vm12, %v2439_v33, %v12980_v4 }
 0x26b   :  { %v9935_v35 = vpop.permute.xlu0 %2526  ;;  %v9937_v13 = vpop.permute.xlu1 %2532  ;;  %v2414_v50 = vsel %vm2103_vm5, %v2410_v32, %v12983_v11  ;;  %v2447_v25 = vsel %vm2143_vm13, %v2443_v19, %v12984_v26  ;;  %v2941_v32 = vld [vmem:[%s12824_s4 + $0x18] sm:$0xff] }
 0x26c   :  { %v2418_v29 = vsel %vm2108_vm6, %v2414_v50, %v12985_v45  ;;  %v2451_v60 = vsel %vm2148_vm14, %v2447_v25, %v12986_v24 }
 0x26d   :  { %2073 = vrot.lane.b32.xlu0 %v12981_v8, %s8846_s1  ;;  %2055 = vrot.lane.b32.xlu1 %v12982_v53, %s8845_s29  ;;  %v2422_v59 = vsel %vm2113_vm7, %v2418_v29, %v12987_v1  ;;  %v2455_v46 = vsel %vm2153_vm15, %v2451_v60, %v9777_v56  ;;  %s12836_s29 = smov 36  }
 0x26e   :  { %v2426_v54 = vsel %vm2118_vm8, %v2422_v59, %v12988_v37 }
 0x26f   :  { %v9964_v21 = vpop.permute.xlu1 %2528  ;;  %v9966_v0 = vpop.permute.xlu0 %2546  ;;  %v2430_v57 = vsel %vm2123_vm9, %v2426_v54, %v12989_v58 }
 0x270   :  { %v2434_v55 = vsel %vm2128_vm10, %v2430_v57, %v12990_v34  ;;  %v12997_v34 = vld [vmem:[#allocation78_spill] sm:$0xff] }
 0x271   :  { %2764 = vrot.lane.b32.xlu0 %v2455_v46, %s8848_s18  ;;  %2826 = vperm.xlu1 %7420, %v2820_v31   ;;  %v2438_v56 = vsel %vm2133_vm11, %v2434_v55, %v12991_v39  ;;  %v12998_v55 = vld [vmem:[#allocation56_spill] sm:$0xff] }
 0x272   :  { %v2442_v41 = vsel %vm2138_vm12, %v2438_v56, %v12992_v3  ;;  %v2700_v39 = vsel %vm2083_vm1, %v12998_v55, %v12997_v34 }
 0x273   :  { %v9979_v6 = vpop.permute.xlu0 %2542  ;;  %v9981_v16 = vpop.permute.xlu1 %2548  ;;  %v2446_v22 = vsel %vm2143_vm13, %v2442_v41, %v12994_v5  ;;  %v2704_v56 = vsel %vm2088_vm2, %v2700_v39, %v9798_v30 }
 0x274   :  { %v2450_v28 = vsel %vm2148_vm14, %v2446_v22, %v12995_v17  ;;  %v12999_v22 = vld [vmem:[#allocation57_spill] sm:$0xff]  ;;  %v13000_v17 = vld [vmem:[#allocation79_spill] sm:$0xff] }
 0x275   :  { %2071 = vrot.lane.b32.xlu1 %v12993_v38, %s8846_s1  ;;  %2800 = vrot.lane.b32.xlu0 %v7091_v23, %s8849_s2  ;;  %v2454_v12 = vsel %vm2153_vm15, %v2450_v28, %v12996_v36  ;;  %v2708_v38 = vsel %vm2093_vm3, %v2704_v56, %v9836_v51  ;;  %v13001_v28 = vld [vmem:[#allocation58_spill] sm:$0xff]  ;;  %s12846_s1 = smov 86  }
 0x276   :  { %v2712_v5 = vsel %vm2098_vm4, %v2708_v38, %v9877_v62  ;;  %v2701_v36 = vsel %vm2083_vm1, %v13001_v28, %v13000_v17 }
 0x277   :  { %v9994_v20 = vpop.permute.xlu1 %2544  ;;  %v2563_v49 = vpop.permute.xlu0 %2562  ;;  %v2705_v51 = vsel %vm2088_vm2, %v2701_v36, %v9817_v43 }
 0x278   :  { %v2709_v34 = vsel %vm2093_vm3, %v2705_v51, %v9860_v10 }
 0x279   :  { %2762 = vrot.lane.b32.xlu1 %v2454_v12, %s8848_s18  ;;  %2796 = vrot.lane.b32.xlu0 %v1831_v44, %s8849_s2  ;;  %v2698_v44 = vsel %vm2083_vm1, %v12999_v22, %v9786_v40  ;;  %v2716_v12 = vsel %vm2103_vm5, %v2712_v5, %v9918_v61  ;;  %s12856_s18 = smov 106  }
 0x27a   :  { %v2702_v30 = vsel %vm2088_vm2, %v2698_v44, %v9815_v14  ;;  %v2720_v62 = vsel %vm2108_vm6, %v2716_v12, %v9966_v0  ;;  %v2713_v14 = vsel %vm2098_vm4, %v2709_v34, %v9898_v18  ;;  %v13002_v0 = vld [vmem:[#allocation59_spill] sm:$0xff] }
 0x27b   :  { %v2559_v33 = vpop.permute.xlu0 %2558  ;;  %v2565_v52 = vpop.permute.xlu1 %2564  ;;  %v2706_v40 = vsel %vm2093_vm3, %v2702_v30, %v9858_v2  ;;  %v2724_v55 = vsel %vm2113_vm7, %v2720_v62, %v2563_v49  ;;  %v2699_v39 = vsel %vm2083_vm1, %v13002_v0, %v9796_v7  ;;  %v2717_v10 = vsel %vm2103_vm5, %v2713_v14, %v9937_v13  ;;  %v2910_v62 = vld [vmem:[%s12823_s3] sm:$0xff] }
 0x27c   :  { %v2710_v61 = vsel %vm2098_vm4, %v2706_v40, %v9896_v42  ;;  %v2703_v42 = vsel %vm2088_vm2, %v2699_v39, %v9834_v15 }
 0x27d   :  { %2926 = vperm.xlu0 %7419, %v2912_v9   ;;  %2798 = vrot.lane.b32.xlu1 %v7090_v27, %s8849_s2  ;;  %v2714_v2 = vsel %vm2103_vm5, %v2710_v61, %v9935_v35  ;;  %v2707_v35 = vsel %vm2093_vm3, %v2703_v42, %v9875_v48 }
 0x27e   :  { %v2718_v18 = vsel %vm2108_vm6, %v2714_v2, %v9979_v6  ;;  %v2711_v15 = vsel %vm2098_vm4, %v2707_v35, %v9916_v63  ;;  %v13003_v35 = vld [vmem:[#allocation8_spill] sm:$0xff] }
 0x27f   :  { %v10007_v4 = vpop.permute.xlu1 %2560  ;;  %v2579_v19 = vpop.permute.xlu0 %2578  ;;  %v2722_v13 = vsel %vm2113_vm7, %v2718_v18, %v2559_v33  ;;  %v2715_v22 = vsel %vm2103_vm5, %v2711_v15, %v9964_v21 }
 0x280   :  { %v2728_v43 = vsel %vm2118_vm8, %v2724_v55, %v2579_v19  ;;  %v2721_v19 = vsel %vm2108_vm6, %v2717_v10, %v9981_v16 }
 0x281   :  { %2959 = vperm.xlu0 %7419, %v2941_v32  }
 0x283   :  { %v2575_v8 = vpop.permute.xlu0 %2574  ;;  %v2581_v53 = vpop.permute.xlu1 %2580 }
 0x284   :  { %v2726_v6 = vsel %vm2118_vm8, %v2722_v13, %v2575_v8  ;;  %v13004_v13 = vld [vmem:[#allocation2_spill] sm:$0xff] }
 0x287   :  { %v10009_v11 = vpop.permute.xlu1 %2576  ;;  %v2595_v50 = vpop.permute.xlu0 %2594 }
 0x288   :  { %v2732_v49 = vsel %vm2123_vm9, %v2728_v43, %v2595_v50  ;;  %v2725_v50 = vsel %vm2113_vm7, %v2721_v19, %v2565_v52 }
 0x289   :  { %v2729_v16 = vsel %vm2118_vm8, %v2725_v50, %v2581_v53  ;;  %v2086_v50 = vsel %vm2083_vm1, %v13004_v13, %v13003_v35  ;;  %v13026_v13 = vld [vmem:[#allocation27_spill] sm:$0xff] }
 0x28b   :  { %v2591_v26 = vpop.permute.xlu0 %2590  ;;  %v2597_v25 = vpop.permute.xlu1 %2596 }
 0x28c   :  { %v2730_v48 = vsel %vm2123_vm9, %v2726_v6, %v2591_v26  ;;  %v2733_v33 = vsel %vm2123_vm9, %v2729_v16, %v2597_v25  ;;  %v13006_v16 = vld [vmem:[#allocation17_spill] sm:$0xff] }
 0x28f   :  { %v10011_v31 = vpop.permute.xlu1 %2592  ;;  %v2611_v45 = vpop.permute.xlu0 %2610 }
 0x290   :  { %v2736_v56 = vsel %vm2128_vm10, %v2732_v49, %v2611_v45 }
 0x293   :  { %v2607_v29 = vpop.permute.xlu0 %2606  ;;  %v2613_v27 = vpop.permute.xlu1 %2612 }
 0x294   :  { %v2734_v63 = vsel %vm2128_vm10, %v2730_v48, %v2607_v29  ;;  %v2737_v8 = vsel %vm2128_vm10, %v2733_v33, %v2613_v27 }
 0x297   :  { %v10013_v24 = vpop.permute.xlu1 %2608  ;;  %v2627_v60 = vpop.permute.xlu0 %2626 }
 0x298   :  { %v2740_v5 = vsel %vm2133_vm11, %v2736_v56, %v2627_v60  ;;  %v2719_v60 = vsel %vm2108_vm6, %v2715_v22, %v9994_v20  ;;  %v13007_v22 = vld [vmem:[#allocation20_spill] sm:$0xff] }
 0x299   :  { %v2723_v21 = vsel %vm2113_vm7, %v2719_v60, %v10007_v4  ;;  %v13009_v60 = vld [vmem:[#allocation4_spill] sm:$0xff] }
 0x29a   :  { %v2727_v20 = vsel %vm2118_vm8, %v2723_v21, %v10009_v11 }
 0x29b   :  { %v2623_v1 = vpop.permute.xlu0 %2622  ;;  %v2629_v59 = vpop.permute.xlu1 %2628  ;;  %v2731_v17 = vsel %vm2123_vm9, %v2727_v20, %v10011_v31 }
 0x29c   :  { %v2738_v26 = vsel %vm2133_vm11, %v2734_v63, %v2623_v1  ;;  %v2741_v25 = vsel %vm2133_vm11, %v2737_v8, %v2629_v59  ;;  %v2735_v59 = vsel %vm2128_vm10, %v2731_v17, %v10013_v24  ;;  %v13010_v8 = vld [vmem:[#allocation24_spill] sm:$0xff] }
 0x29f   :  { %v10015_v46 = vpop.permute.xlu1 %2624  ;;  %v2643_v37 = vpop.permute.xlu0 %2642 }
 0x2a0   :  { %v2744_v45 = vsel %vm2138_vm12, %v2740_v5, %v2643_v37  ;;  %v13005_v5 = vld [vmem:[#allocation13_spill] sm:$0xff] }
 0x2a1   :  { %v2091_v15 = vsel %vm2088_vm2, %v2086_v50, %v13005_v5  ;;  %v13027_v5 = vld [vmem:[#allocation40_spill] sm:$0xff] }
 0x2a3   :  { %v2639_v54 = vpop.permute.xlu0 %2638  ;;  %v2645_v58 = vpop.permute.xlu1 %2644 }
 0x2a4   :  { %v2742_v29 = vsel %vm2138_vm12, %v2738_v26, %v2639_v54  ;;  %v2745_v27 = vsel %vm2138_vm12, %v2741_v25, %v2645_v58  ;;  %v2739_v58 = vsel %vm2133_vm11, %v2735_v59, %v10015_v46  ;;  %v2913_v46 = vld [vmem:[%s12823_s3 + $0x18] sm:$0xff]  ;;  %v13013_v26 = vld [vmem:[#allocation14_spill] sm:$0xff]  ;;  %v13018_v59 = vld [vmem:[#allocation19_spill] sm:$0xff] }
 0x2a7   :  { %v10017_v57 = vpop.permute.xlu1 %2640  ;;  %v2659_v23 = vpop.permute.xlu0 %2658 }
 0x2a8   :  { %v2748_v52 = vsel %vm2143_vm13, %v2744_v45, %v2659_v23  ;;  %v2096_v45 = vsel %vm2093_vm3, %v2091_v15, %v13006_v16  ;;  %v13028_v16 = vld [vmem:[#allocation25_spill] sm:$0xff] }
 0x2a9   :  { %v2101_v48 = vsel %vm2098_vm4, %v2096_v45, %v13007_v22  ;;  %v13029_v22 = vld [vmem:[#allocation26_spill] sm:$0xff] }
 0x2ab   :  { %v2655_v3 = vpop.permute.xlu0 %2654  ;;  %v2661_v41 = vpop.permute.xlu1 %2660 }
 0x2ac   :  { %v2746_v4 = vsel %vm2143_vm13, %v2742_v29, %v2655_v3  ;;  %v2749_v1 = vsel %vm2143_vm13, %v2745_v27, %v2661_v41  ;;  %v2743_v3 = vsel %vm2138_vm12, %v2739_v58, %v10017_v57  ;;  %v2940_v57 = vld [vmem:[%s12824_s4 + $0x10] sm:$0xff]  ;;  %v13015_v29 = vld [vmem:[#allocation11_spill] sm:$0xff]  ;;  %v13016_v27 = vld [vmem:[#allocation5_spill] sm:$0xff] }
 0x2ad   :  { %v2085_v17 = vsel %vm2083_vm1, %v13016_v27, %v13015_v29  ;;  %v13036_v27 = vld [vmem:[#allocation33_spill] sm:$0xff] }
 0x2af   :  { %v2657_v9 = vpop.permute.xlu1 %2656  ;;  %v2675_v32 = vpop.permute.xlu0 %2674 }
 0x2b0   :  { %v2752_v53 = vsel %vm2148_vm14, %v2748_v52, %v2675_v32  ;;  %v2747_v24 = vsel %vm2143_vm13, %v2743_v3, %v2657_v9  ;;  %v13008_v52 = vld [vmem:[#allocation12_spill] sm:$0xff]  ;;  %v13022_v3 = vld [vmem:[#allocation23_spill] sm:$0xff] }
 0x2b1   :  { %v2087_v63 = vsel %vm2083_vm1, %v13009_v60, %v13008_v52  ;;  %v13030_v52 = vld [vmem:[#allocation31_spill] sm:$0xff] }
 0x2b2   :  { %v2092_v25 = vsel %vm2088_vm2, %v2087_v63, %v13013_v26  ;;  %v13031_v63 = vld [vmem:[#allocation44_spill] sm:$0xff] }
 0x2b3   :  { %v2671_v7 = vpop.permute.xlu0 %2670  ;;  %v2677_v38 = vpop.permute.xlu1 %2676 }
 0x2b4   :  { %v2750_v28 = vsel %vm2148_vm14, %v2746_v4, %v2671_v7  ;;  %v2753_v11 = vsel %vm2148_vm14, %v2749_v1, %v2677_v38  ;;  %v13017_v4 = vld [vmem:[#allocation15_spill] sm:$0xff] }
 0x2b7   :  { %v2673_v44 = vpop.permute.xlu1 %2672  ;;  %v2691_v37 = vpop.permute.xlu0 %2690 }
 0x2b8   :  { %v2756_v23 = vsel %vm2153_vm15, %v2752_v53, %v2691_v37  ;;  %v2751_v41 = vsel %vm2148_vm14, %v2747_v24, %v2673_v44  ;;  %v2106_v53 = vsel %vm2103_vm5, %v2101_v48, %v13010_v8  ;;  %v13011_v44 = vld [vmem:[#allocation9_spill] sm:$0xff]  ;;  %v13012_v37 = vld [vmem:[#allocation3_spill] sm:$0xff] }
 0x2b9   :  { %2782 = vrot.lane.b32.xlu1 %v2756_v23, %s8850_s22  ;;  %v2084_v21 = vsel %vm2083_vm1, %v13012_v37, %v13011_v44  ;;  %v13014_v23 = vld [vmem:[#allocation28_spill] sm:$0xff]  ;;  %v13032_v44 = vld [vmem:[#allocation29_spill] sm:$0xff] }
 0x2ba   :  { %v2111_v20 = vsel %vm2108_vm6, %v2106_v53, %v13014_v23  ;;  %v2089_v1 = vsel %vm2088_vm2, %v2084_v21, %v13017_v4  ;;  %v13033_v21 = vld [vmem:[#allocation30_spill] sm:$0xff] }
 0x2bb   :  { %v2687_v54 = vpop.permute.xlu0 %2686  ;;  %v2693_v36 = vpop.permute.xlu1 %2692  ;;  %v13037_v4 = vld [vmem:[#allocation34_spill] sm:$0xff] }
 0x2bc   :  { %v2754_v12 = vsel %vm2153_vm15, %v2750_v28, %v2687_v54  ;;  %v2757_v31 = vsel %vm2153_vm15, %v2753_v11, %v2693_v36  ;;  %v2097_v28 = vsel %vm2093_vm3, %v2092_v25, %v13018_v59  ;;  %v13019_v11 = vld [vmem:[#allocation32_spill] sm:$0xff]  ;;  %v13034_v25 = vld [vmem:[#allocation35_spill] sm:$0xff] }
 0x2bd   :  { %2778 = vrot.lane.b32.xlu1 %v2754_v12, %s8850_s22  ;;  %2784 = vrot.lane.b32.xlu0 %v2757_v31, %s8850_s22  ;;  %v2116_v54 = vsel %vm2113_vm7, %v2111_v20, %v13019_v11  ;;  %v13020_v36 = vld [vmem:[#allocation16_spill] sm:$0xff]  ;;  %v13021_v12 = vld [vmem:[#allocation18_spill] sm:$0xff]  ;;  %v2102_v24 = vsel %vm2098_vm4, %v2097_v28, %v13022_v3  ;;  %v13038_v59 = vld [vmem:[#allocation39_spill] sm:$0xff] }
 0x2be   :  { %v2090_v58 = vsel %vm2088_vm2, %v2085_v17, %v13020_v36  ;;  %v2094_v31 = vsel %vm2093_vm3, %v2089_v1, %v13021_v12  ;;  %v2107_v50 = vsel %vm2103_vm5, %v2102_v24, %v13026_v13  ;;  %v13035_v20 = vld [vmem:[#allocation48_spill] sm:$0xff]  ;;  %v13039_v11 = vld [vmem:[#allocation50_spill] sm:$0xff]  ;;  %v13042_v24 = vld [vmem:[#allocation43_spill] sm:$0xff]  ;;  %vm12864_vm2 = vcmask 523264  }
 0x2bf   :  { %v2689_v30 = vpop.permute.xlu1 %2688  ;;  %v2112_v60 = vsel %vm2108_vm6, %v2107_v50, %v13030_v52  ;;  %v13046_v50 = vld [vmem:[#allocation54_spill] sm:$0xff]  ;;  %v13049_v52 = vld [vmem:[#allocation45_spill] sm:$0xff] }
 0x2c0   :  { %v2755_v51 = vsel %vm2153_vm15, %v2751_v41, %v2689_v30  ;;  %v13023_v41 = vld [vmem:[#allocation36_spill] sm:$0xff]  ;;  %v2117_v23 = vsel %vm2113_vm7, %v2112_v60, %v13034_v25 }
 0x2c1   :  { %2794 = vrot.lane.b32.xlu1 %v9958_v47, %s8849_s2  ;;  %2780 = vrot.lane.b32.xlu0 %v2755_v51, %s8850_s22  ;;  %v2121_v30 = vsel %vm2118_vm8, %v2116_v54, %v13023_v41  ;;  %v2122_v28 = vsel %vm2118_vm8, %v2117_v23, %v13038_v59  ;;  %v13052_v23 = vld [vmem:[#allocation49_spill] sm:$0xff] }
 0x2c2   :  { %v2126_v15 = vsel %vm2123_vm9, %v2121_v30, %v13027_v5  ;;  %v2127_v41 = vsel %vm2123_vm9, %v2122_v28, %v13042_v24  ;;  %v13043_v30 = vld [vmem:[#allocation52_spill] sm:$0xff] }
 0x2c3   :  { %v10132_v32 = vpop.permute.xlu1 %2061  ;;  %v2131_v8 = vsel %vm2128_vm10, %v2126_v15, %v13031_v63  ;;  %v13047_v15 = vld [vmem:[#allocation42_spill] sm:$0xff] }
 0x2c4   :  { %v2136_v29 = vsel %vm2133_vm11, %v2131_v8, %v13035_v20  ;;  %v13050_v63 = vld [vmem:[#allocation46_spill] sm:$0xff] }
 0x2c5   :  { %2931 = vperm.xlu1 %7420, %v2913_v46   ;;  %v13024_v46 = vld [vmem:[#allocation21_spill] sm:$0xff]  ;;  %v2141_v54 = vsel %vm2138_vm12, %v2136_v29, %v13039_v11  ;;  %v13053_v29 = vld [vmem:[#allocation55_spill] sm:$0xff] }
 0x2c8   :  { %v10128_v9 = vpop.permute.xlu0 %2836 }
 0x2c9   :  { %2954 = vperm.xlu1 %7420, %v2940_v57   ;;  %v2095_v57 = vsel %vm2093_vm3, %v2090_v58, %v13024_v46  ;;  %v13040_v58 = vld [vmem:[#allocation37_spill] sm:$0xff]  ;;  %v2146_v46 = vsel %vm2143_vm13, %v2141_v54, %v13043_v30  ;;  %vm2815_vm3 = vcmask 785408  }
 0x2ca   :  { %v2100_v45 = vsel %vm2098_vm4, %v2095_v57, %v13028_v16  ;;  %v13044_v57 = vld [vmem:[#allocation41_spill] sm:$0xff]  ;;  %v2151_v5 = vsel %vm2148_vm14, %v2146_v46, %v13046_v50 }
 0x2cb   :  { %v2105_v37 = vsel %vm2103_vm5, %v2100_v45, %v13032_v44  ;;  %v13048_v45 = vld [vmem:[#allocation51_spill] sm:$0xff]  ;;  %v13051_v44 = vld [vmem:[#allocation53_spill] sm:$0xff] }
 0x2cc   :  { %v10130_v47 = vpop.permute.xlu0 %2009  ;;  %v2110_v17 = vsel %vm2108_vm6, %v2105_v37, %v13036_v27 }
 0x2cd   :  { %2916 = vperm.xlu1 %7420, %v2910_v62   ;;  %v13025_v62 = vld [vmem:[#allocation22_spill] sm:$0xff]  ;;  %v2115_v12 = vsel %vm2113_vm7, %v2110_v17, %v13040_v58 }
 0x2ce   :  { %v2099_v35 = vsel %vm2098_vm4, %v2094_v31, %v13025_v62  ;;  %v13041_v31 = vld [vmem:[#allocation38_spill] sm:$0xff]  ;;  %v2120_v62 = vsel %vm2118_vm8, %v2115_v12, %v13044_v57  ;;  %vm12894_vm4 = vcmask 801792  }
 0x2cf   :  { %v2104_v48 = vsel %vm2103_vm5, %v2099_v35, %v13029_v22  ;;  %v13045_v35 = vld [vmem:[#allocation47_spill] sm:$0xff]  ;;  %v2125_v60 = vsel %vm2123_vm9, %v2120_v62, %v13049_v52  ;;  %vm3235_vm5 = vcmask 441344  }
 0x2d0   :  { %v10134_v40 = vpop.permute.xlu0 %2077  ;;  %v10136_v34 = vpop.permute.xlu1 %2841  ;;  %v2109_v26 = vsel %vm2108_vm6, %v2104_v48, %v13033_v21  ;;  %v2132_v13 = vsel %vm2128_vm10, %v2127_v41, %v13045_v35  ;;  %v2130_v20 = vsel %vm2128_vm10, %v2125_v60, %v13052_v23  ;;  %vm3240_vm6 = vcmask 588800  }
 0x2d1   :  { %v2114_v1 = vsel %vm2113_vm7, %v2109_v26, %v13037_v4  ;;  %v2137_v22 = vsel %vm2133_vm11, %v2132_v13, %v13048_v45  ;;  %v2135_v4 = vsel %vm2133_vm11, %v2130_v20, %v10130_v47  ;;  %v2911_v13 = vld [vmem:[%s12823_s3 + $0x8] sm:$0xff]  ;;  %s8851_s3 = smov 116  }
 0x2d2   :  { %v2119_v3 = vsel %vm2118_vm8, %v2114_v1, %v13041_v31  ;;  %v2142_v37 = vsel %vm2138_vm12, %v2137_v22, %v13051_v44 }
 0x2d3   :  { %v2124_v16 = vsel %vm2123_vm9, %v2119_v3, %v13047_v15  ;;  %v2939_v15 = vld [vmem:[%s12824_s4 + $0x8] sm:$0xff] }
 0x2d4   :  { %v10138_v55 = vpop.permute.xlu0 %2025  ;;  %v10140_v61 = vpop.permute.xlu1 %2007  ;;  %v2129_v8 = vsel %vm2128_vm10, %v2124_v16, %v13050_v63  ;;  %vm3245_vm10 = vcmask 736256  }
 0x2d5   :  { %v2140_v28 = vsel %vm2138_vm12, %v2135_v4, %v10138_v55 }
 0x2d8   :  { %v10142_v14 = vpop.permute.xlu0 %2768  ;;  %v2076_v43 = vpop.permute.xlu1 %2075 }
 0x2d9   :  { %v2156_v48 = vsel %vm2153_vm15, %v2151_v5, %v2076_v43  ;;  %v2147_v43 = vsel %vm2143_vm13, %v2142_v37, %v13053_v29 }
 0x2da   :  { %v2152_v17 = vsel %vm2148_vm14, %v2147_v43, %v10132_v32 }
 0x2db   :  { %v2157_v59 = vsel %vm2153_vm15, %v2152_v17, %v10134_v40 }
 0x2dc   :  { %v10144_v0 = vpop.permute.xlu0 %2041  ;;  %v10146_v39 = vpop.permute.xlu1 %2023  ;;  %v2809_v47 = vsel %vm731_vm0, %v2157_v59, %v10142_v14 }
 0x2dd   :  { %v2145_v32 = vsel %vm2143_vm13, %v2140_v28, %v10144_v0 }
 0x2e0   :  { %v10148_v2 = vpop.permute.xlu0 %2057  ;;  %v2767_v10 = vpop.permute.xlu1 %2766 }
 0x2e1   :  { %v2808_v21 = vsel %vm731_vm0, %v2156_v48, %v2767_v10  ;;  %v2134_v10 = vsel %vm2133_vm11, %v2129_v8, %v10140_v61  ;;  %v2150_v14 = vsel %vm2148_vm14, %v2145_v32, %v10148_v2  ;;  %vm12876_vm11 = vcmask 883712  }
 0x2e2   :  { %v2139_v11 = vsel %vm2138_vm12, %v2134_v10, %v10146_v39  ;;  %vm12865_vm12 = vcmask 1031168  }
 0x2e4   :  { %v10150_v49 = vpop.permute.xlu0 %2831  ;;  %v10152_v42 = vpop.permute.xlu1 %2039 }
 0x2e5   :  { %v2144_v61 = vsel %vm2143_vm13, %v2139_v11, %v10152_v42  ;;  %vm12895_vm13 = vmmov 0  }
 0x2e8   :  { %v10154_v18 = vpop.permute.xlu0 %2073  ;;  %v10156_v19 = vpop.permute.xlu1 %2055 }
 0x2e9   :  { %v2149_v55 = vsel %vm2148_vm14, %v2144_v61, %v10156_v19  ;;  %v2155_v19 = vsel %vm2153_vm15, %v2150_v14, %v10154_v18 }
 0x2ec   :  { %v10158_v56 = vpop.permute.xlu0 %2764  ;;  %v10160_v7 = vpop.permute.xlu1 %2826 }
 0x2ed   :  { %v2807_v2 = vsel %vm731_vm0, %v2155_v19, %v10158_v56 }
 0x2f0   :  { %v10162_v38 = vpop.permute.xlu0 %2800  ;;  %v10169_v6 = vpop.permute.xlu1 %2071 }
 0x2f1   :  { %v2154_v0 = vsel %vm2153_vm15, %v2149_v55, %v10169_v6  ;;  %vm3348_vm15 = vcmask 343040  }
 0x2f4   :  { %v10175_v33 = vpop.permute.xlu0 %2796  ;;  %v10206_v51 = vpop.permute.xlu1 %2762 }
 0x2f5   :  { %v2806_v12 = vsel %vm731_vm0, %v2154_v0, %v10206_v51  ;;  %vm3230_vm0 = vcmask 293888  }
 0x2f8   :  { %v10224_v53 = vpop.permute.xlu0 %2926  ;;  %v2799_v36 = vpop.permute.xlu1 %2798 }
 0x2fc   :  { %v10268_v26 = vpop.permute.xlu0 %2959 }
 0x32b   :  { %v2783_v25 = vpop.permute.xlu1 %2782 }
 0x32c   :  { %v2813_v27 = vsel %vm12864_vm2, %v2808_v21, %v2783_v25 }
 0x32d   :  { %v2818_v1 = vsel %vm2815_vm3, %v2813_v27, %v2799_v36 }
 0x32e   :  { %v10289_v54 = vadd.f32 %v10128_v9, %v2818_v1 }
 0x32f   :  { %v2779_v36 = vpop.permute.xlu1 %2778  ;;  %v2785_v40 = vpop.permute.xlu0 %2784 }
 0x330   :  { %v2814_v58 = vsel %vm12864_vm2, %v2809_v47, %v2785_v40  ;;  %v2855_v9 = vsel %vm12894_vm4, %v10289_v54, 0.0  ;;  %v2863_v39 = vmul.f32 %v10289_v54, %v10289_v54  ;;  %v2811_v24 = vsel %vm12864_vm2, %v2806_v12, %v2779_v36 }
 0x331   :  { %v2819_v42 = vsel %vm2815_vm3, %v2814_v58, %v10162_v38  ;;  %2856 = vadd.xlane.f32.xlu1 %v2855_v9 }
 0x332   :  { %v2847_v31 = vadd.f32 %v10136_v34, %v2819_v42  ;;  %v2871_v3 = vsel %vm12894_vm4, %v2863_v39, 0.0 }
 0x333   :  { %v2795_v6 = vpop.permute.xlu1 %2794  ;;  %2872 = vadd.xlane.f32.xlu0 %v2871_v3  ;;  %v2781_v41 = vpop.permute.xlu0 %2780 }
 0x334   :  { %v2816_v38 = vsel %vm2815_vm3, %v2811_v24, %v2795_v6  ;;  %v2812_v30 = vsel %vm12864_vm2, %v2807_v2, %v2781_v41  ;;  %v2864_v18 = vmul.f32 %v2847_v31, %v2847_v31  ;;  %v2858_v35 = vsel %vm12894_vm4, %v2847_v31, 0.0 }
 0x335   :  { %v10322_v46 = vadd.f32 %v10160_v7, %v2816_v38  ;;  %v2817_v34 = vsel %vm2815_vm3, %v2812_v30, %v10175_v33  ;;  %v2938_v33 = vld [vmem:[%s12824_s4] sm:$0xff]  ;;  %s8852_s4 = smov 88   ;;  %vm3353_vm3 = vcmask 457728   ;;  %vm3358_vm2 = vcmask 572416  }
 0x336   :  { %v10327_v51 = vadd.f32 %v10150_v49, %v2817_v34  ;;  %v2874_v56 = vsel %vm12894_vm4, %v2864_v18, 0.0 }
 0x337   :  { %2875 = vadd.xlane.f32.xlu1 %v2874_v56  ;;  %v2849_v57 = vsel %vm12894_vm4, %v10322_v46, 0.0  ;;  %v2861_v50 = vmul.f32 %v10322_v46, %v10322_v46 }
 0x338   :  { %2850 = vadd.xlane.f32.xlu0 %v2849_v57  ;;  %v2852_v62 = vsel %vm12894_vm4, %v10327_v51, 0.0  ;;  %v2862_v7 = vmul.f32 %v10327_v51, %v10327_v51 }
 0x339   :  { %v2865_v5 = vsel %vm12894_vm4, %v2861_v50, 0.0 }
 0x33a   :  { %v2868_v49 = vsel %vm12894_vm4, %v2862_v7, 0.0 }
 0x33b   :  { %2853 = vadd.xlane.f32.xlu1 %v2852_v62 }
 0x33c   :  { %2859 = vadd.xlane.f32.xlu0 %v2858_v35 }
 0x33f   :  { %2869 = vadd.xlane.f32.xlu1 %v2868_v49 }
 0x340   :  { %v2932_v16 = vpop.permute.xlu1 %2931 }
 0x344   :  { %v2955_v45 = vpop.permute.xlu1 %2954 }
 0x348   :  { %v10350_v22 = vpop.permute.xlu1 %2916 }
 0x350   :  { %2944 = vperm.xlu1 %7420, %v2938_v33  }
 0x352   :  { %2921 = vperm.xlu0 %7419, %v2911_v13  }
 0x371   :  { %2866 = vadd.xlane.f32.xlu0 %v2865_v5 }
 0x387   :  { %2949 = vperm.xlu0 %7419, %v2939_v15  }
 0x3ba   :  { %v2857_v48 = vpop.xlane.xlu1 %2856 }
 0x3bb   :  { %v2880_v52 = vmul.f32 0.010204081, %v2857_v48 }
 0x3bc   :  { %v2873_v60 = vpop.xlane.xlu0 %2872 }
 0x3bd   :  { %v2888_v63 = vmul.f32 %v2880_v52, %v2880_v52  ;;  %v2884_v8 = vmul.f32 0.010204081, %v2873_v60  ;;  %v2904_v10 = vsub.f32 %v10289_v54, %v2880_v52 }
 0x3bf   :  { %v2892_v44 = vsub.f32 %v2884_v8, %v2888_v63 }
 0x3c0   :  { %v2876_v25 = vpop.xlane.xlu1 %2875 }
 0x3c1   :  { %v2851_v37 = vpop.xlane.xlu0 %2850  ;;  %v2896_v21 = vadd.f32 1e-05, %v2892_v44  ;;  %v2885_v29 = vmul.f32 0.010204081, %v2876_v25 }
 0x3c2   :  { %v2878_v42 = vmul.f32 0.010204081, %v2851_v37 }
 0x3c3   :  { %8788 = vrsqrt.f32 %v2896_v21 }
 0x3c4   :  { %v2854_v9 = vpop.xlane.xlu1 %2853  ;;  %v2902_v30 = vsub.f32 %v10322_v46, %v2878_v42 }
 0x3c5   :  { %v2860_v23 = vpop.xlane.xlu0 %2859  ;;  %v2879_v54 = vmul.f32 0.010204081, %v2854_v9 }
 0x3c6   :  { %v2881_v20 = vmul.f32 0.010204081, %v2860_v23 }
 0x3c7   :  { %v2887_v39 = vmul.f32 %v2879_v54, %v2879_v54  ;;  %v2903_v41 = vsub.f32 %v10327_v51, %v2879_v54 }
 0x3c8   :  { %v2889_v43 = vmul.f32 %v2881_v20, %v2881_v20  ;;  %v2905_v28 = vsub.f32 %v2847_v31, %v2881_v20  ;;  %v2886_v31 = vmul.f32 %v2878_v42, %v2878_v42 }
 0x3ca   :  { %v2893_v27 = vsub.f32 %v2885_v29, %v2889_v43 }
 0x3cc   :  { %v2897_v17 = vadd.f32 1e-05, %v2893_v27 }
 0x3cd   :  { %v2922_v0 = vpop.permute.xlu0 %2921 }
 0x3ce   :  { %8790 = vrsqrt.f32 %v2897_v17 }
 0x3d0   :  { %v8789_v4 = vpop.eup %8788 }
 0x3d1   :  { %v2908_v1 = vmul.f32 %v8789_v4, %v2904_v10 }
 0x3d3   :  { %v2936_v59 = vmul.f32 %v10224_v53, %v2908_v1  ;;  %v2870_v53 = vpop.xlane.xlu1 %2869 }
 0x3d5   :  { %v2964_v32 = vadd.f32 %v2955_v45, %v2936_v59 }
 0x3d7   :  { %v2968_v40 = vmax.f32 %v2964_v32, 0.0  ;;  %v2945_v35 = vpop.permute.xlu1 %2944 }
 0x3db   :  { %v8791_v11 = vpop.eup %8790 }
 0x3dc   :  { %v2909_v47 = vmul.f32 %v8791_v11, %v2905_v28 }
 0x3de   :  { %v2937_v61 = vmul.f32 %v2932_v16, %v2909_v47 }
 0x3e0   :  { %v2965_v36 = vadd.f32 %v10268_v26, %v2937_v61  ;;  %v2883_v26 = vmul.f32 0.010204081, %v2870_v53 }
 0x3e2   :  { %v2969_v55 = vmax.f32 %v2965_v36, 0.0  ;;  %v2891_v14 = vsub.f32 %v2883_v26, %v2887_v39 }
 0x3e4   :  { %v7426_v58 = vpack.i.bf16 %v2969_v55, %v2968_v40  ;;  %v2895_v19 = vadd.f32 1e-05, %v2891_v14 }
 0x3e6   :  { %7427 = vrot.lane.b32.xlu0 %v7426_v58, %s8851_s3  ;;  %7422 = vrot.lane.b32.xlu1 %v7426_v58, %s8832_s0  ;;  %8792 = vrsqrt.f32 %v2895_v19 }
 0x3ea   :  { %7437 = vrot.lane.b32.xlu0 %v7426_v58, %s8852_s4  ;;  %7432 = vrot.lane.b32.xlu1 %v7426_v58, %s8853_s27 }
 0x3ee   :  { %7442 = vrot.lane.b32.xlu0 %v7426_v58, %s8854_s15 }
 0x3f2   :  { %7447 = vrot.lane.b32.xlu0 %v7426_v58, %s8855_s25 }
 0x3f3   :  { %v8793_v6 = vpop.eup %8792 }
 0x3f4   :  { %v2907_v38 = vmul.f32 %v8793_v6, %v2903_v41 }
 0x3f6   :  { %7452 = vrot.lane.b32.xlu0 %v7426_v58, %s8856_s17  ;;  %v2935_v56 = vmul.f32 %v2922_v0, %v2907_v38 }
 0x3fa   :  { %v2867_v12 = vpop.xlane.xlu0 %2866 }
 0x3fb   :  { %v2882_v3 = vmul.f32 0.010204081, %v2867_v12 }
 0x3fd   :  { %v2890_v2 = vsub.f32 %v2882_v3, %v2886_v31 }
 0x3ff   :  { %v2894_v24 = vadd.f32 1e-05, %v2890_v2 }
 0x401   :  { %8794 = vrsqrt.f32 %v2894_v24 }
 0x402   :  { %v2950_v34 = vpop.permute.xlu0 %2949 }
 0x403   :  { %v2963_v7 = vadd.f32 %v2950_v34, %v2935_v56 }
 0x405   :  { %v2967_v13 = vmax.f32 %v2963_v7, 0.0 }
 0x40e   :  { %v8795_v18 = vpop.eup %8794 }
 0x40f   :  { %v2906_v57 = vmul.f32 %v8795_v18, %v2902_v30 }
 0x411   :  { %v2934_v62 = vmul.f32 %v10350_v22, %v2906_v57 }
 0x413   :  { %v2962_v49 = vadd.f32 %v2945_v35, %v2934_v62 }
 0x415   :  { %v2966_v33 = vmax.f32 %v2962_v49, 0.0 }
 0x417   :  { %v7476_v50 = vpack.i.bf16 %v2967_v13, %v2966_v33 }
 0x419   :  { %7477 = vrot.lane.b32.xlu0 %v7476_v50, %s8854_s15  ;;  %7457 = vrot.lane.b32.xlu1 %v7476_v50, %s8832_s0 }
 0x41d   :  { %7487 = vrot.lane.b32.xlu0 %v7476_v50, %s8856_s17  ;;  %7462 = vrot.lane.b32.xlu1 %v7476_v50, %s8851_s3 }
 0x421   :  { %7467 = vrot.lane.b32.xlu1 %v7476_v50, %s8853_s27 }
 0x425   :  { %7472 = vrot.lane.b32.xlu1 %v7476_v50, %s8852_s4 }
 0x429   :  { %7482 = vrot.lane.b32.xlu1 %v7476_v50, %s8855_s25 }
 0x458   :  { %v7423_v46 = vpop.permute.xlu1 %7422  ;;  %v7428_v51 = vpop.permute.xlu0 %7427 }
 0x459   :  { %v7425_v5 = vunpack.i.h.bf16 %v7423_v46  ;;  %v7424_v15 = vunpack.i.l.bf16 %v7423_v46  ;;  %v7430_v16 = vunpack.i.h.bf16 %v7428_v51  ;;  %v7429_v45 = vunpack.i.l.bf16 %v7428_v51 }
 0x45b   :  { %v2989_v22 = vsel %vm2083_vm1, 0.0, %v7425_v5  ;;  %v2988_v48 = vsel %vm2083_vm1, 0.0, %v7424_v15  ;;  %v3009_v52 = vsel %vm2083_vm1, 0.0, %v7430_v16  ;;  %v3008_v60 = vsel %vm2083_vm1, 0.0, %v7429_v45 }
 0x45c   :  { %v2993_v63 = vsel %vm2118_vm8, %v2989_v22, 0.0  ;;  %v2992_v8 = vsel %vm2118_vm8, %v2988_v48, 0.0  ;;  %v3013_v44 = vsel %vm2118_vm8, %v3009_v52, 0.0  ;;  %v3012_v37 = vsel %vm2118_vm8, %v3008_v60, 0.0  ;;  %v7433_v21 = vpop.permute.xlu1 %7432  ;;  %v7438_v25 = vpop.permute.xlu0 %7437 }
 0x45d   :  { %v7435_v23 = vunpack.i.h.bf16 %v7433_v21  ;;  %v7434_v20 = vunpack.i.l.bf16 %v7433_v21  ;;  %v7440_v29 = vunpack.i.h.bf16 %v7438_v25  ;;  %v7439_v43 = vunpack.i.l.bf16 %v7438_v25 }
 0x45e   :  { %v7491_v27 = vpack.i.bf16 %v2993_v63, %v2992_v8  ;;  %v7496_v17 = vpack.i.bf16 %v3013_v44, %v3012_v37 }
 0x45f   :  { %v3029_v4 = vsel %vm2083_vm1, 0.0, %v7435_v23  ;;  %v3028_v10 = vsel %vm2083_vm1, 0.0, %v7434_v20  ;;  %v3049_v1 = vsel %vm2083_vm1, 0.0, %v7440_v29  ;;  %v3048_v59 = vsel %vm2083_vm1, 0.0, %v7439_v43 }
 0x460   :  { %v3033_v28 = vsel %vm2118_vm8, %v3029_v4, 0.0  ;;  %v3032_v11 = vsel %vm2118_vm8, %v3028_v10, 0.0  ;;  %v3053_v47 = vsel %vm2118_vm8, %v3049_v1, 0.0  ;;  %v3052_v32 = vsel %vm2118_vm8, %v3048_v59, 0.0  ;;  %7492 = vrot.lane.b32.xlu1 %v7491_v27, %s8840_s19  ;;  %7497 = vrot.lane.b32.xlu0 %v7496_v17, %s12836_s29  ;;  %v7443_v61 = vpop.permute.xlu0 %7442 }
 0x461   :  { %v7445_v36 = vunpack.i.h.bf16 %v7443_v61  ;;  %v7444_v40 = vunpack.i.l.bf16 %v7443_v61  ;;  %v7501_v55 = vpack.i.bf16 %v3033_v28, %v3032_v11  ;;  %v7506_v58 = vpack.i.bf16 %v3053_v47, %v3052_v32 }
 0x463   :  { %v3069_v9 = vsel %vm2083_vm1, 0.0, %v7445_v36  ;;  %v3068_v53 = vsel %vm2083_vm1, 0.0, %v7444_v40 }
 0x464   :  { %v3073_v54 = vsel %vm2118_vm8, %v3069_v9, 0.0  ;;  %v3072_v26 = vsel %vm2118_vm8, %v3068_v53, 0.0  ;;  %7502 = vrot.lane.b32.xlu1 %v7501_v55, %s12832_s20  ;;  %7507 = vrot.lane.b32.xlu0 %v7506_v58, %s8859_s23  ;;  %v7448_v39 = vpop.permute.xlu0 %7447 }
 0x465   :  { %v7450_v14 = vunpack.i.h.bf16 %v7448_v39  ;;  %v7449_v0 = vunpack.i.l.bf16 %v7448_v39  ;;  %v7511_v42 = vpack.i.bf16 %v3073_v54, %v3072_v26 }
 0x467   :  { %v3089_v19 = vsel %vm2083_vm1, 0.0, %v7450_v14  ;;  %v3088_v12 = vsel %vm2083_vm1, 0.0, %v7449_v0 }
 0x468   :  { %v3093_v31 = vsel %vm2118_vm8, %v3089_v19, 0.0  ;;  %v3092_v3 = vsel %vm2118_vm8, %v3088_v12, 0.0  ;;  %7512 = vrot.lane.b32.xlu0 %v7511_v42, %s12848_s28  ;;  %v7453_v2 = vpop.permute.xlu0 %7452 }
 0x469   :  { %v7455_v24 = vunpack.i.h.bf16 %v7453_v2  ;;  %v7454_v6 = vunpack.i.l.bf16 %v7453_v2  ;;  %v7516_v41 = vpack.i.bf16 %v3093_v31, %v3092_v3 }
 0x46b   :  { %v3109_v38 = vsel %vm2083_vm1, 0.0, %v7455_v24  ;;  %v3108_v30 = vsel %vm2083_vm1, 0.0, %v7454_v6 }
 0x46c   :  { %v3113_v18 = vsel %vm2118_vm8, %v3109_v38, 0.0  ;;  %v3112_v34 = vsel %vm2118_vm8, %v3108_v30, 0.0  ;;  %7517 = vrot.lane.b32.xlu0 %v7516_v41, %s8861_s13 }
 0x46d   :  { %v7521_v56 = vpack.i.bf16 %v3113_v18, %v3112_v34 }
 0x470   :  { %7522 = vrot.lane.b32.xlu0 %v7521_v56, %s12844_s14 }
 0x48b   :  { %v7458_v57 = vpop.permute.xlu1 %7457  ;;  %v7478_v62 = vpop.permute.xlu0 %7477 }
 0x48c   :  { %v7460_v7 = vunpack.i.h.bf16 %v7458_v57  ;;  %v7459_v35 = vunpack.i.l.bf16 %v7458_v57  ;;  %v7480_v49 = vunpack.i.h.bf16 %v7478_v62  ;;  %v7479_v33 = vunpack.i.l.bf16 %v7478_v62 }
 0x48e   :  { %v2987_v13 = vsel %vm2083_vm1, 0.0, %v7460_v7  ;;  %v2986_v50 = vsel %vm2083_vm1, 0.0, %v7459_v35  ;;  %v3067_v46 = vsel %vm2083_vm1, 0.0, %v7480_v49  ;;  %v3066_v51 = vsel %vm2083_vm1, 0.0, %v7479_v33 }
 0x48f   :  { %v2991_v5 = vsel %vm2118_vm8, %v2987_v13, 0.0  ;;  %v2990_v15 = vsel %vm2118_vm8, %v2986_v50, 0.0  ;;  %v3071_v16 = vsel %vm2118_vm8, %v3067_v46, 0.0  ;;  %v3070_v45 = vsel %vm2118_vm8, %v3066_v51, 0.0  ;;  %v7463_v22 = vpop.permute.xlu1 %7462  ;;  %v7488_v48 = vpop.permute.xlu0 %7487 }
 0x490   :  { %v7465_v52 = vunpack.i.h.bf16 %v7463_v22  ;;  %v7464_v60 = vunpack.i.l.bf16 %v7463_v22  ;;  %v7490_v63 = vunpack.i.h.bf16 %v7488_v48  ;;  %v7489_v8 = vunpack.i.l.bf16 %v7488_v48 }
 0x491   :  { %v7526_v44 = vpack.i.bf16 %v2991_v5, %v2990_v15  ;;  %v7546_v37 = vpack.i.bf16 %v3071_v16, %v3070_v45 }
 0x492   :  { %v3007_v21 = vsel %vm2083_vm1, 0.0, %v7465_v52  ;;  %v3006_v25 = vsel %vm2083_vm1, 0.0, %v7464_v60  ;;  %v3107_v23 = vsel %vm2083_vm1, 0.0, %v7490_v63  ;;  %v3106_v20 = vsel %vm2083_vm1, 0.0, %v7489_v8 }
 0x493   :  { %v3011_v29 = vsel %vm2118_vm8, %v3007_v21, 0.0  ;;  %v3010_v43 = vsel %vm2118_vm8, %v3006_v25, 0.0  ;;  %v3111_v27 = vsel %vm2118_vm8, %v3107_v23, 0.0  ;;  %v3110_v17 = vsel %vm2118_vm8, %v3106_v20, 0.0  ;;  %7527 = vrot.lane.b32.xlu1 %v7526_v44, %s8840_s19  ;;  %7547 = vrot.lane.b32.xlu0 %v7546_v37, %s12848_s28  ;;  %v7468_v4 = vpop.permute.xlu1 %7467 }
 0x494   :  { %v7470_v10 = vunpack.i.h.bf16 %v7468_v4  ;;  %v7469_v1 = vunpack.i.l.bf16 %v7468_v4  ;;  %v7531_v59 = vpack.i.bf16 %v3011_v29, %v3010_v43  ;;  %v7556_v28 = vpack.i.bf16 %v3111_v27, %v3110_v17 }
 0x496   :  { %v3027_v11 = vsel %vm2083_vm1, 0.0, %v7470_v10  ;;  %v3026_v47 = vsel %vm2083_vm1, 0.0, %v7469_v1 }
 0x497   :  { %v3031_v32 = vsel %vm2118_vm8, %v3027_v11, 0.0  ;;  %v3030_v61 = vsel %vm2118_vm8, %v3026_v47, 0.0  ;;  %7532 = vrot.lane.b32.xlu1 %v7531_v59, %s12836_s29  ;;  %7557 = vrot.lane.b32.xlu0 %v7556_v28, %s12844_s14  ;;  %v7473_v36 = vpop.permute.xlu1 %7472  ;;  %s8874_s29 = smov 118  }
 0x498   :  { %v7475_v40 = vunpack.i.h.bf16 %v7473_v36  ;;  %v7474_v55 = vunpack.i.l.bf16 %v7473_v36  ;;  %v7536_v58 = vpack.i.bf16 %v3031_v32, %v3030_v61 }
 0x49a   :  { %v3047_v9 = vsel %vm2083_vm1, 0.0, %v7475_v40  ;;  %v3046_v53 = vsel %vm2083_vm1, 0.0, %v7474_v55 }
 0x49b   :  { %v3051_v54 = vsel %vm2118_vm8, %v3047_v9, 0.0  ;;  %v3050_v26 = vsel %vm2118_vm8, %v3046_v53, 0.0  ;;  %7537 = vrot.lane.b32.xlu1 %v7536_v58, %s12832_s20  ;;  %v7483_v39 = vpop.permute.xlu1 %7482  ;;  %s8872_s20 = smov 122  }
 0x49c   :  { %v7485_v14 = vunpack.i.h.bf16 %v7483_v39  ;;  %v7484_v0 = vunpack.i.l.bf16 %v7483_v39  ;;  %v7541_v42 = vpack.i.bf16 %v3051_v54, %v3050_v26 }
 0x49e   :  { %v3087_v19 = vsel %vm2083_vm1, 0.0, %v7485_v14  ;;  %v3086_v12 = vsel %vm2083_vm1, 0.0, %v7484_v0 }
 0x49f   :  { %v3091_v31 = vsel %vm2118_vm8, %v3087_v19, 0.0  ;;  %v3090_v3 = vsel %vm2118_vm8, %v3086_v12, 0.0  ;;  %7542 = vrot.lane.b32.xlu1 %v7541_v42, %s8859_s23 }
 0x4a0   :  { %v7551_v2 = vpack.i.bf16 %v3091_v31, %v3090_v3 }
 0x4a3   :  { %7552 = vrot.lane.b32.xlu1 %v7551_v2, %s8861_s13 }
 0x4d2   :  { %v7493_v24 = vpop.permute.xlu1 %7492  ;;  %v7498_v6 = vpop.permute.xlu0 %7497 }
 0x4d3   :  { %v7494_v38 = vunpack.i.l.bf16 %v7493_v24  ;;  %v7495_v18 = vunpack.i.h.bf16 %v7493_v24  ;;  %v7499_v34 = vunpack.i.l.bf16 %v7498_v6  ;;  %v7500_v7 = vunpack.i.h.bf16 %v7498_v6 }
 0x4d5   :  { %v3228_v57 = vsel %vm2123_vm9, 0.0, %v7494_v38  ;;  %v3229_v35 = vsel %vm2123_vm9, 0.0, %v7495_v18 }
 0x4d6   :  { %v7508_v41 = vpop.permute.xlu0 %7507  ;;  %v7503_v30 = vpop.permute.xlu1 %7502  ;;  %v3233_v33 = vsel %vm3230_vm0, %v3228_v57, %v7499_v34  ;;  %v3234_v5 = vsel %vm3230_vm0, %v3229_v35, %v7500_v7 }
 0x4d7   :  { %v7504_v62 = vunpack.i.l.bf16 %v7503_v30  ;;  %v7505_v49 = vunpack.i.h.bf16 %v7503_v30  ;;  %v7509_v13 = vunpack.i.l.bf16 %v7508_v41  ;;  %v7510_v15 = vunpack.i.h.bf16 %v7508_v41 }
 0x4d9   :  { %v3238_v46 = vsel %vm3235_vm5, %v3233_v33, %v7504_v62  ;;  %v3239_v45 = vsel %vm3235_vm5, %v3234_v5, %v7505_v49 }
 0x4da   :  { %v7513_v56 = vpop.permute.xlu0 %7512  ;;  %v3243_v48 = vsel %vm3240_vm6, %v3238_v46, %v7509_v13  ;;  %v3244_v37 = vsel %vm3240_vm6, %v3239_v45, %v7510_v15  ;;  %v12877_v46 = vmov 0.0  }
 0x4db   :  { %v7514_v51 = vunpack.i.l.bf16 %v7513_v56  ;;  %v7515_v22 = vunpack.i.h.bf16 %v7513_v56  ;;  %7092 = vmatprep.subr.bf16.mxu1 %v12877_v46  ;;  %7108 = vmatprep.mubr.msk.bf16.mxu1 %vm12895_vm13, %v12877_v46 }
 0x4dd   :  { %v3248_v63 = vsel %vm3245_vm10, %v3243_v48, %v7514_v51  ;;  %v3249_v25 = vsel %vm3245_vm10, %v3244_v37, %v7515_v22 }
 0x4de   :  { %v7518_v50 = vpop.permute.xlu0 %7517 }
 0x4df   :  { %v7519_v16 = vunpack.i.l.bf16 %v7518_v50  ;;  %v7520_v52 = vunpack.i.h.bf16 %v7518_v50 }
 0x4e1   :  { %v3253_v21 = vsel %vm12876_vm11, %v3248_v63, %v7519_v16  ;;  %v3254_v29 = vsel %vm12876_vm11, %v3249_v25, %v7520_v52 }
 0x4e2   :  { %v7523_v60 = vpop.permute.xlu0 %7522 }
 0x4e3   :  { %v7525_v8 = vunpack.i.h.bf16 %v7523_v60  ;;  %v7524_v44 = vunpack.i.l.bf16 %v7523_v60 }
 0x4e5   :  { %v10454_v23 = vsel %vm12865_vm12, %v3253_v21, %v7524_v44  ;;  %v3262_v20 = vsel %vm2118_vm8, %v7524_v44, 0.0  ;;  %v10462_v27 = vsel %vm12865_vm12, %v3254_v29, %v7525_v8  ;;  %v10465_v17 = vsel %vm2118_vm8, %v7525_v8, 0.0  ;;  %v3944_v29 = vld [vmem:[%s12826_s6 + $0x8] sm:$0xff] }
 0x4e6   :  { %v10459_v43 = vpack.i.bf16 %v3262_v20, %v10454_v23  ;;  %v10471_v4 = vpack.i.bf16 %v10462_v27, %v10454_v23  ;;  %v10474_v10 = vpack.i.bf16 %v10465_v17, %v3262_v20  ;;  %v10562_v5 = vpack.i.bf16 %v10465_v17, %v10462_v27 }
 0x4e8   :  { %7562 = vrot.lane.b32.xlu0 %v10459_v43, %s12846_s1 }
 0x4ec   :  { %7577 = vrot.lane.b32.xlu0 %v10471_v4, %s12852_s16 }
 0x4f0   :  { %7587 = vrot.lane.b32.xlu0 %v10471_v4, %s12834_s21 }
 0x4f4   :  { %7592 = vrot.lane.b32.xlu0 %v10471_v4, %s8861_s13 }
 0x4f8   :  { %7597 = vrot.lane.b32.xlu0 %v10471_v4, %s12838_s26 }
 0x4fc   :  { %7602 = vrot.lane.b32.xlu0 %v10471_v4, %s12844_s14 }
 0x500   :  { %7617 = vrot.lane.b32.xlu0 %v10471_v4, %s8867_s12 }
 0x504   :  { %7627 = vrot.lane.b32.xlu0 %v10471_v4, %s12856_s18 }
 0x505   :  { %v7528_v1 = vpop.permute.xlu1 %7527  ;;  %v7548_v59 = vpop.permute.xlu0 %7547 }
 0x506   :  { %v7530_v40 = vunpack.i.h.bf16 %v7528_v1  ;;  %v7529_v55 = vunpack.i.l.bf16 %v7528_v1  ;;  %v7550_v38 = vunpack.i.h.bf16 %v7548_v59  ;;  %v7549_v30 = vunpack.i.l.bf16 %v7548_v59 }
 0x508   :  { %7632 = vrot.lane.b32.xlu0 %v10471_v4, %s8853_s27  ;;  %v3227_v14 = vsel %vm2123_vm9, 0.0, %v7530_v40  ;;  %v3226_v0 = vsel %vm2123_vm9, 0.0, %v7529_v55 }
 0x509   :  { %v7533_v28 = vpop.permute.xlu1 %7532  ;;  %v7558_v11 = vpop.permute.xlu0 %7557 }
 0x50a   :  { %v7560_v47 = vunpack.i.h.bf16 %v7558_v11  ;;  %v7559_v32 = vunpack.i.l.bf16 %v7558_v11  ;;  %v7535_v9 = vunpack.i.h.bf16 %v7533_v28  ;;  %v7534_v53 = vunpack.i.l.bf16 %v7533_v28 }
 0x50c   :  { %v3261_v61 = vsel %vm2118_vm8, %v7560_v47, 0.0  ;;  %v3260_v36 = vsel %vm2118_vm8, %v7559_v32, 0.0  ;;  %7642 = vrot.lane.b32.xlu0 %v10471_v4, %s8869_s24  ;;  %v3231_v19 = vsel %vm3230_vm0, %v3226_v0, %v7534_v53  ;;  %v3232_v12 = vsel %vm3230_vm0, %v3227_v14, %v7535_v9 }
 0x50d   :  { %v7538_v58 = vpop.permute.xlu1 %7537  ;;  %v10496_v54 = vpack.i.bf16 %v3261_v61, %v3260_v36 }
 0x50e   :  { %v7540_v26 = vunpack.i.h.bf16 %v7538_v58  ;;  %v7539_v39 = vunpack.i.l.bf16 %v7538_v58 }
 0x510   :  { %7662 = vrot.lane.b32.xlu0 %v10471_v4, %s8849_s2  ;;  %v3236_v2 = vsel %vm3235_vm5, %v3231_v19, %v7539_v39  ;;  %v3237_v24 = vsel %vm3235_vm5, %v3232_v12, %v7540_v26 }
 0x511   :  { %v7543_v42 = vpop.permute.xlu1 %7542 }
 0x512   :  { %v7545_v31 = vunpack.i.h.bf16 %v7543_v42  ;;  %v7544_v3 = vunpack.i.l.bf16 %v7543_v42 }
 0x514   :  { %v3241_v6 = vsel %vm3240_vm6, %v3236_v2, %v7544_v3  ;;  %v3242_v41 = vsel %vm3240_vm6, %v3237_v24, %v7545_v31  ;;  %7672 = vrot.lane.b32.xlu0 %v10471_v4, %s8852_s4 }
 0x515   :  { %v7553_v18 = vpop.permute.xlu1 %7552  ;;  %v3246_v57 = vsel %vm3245_vm10, %v3241_v6, %v7549_v30  ;;  %v3247_v62 = vsel %vm3245_vm10, %v3242_v41, %v7550_v38 }
 0x516   :  { %v7555_v34 = vunpack.i.h.bf16 %v7553_v18  ;;  %v7554_v56 = vunpack.i.l.bf16 %v7553_v18 }
 0x518   :  { %v3251_v7 = vsel %vm12876_vm11, %v3246_v57, %v7554_v56  ;;  %v3252_v35 = vsel %vm12876_vm11, %v3247_v62, %v7555_v34  ;;  %vm12897_vm11 = vcmask 703488  }
 0x519   :  { %v10515_v49 = vsel %vm12865_vm12, %v3251_v7, %v7559_v32  ;;  %v10518_v33 = vsel %vm12865_vm12, %v3252_v35, %v7560_v47  ;;  %vm3363_vm12 = vcmask 687104  }
 0x51a   :  { %v7566_v13 = vpack.i.bf16 %v3260_v36, %v10515_v49  ;;  %v10523_v50 = vpack.i.bf16 %v10518_v33, %v10515_v49  ;;  %v10554_v51 = vpack.i.bf16 %v3261_v61, %v10518_v33 }
 0x51c   :  { %7567 = vrot.lane.b32.xlu1 %v7566_v13, %s12846_s1  ;;  %7692 = vrot.lane.b32.xlu0 %v10523_v50, %s12834_s21  ;;  %s12842_s21 = smov 110  }
 0x520   :  { %7572 = vrot.lane.b32.xlu1 %v10471_v4, %s12854_s30  ;;  %7702 = vrot.lane.b32.xlu0 %v10523_v50, %s12838_s26  ;;  %s12840_s26 = smov 98  }
 0x524   :  { %7582 = vrot.lane.b32.xlu1 %v10471_v4, %s8851_s3  ;;  %7707 = vrot.lane.b32.xlu0 %v10523_v50, %s12844_s14  ;;  %s12850_s14 = smov 92  }
 0x528   :  { %7607 = vrot.lane.b32.xlu1 %v10471_v4, %s8872_s20  ;;  %7727 = vrot.lane.b32.xlu0 %v10523_v50, %s12842_s21 }
 0x52c   :  { %7612 = vrot.lane.b32.xlu1 %v10471_v4, %s8874_s29  ;;  %7737 = vrot.lane.b32.xlu0 %v10523_v50, %s8853_s27 }
 0x530   :  { %7622 = vrot.lane.b32.xlu1 %v10471_v4, %s12842_s21  ;;  %7742 = vrot.lane.b32.xlu0 %v10523_v50, %s12840_s26  ;;  %s12860_s21 = smov 100  }
 0x534   :  { %7637 = vrot.lane.b32.xlu1 %v10471_v4, %s12840_s26  ;;  %7752 = vrot.lane.b32.xlu0 %v10523_v50, %s12848_s28  ;;  %s8876_s26 = smov 84  }
 0x538   :  { %7647 = vrot.lane.b32.xlu1 %v10471_v4, %s12848_s28  ;;  %7757 = vrot.lane.b32.xlu0 %v10554_v51, %s12846_s1  ;;  %s12858_s28 = smov 80  }
 0x53c   :  { %7652 = vrot.lane.b32.xlu1 %v10562_v5, %s12846_s1  ;;  %7762 = vrot.lane.b32.xlu0 %v10474_v10, %s8876_s26  ;;  %s8879_s1 = smov 82  }
 0x540   :  { %7657 = vrot.lane.b32.xlu1 %v10471_v4, %s12860_s21  ;;  %7777 = vrot.lane.b32.xlu0 %v10523_v50, %s12850_s14 }
 0x544   :  { %7667 = vrot.lane.b32.xlu1 %v10471_v4, %s12850_s14  ;;  %7787 = vrot.lane.b32.xlu0 %v10496_v54, %s8876_s26  ;;  %s8881_s14 = smov 68  }
 0x548   :  { %7677 = vrot.lane.b32.xlu1 %v10523_v50, %s12854_s30  ;;  %7797 = vrot.lane.b32.xlu0 %v10496_v54, %s8879_s1  ;;  %s8883_s30 = smov 70  }
 0x54c   :  { %7682 = vrot.lane.b32.xlu1 %v10523_v50, %s12852_s16  ;;  %7807 = vrot.lane.b32.xlu0 %v10471_v4, %s12858_s28  ;;  %s8882_s16 = smov 78  }
 0x550   :  { %7687 = vrot.lane.b32.xlu1 %v10523_v50, %s8851_s3  ;;  %7817 = vrot.lane.b32.xlu0 %v10459_v43, %s8859_s23 }
 0x554   :  { %7697 = vrot.lane.b32.xlu1 %v10523_v50, %s8861_s13  ;;  %7832 = vrot.lane.b32.xlu0 %v7566_v13, %s8859_s23 }
 0x558   :  { %7712 = vrot.lane.b32.xlu1 %v10523_v50, %s8872_s20  ;;  %7837 = vrot.lane.b32.xlu0 %v10496_v54, %s8881_s14 }
 0x55a   :  { %v10595_v15 = vpop.permute.xlu0 %7562 }
 0x55c   :  { %7717 = vrot.lane.b32.xlu1 %v10523_v50, %s8874_s29  ;;  %7847 = vrot.lane.b32.xlu0 %v10471_v4, %s8882_s16 }
 0x55e   :  { %v10601_v16 = vpop.permute.xlu0 %7577 }
 0x55f   :  { %v7580_v61 = vunpack.i.h.bf16 %v10601_v16  ;;  %v7579_v36 = vunpack.i.l.bf16 %v10601_v16 }
 0x560   :  { %7722 = vrot.lane.b32.xlu1 %v10523_v50, %s8867_s12  ;;  %7857 = vrot.lane.b32.xlu0 %v10474_v10, %s8883_s30 }
 0x562   :  { %v10607_v45 = vpop.permute.xlu0 %7587 }
 0x563   :  { %v7590_v42 = vunpack.i.h.bf16 %v10607_v45 }
 0x564   :  { %7732 = vrot.lane.b32.xlu1 %v10523_v50, %s12856_s18  ;;  %7862 = vrot.lane.b32.xlu0 %v10523_v50, %s8876_s26  ;;  %s12862_s18 = smov 66  }
 0x566   :  { %v7593_v22 = vpop.permute.xlu0 %7592 }
 0x567   :  { %v10617_v52 = vunpack.i.h.bf16 %v7593_v22  ;;  %v10619_v60 = vunpack.i.l.bf16 %v7593_v22 }
 0x568   :  { %7747 = vrot.lane.b32.xlu1 %v10523_v50, %s8869_s24  ;;  %7867 = vrot.lane.b32.xlu0 %v10523_v50, %s12858_s28  ;;  %s13109_s28 = smov 110  }
 0x56a   :  { %v7598_v48 = vpop.permute.xlu0 %7597 }
 0x56b   :  { %v10621_v63 = vunpack.i.h.bf16 %v7598_v48  ;;  %v10623_v8 = vunpack.i.l.bf16 %v7598_v48 }
 0x56c   :  { %7767 = vrot.lane.b32.xlu1 %v10523_v50, %s12860_s21  ;;  %7872 = vrot.lane.b32.xlu0 %v10474_v10, %s12862_s18  ;;  %s13115_s21 = smov 86  }
 0x56d   :  { %v10632_v44 = vsel %vm2113_vm7, %v10619_v60, %v10623_v8  ;;  %v10637_v37 = vsel %vm2113_vm7, %v10617_v52, %v10621_v63 }
 0x56e   :  { %v10639_v21 = vpop.permute.xlu0 %7602 }
 0x570   :  { %7772 = vrot.lane.b32.xlu1 %v10523_v50, %s8849_s2  ;;  %7902 = vrot.lane.b32.xlu0 %v10523_v50, %s8854_s15 }
 0x572   :  { %v10645_v25 = vpop.permute.xlu0 %7617 }
 0x574   :  { %7782 = vrot.lane.b32.xlu1 %v10523_v50, %s8852_s4  ;;  %7907 = vrot.lane.b32.xlu0 %v10496_v54, %s12862_s18  ;;  %s8886_s18 = smov 76  }
 0x576   :  { %v10653_v20 = vpop.permute.xlu0 %7627 }
 0x578   :  { %7792 = vrot.lane.b32.xlu1 %v10474_v10, %s8879_s1  ;;  %7917 = vrot.lane.b32.xlu0 %v10496_v54, %s8850_s22 }
 0x57a   :  { %v10662_v43 = vpop.permute.xlu0 %7632 }
 0x57c   :  { %7802 = vrot.lane.b32.xlu1 %v10471_v4, %s8876_s26  ;;  %3952 = vperm.xlu0 %7419, %v3944_v29  }
 0x57e   :  { %v10666_v17 = vpop.permute.xlu0 %7642 }
 0x580   :  { %7812 = vrot.lane.b32.xlu1 %v10471_v4, %s8886_s18 }
 0x582   :  { %v10670_v1 = vpop.permute.xlu0 %7662 }
 0x584   :  { %7822 = vrot.lane.b32.xlu1 %v10562_v5, %s8859_s23 }
 0x586   :  { %v10676_v59 = vpop.permute.xlu0 %7672 }
 0x588   :  { %7827 = vrot.lane.b32.xlu1 %v10474_v10, %s8881_s14 }
 0x58c   :  { %7842 = vrot.lane.b32.xlu1 %v10471_v4, %s8879_s1 }
 0x58e   :  { %v10680_v28 = vpop.permute.xlu1 %7567  ;;  %v10682_v11 = vpop.permute.xlu0 %7692 }
 0x590   :  { %7852 = vrot.lane.b32.xlu1 %v10471_v4, %s8854_s15 }
 0x592   :  { %v7573_v47 = vpop.permute.xlu1 %7572  ;;  %v10686_v32 = vpop.permute.xlu0 %7702 }
 0x593   :  { %v7575_v40 = vunpack.i.h.bf16 %v7573_v47  ;;  %v7574_v55 = vunpack.i.l.bf16 %v7573_v47 }
 0x594   :  { %7877 = vrot.lane.b32.xlu1 %v10523_v50, %s8886_s18 }
 0x595   :  { %v3343_v58 = vsel %vm2113_vm7, %v10462_v27, %v7575_v40  ;;  %v3342_v9 = vsel %vm2113_vm7, %v10454_v23, %v7574_v55  ;;  %v3490_v4 = vsel %vm2113_vm7, %v7574_v55, %v7579_v36  ;;  %v3491_v53 = vsel %vm2113_vm7, %v7575_v40, %v7580_v61 }
 0x596   :  { %v7583_v26 = vpop.permute.xlu1 %7582  ;;  %v10698_v39 = vpop.permute.xlu0 %7707  ;;  %v7589_v27 = vunpack.i.l.bf16 %v10607_v45  ;;  %v3346_v19 = vsel %vm2148_vm14, %v3342_v9, %v7579_v36  ;;  %v3347_v23 = vsel %vm2148_vm14, %v3343_v58, %v7580_v61 }
 0x597   :  { %v7585_v14 = vunpack.i.h.bf16 %v7583_v26  ;;  %v7584_v0 = vunpack.i.l.bf16 %v7583_v26 }
 0x598   :  { %7882 = vrot.lane.b32.xlu1 %v10554_v51, %s8859_s23 }
 0x599   :  { %v3351_v12 = vsel %vm3348_vm15, %v3346_v19, %v7584_v0  ;;  %v3352_v31 = vsel %vm3348_vm15, %v3347_v23, %v7585_v14  ;;  %v3494_v3 = vsel %vm2148_vm14, %v3490_v4, %v7584_v0  ;;  %v3495_v2 = vsel %vm2148_vm14, %v3491_v53, %v7585_v14 }
 0x59a   :  { %v3498_v24 = vsel %vm3348_vm15, %v3494_v3, %v7589_v27  ;;  %v3499_v6 = vsel %vm3348_vm15, %v3495_v2, %v7590_v42  ;;  %v10712_v41 = vpop.permute.xlu1 %7607  ;;  %v10714_v38 = vpop.permute.xlu0 %7727  ;;  %v3356_v30 = vsel %vm3353_vm3, %v3351_v12, %v7589_v27  ;;  %v3357_v18 = vsel %vm3353_vm3, %v3352_v31, %v7590_v42 }
 0x59b   :  { %v3361_v34 = vsel %vm3358_vm2, %v3356_v30, %v10619_v60  ;;  %v3362_v56 = vsel %vm3358_vm2, %v3357_v18, %v10617_v52  ;;  %v3502_v57 = vsel %vm3353_vm3, %v3498_v24, %v10619_v60  ;;  %v3503_v62 = vsel %vm3353_vm3, %v3499_v6, %v10617_v52 }
 0x59c   :  { %7887 = vrot.lane.b32.xlu1 %v10523_v50, %s8879_s1  ;;  %v3366_v7 = vsel %vm3363_vm12, %v3361_v34, %v10623_v8  ;;  %v3367_v35 = vsel %vm3363_vm12, %v3362_v56, %v10621_v63  ;;  %v3506_v16 = vsel %vm3358_vm2, %v3502_v57, %v10623_v8  ;;  %v3507_v45 = vsel %vm3358_vm2, %v3503_v62, %v10621_v63 }
 0x59d   :  { %v3940_v5 = vpack.c.bf16 %v3367_v35, %v3366_v7  ;;  %v7665_v42 = vunpack.i.h.bf16 %v10670_v1  ;;  %v7664_v27 = vunpack.i.l.bf16 %v10670_v1 }
 0x59e   :  { %v10732_v13 = vpop.permute.xlu1 %7612  ;;  %v10734_v51 = vpop.permute.xlu0 %7737 }
 0x59f   :  { %7093 = vmatpush3.bf16.msra.mxu1 %v3940_v5  ;;  %v7610_v5 = vunpack.i.h.bf16 %v10712_v41 }
 0x5a0   :  { %7892 = vrot.lane.b32.xlu1 %v10523_v50, %s8882_s16  ;;  %7094 = vmatprep.subr.bf16.mxu1 %v12877_v46  ;;  %v3943_v50 = vld [vmem:[%s12826_s6] sm:$0xff]  ;;  %s13116_s6 = smov 104  }
 0x5a2   :  { %v10743_v22 = vpop.permute.xlu1 %7622  ;;  %v10745_v48 = vpop.permute.xlu0 %7742 }
 0x5a4   :  { %7897 = vrot.lane.b32.xlu1 %v10496_v54, %s8883_s30 }
 0x5a6   :  { %v10749_v52 = vpop.permute.xlu1 %7637  ;;  %v10751_v60 = vpop.permute.xlu0 %7752 }
 0x5a7   :  { %v10763_v29 = vunpack.i.h.bf16 %v10751_v60 }
 0x5a8   :  { %7912 = vrot.lane.b32.xlu1 %v10474_v10, %s8850_s22 }
 0x5aa   :  { %v10758_v63 = vpop.permute.xlu1 %7647  ;;  %v10760_v8 = vpop.permute.xlu0 %7757 }
 0x5ab   :  { %v10766_v54 = vunpack.i.l.bf16 %v10760_v8  ;;  %v10776_v61 = vunpack.i.h.bf16 %v10758_v63 }
 0x5ac   :  { %3947 = vperm.xlu1 %7420, %v3943_v50   ;;  %v7615_v50 = vunpack.i.h.bf16 %v10732_v13 }
 0x5ad   :  { %v10771_v47 = vsel %vm2113_vm7, %v10763_v29, %v10766_v54 }
 0x5ae   :  { %13054 = vst [vmem:[#allocation68_spill] sm:$0xff] %v10771_v47  ;;  %v10773_v10 = vpop.permute.xlu1 %7652  ;;  %v7763_v40 = vpop.permute.xlu0 %7762 }
 0x5af   :  { %v10779_v36 = vunpack.i.l.bf16 %v10773_v10  ;;  %v7765_v30 = vunpack.i.h.bf16 %v7763_v40  ;;  %v7764_v18 = vunpack.i.l.bf16 %v7763_v40  ;;  %v7614_v40 = vunpack.i.l.bf16 %v10732_v13 }
 0x5b1   :  { %v10784_v55 = vsel %vm2113_vm7, %v10776_v61, %v10779_v36 }
 0x5b2   :  { %v7658_v58 = vpop.permute.xlu1 %7657  ;;  %v10798_v19 = vpop.permute.xlu0 %7777 }
 0x5b3   :  { %v7660_v9 = vunpack.i.h.bf16 %v7658_v58  ;;  %v7659_v4 = vunpack.i.l.bf16 %v7658_v58  ;;  %v7605_v58 = vunpack.i.h.bf16 %v10639_v21 }
 0x5b5   :  { %v10787_v53 = vsel %vm3363_vm12, %v3506_v16, %v7659_v4  ;;  %v10790_v26 = vsel %vm3363_vm12, %v3507_v45, %v7660_v9  ;;  %v3655_v14 = vsel %vm2148_vm14, %v10632_v44, %v7659_v4  ;;  %v3656_v0 = vsel %vm2148_vm14, %v10637_v37, %v7660_v9 }
 0x5b6   :  { %v10800_v23 = vpop.permute.xlu1 %7667  ;;  %v10807_v44 = vunpack.i.h.bf16 %v10676_v59  ;;  %v10810_v37 = vunpack.i.l.bf16 %v10676_v59  ;;  %v3659_v2 = vsel %vm3348_vm15, %v3655_v14, %v7664_v27  ;;  %v3660_v1 = vsel %vm3348_vm15, %v3656_v0, %v7665_v42  ;;  %v10826_v57 = vpop.permute.xlu0 %7787 }
 0x5b7   :  { %v12866_v31 = vunpack.i.h.bf16 %v10800_v23  ;;  %v12867_v3 = vunpack.i.l.bf16 %v10800_v23  ;;  %v7609_v16 = vunpack.i.l.bf16 %v10712_v41  ;;  %v7604_v9 = vunpack.i.l.bf16 %v10639_v21 }
 0x5b8   :  { %13055 = vst [vmem:[#allocation60_spill] sm:$0xff] %v10807_v44  ;;  %v3455_v27 = vsel %vm2113_vm7, %v7605_v58, %v7610_v5 }
 0x5b9   :  { %v3663_v24 = vsel %vm3353_vm3, %v3659_v2, %v12867_v3  ;;  %v3664_v6 = vsel %vm3353_vm3, %v3660_v1, %v12866_v31  ;;  %v3454_v41 = vsel %vm2113_vm7, %v7604_v9, %v7609_v16  ;;  %v3459_v21 = vsel %vm2148_vm14, %v3455_v27, %v7615_v50 }
 0x5ba   :  { %v3667_v34 = vsel %vm3358_vm2, %v3663_v24, %v10810_v37  ;;  %v3668_v59 = vsel %vm3358_vm2, %v3664_v6, %v10807_v44  ;;  %v10824_v56 = vpop.permute.xlu1 %7677  ;;  %v10846_v2 = vpop.permute.xlu0 %7797  ;;  %v3458_v13 = vsel %vm2148_vm14, %v3454_v41, %v7614_v40  ;;  %v12868_v16 = vunpack.i.h.bf16 %v10682_v11 }
 0x5bb   :  { %v3671_v62 = vsel %vm3363_vm12, %v3667_v34, %v7764_v18  ;;  %v3672_v7 = vsel %vm3363_vm12, %v3668_v59, %v7765_v30  ;;  %v12872_v4 = vunpack.i.h.bf16 %v10824_v56  ;;  %v12874_v14 = vunpack.i.l.bf16 %v10824_v56 }
 0x5bc   :  { %v10830_v35 = vpack.c.bf16 %v3672_v7, %v3671_v62  ;;  %v7625_v30 = vunpack.i.h.bf16 %v10743_v22  ;;  %v7624_v18 = vunpack.i.l.bf16 %v10743_v22  ;;  %v7620_v62 = vunpack.i.h.bf16 %v10645_v25 }
 0x5bd   :  { %v3341_v34 = vsel %vm2113_vm7, %v10518_v33, %v12872_v4  ;;  %v3340_v59 = vsel %vm2113_vm7, %v10515_v49, %v12874_v14  ;;  %v7619_v7 = vunpack.i.l.bf16 %v10645_v25  ;;  %v12869_v33 = vunpack.i.l.bf16 %v10682_v11 }
 0x5be   :  { %v10834_v45 = vpop.permute.xlu1 %7682  ;;  %v3463_v58 = vsel %vm3348_vm15, %v3459_v21, %v7620_v62  ;;  %v10903_v62 = vunpack.i.h.bf16 %v10686_v32  ;;  %v10920_v31 = vunpack.i.l.bf16 %v10662_v43  ;;  %v7709_v14 = vunpack.i.l.bf16 %v10698_v39 }
 0x5bf   :  { %v12873_v0 = vunpack.i.h.bf16 %v10834_v45  ;;  %v12875_v42 = vunpack.i.l.bf16 %v10834_v45  ;;  %v3462_v40 = vsel %vm3348_vm15, %v3458_v13, %v7619_v7  ;;  %v10906_v7 = vunpack.i.l.bf16 %v10686_v32 }
 0x5c0   :  { %v3466_v27 = vsel %vm3353_vm3, %v3462_v40, %v7624_v18 }
 0x5c1   :  { %v3344_v5 = vsel %vm2148_vm14, %v3340_v59, %v12875_v42  ;;  %v3345_v22 = vsel %vm2148_vm14, %v3341_v34, %v12873_v0  ;;  %v3467_v34 = vsel %vm3353_vm3, %v3463_v58, %v7625_v30  ;;  %v10888_v59 = vpop.permute.xlu0 %7807 }
 0x5c2   :  { %v10848_v1 = vpop.permute.xlu1 %7687  ;;  %13056 = vst [vmem:[#allocation70_spill] sm:$0xff] %v10888_v59  ;;  %v12889_v59 = vunpack.i.l.bf16 %v10798_v19 }
 0x5c3   :  { %v12870_v24 = vunpack.i.h.bf16 %v10848_v1  ;;  %v12871_v6 = vunpack.i.l.bf16 %v10848_v1 }
 0x5c5   :  { %v3349_v49 = vsel %vm3348_vm15, %v3344_v5, %v12871_v6  ;;  %v3350_v25 = vsel %vm3348_vm15, %v3345_v22, %v12870_v24  ;;  %v10891_v5 = vunpack.i.h.bf16 %v10653_v20  ;;  %v10894_v22 = vunpack.i.l.bf16 %v10653_v20 }
 0x5c6   :  { %v7698_v50 = vpop.permute.xlu1 %7697  ;;  %v3354_v13 = vsel %vm3353_vm3, %v3349_v49, %v12869_v33  ;;  %v3355_v21 = vsel %vm3353_vm3, %v3350_v25, %v12868_v16  ;;  %v10917_v25 = vunpack.i.h.bf16 %v10662_v43  ;;  %v10934_v43 = vunpack.i.l.bf16 %v10595_v15 }
 0x5c7   :  { %v10882_v9 = vunpack.i.h.bf16 %v7698_v50  ;;  %v10884_v41 = vunpack.i.l.bf16 %v7698_v50  ;;  %v3470_v49 = vsel %vm3358_vm2, %v3466_v27, %v10894_v22  ;;  %v3471_v58 = vsel %vm3358_vm2, %v3467_v34, %v10891_v5 }
 0x5c8   :  { %v3474_v27 = vsel %vm3363_vm12, %v3470_v49, %v10920_v31  ;;  %v3475_v34 = vsel %vm3363_vm12, %v3471_v58, %v10917_v25  ;;  %v12884_v58 = vunpack.i.l.bf16 %v10749_v52  ;;  %v3580_v42 = vsel %vm2113_vm7, %v7625_v30, %v10891_v5 }
 0x5c9   :  { %v3359_v40 = vsel %vm3358_vm2, %v3354_v13, %v10884_v41  ;;  %v3360_v20 = vsel %vm3358_vm2, %v3355_v21, %v10882_v9  ;;  %v10926_v21 = vpop.permute.xlu0 %7817  ;;  %v10941_v24 = vpack.c.bf16 %v3475_v34, %v3474_v27  ;;  %v7729_v27 = vunpack.i.l.bf16 %v10714_v38 }
 0x5ca   :  { %v7713_v50 = vpop.permute.xlu1 %7712  ;;  %v3364_v32 = vsel %vm3363_vm12, %v3359_v40, %v10906_v7  ;;  %v3365_v13 = vsel %vm3363_vm12, %v3360_v20, %v10903_v62  ;;  %13057 = vst [vmem:[#allocation61_spill] sm:$0xff] %v10926_v21 }
 0x5cb   :  { %v3939_v3 = vpack.c.bf16 %v3365_v13, %v3364_v32  ;;  %v7710_v13 = vunpack.i.h.bf16 %v10698_v39  ;;  %v7715_v49 = vunpack.i.h.bf16 %v7713_v50  ;;  %v7714_v33 = vunpack.i.l.bf16 %v7713_v50 }
 0x5cc   :  { %v7730_v50 = vunpack.i.h.bf16 %v10714_v38  ;;  %v10960_v39 = vunpack.i.l.bf16 %v10734_v51  ;;  %v3584_v38 = vsel %vm2148_vm14, %v3580_v42, %v10917_v25  ;;  %v12883_v42 = vunpack.i.l.bf16 %v10745_v48 }
 0x5cd   :  { %7095 = vmatpush3.bf16.msra.mxu1 %v3939_v3  ;;  %v3579_v3 = vsel %vm2113_vm7, %v7624_v18, %v10894_v22  ;;  %v10953_v18 = vunpack.i.h.bf16 %v10734_v51  ;;  %v10956_v34 = vpop.permute.xlu0 %7832  ;;  %v3452_v30 = vsel %vm2113_vm7, %v7709_v14, %v7714_v33  ;;  %v3453_v40 = vsel %vm2113_vm7, %v7710_v13, %v7715_v49 }
 0x5ce   :  { %v7718_v12 = vpop.permute.xlu1 %7717  ;;  %7096 = vmatprep.subr.bf16.mxu1 %v12877_v46  ;;  %v12880_v33 = vunpack.i.h.bf16 %v10745_v48  ;;  %v13058_v13 = vunpack.i.h.bf16 %v10749_v52 }
 0x5cf   :  { %v7720_v6 = vunpack.i.h.bf16 %v7718_v12  ;;  %v7719_v4 = vunpack.i.l.bf16 %v7718_v12 }
 0x5d0   :  { %v3588_v49 = vsel %vm3348_vm15, %v3584_v38, %v13058_v13 }
 0x5d1   :  { %7097 = vmatpush3.bf16.msra.mxu1 %v10941_v24  ;;  %v3456_v12 = vsel %vm2148_vm14, %v3452_v30, %v7719_v4  ;;  %v7655_v4 = vunpack.i.h.bf16 %v10773_v10 }
 0x5d2   :  { %v7723_v0 = vpop.permute.xlu1 %7722  ;;  %7098 = vmatprep.subr.bf16.mxu1 %v12877_v46  ;;  %v3457_v46 = vsel %vm2148_vm14, %v3453_v40, %v7720_v6  ;;  %v10986_v6 = vunpack.i.l.bf16 %v10758_v63  ;;  %v13059_v40 = vunpack.i.l.bf16 %v10666_v17 }
 0x5d3   :  { %v7725_v32 = vunpack.i.h.bf16 %v7723_v0  ;;  %v7724_v16 = vunpack.i.l.bf16 %v7723_v0  ;;  %v3583_v0 = vsel %vm2148_vm14, %v3579_v3, %v10920_v31 }
 0x5d4   :  { %v3587_v20 = vsel %vm3348_vm15, %v3583_v0, %v12884_v58 }
 0x5d5   :  { %v3460_v47 = vsel %vm3348_vm15, %v3456_v12, %v7724_v16  ;;  %v3461_v3 = vsel %vm3348_vm15, %v3457_v46, %v7725_v32  ;;  %v3591_v32 = vsel %vm3353_vm3, %v3587_v20, %v13059_v40  ;;  %v10995_v12 = vpop.permute.xlu0 %7837  ;;  %v11023_v40 = vunpack.i.l.bf16 %v10680_v28 }
 0x5d6   :  { %v7733_v51 = vpop.permute.xlu1 %7732  ;;  %v3464_v30 = vsel %vm3353_vm3, %v3460_v47, %v7729_v27  ;;  %v3465_v38 = vsel %vm3353_vm3, %v3461_v3, %v7730_v50 }
 0x5d7   :  { %v10975_v21 = vunpack.i.h.bf16 %v7733_v51  ;;  %v10977_v14 = vunpack.i.l.bf16 %v7733_v51 }
 0x5d9   :  { %v3577_v46 = vsel %vm2113_vm7, %v7729_v27, %v10977_v14  ;;  %v3578_v16 = vsel %vm2113_vm7, %v7730_v50, %v10975_v21  ;;  %v3469_v47 = vsel %vm3358_vm2, %v3465_v38, %v10975_v21  ;;  %v3572_v50 = vsel %vm12897_vm11, %v10779_v36, %v7655_v4 }
 0x5da   :  { %v3581_v0 = vsel %vm2148_vm14, %v3577_v46, %v10960_v39  ;;  %v3582_v10 = vsel %vm2148_vm14, %v3578_v16, %v10953_v18  ;;  %v11001_v63 = vpop.permute.xlu1 %7747  ;;  %v3468_v16 = vsel %vm3358_vm2, %v3464_v30, %v10977_v14  ;;  %v13060_v27 = vunpack.i.h.bf16 %v10666_v17 }
 0x5db   :  { %v12882_v51 = vunpack.i.h.bf16 %v11001_v63  ;;  %v12881_v13 = vunpack.i.l.bf16 %v11001_v63  ;;  %v3585_v20 = vsel %vm3348_vm15, %v3581_v0, %v12883_v42  ;;  %v3586_v46 = vsel %vm3348_vm15, %v3582_v10, %v12880_v33 }
 0x5dc   :  { %v3592_v3 = vsel %vm3353_vm3, %v3588_v49, %v13060_v27  ;;  %v7760_v0 = vunpack.i.h.bf16 %v10760_v8  ;;  %v3595_v10 = vsel %vm3358_vm2, %v3591_v32, %v10986_v6  ;;  %v3472_v49 = vsel %vm3363_vm12, %v3468_v16, %v10960_v39 }
 0x5dd   :  { %v3596_v30 = vsel %vm3358_vm2, %v3592_v3, %v10776_v61  ;;  %v3589_v38 = vsel %vm3353_vm3, %v3585_v20, %v12881_v13  ;;  %v3590_v4 = vsel %vm3353_vm3, %v3586_v46, %v12882_v51  ;;  %v3473_v8 = vsel %vm3363_vm12, %v3469_v47, %v10953_v18  ;;  %v11048_v20 = vpop.permute.xlu0 %7847 }
 0x5de   :  { %v11040_v27 = vpop.permute.xlu1 %7767  ;;  %v11043_v32 = vunpack.i.l.bf16 %v10751_v60  ;;  %v11045_v3 = vpack.c.bf16 %v3473_v8, %v3472_v49  ;;  %v3600_v33 = vsel %vm3363_vm12, %v3596_v30, %v3572_v50  ;;  %v13061_v16 = vunpack.i.h.bf16 %v10595_v15 }
 0x5df   :  { %v12890_v13 = vunpack.i.h.bf16 %v11040_v27  ;;  %v12891_v46 = vunpack.i.l.bf16 %v11040_v27  ;;  %v3594_v50 = vsel %vm3358_vm2, %v3590_v4, %v10763_v29  ;;  %v13062_v30 = vmov 0.0  }
 0x5e0   :  { %v3571_v47 = vsel %vm12897_vm11, %v10934_v43, %v13061_v16  ;;  %7099 = vmatpush3.bf16.msra.mxu1 %v11045_v3  ;;  %v3593_v49 = vsel %vm3358_vm2, %v3589_v38, %v11043_v32  ;;  %v13064_v15 = vunpack.i.h.bf16 %v10680_v28  ;;  %v3570_v42 = vsel %vm12897_vm11, %v10766_v54, %v7760_v0 }
 0x5e1   :  { %v3599_v60 = vsel %vm3363_vm12, %v3595_v10, %v3571_v47  ;;  %7100 = vmatprep.subr.bf16.mxu1 %v13062_v30  ;;  %v3649_v10 = vsel %vm2113_vm7, %v10884_v41, %v10906_v7  ;;  %v3650_v38 = vsel %vm2113_vm7, %v10882_v9, %v10903_v62  ;;  %v11090_v44 = vpop.permute.xlu0 %7857 }
 0x5e2   :  { %v11063_v8 = vpack.c.bf16 %v3600_v33, %v3599_v60  ;;  %v7773_v51 = vpop.permute.xlu1 %7772  ;;  %v3569_v16 = vsel %vm12897_vm11, %v11023_v40, %v13064_v15  ;;  %v3653_v28 = vsel %vm2148_vm14, %v3649_v10, %v12891_v46  ;;  %v3654_v47 = vsel %vm2148_vm14, %v3650_v38, %v12890_v13 }
 0x5e3   :  { %v7775_v4 = vunpack.i.h.bf16 %v7773_v51  ;;  %v7774_v33 = vunpack.i.l.bf16 %v7773_v51  ;;  %v3597_v0 = vsel %vm3363_vm12, %v3593_v49, %v3569_v16  ;;  %v3598_v60 = vsel %vm3363_vm12, %v3594_v50, %v3570_v42 }
 0x5e4   :  { %13063 = vst [vmem:[#allocation72_spill] sm:$0xff] %v11063_v8  ;;  %7101 = vmatpush3.bf16.msra.mxu1 %v11063_v8  ;;  %v12888_v51 = vunpack.i.h.bf16 %v10798_v19  ;;  %v11093_v38 = vpack.c.bf16 %v3598_v60, %v3597_v0  ;;  %v13071_v46 = vunpack.i.h.bf16 %v10848_v1  ;;  %v3691_v8 = vsel %vm2113_vm7, %v10894_v22, %v10920_v31 }
 0x5e5   :  { %v3657_v15 = vsel %vm3348_vm15, %v3653_v28, %v7774_v33  ;;  %v3658_v58 = vsel %vm3348_vm15, %v3654_v47, %v7775_v4  ;;  %7102 = vmatprep.subr.bf16.mxu1 %v13062_v30  ;;  %v7790_v28 = vunpack.i.h.bf16 %v10826_v57  ;;  %v7789_v47 = vunpack.i.l.bf16 %v10826_v57  ;;  %v11115_v60 = vpop.permute.xlu0 %7862  ;;  %v8784_v57 = vld [vmem:[%s12825_s5] sm:$0xff]  }
 0x5e6   :  { %v7783_v10 = vpop.permute.xlu1 %7782  ;;  %13065 = vst [vmem:[#allocation10_spill] sm:$0xff] %v11093_v38  ;;  %v3661_v50 = vsel %vm3353_vm3, %v3657_v15, %v12889_v59  ;;  %v3662_v16 = vsel %vm3353_vm3, %v3658_v58, %v12888_v51  ;;  %v13070_v59 = vunpack.i.l.bf16 %v10848_v1  ;;  %v13073_v1 = vunpack.i.l.bf16 %v10682_v11 }
 0x5e7   :  { %v11095_v49 = vunpack.i.h.bf16 %v7783_v10  ;;  %v11097_v42 = vunpack.i.l.bf16 %v7783_v10 }
 0x5e8   :  { %7103 = vmatpush3.bf16.msra.mxu1 %v11093_v38 }
 0x5e9   :  { %v3665_v4 = vsel %vm3358_vm2, %v3661_v50, %v11097_v42  ;;  %v3666_v33 = vsel %vm3358_vm2, %v3662_v16, %v11095_v49  ;;  %7104 = vmatprep.subr.bf16.mxu1 %v13062_v30  ;;  %v11129_v16 = vpop.permute.xlu0 %7867 }
 0x5ea   :  { %v11113_v0 = vpop.permute.xlu1 %7792  ;;  %v3669_v58 = vsel %vm3363_vm12, %v3665_v4, %v7789_v47  ;;  %v3670_v15 = vsel %vm3363_vm12, %v3666_v33, %v7790_v28  ;;  %v13066_v33 = vunpack.i.l.bf16 %v10834_v45  ;;  %v13067_v28 = vunpack.i.l.bf16 %v10824_v56 }
 0x5eb   :  { %v11120_v10 = vpack.c.bf16 %v3670_v15, %v3669_v58  ;;  %v13068_v58 = vunpack.i.h.bf16 %v10834_v45  ;;  %v13069_v15 = vunpack.i.h.bf16 %v10824_v56  ;;  %v13072_v45 = vunpack.i.l.bf16 %v10749_v52 }
 0x5ec   :  { %7105 = vmatpush3.bf16.msra.mxu1 %v10830_v35  ;;  %v3488_v47 = vsel %vm2113_vm7, %v13067_v28, %v13066_v33 }
 0x5ed   :  { %7106 = vmatprep.subr.bf16.mxu1 %v13062_v30  ;;  %v3489_v51 = vsel %vm2113_vm7, %v13069_v15, %v13068_v58  ;;  %v3492_v13 = vsel %vm2148_vm14, %v3488_v47, %v13070_v59  ;;  %v3695_v56 = vsel %vm2148_vm14, %v3691_v8, %v13072_v45  ;;  %v13078_v47 = vunpack.i.l.bf16 %v11040_v27 }
 0x5ee   :  { %v11123_v50 = vpop.permute.xlu1 %7802  ;;  %v3493_v38 = vsel %vm2148_vm14, %v3489_v51, %v13071_v46  ;;  %v3496_v59 = vsel %vm3348_vm15, %v3492_v13, %v13073_v1  ;;  %v13074_v46 = vunpack.i.h.bf16 %v10682_v11  ;;  %v11175_v51 = vpop.permute.xlu0 %7872  ;;  %v13076_v11 = vunpack.i.l.bf16 %v10666_v17 }
 0x5ef   :  { %v3500_v22 = vsel %vm3353_vm3, %v3496_v59, %v10884_v41  ;;  %v13079_v15 = vunpack.i.h.bf16 %v11040_v27 }
 0x5f0   :  { %7107 = vmatpush3.bf16.msra.mxu1 %v11120_v10  ;;  %v3497_v31 = vsel %vm3348_vm15, %v3493_v38, %v13074_v46  ;;  %v3699_v38 = vsel %vm3348_vm15, %v3695_v56, %v13076_v11  ;;  %v13081_v56 = vunpack.i.l.bf16 %v10800_v23 }
 0x5f1   :  { %7112 = vmatprep.subr.bf16.mxu1 %v13062_v30  ;;  %v3501_v8 = vsel %vm3353_vm3, %v3497_v31, %v10882_v9  ;;  %v3504_v9 = vsel %vm3358_vm2, %v3500_v22, %v10906_v7  ;;  %v3871_v7 = vsel %vm2113_vm7, %v10986_v6, %v10934_v43  ;;  %v7849_v22 = vunpack.i.l.bf16 %v11048_v20 }
 0x5f2   :  { %v11132_v4 = vpop.permute.xlu1 %7812  ;;  %v3508_v58 = vsel %vm3363_vm12, %v3504_v9, %v13078_v47  ;;  %v11226_v1 = vsel %vm2113_vm7, %v13081_v56, %v10810_v37  ;;  %v7864_v9 = vunpack.i.l.bf16 %v11115_v60 }
 0x5f3   :  { %7109 = vmatmul.mubr.bf16.vlgmr.msra.gmra.mxu1 %v8784_v57  ;;  %v13075_v57 = vunpack.i.h.bf16 %v10749_v52  ;;  %v3505_v52 = vsel %vm3358_vm2, %v3501_v8, %v10903_v62  ;;  %v11208_v62 = vsel %vm2113_vm7, %v11043_v32, %v11023_v40  ;;  %v7860_v8 = vunpack.i.h.bf16 %v11090_v44 }
 0x5f4   :  { %7113 = vmatpush3.bf16.msra.mxu1 %v10941_v24  ;;  %7128 = vmatprep.mubr.msk.bf16.mxu1 %vm12895_vm13, %v13062_v30  ;;  %v3692_v24 = vsel %vm2113_vm7, %v10891_v5, %v10917_v25  ;;  %v3703_v5 = vsel %vm3353_vm3, %v3699_v38, %v10986_v6  ;;  %v13077_v25 = vunpack.i.h.bf16 %v10666_v17  ;;  %v3509_v45 = vsel %vm3363_vm12, %v3505_v52, %v13079_v15 }
 0x5f5   :  { %7114 = vmatprep.subr.bf16.mxu1 %v13062_v30  ;;  %v3696_v13 = vsel %vm2148_vm14, %v3692_v24, %v13075_v57  ;;  %v3690_v6 = vsel %vm2113_vm7, %v10975_v21, %v10953_v18  ;;  %v4004_v59 = vpack.c.bf16 %v3509_v45, %v3508_v58  ;;  %v7850_v24 = vunpack.i.h.bf16 %v11048_v20 }
 0x5f6   :  { %v11158_v33 = vpop.permute.xlu1 %7822  ;;  %v3700_v28 = vsel %vm3348_vm15, %v3696_v13, %v13077_v25  ;;  %v13083_v21 = vunpack.i.l.bf16 %v11001_v63  ;;  %v7859_v57 = vunpack.i.l.bf16 %v11090_v44  ;;  %v13084_v13 = vunpack.i.h.bf16 %v10745_v48 }
 0x5f7   :  { %v3704_v17 = vsel %vm3353_vm3, %v3700_v28, %v10776_v61  ;;  %v7834_v61 = vunpack.i.l.bf16 %v10956_v34  ;;  %v7865_v20 = vunpack.i.h.bf16 %v11115_v60  ;;  %v13085_v52 = vunpack.i.h.bf16 %v11001_v63 }
 0x5f8   :  { %7115 = vmatpush3.bf16.msra.mxu1 %v11045_v3  ;;  %v3689_v3 = vsel %vm2113_vm7, %v10977_v14, %v10960_v39  ;;  %v3707_v39 = vsel %vm3358_vm2, %v3703_v5, %v10934_v43  ;;  %v13080_v14 = vpack.c.bf16 %v10790_v26, %v10787_v53  ;;  %v3708_v27 = vsel %vm3358_vm2, %v3704_v17, %v10779_v36  ;;  %v11232_v43 = vpop.permute.xlu0 %7902 }
 0x5f9   :  { %7116 = vmatprep.subr.bf16.mxu1 %v13062_v30  ;;  %v13082_v26 = vunpack.i.l.bf16 %v10745_v48  ;;  %v3694_v11 = vsel %vm2148_vm14, %v3690_v6, %v13084_v13  ;;  %v7869_v44 = vunpack.i.l.bf16 %v11129_v16  ;;  %v7875_v58 = vunpack.i.h.bf16 %v11175_v51 }
 0x5fa   :  { %v11187_v41 = vpop.permute.xlu1 %7827  ;;  %v3698_v25 = vsel %vm3348_vm15, %v3694_v11, %v13085_v52  ;;  %v7795_v63 = vunpack.i.h.bf16 %v11113_v0  ;;  %v3910_v6 = vsel %vm2113_vm7, %v11095_v49, %v7865_v20  ;;  %v7799_v13 = vunpack.i.l.bf16 %v10846_v2 }
 0x5fb   :  { %v3693_v36 = vsel %vm2148_vm14, %v3689_v3, %v13082_v26  ;;  %v7794_v3 = vunpack.i.l.bf16 %v11113_v0  ;;  %v3702_v0 = vsel %vm3353_vm3, %v3698_v25, %v10763_v29  ;;  %v7839_v11 = vunpack.i.l.bf16 %v10995_v12 }
 0x5fc   :  { %7117 = vmatpush3.bf16.msra.mxu1 %v13080_v14  ;;  %v3697_v18 = vsel %vm3348_vm15, %v3693_v36, %v13083_v21  ;;  %v11262_v15 = vpop.permute.xlu0 %7907  ;;  %v7870_v21 = vunpack.i.h.bf16 %v11129_v16 }
 0x5fd   :  { %7118 = vmatprep.subr.bf16.mxu1 %v13062_v30  ;;  %v3701_v28 = vsel %vm3353_vm3, %v3697_v18, %v11043_v32  ;;  %v3909_v32 = vsel %vm2113_vm7, %v11097_v42, %v7864_v9  ;;  %v3711_v36 = vsel %vm3363_vm12, %v3707_v39, %v7794_v3 }
 0x5fe   :  { %v7843_v53 = vpop.permute.xlu1 %7842  ;;  %v3705_v18 = vsel %vm3358_vm2, %v3701_v28, %v11023_v40  ;;  %v7840_v40 = vunpack.i.h.bf16 %v10995_v12 }
 0x5ff   :  { %v7845_v46 = vunpack.i.h.bf16 %v7843_v53  ;;  %v7844_v31 = vunpack.i.l.bf16 %v7843_v53  ;;  %v3709_v28 = vsel %vm3363_vm12, %v3705_v18, %v7799_v13  ;;  %v8785_v18 = vld [vmem:[%s12825_s5 + $0x8] sm:$0xff]   ;;  %v13090_v13 = vunpack.i.l.bf16 %v10798_v19 }
 0x600   :  { %7119 = vmatpush3.bf16.msra.mxu1 %v4004_v59 }
 0x601   :  { %v3875_v38 = vsel %vm2148_vm14, %v3871_v7, %v7844_v31  ;;  %v3876_v5 = vsel %vm2148_vm14, %v10784_v55, %v7845_v46  ;;  %7120 = vmatprep.subr.bf16.mxu1 %v13062_v30  ;;  %v7874_v7 = vunpack.i.l.bf16 %v11175_v51  ;;  %v3712_v31 = vsel %vm3363_vm12, %v3708_v27, %v7795_v63 }
 0x602   :  { %v7853_v48 = vpop.permute.xlu1 %7852  ;;  %v3879_v45 = vsel %vm3348_vm15, %v3875_v38, %v7849_v22  ;;  %v3880_v17 = vsel %vm3348_vm15, %v3876_v5, %v7850_v24  ;;  %v3913_v22 = vsel %vm2148_vm14, %v3909_v32, %v7869_v44  ;;  %v3706_v27 = vsel %vm3358_vm2, %v3702_v0, %v10766_v54  ;;  %v7918_v38 = vpop.permute.xlu0 %7917  ;;  %v13088_v32 = vld [vmem:[#allocation70_spill] sm:$0xff] }
 0x603   :  { %v7855_v47 = vunpack.i.h.bf16 %v7853_v48  ;;  %v7854_v55 = vunpack.i.l.bf16 %v7853_v48  ;;  %v3914_v54 = vsel %vm2148_vm14, %v3910_v6, %v7870_v21  ;;  %v11319_v25 = vpack.c.bf16 %v3712_v31, %v3711_v36 }
 0x604   :  { %7121 = vmatpush3.bf16.msra.mxu1 %v10830_v35  ;;  %v7804_v0 = vunpack.i.l.bf16 %v11123_v50 }
 0x605   :  { %v3883_v14 = vsel %vm3353_vm3, %v3879_v45, %v7854_v55  ;;  %v3884_v56 = vsel %vm3353_vm3, %v3880_v17, %v7855_v47  ;;  %7122 = vmatprep.subr.bf16.mxu1 %v13062_v30  ;;  %v13086_v55 = vld [vmem:[#allocation60_spill] sm:$0xff]  ;;  %v7920_v45 = vunpack.i.h.bf16 %v7918_v38  ;;  %v7919_v17 = vunpack.i.l.bf16 %v7918_v38 }
 0x606   :  { %v3887_v51 = vsel %vm3358_vm2, %v3883_v14, %v7859_v57  ;;  %v3888_v53 = vsel %vm3358_vm2, %v3884_v56, %v7860_v8  ;;  %v11284_v26 = vpop.permute.xlu1 %7877  ;;  %v7800_v57 = vunpack.i.h.bf16 %v10846_v2  ;;  %v7810_v14 = vunpack.i.h.bf16 %v13088_v32 }
 0x607   :  { %v7879_v59 = vunpack.i.l.bf16 %v11284_v26  ;;  %v3891_v46 = vsel %vm3363_vm12, %v3887_v51, %v7874_v7  ;;  %v3892_v29 = vsel %vm3363_vm12, %v3888_v53, %v7875_v58  ;;  %v7880_v24 = vunpack.i.h.bf16 %v11284_v26 }
 0x608   :  { %v11295_v8 = vpack.c.bf16 %v3892_v29, %v3891_v46  ;;  %7123 = vmatpush3.bf16.msra.mxu1 %v11120_v10  ;;  %v3710_v3 = vsel %vm3363_vm12, %v3706_v27, %v7800_v57  ;;  %v13087_v58 = vunpack.i.h.bf16 %v10800_v23  ;;  %v7809_v56 = vunpack.i.l.bf16 %v13088_v32  ;;  %v13089_v29 = vld [vmem:[#allocation61_spill] sm:$0xff] }
 0x609   :  { %v3917_v39 = vsel %vm3348_vm15, %v3913_v22, %v7879_v59  ;;  %7124 = vmatprep.subr.bf16.mxu1 %v13062_v30  ;;  %v3918_v48 = vsel %vm3348_vm15, %v3914_v54, %v7880_v24  ;;  %v7805_v51 = vunpack.i.h.bf16 %v11123_v50  ;;  %v11346_v53 = vpack.c.bf16 %v3710_v3, %v3709_v28 }
 0x60a   :  { %v3921_v5 = vsel %vm3353_vm3, %v3917_v39, %v7834_v61  ;;  %v11313_v52 = vpop.permute.xlu1 %7882  ;;  %v3788_v63 = vsel %vm2113_vm7, %v13087_v58, %v13086_v55  ;;  %v7820_v31 = vunpack.i.h.bf16 %v13089_v29  ;;  %v7819_v50 = vunpack.i.l.bf16 %v13089_v29 }
 0x60b   :  { %v7884_v2 = vunpack.i.l.bf16 %v11313_v52  ;;  %v3925_v47 = vsel %vm3358_vm2, %v3921_v5, %v7839_v11  ;;  %v7905_v57 = vunpack.i.h.bf16 %v11232_v43  ;;  %v3785_v38 = vsel %vm2113_vm7, %v13090_v13, %v11097_v42 }
 0x60c   :  { %7125 = vmatpush3.bf16.msra.mxu1 %v11319_v25  ;;  %v11349_v36 = vsel %vm3363_vm12, %v3925_v47, %v7919_v17  ;;  %v13091_v5 = vunpack.i.h.bf16 %v10798_v19  ;;  %v7910_v28 = vunpack.i.h.bf16 %v11262_v15  ;;  %v3911_v3 = vsel %vm2113_vm7, %v10810_v37, %v7804_v0 }
 0x60d   :  { %v3922_v7 = vsel %vm3353_vm3, %v3918_v48, %v7884_v2  ;;  %7126 = vmatprep.subr.bf16.mxu1 %v13062_v30  ;;  %v7904_v48 = vunpack.i.l.bf16 %v11232_v43  ;;  %v7814_v47 = vunpack.i.l.bf16 %v11132_v4  ;;  %v7909_v42 = vunpack.i.l.bf16 %v11262_v15 }
 0x60e   :  { %v3926_v23 = vsel %vm3358_vm2, %v3922_v7, %v7840_v40  ;;  %v7888_v6 = vpop.permute.xlu1 %7887  ;;  %v3786_v54 = vsel %vm2113_vm7, %v13091_v5, %v11095_v49  ;;  %v3912_v19 = vsel %vm2113_vm7, %v13086_v55, %v7805_v51  ;;  %v3789_v43 = vsel %vm2148_vm14, %v3785_v38, %v7864_v9  ;;  %v13092_v7 = vld [vmem:[#allocation68_spill] sm:$0xff] }
 0x60f   :  { %v11352_v46 = vsel %vm3363_vm12, %v3926_v23, %v7920_v45  ;;  %v7890_v22 = vunpack.i.h.bf16 %v7888_v6  ;;  %v7889_v39 = vunpack.i.l.bf16 %v7888_v6  ;;  %v3790_v37 = vsel %vm2148_vm14, %v3786_v54, %v7865_v20  ;;  %v13093_v6 = vld [vmem:[#allocation72_spill] sm:$0xff] }
 0x610   :  { %v4110_v27 = vpack.c.bf16 %v11352_v46, %v11349_v36  ;;  %7127 = vmatpush3.bf16.msra.mxu1 %v11346_v53  ;;  %v7815_v15 = vunpack.i.h.bf16 %v11132_v4  ;;  %v3915_v55 = vsel %vm2148_vm14, %v3911_v3, %v7809_v56  ;;  %v3791_v60 = vsel %vm2148_vm14, %v11226_v1, %v7804_v0 }
 0x611   :  { %7132 = vmatprep.subr.bf16.mxu1 %v13062_v30  ;;  %v3873_v17 = vsel %vm2148_vm14, %v11208_v62, %v7889_v39  ;;  %v3874_v23 = vsel %vm2148_vm14, %v13092_v7, %v7890_v22  ;;  %v3792_v62 = vsel %vm2148_vm14, %v3788_v63, %v7805_v51  ;;  %v3916_v4 = vsel %vm2148_vm14, %v3912_v19, %v7810_v14 }
 0x612   :  { %v7893_v58 = vpop.permute.xlu1 %7892  ;;  %v3919_v20 = vsel %vm3348_vm15, %v3915_v55, %v7814_v47  ;;  %v7825_v39 = vunpack.i.h.bf16 %v11158_v33  ;;  %v7830_v54 = vunpack.i.h.bf16 %v11187_v41  ;;  %v7829_v1 = vunpack.i.l.bf16 %v11187_v41 }
 0x613   :  { %v7895_v49 = vunpack.i.h.bf16 %v7893_v58  ;;  %v7894_v45 = vunpack.i.l.bf16 %v7893_v58  ;;  %7129 = vmatmul.mubr.bf16.vlgmr.msra.gmra.mxu1 %v8785_v18  ;;  %v7824_v18 = vunpack.i.l.bf16 %v11158_v33  ;;  %v3795_v51 = vsel %vm3348_vm15, %v3791_v60, %v7809_v56  ;;  %v13094_v58 = vld [vmem:[#allocation10_spill] sm:$0xff] }
 0x614   :  { %7133 = vmatpush3.bf16.msra.mxu1 %v13093_v6  ;;  %7148 = vmatprep.mubr.msk.bf16.mxu1 %vm12895_vm13, %v13062_v30  ;;  %v3920_v3 = vsel %vm3348_vm15, %v3916_v4, %v7815_v15  ;;  %v3799_v55 = vsel %vm3353_vm3, %v3795_v51, %v7814_v47  ;;  %v3767_v60 = vsel %vm3240_vm6, %v7819_v50, %v7820_v31  ;;  %v7835_v4 = vunpack.i.h.bf16 %v10956_v34  ;;  %v8786_v34 = vld [vmem:[%s12825_s5 + $0x10] sm:$0xff]  }
 0x615   :  { %v3877_v13 = vsel %vm3348_vm15, %v3873_v17, %v7894_v45  ;;  %v3878_v9 = vsel %vm3348_vm15, %v3874_v23, %v7895_v49  ;;  %7134 = vmatprep.subr.bf16.mxu1 %v13062_v30  ;;  %v3923_v49 = vsel %vm3353_vm3, %v3919_v20, %v7819_v50  ;;  %v7885_v45 = vunpack.i.h.bf16 %v11313_v52 }
 0x616   :  { %v7898_v22 = vpop.permute.xlu1 %7897  ;;  %v3881_v63 = vsel %vm3353_vm3, %v3877_v13, %v7904_v48  ;;  %v3882_v0 = vsel %vm3353_vm3, %v3878_v9, %v7905_v57  ;;  %v3924_v56 = vsel %vm3353_vm3, %v3920_v3, %v7824_v18  ;;  %v3768_v6 = vsel %vm3240_vm6, %v7824_v18, %v7825_v39 }
 0x617   :  { %v7900_v38 = vunpack.i.h.bf16 %v7898_v22  ;;  %v7899_v5 = vunpack.i.l.bf16 %v7898_v22  ;;  %v3927_v13 = vsel %vm3358_vm2, %v3923_v49, %v7829_v1  ;;  %v3928_v9 = vsel %vm3358_vm2, %v3924_v56, %v7830_v54 }
 0x618   :  { %7135 = vmatpush3.bf16.msra.mxu1 %v13094_v58  ;;  %v3766_v29 = vsel %vm3240_vm6, %v7884_v2, %v7885_v45  ;;  %v3803_v32 = vsel %vm3358_vm2, %v3799_v55, %v3767_v60  ;;  %v3793_v50 = vsel %vm3348_vm15, %v3789_v43, %v7869_v44  ;;  %v3765_v16 = vsel %vm3240_vm6, %v7834_v61, %v7835_v4  ;;  %v4248_v60 = vld [vmem:[%s12827_s7 + $0x8] sm:$0xff] }
 0x619   :  { %v3885_v19 = vsel %vm3358_vm2, %v3881_v63, %v7899_v5  ;;  %v3886_v33 = vsel %vm3358_vm2, %v3882_v0, %v7900_v38  ;;  %7136 = vmatprep.subr.bf16.mxu1 %v13062_v30  ;;  %v3797_v2 = vsel %vm3353_vm3, %v3793_v50, %v7879_v59 }
 0x61a   :  { %v7913_v41 = vpop.permute.xlu1 %7912  ;;  %v3889_v48 = vsel %vm3363_vm12, %v3885_v19, %v7909_v42  ;;  %v3890_v57 = vsel %vm3363_vm12, %v3886_v33, %v7910_v28  ;;  %v3796_v28 = vsel %vm3348_vm15, %v3792_v62, %v7810_v14  ;;  %v3794_v62 = vsel %vm3348_vm15, %v3790_v37, %v7870_v21 }
 0x61b   :  { %v7915_v17 = vunpack.i.h.bf16 %v7913_v41  ;;  %v7914_v7 = vunpack.i.l.bf16 %v7913_v41  ;;  %v4056_v23 = vpack.c.bf16 %v3890_v57, %v3889_v48  ;;  %v3800_v20 = vsel %vm3353_vm3, %v3796_v28, %v7815_v15 }
 0x61c   :  { %7137 = vmatpush3.bf16.msra.mxu1 %v10830_v35  ;;  %v3804_v14 = vsel %vm3358_vm2, %v3800_v20, %v3768_v6  ;;  %v3807_v15 = vsel %vm3363_vm12, %v3803_v32, %v7829_v1  ;;  %v3798_v22 = vsel %vm3353_vm3, %v3794_v62, %v7880_v24  ;;  %v3801_v44 = vsel %vm3358_vm2, %v3797_v2, %v3765_v16  ;;  %v4262_v62 = vld [vmem:[%s12828_s8 + $0x8] sm:$0xff] }
 0x61d   :  { %v3931_v42 = vsel %vm3363_vm12, %v3927_v13, %v7914_v7  ;;  %v3932_v47 = vsel %vm3363_vm12, %v3928_v9, %v7915_v17  ;;  %7138 = vmatprep.subr.bf16.mxu1 %v13062_v30  ;;  %v3808_v52 = vsel %vm3363_vm12, %v3804_v14, %v7830_v54  ;;  %v3802_v39 = vsel %vm3358_vm2, %v3798_v22, %v3766_v29  ;;  %v4247_v14 = vld [vmem:[%s12827_s7] sm:$0xff]  ;;  %s13117_s7 = smov 120  }
 0x61e   :  { %v4111_v31 = vpack.c.bf16 %v3932_v47, %v3931_v42  ;;  %v4059_v21 = vpack.c.bf16 %v3808_v52, %v3807_v15  ;;  %v3806_v59 = vsel %vm3363_vm12, %v3802_v39, %v7840_v40  ;;  %v3805_v26 = vsel %vm3363_vm12, %v3801_v44, %v7839_v11  ;;  %v4261_v22 = vld [vmem:[%s12828_s8] sm:$0xff]  ;;  %s13095_s8 = smov 36  }
 0x61f   :  { %v4058_v24 = vpack.c.bf16 %v3806_v59, %v3805_v26 }
 0x620   :  { %7139 = vmatpush3.bf16.msra.mxu1 %v11120_v10 }
 0x621   :  { %7140 = vmatprep.subr.bf16.mxu1 %v13062_v30 }
 0x624   :  { %7141 = vmatpush3.bf16.msra.mxu1 %v4059_v21 }
 0x625   :  { %7142 = vmatprep.subr.bf16.mxu1 %v13062_v30 }
 0x627   :  { %v3948_v12 = vpop.permute.xlu1 %3947 }
 0x628   :  { %7143 = vmatpush3.bf16.msra.mxu1 %v4058_v24 }
 0x629   :  { %7144 = vmatprep.subr.bf16.mxu1 %v13062_v30 }
 0x62c   :  { %7145 = vmatpush3.bf16.msra.mxu1 %v11295_v8 }
 0x62d   :  { %7146 = vmatprep.subr.bf16.mxu1 %v13062_v30 }
 0x630   :  { %7147 = vmatpush3.bf16.msra.mxu1 %v4056_v23 }
 0x631   :  { %7152 = vmatprep.subr.bf16.mxu1 %v13062_v30 }
 0x633   :  { %7149 = vmatmul.mubr.bf16.vlgmr.msra.gmra.mxu1 %v8786_v34 }
 0x634   :  { %7153 = vmatpush3.bf16.msra.mxu1 %v10830_v35  ;;  %7168 = vmatprep.mubr.msk.bf16.mxu1 %vm12895_vm13, %v13062_v30  ;;  %v8787_v35 = vld [vmem:[%s12825_s5 + $0x18] sm:$0xff]   ;;  %s13114_s5 = smov 98  }
 0x635   :  { %7154 = vmatprep.subr.bf16.mxu1 %v13062_v30 }
 0x638   :  { %7155 = vmatpush3.bf16.msra.mxu1 %v11120_v10 }
 0x639   :  { %7156 = vmatprep.subr.bf16.mxu1 %v13062_v30 }
 0x63c   :  { %7157 = vmatpush3.bf16.msra.mxu1 %v11319_v25  ;;  %v3953_v25 = vpop.permute.xlu0 %3952 }
 0x63d   :  { %7158 = vmatprep.subr.bf16.mxu1 %v13062_v30 }
 0x640   :  { %7159 = vmatpush3.bf16.msra.mxu1 %v11346_v53 }
 0x641   :  { %7160 = vmatprep.subr.bf16.mxu1 %v13062_v30 }
 0x644   :  { %7161 = vmatpush3.bf16.msra.mxu1 %v11295_v8 }
 0x645   :  { %7162 = vmatprep.subr.bf16.mxu1 %v13062_v30 }
 0x648   :  { %7163 = vmatpush3.bf16.msra.mxu1 %v4056_v23 }
 0x649   :  { %7164 = vmatprep.subr.bf16.mxu1 %v13062_v30 }
 0x64c   :  { %7165 = vmatpush3.bf16.msra.mxu1 %v4111_v31 }
 0x64d   :  { %7166 = vmatprep.subr.bf16.mxu1 %v13062_v30 }
 0x650   :  { %7167 = vmatpush3.bf16.msra.mxu1 %v4110_v27 }
 0x651   :  { %7172 = vmatprep.subr.bf16.mxu1 %v13062_v30 }
 0x653   :  { %7169 = vmatmul.mubr.bf16.vlgmr.msra.gmra.mxu1 %v8787_v35 }
 0x654   :  { %7180 = vmatprep.mubr.msk.bf16.mxu1 %vm12895_vm13, %v13062_v30  ;;  %vm13101_vm13 = vcmask 1031168  }
 0x655   :  { %vm13102_vm11 = vmmov %vm13101_vm13 }
 0x6b3   :  { %v3995_v10 = vpop.f32.mrf.mxu1 }
 0x6b4   :  { %v11501_v61 = vadd.f32 %v3995_v10, %v3948_v12 }
 0x6b5   :  { %v7110_v8 = vpop.f32.mrf.mxu1 }
 0x6b6   :  { %v4162_v11 = vsel %vm12894_vm4, %v11501_v61, 0.0  ;;  %v4168_v40 = vmul.f32 %v11501_v61, %v11501_v61 }
 0x6b7   :  { %4163 = vadd.xlane.f32.xlu1 %v4162_v11  ;;  %v3998_v53 = vpop.f32.mrf.mxu1 }
 0x6b8   :  { %v11507_v36 = vadd.f32 %v3998_v53, %v3953_v25  ;;  %v4170_v46 = vsel %vm12894_vm4, %v4168_v40, 0.0 }
 0x6b9   :  { %4171 = vadd.xlane.f32.xlu0 %v4170_v46  ;;  %v7111_v27 = vpop.f32.mrf.mxu1 }
 0x6ba   :  { %v4169_v43 = vmul.f32 %v11507_v36, %v11507_v36  ;;  %v4165_v18 = vsel %vm12894_vm4, %v11507_v36, 0.0 }
 0x6bc   :  { %v4173_v37 = vsel %vm12894_vm4, %v4169_v43, 0.0 }
 0x6bd   :  { %4174 = vadd.xlane.f32.xlu1 %v4173_v37  ;;  %4166 = vadd.xlane.f32.xlu0 %v4165_v18 }
 0x6d3   :  { %v4049_v38 = vpop.f32.mrf.mxu1 }
 0x6d4   :  { %v11515_v5 = vadd.f32 %v4049_v38, %v3948_v12 }
 0x6d5   :  { %v7130_v54 = vpop.f32.mrf.mxu1 }
 0x6d6   :  { %v4176_v1 = vsel %vm12894_vm4, %v11515_v5, 0.0  ;;  %v4182_v63 = vmul.f32 %v11515_v5, %v11515_v5 }
 0x6d7   :  { %4177 = vadd.xlane.f32.xlu0 %v4176_v1  ;;  %v4052_v0 = vpop.f32.mrf.mxu1 }
 0x6d8   :  { %v11521_v51 = vadd.f32 %v4052_v0, %v3953_v25  ;;  %v4184_v58 = vsel %vm12894_vm4, %v4182_v63, 0.0 }
 0x6d9   :  { %v7131_v3 = vpop.f32.mrf.mxu1 }
 0x6da   :  { %v4179_v19 = vsel %vm12894_vm4, %v11521_v51, 0.0  ;;  %v4183_v33 = vmul.f32 %v11521_v51, %v11521_v51 }
 0x6db   :  { %4185 = vadd.xlane.f32.xlu0 %v4184_v58  ;;  %4180 = vadd.xlane.f32.xlu1 %v4179_v19 }
 0x6dc   :  { %v4187_v49 = vsel %vm12894_vm4, %v4183_v33, 0.0 }
 0x6df   :  { %4188 = vadd.xlane.f32.xlu1 %v4187_v49 }
 0x6f3   :  { %v4103_v45 = vpop.f32.mrf.mxu1 }
 0x6f4   :  { %v11529_v41 = vadd.f32 %v4103_v45, %v3948_v12 }
 0x6f5   :  { %v7150_v48 = vpop.f32.mrf.mxu1 }
 0x6f6   :  { %v4194_v57 = vsel %vm12894_vm4, %v11529_v41, 0.0  ;;  %v4200_v56 = vmul.f32 %v11529_v41, %v11529_v41 }
 0x6f7   :  { %4195 = vadd.xlane.f32.xlu0 %v4194_v57  ;;  %v4106_v17 = vpop.f32.mrf.mxu1 }
 0x6f8   :  { %v11535_v7 = vadd.f32 %v4106_v17, %v3953_v25  ;;  %v4202_v55 = vsel %vm12894_vm4, %v4200_v56, 0.0 }
 0x6f9   :  { %v7151_v23 = vpop.f32.mrf.mxu1 }
 0x6fa   :  { %v4197_v6 = vsel %vm12894_vm4, %v11535_v7, 0.0  ;;  %v4201_v13 = vmul.f32 %v11535_v7, %v11535_v7 }
 0x6fb   :  { %4203 = vadd.xlane.f32.xlu0 %v4202_v55  ;;  %4198 = vadd.xlane.f32.xlu1 %v4197_v6 }
 0x6fc   :  { %v4205_v9 = vsel %vm12894_vm4, %v4201_v13, 0.0 }
 0x6ff   :  { %4206 = vadd.xlane.f32.xlu1 %v4205_v9 }
 0x710   :  { %4256 = vperm.xlu1 %7420, %v4248_v60  }
 0x713   :  { %v4155_v28 = vpop.f32.mrf.mxu1 }
 0x714   :  { %v11546_v42 = vadd.f32 %v4155_v28, %v3948_v12 }
 0x715   :  { %v7170_v47 = vpop.f32.mrf.mxu1 }
 0x716   :  { %v4212_v4 = vsel %vm12894_vm4, %v11546_v42, 0.0  ;;  %v4218_v20 = vmul.f32 %v11546_v42, %v11546_v42 }
 0x717   :  { %4213 = vadd.xlane.f32.xlu0 %v4212_v4  ;;  %v4158_v29 = vpop.f32.mrf.mxu1 }
 0x718   :  { %v4220_v32 = vsel %vm12894_vm4, %v4218_v20, 0.0  ;;  %v11556_v50 = vadd.f32 %v4158_v29, %v3953_v25 }
 0x719   :  { %v7171_v31 = vpop.f32.mrf.mxu1 }
 0x71a   :  { %v4215_v15 = vsel %vm12894_vm4, %v11556_v50, 0.0  ;;  %v4219_v52 = vmul.f32 %v11556_v50, %v11556_v50 }
 0x71b   :  { %4221 = vadd.xlane.f32.xlu0 %v4220_v32 }
 0x71c   :  { %v4223_v2 = vsel %vm12894_vm4, %v4219_v52, 0.0 }
 0x731   :  { %4251 = vperm.xlu0 %7419, %v4247_v14  }
 0x734   :  { %4216 = vadd.xlane.f32.xlu1 %v4215_v15 }
 0x735   :  { %4270 = vperm.xlu0 %7419, %v4262_v62  }
 0x738   :  { %4224 = vadd.xlane.f32.xlu1 %v4223_v2 }
 0x740   :  { %v4164_v21 = vpop.xlane.xlu1 %4163 }
 0x742   :  { %v4172_v39 = vpop.xlane.xlu0 %4171 }
 0x746   :  { %v4167_v16 = vpop.xlane.xlu0 %4166  ;;  %v4175_v26 = vpop.xlane.xlu1 %4174 }
 0x749   :  { %4265 = vperm.xlu1 %7420, %v4261_v22  }
 0x760   :  { %v4178_v44 = vpop.xlane.xlu0 %4177 }
 0x761   :  { %v4190_v11 = vadd.f32 %v4178_v44, %v4164_v21 }
 0x764   :  { %v4186_v59 = vpop.xlane.xlu0 %4185  ;;  %v4181_v34 = vpop.xlane.xlu1 %4180 }
 0x765   :  { %v4192_v40 = vadd.f32 %v4186_v59, %v4172_v39  ;;  %v4191_v1 = vadd.f32 %v4181_v34, %v4167_v16 }
 0x768   :  { %v4189_v12 = vpop.xlane.xlu1 %4188 }
 0x769   :  { %v4193_v33 = vadd.f32 %v4189_v12, %v4175_v26 }
 0x780   :  { %v4196_v24 = vpop.xlane.xlu0 %4195 }
 0x781   :  { %v4208_v25 = vadd.f32 %v4196_v24, %v4190_v11 }
 0x784   :  { %v4204_v35 = vpop.xlane.xlu0 %4203  ;;  %v4199_v8 = vpop.xlane.xlu1 %4198 }
 0x785   :  { %v4210_v46 = vadd.f32 %v4204_v35, %v4192_v40  ;;  %v4209_v0 = vadd.f32 %v4199_v8, %v4191_v1 }
 0x788   :  { %v4207_v27 = vpop.xlane.xlu1 %4206 }
 0x789   :  { %v4211_v49 = vadd.f32 %v4207_v27, %v4193_v33 }
 0x78c   :  { %v11571_v38 = vpop.permute.xlu1 %4256 }
 0x7a0   :  { %v4214_v10 = vpop.xlane.xlu0 %4213 }
 0x7a1   :  { %v4226_v43 = vadd.f32 %v4214_v10, %v4208_v25 }
 0x7a3   :  { %v11569_v18 = vmul.f32 0.0025510204, %v4226_v43 }
 0x7a4   :  { %v4222_v53 = vpop.xlane.xlu0 %4221 }
 0x7a5   :  { %v4228_v37 = vadd.f32 %v4222_v53, %v4210_v46  ;;  %v4235_v63 = vmul.f32 %v11569_v18, %v11569_v18  ;;  %v4297_v9 = vsub.f32 %v11546_v42, %v11569_v18  ;;  %v4287_v62 = vsub.f32 %v11529_v41, %v11569_v18 }
 0x7a6   :  { %v4277_v34 = vsub.f32 %v11515_v5, %v11569_v18  ;;  %v4243_v43 = vsub.f32 %v11501_v61, %v11569_v18 }
 0x7a7   :  { %v4233_v54 = vmul.f32 0.0025510204, %v4228_v37 }
 0x7a9   :  { %v4237_v3 = vsub.f32 %v4233_v54, %v4235_v63 }
 0x7ab   :  { %v4239_v45 = vadd.f32 1e-05, %v4237_v3 }
 0x7ac   :  { %v4252_v28 = vpop.permute.xlu0 %4251 }
 0x7ad   :  { %8796 = vrsqrt.f32 %v4239_v45 }
 0x7b0   :  { %v4271_v2 = vpop.permute.xlu0 %4270 }
 0x7ba   :  { %v8797_v13 = vpop.eup %8796 }
 0x7bb   :  { %v4299_v60 = vmul.f32 %v8797_v13, %v4297_v9  ;;  %v4289_v22 = vmul.f32 %v8797_v13, %v4287_v62  ;;  %v4279_v12 = vmul.f32 %v8797_v13, %v4277_v34  ;;  %v4245_v37 = vmul.f32 %v8797_v13, %v4243_v43 }
 0x7bd   :  { %v4217_v58 = vpop.xlane.xlu1 %4216  ;;  %v4301_v31 = vmul.f32 %v4299_v60, %v4252_v28  ;;  %v4291_v44 = vmul.f32 %v4289_v22, %v4252_v28 }
 0x7be   :  { %v4227_v19 = vadd.f32 %v4217_v58, %v4209_v0 }
 0x7c0   :  { %v4232_v48 = vmul.f32 0.0025510204, %v4227_v19 }
 0x7c1   :  { %v4225_v57 = vpop.xlane.xlu1 %4224 }
 0x7c2   :  { %v4229_v56 = vadd.f32 %v4225_v57, %v4211_v49  ;;  %v4236_v17 = vmul.f32 %v4232_v48, %v4232_v48  ;;  %v4288_v47 = vsub.f32 %v11535_v7, %v4232_v48  ;;  %v4298_v4 = vsub.f32 %v11556_v50, %v4232_v48 }
 0x7c3   :  { %v4278_v59 = vsub.f32 %v11521_v51, %v4232_v48  ;;  %v4281_v51 = vmul.f32 %v4279_v12, %v4252_v28  ;;  %v4244_v25 = vsub.f32 %v11507_v36, %v4232_v48  ;;  %v4259_v36 = vmul.f32 %v4252_v28, %v4245_v37 }
 0x7c4   :  { %v4234_v23 = vmul.f32 0.0025510204, %v4229_v56 }
 0x7c5   :  { %v4266_v29 = vpop.permute.xlu1 %4265 }
 0x7c6   :  { %v4238_v55 = vsub.f32 %v4234_v23, %v4236_v17  ;;  %v4303_v15 = vadd.f32 %v4301_v31, %v4266_v29  ;;  %v4293_v26 = vadd.f32 %v4291_v44, %v4266_v29  ;;  %v4283_v40 = vadd.f32 %v4281_v51, %v4266_v29 }
 0x7c7   :  { %v4273_v63 = vadd.f32 %v4266_v29, %v4259_v36 }
 0x7c8   :  { %v4240_v6 = vadd.f32 1e-05, %v4238_v55  ;;  %v4305_v16 = vmax.f32 %v4303_v15, 0.0  ;;  %v4295_v35 = vmax.f32 %v4293_v26, 0.0  ;;  %v4285_v53 = vmax.f32 %v4283_v40, 0.0 }
 0x7c9   :  { %v4275_v61 = vmax.f32 %v4273_v63, 0.0 }
 0x7ca   :  { %8798 = vrsqrt.f32 %v4240_v6 }
 0x7d7   :  { %v8799_v20 = vpop.eup %8798 }
 0x7d8   :  { %v4300_v32 = vmul.f32 %v8799_v20, %v4298_v4  ;;  %v4290_v14 = vmul.f32 %v8799_v20, %v4288_v47  ;;  %v4280_v24 = vmul.f32 %v8799_v20, %v4278_v59  ;;  %v4246_v27 = vmul.f32 %v8799_v20, %v4244_v25 }
 0x7da   :  { %v4302_v52 = vmul.f32 %v4300_v32, %v11571_v38  ;;  %v4292_v39 = vmul.f32 %v4290_v14, %v11571_v38  ;;  %v4282_v8 = vmul.f32 %v4280_v24, %v11571_v38  ;;  %v4260_v54 = vmul.f32 %v11571_v38, %v4246_v27 }
 0x7dc   :  { %v4304_v42 = vadd.f32 %v4302_v52, %v4271_v2  ;;  %v4294_v21 = vadd.f32 %v4292_v39, %v4271_v2  ;;  %v4284_v11 = vadd.f32 %v4282_v8, %v4271_v2  ;;  %v4274_v1 = vadd.f32 %v4271_v2, %v4260_v54 }
 0x7de   :  { %v4306_v7 = vmax.f32 %v4304_v42, 0.0  ;;  %v4296_v41 = vmax.f32 %v4294_v21, 0.0  ;;  %v4286_v5 = vmax.f32 %v4284_v11, 0.0  ;;  %v4276_v0 = vmax.f32 %v4274_v1, 0.0 }
 0x7e0   :  { %v7926_v50 = vpack.i.bf16 %v4306_v7, %v4305_v16  ;;  %v7941_v10 = vpack.i.bf16 %v4296_v41, %v4295_v35  ;;  %v7976_v46 = vpack.i.bf16 %v4286_v5, %v4285_v53  ;;  %v8011_v18 = vpack.i.bf16 %v4276_v0, %v4275_v61 }
 0x7e2   :  { %7927 = vrot.lane.b32.xlu0 %v7926_v50, %s8851_s3  ;;  %7922 = vrot.lane.b32.xlu1 %v7926_v50, %s8832_s0 }
 0x7e6   :  { %7937 = vrot.lane.b32.xlu0 %v7926_v50, %s8852_s4  ;;  %7932 = vrot.lane.b32.xlu1 %v7926_v50, %s8853_s27 }
 0x7ea   :  { %7947 = vrot.lane.b32.xlu0 %v7926_v50, %s8854_s15  ;;  %7942 = vrot.lane.b32.xlu1 %v7941_v10, %s8832_s0 }
 0x7ee   :  { %7957 = vrot.lane.b32.xlu0 %v7926_v50, %s8855_s25  ;;  %7952 = vrot.lane.b32.xlu1 %v7941_v10, %s8851_s3 }
 0x7f2   :  { %7967 = vrot.lane.b32.xlu0 %v7926_v50, %s8856_s17  ;;  %7962 = vrot.lane.b32.xlu1 %v7941_v10, %s8853_s27 }
 0x7f6   :  { %7972 = vrot.lane.b32.xlu1 %v7941_v10, %s8852_s4  ;;  %7977 = vrot.lane.b32.xlu0 %v7976_v46, %s8832_s0 }
 0x7fa   :  { %7982 = vrot.lane.b32.xlu1 %v7941_v10, %s8854_s15  ;;  %7987 = vrot.lane.b32.xlu0 %v7976_v46, %s8851_s3 }
 0x7fe   :  { %7992 = vrot.lane.b32.xlu1 %v7941_v10, %s8855_s25  ;;  %7997 = vrot.lane.b32.xlu0 %v7976_v46, %s8853_s27 }
 0x802   :  { %8002 = vrot.lane.b32.xlu1 %v7941_v10, %s8856_s17  ;;  %8007 = vrot.lane.b32.xlu0 %v7976_v46, %s8852_s4 }
 0x806   :  { %8012 = vrot.lane.b32.xlu1 %v8011_v18, %s8832_s0  ;;  %8017 = vrot.lane.b32.xlu0 %v7976_v46, %s8854_s15  ;;  %s13096_s0 = smov 54  }
 0x80a   :  { %8022 = vrot.lane.b32.xlu1 %v8011_v18, %s8851_s3  ;;  %8027 = vrot.lane.b32.xlu0 %v7976_v46, %s8855_s25 }
 0x80e   :  { %8032 = vrot.lane.b32.xlu1 %v8011_v18, %s8853_s27  ;;  %8037 = vrot.lane.b32.xlu0 %v7976_v46, %s8856_s17 }
 0x812   :  { %8042 = vrot.lane.b32.xlu1 %v8011_v18, %s8852_s4  ;;  %8047 = vrot.lane.b32.xlu0 %v8011_v18, %s8854_s15 }
 0x816   :  { %8052 = vrot.lane.b32.xlu1 %v8011_v18, %s8855_s25  ;;  %8057 = vrot.lane.b32.xlu0 %v8011_v18, %s8856_s17  ;;  %s13097_s25 = smov 90   ;;  %s13098_s17 = smov 126  }
 0x854   :  { %v7928_v38 = vpop.permute.xlu0 %7927  ;;  %v7923_v3 = vpop.permute.xlu1 %7922 }
 0x855   :  { %v7930_v58 = vunpack.i.h.bf16 %v7928_v38  ;;  %v7929_v19 = vunpack.i.l.bf16 %v7928_v38  ;;  %v7925_v33 = vunpack.i.h.bf16 %v7923_v3  ;;  %v7924_v49 = vunpack.i.l.bf16 %v7923_v3 }
 0x857   :  { %v4758_v45 = vsel %vm2083_vm1, 0.0, %v7930_v58  ;;  %v4757_v48 = vsel %vm2083_vm1, 0.0, %v7929_v19  ;;  %v4748_v57 = vsel %vm2083_vm1, 0.0, %v7925_v33  ;;  %v4747_v56 = vsel %vm2083_vm1, 0.0, %v7924_v49 }
 0x858   :  { %v4760_v17 = vsel %vm2118_vm8, %v4758_v45, 0.0  ;;  %v4759_v23 = vsel %vm2118_vm8, %v4757_v48, 0.0  ;;  %v4750_v55 = vsel %vm2118_vm8, %v4748_v57, 0.0  ;;  %v4749_v6 = vsel %vm2118_vm8, %v4747_v56, 0.0  ;;  %v7938_v13 = vpop.permute.xlu0 %7937  ;;  %v7933_v9 = vpop.permute.xlu1 %7932 }
 0x859   :  { %v7940_v60 = vunpack.i.h.bf16 %v7938_v13  ;;  %v7939_v28 = vunpack.i.l.bf16 %v7938_v13  ;;  %v7935_v47 = vunpack.i.h.bf16 %v7933_v9  ;;  %v7934_v4 = vunpack.i.l.bf16 %v7933_v9 }
 0x85a   :  { %v8061_v20 = vpack.i.bf16 %v4750_v55, %v4749_v6  ;;  %v8066_v29 = vpack.i.bf16 %v4760_v17, %v4759_v23 }
 0x85b   :  { %v4778_v31 = vsel %vm2083_vm1, 0.0, %v7940_v60  ;;  %v4777_v32 = vsel %vm2083_vm1, 0.0, %v7939_v28  ;;  %v4768_v14 = vsel %vm2083_vm1, 0.0, %v7935_v47  ;;  %v4767_v62 = vsel %vm2083_vm1, 0.0, %v7934_v4 }
 0x85c   :  { %v4780_v15 = vsel %vm2118_vm8, %v4778_v31, 0.0  ;;  %v4779_v52 = vsel %vm2118_vm8, %v4777_v32, 0.0  ;;  %v4770_v2 = vsel %vm2118_vm8, %v4768_v14, 0.0  ;;  %v4769_v22 = vsel %vm2118_vm8, %v4767_v62, 0.0  ;;  %8062 = vrot.lane.b32.xlu1 %v8061_v20, %s8840_s19  ;;  %8067 = vrot.lane.b32.xlu0 %v8066_v29, %s13095_s8  ;;  %v7948_v42 = vpop.permute.xlu0 %7947  ;;  %v7943_v39 = vpop.permute.xlu1 %7942 }
 0x85d   :  { %v7950_v16 = vunpack.i.h.bf16 %v7948_v42  ;;  %v7949_v7 = vunpack.i.l.bf16 %v7948_v42  ;;  %v7945_v44 = vunpack.i.h.bf16 %v7943_v39  ;;  %v7944_v50 = vunpack.i.l.bf16 %v7943_v39 }
 0x85e   :  { %v8071_v21 = vpack.i.bf16 %v4770_v2, %v4769_v22  ;;  %v8076_v59 = vpack.i.bf16 %v4780_v15, %v4779_v52 }
 0x85f   :  { %v4788_v26 = vsel %vm2083_vm1, 0.0, %v7950_v16  ;;  %v4787_v41 = vsel %vm2083_vm1, 0.0, %v7949_v7  ;;  %v4604_v24 = vsel %vm2083_vm1, 0.0, %v7945_v44  ;;  %v4603_v34 = vsel %vm2083_vm1, 0.0, %v7944_v50 }
 0x860   :  { %v4790_v35 = vsel %vm2118_vm8, %v4788_v26, 0.0  ;;  %v4789_v12 = vsel %vm2118_vm8, %v4787_v41, 0.0  ;;  %v4606_v10 = vsel %vm2118_vm8, %v4604_v24, 0.0  ;;  %v4605_v8 = vsel %vm2118_vm8, %v4603_v34, 0.0  ;;  %8072 = vrot.lane.b32.xlu1 %v8071_v21, %s13096_s0  ;;  %8077 = vrot.lane.b32.xlu0 %v8076_v59, %s8859_s23  ;;  %v7958_v51 = vpop.permute.xlu0 %7957  ;;  %v7953_v11 = vpop.permute.xlu1 %7952 }
 0x861   :  { %v7960_v40 = vunpack.i.h.bf16 %v7958_v51  ;;  %v7959_v5 = vunpack.i.l.bf16 %v7958_v51  ;;  %v7955_v25 = vunpack.i.h.bf16 %v7953_v11  ;;  %v7954_v53 = vunpack.i.l.bf16 %v7953_v11 }
 0x862   :  { %v8081_v46 = vpack.i.bf16 %v4606_v10, %v4605_v8  ;;  %v8086_v27 = vpack.i.bf16 %v4790_v35, %v4789_v12 }
 0x863   :  { %v4798_v43 = vsel %vm2083_vm1, 0.0, %v7960_v40  ;;  %v4797_v37 = vsel %vm2083_vm1, 0.0, %v7959_v5  ;;  %v4614_v54 = vsel %vm2083_vm1, 0.0, %v7955_v25  ;;  %v4613_v36 = vsel %vm2083_vm1, 0.0, %v7954_v53 }
 0x864   :  { %v4800_v1 = vsel %vm2118_vm8, %v4798_v43, 0.0  ;;  %v4799_v63 = vsel %vm2118_vm8, %v4797_v37, 0.0  ;;  %v4616_v0 = vsel %vm2118_vm8, %v4614_v54, 0.0  ;;  %v4615_v61 = vsel %vm2118_vm8, %v4613_v36, 0.0  ;;  %8082 = vrot.lane.b32.xlu1 %v8081_v46, %s8840_s19  ;;  %8087 = vrot.lane.b32.xlu0 %v8086_v27, %s13097_s25  ;;  %v7968_v18 = vpop.permute.xlu0 %7967  ;;  %v7963_v38 = vpop.permute.xlu1 %7962 }
 0x865   :  { %v7970_v3 = vunpack.i.h.bf16 %v7968_v18  ;;  %v7969_v58 = vunpack.i.l.bf16 %v7968_v18  ;;  %v7965_v19 = vunpack.i.h.bf16 %v7963_v38  ;;  %v7964_v33 = vunpack.i.l.bf16 %v7963_v38 }
 0x866   :  { %v8091_v49 = vpack.i.bf16 %v4616_v0, %v4615_v61  ;;  %v8096_v45 = vpack.i.bf16 %v4800_v1, %v4799_v63 }
 0x867   :  { %v4808_v48 = vsel %vm2083_vm1, 0.0, %v7970_v3  ;;  %v4807_v57 = vsel %vm2083_vm1, 0.0, %v7969_v58  ;;  %v4624_v56 = vsel %vm2083_vm1, 0.0, %v7965_v19  ;;  %v4623_v17 = vsel %vm2083_vm1, 0.0, %v7964_v33 }
 0x868   :  { %v4810_v23 = vsel %vm2118_vm8, %v4808_v48, 0.0  ;;  %v4809_v55 = vsel %vm2118_vm8, %v4807_v57, 0.0  ;;  %v4626_v6 = vsel %vm2118_vm8, %v4624_v56, 0.0  ;;  %v4625_v13 = vsel %vm2118_vm8, %v4623_v17, 0.0  ;;  %8092 = vrot.lane.b32.xlu1 %v8091_v49, %s13095_s8  ;;  %8097 = vrot.lane.b32.xlu0 %v8096_v45, %s8861_s13  ;;  %v7973_v9 = vpop.permute.xlu1 %7972  ;;  %v7978_v60 = vpop.permute.xlu0 %7977 }
 0x869   :  { %v7975_v28 = vunpack.i.h.bf16 %v7973_v9  ;;  %v7974_v47 = vunpack.i.l.bf16 %v7973_v9  ;;  %v7980_v4 = vunpack.i.h.bf16 %v7978_v60  ;;  %v7979_v20 = vunpack.i.l.bf16 %v7978_v60 }
 0x86a   :  { %v8101_v29 = vpack.i.bf16 %v4626_v6, %v4625_v13  ;;  %v8106_v31 = vpack.i.bf16 %v4810_v23, %v4809_v55 }
 0x86b   :  { %v4634_v32 = vsel %vm2083_vm1, 0.0, %v7975_v28  ;;  %v4633_v14 = vsel %vm2083_vm1, 0.0, %v7974_v47  ;;  %v4460_v62 = vsel %vm2083_vm1, 0.0, %v7980_v4  ;;  %v4459_v15 = vsel %vm2083_vm1, 0.0, %v7979_v20 }
 0x86c   :  { %v4636_v52 = vsel %vm2118_vm8, %v4634_v32, 0.0  ;;  %v4635_v2 = vsel %vm2118_vm8, %v4633_v14, 0.0  ;;  %v4462_v22 = vsel %vm2118_vm8, %v4460_v62, 0.0  ;;  %v4461_v42 = vsel %vm2118_vm8, %v4459_v15, 0.0  ;;  %8102 = vrot.lane.b32.xlu1 %v8101_v29, %s13096_s0  ;;  %8107 = vrot.lane.b32.xlu0 %v8106_v31, %s13098_s17  ;;  %v7983_v39 = vpop.permute.xlu1 %7982  ;;  %v7988_v16 = vpop.permute.xlu0 %7987 }
 0x86d   :  { %v7985_v7 = vunpack.i.h.bf16 %v7983_v39  ;;  %v7984_v44 = vunpack.i.l.bf16 %v7983_v39  ;;  %v7990_v50 = vunpack.i.h.bf16 %v7988_v16  ;;  %v7989_v21 = vunpack.i.l.bf16 %v7988_v16 }
 0x86e   :  { %v8111_v59 = vpack.i.bf16 %v4636_v52, %v4635_v2  ;;  %v8116_v26 = vpack.i.bf16 %v4462_v22, %v4461_v42 }
 0x86f   :  { %v4644_v41 = vsel %vm2083_vm1, 0.0, %v7985_v7  ;;  %v4643_v24 = vsel %vm2083_vm1, 0.0, %v7984_v44  ;;  %v4470_v34 = vsel %vm2083_vm1, 0.0, %v7990_v50  ;;  %v4469_v35 = vsel %vm2083_vm1, 0.0, %v7989_v21 }
 0x870   :  { %v4646_v12 = vsel %vm2118_vm8, %v4644_v41, 0.0  ;;  %v4645_v10 = vsel %vm2118_vm8, %v4643_v24, 0.0  ;;  %v4472_v8 = vsel %vm2118_vm8, %v4470_v34, 0.0  ;;  %v4471_v51 = vsel %vm2118_vm8, %v4469_v35, 0.0  ;;  %8112 = vrot.lane.b32.xlu1 %v8111_v59, %s8859_s23  ;;  %8117 = vrot.lane.b32.xlu0 %v8116_v26, %s8840_s19  ;;  %v7993_v11 = vpop.permute.xlu1 %7992  ;;  %v7998_v40 = vpop.permute.xlu0 %7997 }
 0x871   :  { %v7995_v5 = vunpack.i.h.bf16 %v7993_v11  ;;  %v7994_v25 = vunpack.i.l.bf16 %v7993_v11  ;;  %v8000_v53 = vunpack.i.h.bf16 %v7998_v40  ;;  %v7999_v46 = vunpack.i.l.bf16 %v7998_v40 }
 0x872   :  { %v8121_v27 = vpack.i.bf16 %v4646_v12, %v4645_v10  ;;  %v8126_v43 = vpack.i.bf16 %v4472_v8, %v4471_v51 }
 0x873   :  { %v4654_v37 = vsel %vm2083_vm1, 0.0, %v7995_v5  ;;  %v4653_v54 = vsel %vm2083_vm1, 0.0, %v7994_v25  ;;  %v4480_v36 = vsel %vm2083_vm1, 0.0, %v8000_v53  ;;  %v4479_v1 = vsel %vm2083_vm1, 0.0, %v7999_v46 }
 0x874   :  { %v4656_v63 = vsel %vm2118_vm8, %v4654_v37, 0.0  ;;  %v4655_v0 = vsel %vm2118_vm8, %v4653_v54, 0.0  ;;  %v4482_v61 = vsel %vm2118_vm8, %v4480_v36, 0.0  ;;  %v4481_v18 = vsel %vm2118_vm8, %v4479_v1, 0.0  ;;  %8122 = vrot.lane.b32.xlu1 %v8121_v27, %s13097_s25  ;;  %8127 = vrot.lane.b32.xlu0 %v8126_v43, %s13095_s8  ;;  %v8003_v38 = vpop.permute.xlu1 %8002  ;;  %v8008_v3 = vpop.permute.xlu0 %8007 }
 0x875   :  { %v8005_v58 = vunpack.i.h.bf16 %v8003_v38  ;;  %v8004_v19 = vunpack.i.l.bf16 %v8003_v38  ;;  %v8010_v33 = vunpack.i.h.bf16 %v8008_v3  ;;  %v8009_v49 = vunpack.i.l.bf16 %v8008_v3 }
 0x876   :  { %v8131_v45 = vpack.i.bf16 %v4656_v63, %v4655_v0  ;;  %v8136_v48 = vpack.i.bf16 %v4482_v61, %v4481_v18 }
 0x877   :  { %v4664_v57 = vsel %vm2083_vm1, 0.0, %v8005_v58  ;;  %v4663_v56 = vsel %vm2083_vm1, 0.0, %v8004_v19  ;;  %v4490_v17 = vsel %vm2083_vm1, 0.0, %v8010_v33  ;;  %v4489_v23 = vsel %vm2083_vm1, 0.0, %v8009_v49 }
 0x878   :  { %v4666_v55 = vsel %vm2118_vm8, %v4664_v57, 0.0  ;;  %v4665_v6 = vsel %vm2118_vm8, %v4663_v56, 0.0  ;;  %v4492_v13 = vsel %vm2118_vm8, %v4490_v17, 0.0  ;;  %v4491_v9 = vsel %vm2118_vm8, %v4489_v23, 0.0  ;;  %8132 = vrot.lane.b32.xlu1 %v8131_v45, %s8861_s13  ;;  %8137 = vrot.lane.b32.xlu0 %v8136_v48, %s13096_s0  ;;  %v8013_v60 = vpop.permute.xlu1 %8012  ;;  %v8018_v28 = vpop.permute.xlu0 %8017 }
 0x879   :  { %v8015_v47 = vunpack.i.h.bf16 %v8013_v60  ;;  %v8014_v4 = vunpack.i.l.bf16 %v8013_v60  ;;  %v8020_v20 = vunpack.i.h.bf16 %v8018_v28  ;;  %v8019_v29 = vunpack.i.l.bf16 %v8018_v28 }
 0x87a   :  { %v8141_v31 = vpack.i.bf16 %v4666_v55, %v4665_v6  ;;  %v8146_v32 = vpack.i.bf16 %v4492_v13, %v4491_v9 }
 0x87b   :  { %v4316_v14 = vsel %vm2083_vm1, 0.0, %v8015_v47  ;;  %v4315_v62 = vsel %vm2083_vm1, 0.0, %v8014_v4  ;;  %v4500_v15 = vsel %vm2083_vm1, 0.0, %v8020_v20  ;;  %v4499_v52 = vsel %vm2083_vm1, 0.0, %v8019_v29 }
 0x87c   :  { %v4318_v2 = vsel %vm2118_vm8, %v4316_v14, 0.0  ;;  %v4317_v22 = vsel %vm2118_vm8, %v4315_v62, 0.0  ;;  %v4502_v42 = vsel %vm2118_vm8, %v4500_v15, 0.0  ;;  %v4501_v39 = vsel %vm2118_vm8, %v4499_v52, 0.0  ;;  %8142 = vrot.lane.b32.xlu1 %v8141_v31, %s13098_s17  ;;  %8147 = vrot.lane.b32.xlu0 %v8146_v32, %s8859_s23  ;;  %v8023_v16 = vpop.permute.xlu1 %8022  ;;  %v8028_v7 = vpop.permute.xlu0 %8027 }
 0x87d   :  { %v8025_v44 = vunpack.i.h.bf16 %v8023_v16  ;;  %v8024_v50 = vunpack.i.l.bf16 %v8023_v16  ;;  %v8030_v21 = vunpack.i.h.bf16 %v8028_v7  ;;  %v8029_v59 = vunpack.i.l.bf16 %v8028_v7 }
 0x87e   :  { %v8151_v26 = vpack.i.bf16 %v4318_v2, %v4317_v22  ;;  %v8156_v41 = vpack.i.bf16 %v4502_v42, %v4501_v39 }
 0x87f   :  { %v4326_v24 = vsel %vm2083_vm1, 0.0, %v8025_v44  ;;  %v4325_v34 = vsel %vm2083_vm1, 0.0, %v8024_v50  ;;  %v4510_v35 = vsel %vm2083_vm1, 0.0, %v8030_v21  ;;  %v4509_v12 = vsel %vm2083_vm1, 0.0, %v8029_v59 }
 0x880   :  { %v4328_v10 = vsel %vm2118_vm8, %v4326_v24, 0.0  ;;  %v4327_v8 = vsel %vm2118_vm8, %v4325_v34, 0.0  ;;  %v4512_v51 = vsel %vm2118_vm8, %v4510_v35, 0.0  ;;  %v4511_v11 = vsel %vm2118_vm8, %v4509_v12, 0.0  ;;  %8152 = vrot.lane.b32.xlu1 %v8151_v26, %s8840_s19  ;;  %8157 = vrot.lane.b32.xlu0 %v8156_v41, %s13097_s25  ;;  %v8033_v40 = vpop.permute.xlu1 %8032  ;;  %v8038_v5 = vpop.permute.xlu0 %8037  ;;  %s13103_s19 = smov 124  }
 0x881   :  { %v8035_v25 = vunpack.i.h.bf16 %v8033_v40  ;;  %v8034_v53 = vunpack.i.l.bf16 %v8033_v40  ;;  %v8040_v46 = vunpack.i.h.bf16 %v8038_v5  ;;  %v8039_v27 = vunpack.i.l.bf16 %v8038_v5 }
 0x882   :  { %v8161_v43 = vpack.i.bf16 %v4328_v10, %v4327_v8  ;;  %v8166_v37 = vpack.i.bf16 %v4512_v51, %v4511_v11 }
 0x883   :  { %v4336_v54 = vsel %vm2083_vm1, 0.0, %v8035_v25  ;;  %v4335_v36 = vsel %vm2083_vm1, 0.0, %v8034_v53  ;;  %v4520_v1 = vsel %vm2083_vm1, 0.0, %v8040_v46  ;;  %v4519_v63 = vsel %vm2083_vm1, 0.0, %v8039_v27 }
 0x884   :  { %v4338_v0 = vsel %vm2118_vm8, %v4336_v54, 0.0  ;;  %v4337_v61 = vsel %vm2118_vm8, %v4335_v36, 0.0  ;;  %v4522_v18 = vsel %vm2118_vm8, %v4520_v1, 0.0  ;;  %v4521_v38 = vsel %vm2118_vm8, %v4519_v63, 0.0  ;;  %8162 = vrot.lane.b32.xlu1 %v8161_v43, %s13095_s8  ;;  %8167 = vrot.lane.b32.xlu0 %v8166_v37, %s8861_s13  ;;  %v8043_v3 = vpop.permute.xlu1 %8042  ;;  %v8048_v58 = vpop.permute.xlu0 %8047  ;;  %s13118_s8 = smov 112  }
 0x885   :  { %v8045_v19 = vunpack.i.h.bf16 %v8043_v3  ;;  %v8044_v33 = vunpack.i.l.bf16 %v8043_v3  ;;  %v8050_v49 = vunpack.i.h.bf16 %v8048_v58  ;;  %v8049_v45 = vunpack.i.l.bf16 %v8048_v58 }
 0x886   :  { %v8171_v48 = vpack.i.bf16 %v4338_v0, %v4337_v61  ;;  %v8176_v57 = vpack.i.bf16 %v4522_v18, %v4521_v38 }
 0x887   :  { %v4346_v56 = vsel %vm2083_vm1, 0.0, %v8045_v19  ;;  %v4345_v17 = vsel %vm2083_vm1, 0.0, %v8044_v33  ;;  %v4356_v23 = vsel %vm2083_vm1, 0.0, %v8050_v49  ;;  %v4355_v55 = vsel %vm2083_vm1, 0.0, %v8049_v45 }
 0x888   :  { %v4348_v6 = vsel %vm2118_vm8, %v4346_v56, 0.0  ;;  %v4347_v13 = vsel %vm2118_vm8, %v4345_v17, 0.0  ;;  %v4358_v9 = vsel %vm2118_vm8, %v4356_v23, 0.0  ;;  %v4357_v60 = vsel %vm2118_vm8, %v4355_v55, 0.0  ;;  %8172 = vrot.lane.b32.xlu1 %v8171_v48, %s13096_s0  ;;  %8177 = vrot.lane.b32.xlu0 %v8176_v57, %s13098_s17  ;;  %v8053_v28 = vpop.permute.xlu1 %8052  ;;  %v8058_v47 = vpop.permute.xlu0 %8057  ;;  %s13119_s0 = smov 106  }
 0x889   :  { %v8055_v4 = vunpack.i.h.bf16 %v8053_v28  ;;  %v8054_v20 = vunpack.i.l.bf16 %v8053_v28  ;;  %v8060_v29 = vunpack.i.h.bf16 %v8058_v47  ;;  %v8059_v31 = vunpack.i.l.bf16 %v8058_v47 }
 0x88a   :  { %v8181_v32 = vpack.i.bf16 %v4348_v6, %v4347_v13  ;;  %v8186_v14 = vpack.i.bf16 %v4358_v9, %v4357_v60 }
 0x88b   :  { %v4366_v62 = vsel %vm2083_vm1, 0.0, %v8055_v4  ;;  %v4365_v15 = vsel %vm2083_vm1, 0.0, %v8054_v20  ;;  %v4376_v52 = vsel %vm2083_vm1, 0.0, %v8060_v29  ;;  %v4375_v2 = vsel %vm2083_vm1, 0.0, %v8059_v31 }
 0x88c   :  { %v4368_v22 = vsel %vm2118_vm8, %v4366_v62, 0.0  ;;  %v4367_v42 = vsel %vm2118_vm8, %v4365_v15, 0.0  ;;  %v4378_v39 = vsel %vm2118_vm8, %v4376_v52, 0.0  ;;  %v4377_v16 = vsel %vm2118_vm8, %v4375_v2, 0.0  ;;  %8182 = vrot.lane.b32.xlu1 %v8181_v32, %s8859_s23  ;;  %8187 = vrot.lane.b32.xlu0 %v8186_v14, %s13097_s25 }
 0x88d   :  { %v8191_v7 = vpack.i.bf16 %v4368_v22, %v4367_v42  ;;  %v8196_v44 = vpack.i.bf16 %v4378_v39, %v4377_v16  ;;  %vm13099_vm1 = vcmask 883712  }
 0x88e   :  { %vm13100_vm4 = vmmov %vm13099_vm1 }
 0x890   :  { %8192 = vrot.lane.b32.xlu1 %v8191_v7, %s8861_s13  ;;  %8197 = vrot.lane.b32.xlu0 %v8196_v44, %s13098_s17 }
 0x8ce   :  { %v8063_v50 = vpop.permute.xlu1 %8062  ;;  %v8068_v21 = vpop.permute.xlu0 %8067 }
 0x8cf   :  { %v8065_v41 = vunpack.i.h.bf16 %v8063_v50  ;;  %v8064_v24 = vunpack.i.l.bf16 %v8063_v50  ;;  %v8070_v12 = vunpack.i.h.bf16 %v8068_v21  ;;  %v8069_v10 = vunpack.i.l.bf16 %v8068_v21 }
 0x8d1   :  { %v4868_v8 = vsel %vm2123_vm9, 0.0, %v8065_v41  ;;  %v4867_v51 = vsel %vm2123_vm9, 0.0, %v8064_v24 }
 0x8d2   :  { %v8073_v59 = vpop.permute.xlu1 %8072  ;;  %v8078_v26 = vpop.permute.xlu0 %8077  ;;  %v4870_v53 = vsel %vm3230_vm0, %v4868_v8, %v8070_v12  ;;  %v4869_v46 = vsel %vm3230_vm0, %v4867_v51, %v8069_v10 }
 0x8d3   :  { %v8075_v11 = vunpack.i.h.bf16 %v8073_v59  ;;  %v8074_v40 = vunpack.i.l.bf16 %v8073_v59  ;;  %v8080_v27 = vunpack.i.h.bf16 %v8078_v26  ;;  %v8079_v43 = vunpack.i.l.bf16 %v8078_v26 }
 0x8d5   :  { %v4871_v37 = vsel %vm3235_vm5, %v4869_v46, %v8074_v40  ;;  %v4872_v54 = vsel %vm3235_vm5, %v4870_v53, %v8075_v11 }
 0x8d6   :  { %v8083_v34 = vpop.permute.xlu1 %8082  ;;  %v8088_v35 = vpop.permute.xlu0 %8087  ;;  %v4873_v38 = vsel %vm3240_vm6, %v4871_v37, %v8079_v43  ;;  %v4874_v3 = vsel %vm3240_vm6, %v4872_v54, %v8080_v27 }
 0x8d7   :  { %v8090_v36 = vunpack.i.h.bf16 %v8088_v35  ;;  %v8089_v1 = vunpack.i.l.bf16 %v8088_v35  ;;  %v8084_v60 = vunpack.i.l.bf16 %v8083_v34  ;;  %v8085_v28 = vunpack.i.h.bf16 %v8083_v34 }
 0x8d9   :  { %v4875_v33 = vsel %vm3245_vm10, %v4873_v38, %v8089_v1  ;;  %v4876_v49 = vsel %vm3245_vm10, %v4874_v3, %v8090_v36  ;;  %v4723_v14 = vsel %vm2123_vm9, 0.0, %v8084_v60  ;;  %v4724_v52 = vsel %vm2123_vm9, 0.0, %v8085_v28 }
 0x8da   :  { %v8093_v5 = vpop.permute.xlu1 %8092  ;;  %v8098_v25 = vpop.permute.xlu0 %8097 }
 0x8db   :  { %v8100_v63 = vunpack.i.h.bf16 %v8098_v25  ;;  %v8099_v0 = vunpack.i.l.bf16 %v8098_v25  ;;  %v8094_v47 = vunpack.i.l.bf16 %v8093_v5  ;;  %v8095_v29 = vunpack.i.h.bf16 %v8093_v5 }
 0x8dd   :  { %v4877_v45 = vsel %vm13099_vm1, %v4875_v33, %v8099_v0  ;;  %v4878_v48 = vsel %vm13100_vm4, %v4876_v49, %v8100_v63  ;;  %v4725_v2 = vsel %vm3230_vm0, %v4723_v14, %v8094_v47  ;;  %v4726_v7 = vsel %vm3230_vm0, %v4724_v52, %v8095_v29  ;;  %vm13104_vm4 = vmmov %vm13099_vm1 }
 0x8de   :  { %v8103_v61 = vpop.permute.xlu1 %8102  ;;  %v8108_v18 = vpop.permute.xlu0 %8107 }
 0x8df   :  { %v8110_v58 = vunpack.i.h.bf16 %v8108_v18  ;;  %v8109_v19 = vunpack.i.l.bf16 %v8108_v18  ;;  %v8104_v31 = vunpack.i.l.bf16 %v8103_v61  ;;  %v8105_v32 = vunpack.i.h.bf16 %v8103_v61 }
 0x8e1   :  { %v11772_v57 = vsel %vm2118_vm8, %v8110_v58, 0.0  ;;  %v11775_v56 = vsel %vm2118_vm8, %v8109_v19, 0.0  ;;  %v11780_v23 = vsel %vm13101_vm13, %v4878_v48, %v8110_v58  ;;  %v11783_v55 = vsel %vm13102_vm11, %v4877_v45, %v8109_v19  ;;  %vm13105_vm11 = vmmov %vm13099_vm1 }
 0x8e2   :  { %v8491_v17 = vpack.i.bf16 %v11772_v57, %v11775_v56  ;;  %v8113_v6 = vpop.permute.xlu1 %8112  ;;  %v8118_v13 = vpop.permute.xlu0 %8117  ;;  %v11787_v9 = vpack.i.bf16 %v11780_v23, %v11783_v55  ;;  %v4727_v44 = vsel %vm3235_vm5, %v4725_v2, %v8104_v31  ;;  %v4728_v50 = vsel %vm3235_vm5, %v4726_v7, %v8105_v32  ;;  %vm13106_vm1 = vmmov %vm13101_vm13 }
 0x8e3   :  { %v8115_v62 = vunpack.i.h.bf16 %v8113_v6  ;;  %v8114_v15 = vunpack.i.l.bf16 %v8113_v6  ;;  %v8120_v24 = vunpack.i.h.bf16 %v8118_v13  ;;  %v8119_v34 = vunpack.i.l.bf16 %v8118_v13 }
 0x8e4   :  { %8222 = vrot.lane.b32.xlu1 %v11787_v9, %s13103_s19 }
 0x8e5   :  { %v4729_v26 = vsel %vm3240_vm6, %v4727_v44, %v8114_v15  ;;  %v4730_v41 = vsel %vm3240_vm6, %v4728_v50, %v8115_v62  ;;  %v4580_v0 = vsel %vm2123_vm9, 0.0, %v8120_v24  ;;  %v4579_v61 = vsel %vm2123_vm9, 0.0, %v8119_v34 }
 0x8e6   :  { %v8123_v4 = vpop.permute.xlu1 %8122  ;;  %v8128_v20 = vpop.permute.xlu0 %8127 }
 0x8e7   :  { %v8125_v22 = vunpack.i.h.bf16 %v8123_v4  ;;  %v8124_v42 = vunpack.i.l.bf16 %v8123_v4  ;;  %v8130_v10 = vunpack.i.h.bf16 %v8128_v20  ;;  %v8129_v8 = vunpack.i.l.bf16 %v8128_v20 }
 0x8e8   :  { %8232 = vrot.lane.b32.xlu1 %v11787_v9, %s8851_s3 }
 0x8e9   :  { %v4731_v35 = vsel %vm3245_vm10, %v4729_v26, %v8124_v42  ;;  %v4732_v12 = vsel %vm3245_vm10, %v4730_v41, %v8125_v22  ;;  %v4581_v58 = vsel %vm3230_vm0, %v4579_v61, %v8129_v8  ;;  %v4582_v19 = vsel %vm3230_vm0, %v4580_v0, %v8130_v10 }
 0x8ea   :  { %v8133_v39 = vpop.permute.xlu1 %8132  ;;  %v8138_v16 = vpop.permute.xlu0 %8137 }
 0x8eb   :  { %v8135_v21 = vunpack.i.h.bf16 %v8133_v39  ;;  %v8134_v59 = vunpack.i.l.bf16 %v8133_v39  ;;  %v8140_v40 = vunpack.i.h.bf16 %v8138_v16  ;;  %v8139_v5 = vunpack.i.l.bf16 %v8138_v16 }
 0x8ec   :  { %8242 = vrot.lane.b32.xlu1 %v11787_v9, %s8861_s13 }
 0x8ed   :  { %v4733_v46 = vsel %vm13104_vm4, %v4731_v35, %v8134_v59  ;;  %v4734_v27 = vsel %vm13105_vm11, %v4732_v12, %v8135_v21  ;;  %v4583_v45 = vsel %vm3235_vm5, %v4581_v58, %v8139_v5  ;;  %v4584_v48 = vsel %vm3235_vm5, %v4582_v19, %v8140_v40  ;;  %vm13107_vm11 = vmmov %vm13104_vm4 }
 0x8ee   :  { %v8143_v51 = vpop.permute.xlu1 %8142  ;;  %v8148_v11 = vpop.permute.xlu0 %8147 }
 0x8ef   :  { %v8145_v25 = vunpack.i.h.bf16 %v8143_v51  ;;  %v8144_v53 = vunpack.i.l.bf16 %v8143_v51  ;;  %v8150_v43 = vunpack.i.h.bf16 %v8148_v11  ;;  %v8149_v37 = vunpack.i.l.bf16 %v8148_v11 }
 0x8f1   :  { %v4738_v54 = vsel %vm2118_vm8, %v8145_v25, 0.0  ;;  %v4737_v36 = vsel %vm2118_vm8, %v8144_v53, 0.0  ;;  %v4735_v1 = vsel %vm13101_vm13, %v4733_v46, %v8144_v53  ;;  %v4736_v63 = vsel %vm13106_vm1, %v4734_v27, %v8145_v25  ;;  %vm13108_vm13 = vmmov %vm13106_vm1 }
 0x8f2   :  { %v11813_v18 = vpack.i.bf16 %v4738_v54, %v4737_v36  ;;  %v8153_v38 = vpop.permute.xlu1 %8152  ;;  %v8158_v3 = vpop.permute.xlu0 %8157  ;;  %v11819_v6 = vpack.i.bf16 %v4736_v63, %v4735_v1  ;;  %v4585_v13 = vsel %vm3240_vm6, %v4583_v45, %v8149_v37  ;;  %v4586_v60 = vsel %vm3240_vm6, %v4584_v48, %v8150_v43 }
 0x8f3   :  { %v8160_v33 = vunpack.i.h.bf16 %v8158_v3  ;;  %v8159_v49 = vunpack.i.l.bf16 %v8158_v3  ;;  %v8155_v28 = vunpack.i.h.bf16 %v8153_v38  ;;  %v8154_v47 = vunpack.i.l.bf16 %v8153_v38 }
 0x8f4   :  { %8252 = vrot.lane.b32.xlu1 %v11819_v6, %s8872_s20 }
 0x8f5   :  { %v4587_v29 = vsel %vm3245_vm10, %v4585_v13, %v8159_v49  ;;  %v4588_v31 = vsel %vm3245_vm10, %v4586_v60, %v8160_v33  ;;  %v4435_v44 = vsel %vm2123_vm9, 0.0, %v8154_v47  ;;  %v4436_v59 = vsel %vm2123_vm9, 0.0, %v8155_v28  ;;  %vm13110_vm9 = vmmov %vm13104_vm4 }
 0x8f6   :  { %v8163_v4 = vpop.permute.xlu1 %8162  ;;  %v8168_v20 = vpop.permute.xlu0 %8167  ;;  %v8216_v47 = vpack.i.bf16 %v11775_v56, %v11783_v55 }
 0x8f7   :  { %v8169_v32 = vunpack.i.l.bf16 %v8168_v20  ;;  %v8165_v14 = vunpack.i.h.bf16 %v8163_v4  ;;  %v8164_v62 = vunpack.i.l.bf16 %v8163_v4  ;;  %v8170_v15 = vunpack.i.h.bf16 %v8168_v20 }
 0x8f8   :  { %8262 = vrot.lane.b32.xlu1 %v11819_v6, %s8874_s29  ;;  %v8441_v4 = vpack.i.bf16 %v11772_v57, %v11780_v23 }
 0x8f9   :  { %v4589_v52 = vsel %vm13104_vm4, %v4587_v29, %v8169_v32  ;;  %v4590_v50 = vsel %vm13107_vm11, %v4588_v31, %v8170_v15  ;;  %v4437_v26 = vsel %vm3230_vm0, %v4435_v44, %v8164_v62  ;;  %v4438_v35 = vsel %vm3230_vm0, %v4436_v59, %v8165_v14  ;;  %vm13111_vm0 = vmmov %vm13104_vm4 }
 0x8fa   :  { %v8173_v2 = vpop.permute.xlu1 %8172  ;;  %v8178_v22 = vpop.permute.xlu0 %8177  ;;  %vm13113_vm4 = vmmov %vm13106_vm1  ;;  %vm13126_vm11 = vcmask 523264  }
 0x8fb   :  { %v8175_v42 = vunpack.i.h.bf16 %v8173_v2  ;;  %v8174_v39 = vunpack.i.l.bf16 %v8173_v2  ;;  %v8180_v16 = vunpack.i.h.bf16 %v8178_v22  ;;  %v8179_v7 = vunpack.i.l.bf16 %v8178_v22 }
 0x8fc   :  { %8272 = vrot.lane.b32.xlu1 %v11819_v6, %s13109_s28 }
 0x8fd   :  { %v4591_v21 = vsel %vm13108_vm13, %v4589_v52, %v8179_v7  ;;  %v4592_v41 = vsel %vm13106_vm1, %v4590_v50, %v8180_v16  ;;  %v4439_v12 = vsel %vm3235_vm5, %v4437_v26, %v8174_v39  ;;  %v4440_v51 = vsel %vm3235_vm5, %v4438_v35, %v8175_v42  ;;  %vm13112_vm5 = vmmov %vm13106_vm1 }
 0x8fe   :  { %v8183_v24 = vpop.permute.xlu1 %8182  ;;  %v8188_v34 = vpop.permute.xlu0 %8187  ;;  %v11841_v5 = vpack.i.bf16 %v4592_v41, %v4591_v21  ;;  %v4594_v1 = vsel %vm2118_vm8, %v8180_v16, 0.0  ;;  %v4593_v63 = vsel %vm2118_vm8, %v8179_v7, 0.0  ;;  %vm13127_vm13 = vmmov 0   ;;  %vm13128_vm1 = vmmov %vm13126_vm11 }
 0x8ff   :  { %v8185_v10 = vunpack.i.h.bf16 %v8183_v24  ;;  %v8184_v8 = vunpack.i.l.bf16 %v8183_v24  ;;  %v8190_v11 = vunpack.i.h.bf16 %v8188_v34  ;;  %v8189_v40 = vunpack.i.l.bf16 %v8188_v34 }
 0x900   :  { %8282 = vrot.lane.b32.xlu1 %v11841_v5, %s13109_s28  ;;  %v11861_v48 = vpack.i.bf16 %v4594_v1, %v4593_v63  ;;  %v11865_v13 = vpack.i.bf16 %v4593_v63, %v4591_v21  ;;  %v11873_v28 = vpack.i.bf16 %v4594_v1, %v4592_v41 }
 0x901   :  { %v4441_v25 = vsel %vm3240_vm6, %v4439_v12, %v8184_v8  ;;  %v4442_v53 = vsel %vm3240_vm6, %v4440_v51, %v8185_v10 }
 0x902   :  { %v8193_v46 = vpop.permute.xlu1 %8192  ;;  %v8198_v27 = vpop.permute.xlu0 %8197  ;;  %v4444_v0 = vsel %vm3245_vm10, %v4442_v53, %v8190_v11  ;;  %v4443_v61 = vsel %vm3245_vm10, %v4441_v25, %v8189_v40 }
 0x903   :  { %v8195_v43 = vunpack.i.h.bf16 %v8193_v46  ;;  %v8194_v37 = vunpack.i.l.bf16 %v8193_v46  ;;  %v8200_v54 = vunpack.i.h.bf16 %v8198_v27  ;;  %v8199_v36 = vunpack.i.l.bf16 %v8198_v27 }
 0x904   :  { %8292 = vrot.lane.b32.xlu1 %v11819_v6, %s8853_s27 }
 0x905   :  { %v4445_v38 = vsel %vm13110_vm9, %v4443_v61, %v8194_v37  ;;  %v4446_v3 = vsel %vm13111_vm0, %v4444_v0, %v8195_v43  ;;  %v4450_v58 = vsel %vm2118_vm8, %v8200_v54, 0.0  ;;  %v4449_v19 = vsel %vm2118_vm8, %v8199_v36, 0.0 }
 0x906   :  { %v4447_v33 = vsel %vm13112_vm5, %v4445_v38, %v8199_v36  ;;  %v4448_v49 = vsel %vm13113_vm4, %v4446_v3, %v8200_v54  ;;  %v11859_v45 = vpack.i.bf16 %v4450_v58, %v4449_v19  ;;  %vm13124_vm8 = vcmask 703488   ;;  %vm13131_vm5 = vmmov %vm13128_vm1 }
 0x907   :  { %v11867_v60 = vpack.i.bf16 %v4448_v49, %v4447_v33  ;;  %vm13125_vm10 = vmmov %vm13124_vm8 }
 0x908   :  { %8202 = vrot.lane.b32.xlu0 %v11859_v45, %s8876_s26  ;;  %8302 = vrot.lane.b32.xlu1 %v11841_v5, %s13114_s5  ;;  %vm13129_vm9 = vmmov %vm13124_vm8 }
 0x909   :  { %vm13130_vm0 = vmmov %vm13124_vm8 }
 0x90a   :  { %vm13132_vm4 = vmmov %vm13128_vm1 }
 0x90c   :  { %8207 = vrot.lane.b32.xlu0 %v11861_v48, %s8876_s26  ;;  %8312 = vrot.lane.b32.xlu1 %v11841_v5, %s13097_s25 }
 0x910   :  { %8212 = vrot.lane.b32.xlu0 %v11865_v13, %s13115_s21  ;;  %8317 = vrot.lane.b32.xlu1 %v11873_v28, %s13115_s21 }
 0x914   :  { %8217 = vrot.lane.b32.xlu0 %v8216_v47, %s13115_s21  ;;  %8327 = vrot.lane.b32.xlu1 %v11867_v60, %s13116_s6 }
 0x918   :  { %8227 = vrot.lane.b32.xlu0 %v11787_v9, %s13117_s7  ;;  %8337 = vrot.lane.b32.xlu1 %v11867_v60, %s8849_s2 }
 0x91c   :  { %8237 = vrot.lane.b32.xlu0 %v11787_v9, %s13118_s8  ;;  %8347 = vrot.lane.b32.xlu1 %v11867_v60, %s8852_s4 }
 0x920   :  { %8247 = vrot.lane.b32.xlu0 %v11819_v6, %s13098_s17  ;;  %8352 = vrot.lane.b32.xlu1 %v11787_v9, %s13098_s17  ;;  %s13121_s17 = smov 92  }
 0x924   :  { %8257 = vrot.lane.b32.xlu0 %v11787_v9, %s13116_s6  ;;  %8362 = vrot.lane.b32.xlu1 %v11787_v9, %s8874_s29  ;;  %s13120_s29 = smov 100  }
 0x928   :  { %8267 = vrot.lane.b32.xlu0 %v11819_v6, %s8867_s12  ;;  %8372 = vrot.lane.b32.xlu1 %v11787_v9, %s13109_s28 }
 0x92c   :  { %8277 = vrot.lane.b32.xlu0 %v11819_v6, %s13119_s0  ;;  %8382 = vrot.lane.b32.xlu1 %v11787_v9, %s8853_s27 }
 0x930   :  { %8287 = vrot.lane.b32.xlu0 %v11841_v5, %s13119_s0  ;;  %8392 = vrot.lane.b32.xlu1 %v11841_v5, %s13116_s6 }
 0x934   :  { %8297 = vrot.lane.b32.xlu0 %v11841_v5, %s8853_s27  ;;  %8402 = vrot.lane.b32.xlu1 %v11841_v5, %s8849_s2 }
 0x938   :  { %8307 = vrot.lane.b32.xlu0 %v11841_v5, %s8869_s24  ;;  %8412 = vrot.lane.b32.xlu1 %v11841_v5, %s8852_s4 }
 0x93c   :  { %8322 = vrot.lane.b32.xlu0 %v11867_v60, %s8861_s13  ;;  %8417 = vrot.lane.b32.xlu1 %v11787_v9, %s13114_s5 }
 0x940   :  { %8332 = vrot.lane.b32.xlu0 %v11867_v60, %s13120_s29  ;;  %8427 = vrot.lane.b32.xlu1 %v11819_v6, %s8861_s13 }
 0x944   :  { %8342 = vrot.lane.b32.xlu0 %v11867_v60, %s13121_s17  ;;  %8437 = vrot.lane.b32.xlu1 %v11787_v9, %s13097_s25 }
 0x948   :  { %8357 = vrot.lane.b32.xlu0 %v11787_v9, %s8872_s20  ;;  %8442 = vrot.lane.b32.xlu1 %v8441_v4, %s13115_s21 }
 0x94c   :  { %8367 = vrot.lane.b32.xlu0 %v11787_v9, %s8867_s12  ;;  %8452 = vrot.lane.b32.xlu1 %v11819_v6, %s8849_s2 }
 0x950   :  { %8377 = vrot.lane.b32.xlu0 %v11787_v9, %s13119_s0  ;;  %8462 = vrot.lane.b32.xlu1 %v11819_v6, %s8852_s4 }
 0x954   :  { %8387 = vrot.lane.b32.xlu0 %v11841_v5, %s8861_s13  ;;  %8472 = vrot.lane.b32.xlu1 %v11787_v9, %s13120_s29 }
 0x956   :  { %v8223_v20 = vpop.permute.xlu1 %8222 }
 0x957   :  { %v8224_v26 = vunpack.i.l.bf16 %v8223_v20  ;;  %v8225_v24 = vunpack.i.h.bf16 %v8223_v20 }
 0x958   :  { %8397 = vrot.lane.b32.xlu0 %v11841_v5, %s13120_s29  ;;  %8482 = vrot.lane.b32.xlu1 %v11787_v9, %s13121_s17 }
 0x959   :  { %v4921_v10 = vsel %vm2113_vm7, %v11783_v55, %v8224_v26  ;;  %v4922_v51 = vsel %vm2113_vm7, %v11780_v23, %v8225_v24 }
 0x95a   :  { %v11957_v29 = vpop.permute.xlu1 %8232 }
 0x95b   :  { %v8234_v25 = vunpack.i.l.bf16 %v11957_v29  ;;  %v8235_v27 = vunpack.i.h.bf16 %v11957_v29 }
 0x95c   :  { %8407 = vrot.lane.b32.xlu0 %v11841_v5, %s13121_s17  ;;  %8492 = vrot.lane.b32.xlu1 %v8491_v17, %s8876_s26 }
 0x95e   :  { %v11967_v31 = vpop.permute.xlu1 %8242 }
 0x95f   :  { %v8244_v1 = vunpack.i.l.bf16 %v11967_v31  ;;  %v8245_v38 = vunpack.i.h.bf16 %v11967_v31 }
 0x960   :  { %8422 = vrot.lane.b32.xlu0 %v11787_v9, %s8869_s24  ;;  %8502 = vrot.lane.b32.xlu1 %v11819_v6, %s13117_s7 }
 0x964   :  { %8432 = vrot.lane.b32.xlu0 %v11819_v6, %s13116_s6  ;;  %8512 = vrot.lane.b32.xlu1 %v11819_v6, %s13118_s8 }
 0x966   :  { %v11973_v32 = vpop.permute.xlu1 %8252 }
 0x967   :  { %v8254_v3 = vunpack.i.l.bf16 %v11973_v32  ;;  %v8255_v33 = vunpack.i.h.bf16 %v11973_v32 }
 0x968   :  { %8447 = vrot.lane.b32.xlu0 %v11819_v6, %s13120_s29  ;;  %8522 = vrot.lane.b32.xlu1 %v11867_v60, %s8853_s27 }
 0x96a   :  { %v11979_v57 = vpop.permute.xlu1 %8262 }
 0x96b   :  { %v8264_v31 = vunpack.i.l.bf16 %v11979_v57  ;;  %v8265_v24 = vunpack.i.h.bf16 %v11979_v57 }
 0x96c   :  { %8457 = vrot.lane.b32.xlu0 %v11819_v6, %s13121_s17  ;;  %8532 = vrot.lane.b32.xlu1 %v11867_v60, %s8869_s24 }
 0x96e   :  { %v11985_v56 = vpop.permute.xlu1 %8272 }
 0x970   :  { %8467 = vrot.lane.b32.xlu0 %v11813_v18, %s8876_s26  ;;  %8542 = vrot.lane.b32.xlu1 %v11867_v60, %s13115_s21 }
 0x972   :  { %v11991_v17 = vpop.permute.xlu1 %8282 }
 0x974   :  { %8477 = vrot.lane.b32.xlu0 %v11787_v9, %s8849_s2  ;;  %8552 = vrot.lane.b32.xlu1 %v11819_v6, %s13114_s5  ;;  %s13122_s2 = smov 80  }
 0x976   :  { %v11997_v14 = vpop.permute.xlu1 %8292 }
 0x978   :  { %8487 = vrot.lane.b32.xlu0 %v11787_v9, %s8852_s4  ;;  %8562 = vrot.lane.b32.xlu1 %v11819_v6, %s13097_s25 }
 0x97a   :  { %v12003_v62 = vpop.permute.xlu0 %8202  ;;  %v12005_v15 = vpop.permute.xlu1 %8302 }
 0x97c   :  { %8497 = vrot.lane.b32.xlu0 %v11819_v6, %s13103_s19  ;;  %8572 = vrot.lane.b32.xlu1 %v11813_v18, %s8879_s1 }
 0x97e   :  { %v12011_v52 = vpop.permute.xlu0 %8207  ;;  %v12013_v2 = vpop.permute.xlu1 %8312 }
 0x97f   :  { %v8314_v22 = vunpack.i.l.bf16 %v12013_v2  ;;  %v8315_v18 = vunpack.i.h.bf16 %v12013_v2 }
 0x980   :  { %8507 = vrot.lane.b32.xlu0 %v11819_v6, %s8851_s3  ;;  %8577 = vrot.lane.b32.xlu1 %v11865_v13, %s8859_s23  ;;  %s13123_s3 = smov 66  }
 0x982   :  { %v12019_v9 = vpop.permute.xlu0 %8212  ;;  %v12023_v39 = vpop.permute.xlu1 %8317 }
 0x983   :  { %v8214_v42 = vunpack.i.l.bf16 %v12019_v9  ;;  %v8319_v16 = vunpack.i.l.bf16 %v12023_v39 }
 0x984   :  { %8517 = vrot.lane.b32.xlu0 %v11867_v60, %s13119_s0  ;;  %8582 = vrot.lane.b32.xlu1 %v11861_v48, %s8881_s14 }
 0x985   :  { %v12034_v7 = vsel %vm2113_vm7, %v8314_v22, %v8214_v42  ;;  %v12045_v50 = vsel %vm2113_vm7, %v8315_v18, %v8319_v16 }
 0x986   :  { %v12038_v44 = vpop.permute.xlu0 %8217  ;;  %v12047_v21 = vpop.permute.xlu1 %8327 }
 0x987   :  { %v8329_v2 = vunpack.i.l.bf16 %v12047_v21 }
 0x988   :  { %8527 = vrot.lane.b32.xlu0 %v11867_v60, %s13114_s5  ;;  %8592 = vrot.lane.b32.xlu1 %v11841_v5, %s13122_s2 }
 0x98a   :  { %v8228_v59 = vpop.permute.xlu0 %8227  ;;  %v12053_v41 = vpop.permute.xlu1 %8337 }
 0x98b   :  { %v8229_v34 = vunpack.i.l.bf16 %v8228_v59  ;;  %v8230_v35 = vunpack.i.h.bf16 %v8228_v59 }
 0x98c   :  { %8537 = vrot.lane.b32.xlu0 %v11867_v60, %s13097_s25  ;;  %8612 = vrot.lane.b32.xlu1 %v11867_v60, %s8882_s16 }
 0x98d   :  { %v4923_v11 = vsel %vm2148_vm14, %v4921_v10, %v8229_v34  ;;  %v4924_v53 = vsel %vm2148_vm14, %v4922_v51, %v8230_v35 }
 0x98e   :  { %v8238_v12 = vpop.permute.xlu0 %8237  ;;  %v12061_v8 = vpop.permute.xlu1 %8347  ;;  %v4925_v43 = vsel %vm3348_vm15, %v4923_v11, %v8234_v25  ;;  %v4926_v23 = vsel %vm3348_vm15, %v4924_v53, %v8235_v27  ;;  %v8274_v25 = vunpack.i.l.bf16 %v11985_v56 }
 0x98f   :  { %v8239_v40 = vunpack.i.l.bf16 %v8238_v12  ;;  %v8240_v46 = vunpack.i.h.bf16 %v8238_v12 }
 0x990   :  { %8547 = vrot.lane.b32.xlu0 %v11859_v45, %s8879_s1  ;;  %8617 = vrot.lane.b32.xlu1 %v11859_v45, %s8883_s30 }
 0x991   :  { %v4927_v54 = vsel %vm3353_vm3, %v4925_v43, %v8239_v40  ;;  %v4928_v63 = vsel %vm3353_vm3, %v4926_v23, %v8240_v46  ;;  %v8275_v46 = vunpack.i.h.bf16 %v11985_v56  ;;  %v8294_v23 = vunpack.i.l.bf16 %v11997_v14 }
 0x992   :  { %v8248_v55 = vpop.permute.xlu0 %8247  ;;  %v12074_v37 = vpop.permute.xlu1 %8352  ;;  %v4929_v13 = vsel %vm3358_vm2, %v4927_v54, %v8244_v1  ;;  %v4930_v20 = vsel %vm3358_vm2, %v4928_v63, %v8245_v38 }
 0x993   :  { %v8249_v36 = vunpack.i.l.bf16 %v8248_v55  ;;  %v8250_v0 = vunpack.i.h.bf16 %v8248_v55  ;;  %v8295_v55 = vunpack.i.h.bf16 %v11997_v14 }
 0x994   :  { %8557 = vrot.lane.b32.xlu0 %v11819_v6, %s8869_s24  ;;  %8632 = vrot.lane.b32.xlu1 %v11841_v5, %s8879_s1 }
 0x995   :  { %v4977_v47 = vsel %vm2113_vm7, %v8249_v36, %v8254_v3  ;;  %v4978_v32 = vsel %vm2113_vm7, %v8250_v0, %v8255_v33 }
 0x996   :  { %v8258_v61 = vpop.permute.xlu0 %8257  ;;  %v12087_v49 = vpop.permute.xlu1 %8362  ;;  %v4979_v51 = vsel %vm2148_vm14, %v4977_v47, %v8264_v31  ;;  %v4980_v11 = vsel %vm2148_vm14, %v4978_v32, %v8265_v24  ;;  %v8285_v47 = vunpack.i.h.bf16 %v11991_v17 }
 0x997   :  { %v8260_v58 = vunpack.i.h.bf16 %v8258_v61  ;;  %v8259_v19 = vunpack.i.l.bf16 %v8258_v61 }
 0x998   :  { %8567 = vrot.lane.b32.xlu0 %v11819_v6, %s13115_s21  ;;  %8647 = vrot.lane.b32.xlu1 %v11841_v5, %s8854_s15 }
 0x999   :  { %v12094_v4 = vsel %vm2113_vm7, %v8245_v38, %v8260_v58  ;;  %v4931_v29 = vsel %vm3363_vm12, %v4929_v13, %v8259_v19  ;;  %v4932_v59 = vsel %vm3363_vm12, %v4930_v20, %v8260_v58  ;;  %v12102_v26 = vsel %vm2113_vm7, %v8244_v1, %v8259_v19 }
 0x99a   :  { %v8268_v6 = vpop.permute.xlu0 %8267  ;;  %v5679_v34 = vpack.c.bf16 %v4932_v59, %v4931_v29  ;;  %v12107_v10 = vpop.permute.xlu1 %8372  ;;  %v8284_v20 = vunpack.i.l.bf16 %v11991_v17 }
 0x99b   :  { %v8270_v35 = vunpack.i.h.bf16 %v8268_v6  ;;  %v8269_v12 = vunpack.i.l.bf16 %v8268_v6 }
 0x99c   :  { %8587 = vrot.lane.b32.xlu0 %v11841_v5, %s8876_s26  ;;  %7173 = vmatpush3.bf16.msra.mxu1 %v5679_v34  ;;  %v8305_v34 = vunpack.i.h.bf16 %v12005_v15 }
 0x99d   :  { %v4981_v40 = vsel %vm3348_vm15, %v4979_v51, %v8269_v12  ;;  %v4982_v53 = vsel %vm3348_vm15, %v4980_v11, %v8270_v35  ;;  %8652 = vrot.lane.b32.xlu1 %v11861_v48, %s13123_s3  ;;  %7174 = vmatprep.subr.bf16.mxu1 %v13062_v30  ;;  %v8304_v35 = vunpack.i.l.bf16 %v12005_v15  ;;  %v8320_v12 = vunpack.i.h.bf16 %v12023_v39 }
 0x99e   :  { %v8278_v57 = vpop.permute.xlu0 %8277  ;;  %v12122_v54 = vpop.permute.xlu1 %8382  ;;  %v4983_v36 = vsel %vm3353_vm3, %v4981_v40, %v8274_v25  ;;  %v4984_v63 = vsel %vm3353_vm3, %v4982_v53, %v8275_v46  ;;  %v8215_v51 = vunpack.i.h.bf16 %v12019_v9 }
 0x99f   :  { %v8280_v27 = vunpack.i.h.bf16 %v8278_v57  ;;  %v8279_v43 = vunpack.i.l.bf16 %v8278_v57 }
 0x9a0   :  { %8597 = vrot.lane.b32.xlu0 %v11841_v5, %s8886_s18 }
 0x9a1   :  { %v12128_v1 = vsel %vm2113_vm7, %v8280_v27, %v8295_v55  ;;  %v4985_v56 = vsel %vm3358_vm2, %v4983_v36, %v8279_v43  ;;  %v4986_v0 = vsel %vm3358_vm2, %v4984_v63, %v8280_v27  ;;  %v12134_v61 = vsel %vm2113_vm7, %v8279_v43, %v8294_v23  ;;  %8662 = vrot.lane.b32.xlu1 %v11867_v60, %s13122_s2 }
 0x9a2   :  { %v8288_v14 = vpop.permute.xlu0 %8287  ;;  %v4987_v38 = vsel %vm3363_vm12, %v4985_v56, %v8294_v23  ;;  %v4988_v3 = vsel %vm3363_vm12, %v4986_v0, %v8295_v55  ;;  %v12140_v58 = vpop.permute.xlu1 %8392  ;;  %v5146_v27 = vsel %vm13124_vm8, %v8319_v16, %v8320_v12  ;;  %v5145_v43 = vsel %vm13125_vm10, %v8214_v42, %v8215_v51  ;;  %vm13133_vm8 = vmmov %vm13128_vm1 }
 0x9a3   :  { %v8290_v19 = vunpack.i.h.bf16 %v8288_v14  ;;  %v8289_v33 = vunpack.i.l.bf16 %v8288_v14  ;;  %v12144_v13 = vpack.c.bf16 %v4988_v3, %v4987_v38  ;;  %vm13134_vm10 = vmmov %vm13128_vm1 }
 0x9a4   :  { %8602 = vrot.lane.b32.xlu0 %v11873_v28, %s8859_s23 }
 0x9a5   :  { %8677 = vrot.lane.b32.xlu1 %v11867_v60, %s8859_s23  ;;  %7175 = vmatpush3.bf16.msra.mxu1 %v12144_v13  ;;  %v5150_v59 = vsel %vm2113_vm7, %v8285_v47, %v8290_v19  ;;  %v5149_v28 = vsel %vm2113_vm7, %v8284_v20, %v8289_v33  ;;  %v8340_v20 = vunpack.i.h.bf16 %v12053_v41 }
 0x9a6   :  { %v8298_v29 = vpop.permute.xlu0 %8297  ;;  %7176 = vmatprep.subr.bf16.mxu1 %v13062_v30  ;;  %v12154_v6 = vpop.permute.xlu1 %8402 }
 0x9a7   :  { %v8300_v31 = vunpack.i.h.bf16 %v8298_v29  ;;  %v8299_v32 = vunpack.i.l.bf16 %v8298_v29  ;;  %v8339_v29 = vunpack.i.l.bf16 %v12053_v41  ;;  %v8204_v41 = vunpack.i.l.bf16 %v12003_v62 }
 0x9a8   :  { %8607 = vrot.lane.b32.xlu0 %v11867_v60, %s8879_s1 }
 0x9a9   :  { %v5151_v17 = vsel %vm2148_vm14, %v5149_v28, %v8299_v32  ;;  %v5152_v24 = vsel %vm2148_vm14, %v5150_v59, %v8300_v31  ;;  %8682 = vrot.lane.b32.xlu1 %v11859_v45, %s8850_s22  ;;  %v8350_v28 = vunpack.i.h.bf16 %v12061_v8 }
 0x9aa   :  { %v8308_v11 = vpop.permute.xlu0 %8307  ;;  %v12166_v53 = vpop.permute.xlu1 %8412  ;;  %v5153_v57 = vsel %vm3348_vm15, %v5151_v17, %v8304_v35  ;;  %v5154_v46 = vsel %vm3348_vm15, %v5152_v24, %v8305_v34  ;;  %v8349_v17 = vunpack.i.l.bf16 %v12061_v8  ;;  %v8205_v35 = vunpack.i.h.bf16 %v12003_v62 }
 0x9ab   :  { %v8310_v40 = vunpack.i.h.bf16 %v8308_v11  ;;  %v8309_v25 = vunpack.i.l.bf16 %v8308_v11  ;;  %v8354_v11 = vunpack.i.l.bf16 %v12074_v37 }
 0x9ac   :  { %8622 = vrot.lane.b32.xlu0 %v11867_v60, %s8854_s15 }
 0x9ad   :  { %v5155_v15 = vsel %vm3353_vm3, %v5153_v57, %v8309_v25  ;;  %v5156_v55 = vsel %vm3353_vm3, %v5154_v46, %v8310_v40 }
 0x9ae   :  { %v5157_v23 = vsel %vm3358_vm2, %v5155_v15, %v8314_v22  ;;  %v5158_v36 = vsel %vm3358_vm2, %v5156_v55, %v8315_v18  ;;  %v8323_v63 = vpop.permute.xlu0 %8322  ;;  %v12188_v39 = vpop.permute.xlu1 %8417  ;;  %v8330_v22 = vunpack.i.h.bf16 %v12047_v21  ;;  %v8355_v55 = vunpack.i.h.bf16 %v12074_v37  ;;  %v12243_v37 = vld [vmem:[%s12829_s9] sm:$0x3] }
 0x9af   :  { %v5159_v56 = vsel %vm3363_vm12, %v5157_v23, %v5145_v43  ;;  %v5160_v0 = vsel %vm3363_vm12, %v5158_v36, %v5146_v27  ;;  %v8325_v16 = vunpack.i.h.bf16 %v8323_v63  ;;  %v8324_v14 = vunpack.i.l.bf16 %v8323_v63 }
 0x9b0   :  { %8627 = vrot.lane.b32.xlu0 %v11859_v45, %s13123_s3  ;;  %v12192_v9 = vpack.c.bf16 %v5160_v0, %v5159_v56  ;;  %v8364_v36 = vunpack.i.l.bf16 %v12087_v49  ;;  %v8365_v0 = vunpack.i.h.bf16 %v12087_v49  ;;  %v8374_v49 = vunpack.i.l.bf16 %v12107_v10 }
 0x9b1   :  { %v5208_v3 = vsel %vm2113_vm7, %v8325_v16, %v8330_v22  ;;  %v5207_v19 = vsel %vm2113_vm7, %v8324_v14, %v8329_v2 }
 0x9b2   :  { %v8333_v42 = vpop.permute.xlu0 %8332  ;;  %7177 = vmatpush3.bf16.msra.mxu1 %v12192_v9  ;;  %v12200_v33 = vpop.permute.xlu1 %8427 }
 0x9b3   :  { %v8335_v18 = vunpack.i.h.bf16 %v8333_v42  ;;  %v8334_v38 = vunpack.i.l.bf16 %v8333_v42  ;;  %7178 = vmatprep.subr.bf16.mxu1 %v13062_v30 }
 0x9b4   :  { %8637 = vrot.lane.b32.xlu0 %v11841_v5, %s8882_s16 }
 0x9b5   :  { %v5209_v47 = vsel %vm2148_vm14, %v5207_v19, %v8334_v38  ;;  %v5210_v21 = vsel %vm2148_vm14, %v5208_v3, %v8335_v18  ;;  %v8375_v19 = vunpack.i.h.bf16 %v12107_v10  ;;  %v5680_v10 = vld [vmem:[%s12830_s10] sm:$0x7] }
 0x9b6   :  { %v8343_v31 = vpop.permute.xlu0 %8342  ;;  %v12210_v24 = vpop.permute.xlu1 %8437  ;;  %v5211_v34 = vsel %vm3348_vm15, %v5209_v47, %v8339_v29  ;;  %v5212_v5 = vsel %vm3348_vm15, %v5210_v21, %v8340_v20  ;;  %v8384_v21 = vunpack.i.l.bf16 %v12122_v54 }
 0x9b7   :  { %v8345_v32 = vunpack.i.h.bf16 %v8343_v31  ;;  %v8344_v59 = vunpack.i.l.bf16 %v8343_v31  ;;  %v8385_v31 = vunpack.i.h.bf16 %v12122_v54 }
 0x9b8   :  { %8642 = vrot.lane.b32.xlu0 %v11861_v48, %s8883_s30 }
 0x9b9   :  { %v5213_v12 = vsel %vm3353_vm3, %v5211_v34, %v8344_v59  ;;  %v5214_v51 = vsel %vm3353_vm3, %v5212_v5, %v8345_v32 }
 0x9ba   :  { %v5215_v40 = vsel %vm3358_vm2, %v5213_v12, %v8349_v17  ;;  %v5216_v25 = vsel %vm3358_vm2, %v5214_v51, %v8350_v28  ;;  %v8358_v57 = vpop.permute.xlu0 %8357  ;;  %v12232_v43 = vpop.permute.xlu1 %8442 }
 0x9bb   :  { %v5217_v48 = vsel %vm3363_vm12, %v5215_v40, %v8204_v41  ;;  %v5218_v46 = vsel %vm3363_vm12, %v5216_v25, %v8205_v35  ;;  %v8360_v62 = vunpack.i.h.bf16 %v8358_v57  ;;  %v8359_v15 = vunpack.i.l.bf16 %v8358_v57 }
 0x9bc   :  { %v12230_v27 = vpack.c.bf16 %v5218_v46, %v5217_v48  ;;  %8657 = vrot.lane.b32.xlu0 %v11867_v60, %s8876_s26  ;;  %v8395_v25 = vunpack.i.h.bf16 %v12140_v58 }
 0x9bd   :  { %v5031_v23 = vsel %vm2113_vm7, %v8354_v11, %v8359_v15  ;;  %v5032_v63 = vsel %vm2113_vm7, %v8355_v55, %v8360_v62  ;;  %v8394_v11 = vunpack.i.l.bf16 %v12140_v58  ;;  %v8405_v58 = vunpack.i.h.bf16 %v12154_v6 }
 0x9be   :  { %v8368_v56 = vpop.permute.xlu0 %8367  ;;  %7179 = vmatpush3.bf16.msra.mxu1 %v12230_v27  ;;  %v12247_v22 = vpop.permute.xlu1 %8452  ;;  %v5033_v2 = vsel %vm2148_vm14, %v5031_v23, %v8364_v36  ;;  %v5034_v42 = vsel %vm2148_vm14, %v5032_v63, %v8365_v0  ;;  %v8404_v23 = vunpack.i.l.bf16 %v12154_v6 }
 0x9bf   :  { %v8370_v16 = vunpack.i.h.bf16 %v8368_v56  ;;  %v8369_v14 = vunpack.i.l.bf16 %v8368_v56  ;;  %7184 = vmatprep.subr.bf16.mxu1 %v13062_v30  ;;  %v8415_v56 = vunpack.i.h.bf16 %v12166_v53 }
 0x9c0   :  { %8667 = vrot.lane.b32.xlu0 %v11867_v60, %s8886_s18 }
 0x9c1   :  { %v5035_v18 = vsel %vm3348_vm15, %v5033_v2, %v8369_v14  ;;  %7181 = vmatmul.mubr.msk.bf16.vlgmr.msra.gmra.mxu1 %vm13126_vm11, %v12243_v37  ;;  %v5036_v38 = vsel %vm3348_vm15, %v5034_v42, %v8370_v16  ;;  %v8209_v14 = vunpack.i.l.bf16 %v12011_v52  ;;  %v8414_v2 = vunpack.i.l.bf16 %v12166_v53  ;;  %vm13136_vm11 = vmmov %vm13128_vm1 }
 0x9c2   :  { %v8378_v3 = vpop.permute.xlu0 %8377  ;;  %7185 = vmatpush3.bf16.msra.mxu1 %v12144_v13  ;;  %7192 = vmatprep.mubr.msk.bf16.mxu1 %vm13127_vm13, %v13062_v30  ;;  %v12264_v20 = vpop.permute.xlu1 %8462  ;;  %v5037_v29 = vsel %vm3353_vm3, %v5035_v18, %v8374_v49  ;;  %v5038_v32 = vsel %vm3353_vm3, %v5036_v38, %v8375_v19 }
 0x9c3   :  { %v8380_v60 = vunpack.i.h.bf16 %v8378_v3  ;;  %v8379_v47 = vunpack.i.l.bf16 %v8378_v3  ;;  %7186 = vmatprep.subr.bf16.mxu1 %v13062_v30 }
 0x9c4   :  { %8672 = vrot.lane.b32.xlu0 %v11859_v45, %s8881_s14 }
 0x9c5   :  { %v5039_v59 = vsel %vm3358_vm2, %v5037_v29, %v8379_v47  ;;  %v5040_v34 = vsel %vm3358_vm2, %v5038_v32, %v8380_v60  ;;  %v5360_v42 = vsel %vm2113_vm7, %v8375_v19, %v8380_v60  ;;  %v5359_v3 = vsel %vm2113_vm7, %v8374_v49, %v8379_v47 }
 0x9c6   :  { %v8388_v5 = vpop.permute.xlu0 %8387  ;;  %v5041_v35 = vsel %vm3363_vm12, %v5039_v59, %v8384_v21  ;;  %v5042_v41 = vsel %vm3363_vm12, %v5040_v34, %v8385_v31  ;;  %v12278_v12 = vpop.permute.xlu1 %8472  ;;  %v8210_v59 = vunpack.i.h.bf16 %v12011_v52  ;;  %v5362_v34 = vsel %vm2148_vm14, %v5360_v42, %v8385_v31 }
 0x9c7   :  { %v8389_v45 = vunpack.i.l.bf16 %v8388_v5  ;;  %v12280_v54 = vpack.c.bf16 %v5042_v41, %v5041_v35  ;;  %v8390_v51 = vunpack.i.h.bf16 %v8388_v5  ;;  %v5361_v5 = vsel %vm2148_vm14, %v5359_v3, %v8384_v21 }
 0x9c8   :  { %5683 = vperm.xlu0 %7419, %v5680_v10   ;;  %v8220_v31 = vunpack.i.h.bf16 %v12038_v44 }
 0x9c9   :  { %7187 = vmatpush3.bf16.msra.mxu1 %v12280_v54  ;;  %v5261_v46 = vsel %vm2113_vm7, %v8389_v45, %v8394_v11  ;;  %v5262_v15 = vsel %vm2113_vm7, %v8390_v51, %v8395_v25  ;;  %v8420_v51 = vunpack.i.h.bf16 %v12188_v39  ;;  %v8419_v11 = vunpack.i.l.bf16 %v12188_v39 }
 0x9ca   :  { %v8398_v40 = vpop.permute.xlu0 %8397  ;;  %7188 = vmatprep.subr.bf16.mxu1 %v13062_v30  ;;  %v12287_v62 = vpop.permute.xlu1 %8482 }
 0x9cb   :  { %v8400_v57 = vunpack.i.h.bf16 %v8398_v40  ;;  %v8399_v48 = vunpack.i.l.bf16 %v8398_v40  ;;  %v5363_v21 = vsel %vm3348_vm15, %v5361_v5, %v8419_v11 }
 0x9cd   :  { %v5263_v55 = vsel %vm2148_vm14, %v5261_v46, %v8399_v48  ;;  %v5264_v36 = vsel %vm2148_vm14, %v5262_v15, %v8400_v57  ;;  %7189 = vmatpush3.bf16.msra.mxu1 %v12230_v27  ;;  %v8219_v57 = vunpack.i.l.bf16 %v12038_v44  ;;  %v5364_v48 = vsel %vm3348_vm15, %v5362_v34, %v8420_v51 }
 0x9ce   :  { %v8408_v63 = vpop.permute.xlu0 %8407  ;;  %7190 = vmatprep.subr.bf16.mxu1 %v13062_v30  ;;  %v12300_v18 = vpop.permute.xlu1 %8492  ;;  %v5265_v38 = vsel %vm3348_vm15, %v5263_v55, %v8404_v23  ;;  %v5266_v29 = vsel %vm3348_vm15, %v5264_v36, %v8405_v58  ;;  %v8440_v44 = vunpack.i.h.bf16 %v12210_v24  ;;  %v8439_v36 = vunpack.i.l.bf16 %v12210_v24 }
 0x9cf   :  { %v8410_v0 = vunpack.i.h.bf16 %v8408_v63  ;;  %v8409_v16 = vunpack.i.l.bf16 %v8408_v63  ;;  %v8445_v63 = vunpack.i.h.bf16 %v12232_v43  ;;  %v8444_v58 = vunpack.i.l.bf16 %v12232_v43 }
 0x9d1   :  { %v12305_v6 = vsel %vm2113_vm7, %v8410_v0, %v8415_v56  ;;  %v5267_v32 = vsel %vm3353_vm3, %v5265_v38, %v8409_v16  ;;  %v5268_v10 = vsel %vm3353_vm3, %v5266_v29, %v8410_v0  ;;  %v12313_v19 = vsel %vm2113_vm7, %v8409_v16, %v8414_v2 }
 0x9d2   :  { %v5269_v53 = vsel %vm3358_vm2, %v5267_v32, %v8414_v2  ;;  %v8423_v60 = vpop.permute.xlu0 %8422  ;;  %v5270_v49 = vsel %vm3358_vm2, %v5268_v10, %v8415_v56  ;;  %v12320_v41 = vpop.permute.xlu1 %8502  ;;  %v8430_v56 = vunpack.i.h.bf16 %v12200_v33  ;;  %v8429_v0 = vunpack.i.l.bf16 %v12200_v33 }
 0x9d3   :  { %v5271_v47 = vsel %vm3363_vm12, %v5269_v53, %v8209_v14  ;;  %v5272_v35 = vsel %vm3363_vm12, %v5270_v49, %v8210_v59  ;;  %v8425_v52 = vunpack.i.h.bf16 %v8423_v60  ;;  %v8424_v45 = vunpack.i.l.bf16 %v8423_v60 }
 0x9d4   :  { %v12324_v40 = vpack.c.bf16 %v5272_v35, %v5271_v47  ;;  %v5355_v29 = vsel %vm13129_vm9, %v8219_v57, %v8220_v31  ;;  %v5356_v32 = vsel %vm13130_vm0, %v8444_v58, %v8445_v63  ;;  %v8455_v53 = vunpack.i.h.bf16 %v12247_v22  ;;  %vm13137_vm9 = vmmov %vm13128_vm1 }
 0x9d5   :  { %v5365_v46 = vsel %vm3353_vm3, %v5363_v21, %v8424_v45  ;;  %v5366_v15 = vsel %vm3353_vm3, %v5364_v48, %v8425_v52  ;;  %v8454_v60 = vunpack.i.l.bf16 %v12247_v22  ;;  %v8465_v57 = vunpack.i.h.bf16 %v12264_v20  ;;  %vm13138_vm0 = vmmov %vm13128_vm1 }
 0x9d6   :  { %v12326_v25 = vpop.permute.xlu0 %8432  ;;  %7191 = vmatpush3.bf16.msra.mxu1 %v12324_v40  ;;  %v12335_v55 = vpop.permute.xlu1 %8512  ;;  %v5367_v14 = vsel %vm3358_vm2, %v5365_v46, %v8439_v36  ;;  %v5368_v2 = vsel %vm3358_vm2, %v5366_v15, %v8440_v44  ;;  %v8464_v21 = vunpack.i.l.bf16 %v12264_v20  ;;  %v8475_v44 = vunpack.i.h.bf16 %v12278_v12 }
 0x9d7   :  { %v8435_v39 = vunpack.i.h.bf16 %v12326_v25  ;;  %v8434_v23 = vunpack.i.l.bf16 %v12326_v25  ;;  %7196 = vmatprep.subr.bf16.mxu1 %v13062_v30  ;;  %v5369_v49 = vsel %vm3363_vm12, %v5367_v14, %v5355_v29  ;;  %v5370_v47 = vsel %vm3363_vm12, %v5368_v2, %v5356_v32  ;;  %v12514_v25 = vld [vmem:[%s12829_s9 + $0x2] sm:$0x3] }
 0x9d8   :  { %v12390_v31 = vpack.c.bf16 %v5370_v47, %v5369_v49  ;;  %v8474_v36 = vunpack.i.l.bf16 %v12278_v12 }
 0x9d9   :  { %7193 = vmatmul.mubr.msk.bf16.vlgmr.msra.gmra.mxu1 %vm13128_vm1, %v12243_v37  ;;  %v5398_v43 = vsel %vm2113_vm7, %v8430_v56, %v8435_v39  ;;  %v5397_v38 = vsel %vm2113_vm7, %v8429_v0, %v8434_v23 }
 0x9da   :  { %v12348_v16 = vpop.permute.xlu0 %8447  ;;  %7197 = vmatpush3.bf16.msra.mxu1 %v12192_v9  ;;  %7204 = vmatprep.mubr.msk.bf16.mxu1 %vm13127_vm13, %v13062_v30  ;;  %v12367_v3 = vpop.permute.xlu1 %8522  ;;  %v5441_v12 = vsel %vm2148_vm14, %v12102_v26, %v8474_v36  ;;  %v8494_v26 = vunpack.i.l.bf16 %v12300_v18 }
 0x9db   :  { %v8450_v42 = vunpack.i.h.bf16 %v12348_v16  ;;  %v8449_v24 = vunpack.i.l.bf16 %v12348_v16  ;;  %7198 = vmatprep.subr.bf16.mxu1 %v13062_v30  ;;  %v8525_v33 = vunpack.i.h.bf16 %v12367_v3 }
 0x9dd   :  { %v5399_v59 = vsel %vm2148_vm14, %v5397_v38, %v8449_v24  ;;  %v5400_v10 = vsel %vm2148_vm14, %v5398_v43, %v8450_v42 }
 0x9de   :  { %v8458_v34 = vpop.permute.xlu0 %8457  ;;  %7199 = vmatpush3.bf16.msra.mxu1 %v12230_v27  ;;  %v5401_v52 = vsel %vm3348_vm15, %v5399_v59, %v8454_v60  ;;  %v5402_v45 = vsel %vm3348_vm15, %v5400_v10, %v8455_v53  ;;  %v12386_v51 = vpop.permute.xlu1 %8532  ;;  %v5442_v59 = vsel %vm2148_vm14, %v12094_v4, %v8475_v44  ;;  %v8485_v60 = vunpack.i.h.bf16 %v12287_v62 }
 0x9df   :  { %v8460_v5 = vunpack.i.h.bf16 %v8458_v34  ;;  %v8459_v35 = vunpack.i.l.bf16 %v8458_v34  ;;  %7200 = vmatprep.subr.bf16.mxu1 %v13062_v30  ;;  %v8484_v34 = vunpack.i.l.bf16 %v12287_v62  ;;  %v8495_v4 = vunpack.i.h.bf16 %v12300_v18 }
 0x9e1   :  { %v5403_v11 = vsel %vm3353_vm3, %v5401_v52, %v8459_v35  ;;  %v5404_v22 = vsel %vm3353_vm3, %v5402_v45, %v8460_v5 }
 0x9e2   :  { %v8468_v48 = vpop.permute.xlu0 %8467  ;;  %7201 = vmatpush3.bf16.msra.mxu1 %v12390_v31  ;;  %v5405_v63 = vsel %vm3358_vm2, %v5403_v11, %v8464_v21  ;;  %v5406_v58 = vsel %vm3358_vm2, %v5404_v22, %v8465_v57  ;;  %v12404_v38 = vpop.permute.xlu1 %8542 }
 0x9e3   :  { %v8470_v46 = vunpack.i.h.bf16 %v8468_v48  ;;  %v8469_v15 = vunpack.i.l.bf16 %v8468_v48  ;;  %7202 = vmatprep.subr.bf16.mxu1 %v13062_v30 }
 0x9e5   :  { %v5407_v14 = vsel %vm3363_vm12, %v5405_v63, %v8469_v15  ;;  %v5408_v2 = vsel %vm3363_vm12, %v5406_v58, %v8470_v46  ;;  %v8504_v58 = vunpack.i.l.bf16 %v12320_v41 }
 0x9e6   :  { %v12402_v20 = vpack.c.bf16 %v5408_v2, %v5407_v14  ;;  %v8478_v43 = vpop.permute.xlu0 %8477  ;;  %v12425_v62 = vpop.permute.xlu1 %8552 }
 0x9e7   :  { %v8480_v29 = vunpack.i.h.bf16 %v8478_v43  ;;  %v8479_v32 = vunpack.i.l.bf16 %v8478_v43  ;;  %v8505_v43 = vunpack.i.h.bf16 %v12320_v41  ;;  %v8515_v41 = vunpack.i.h.bf16 %v12335_v55 }
 0x9e8   :  { %7203 = vmatpush3.bf16.msra.mxu1 %v12402_v20 }
 0x9e9   :  { %v5443_v10 = vsel %vm3348_vm15, %v5441_v12, %v8479_v32  ;;  %v5444_v53 = vsel %vm3348_vm15, %v5442_v59, %v8480_v29  ;;  %7208 = vmatprep.subr.bf16.mxu1 %v13062_v30 }
 0x9ea   :  { %v8488_v49 = vpop.permute.xlu0 %8487  ;;  %v5445_v35 = vsel %vm3353_vm3, %v5443_v10, %v8484_v34  ;;  %v5446_v52 = vsel %vm3353_vm3, %v5444_v53, %v8485_v60  ;;  %v12436_v46 = vpop.permute.xlu1 %8562  ;;  %v8514_v10 = vunpack.i.l.bf16 %v12335_v55 }
 0x9eb   :  { %v8490_v47 = vunpack.i.h.bf16 %v8488_v49  ;;  %v8489_v5 = vunpack.i.l.bf16 %v8488_v49  ;;  %7205 = vmatmul.mubr.msk.bf16.vlgmr.msra.gmra.mxu1 %vm13131_vm5, %v12243_v37  ;;  %vm13139_vm5 = vmmov %vm13138_vm0 }
 0x9ec   :  { %7209 = vmatpush3.bf16.msra.mxu1 %v12230_v27  ;;  %7216 = vmatprep.mubr.msk.bf16.mxu1 %vm13127_vm13, %v13062_v30 }
 0x9ed   :  { %v5447_v45 = vsel %vm3358_vm2, %v5445_v35, %v8489_v5  ;;  %v5448_v11 = vsel %vm3358_vm2, %v5446_v52, %v8490_v47  ;;  %7210 = vmatprep.subr.bf16.mxu1 %v13062_v30  ;;  %v8544_v5 = vunpack.i.l.bf16 %v12404_v38 }
 0x9ee   :  { %v5449_v22 = vsel %vm3363_vm12, %v5447_v45, %v8494_v26  ;;  %v5450_v18 = vsel %vm3363_vm12, %v5448_v11, %v8495_v4  ;;  %v8498_v57 = vpop.permute.xlu0 %8497  ;;  %v12442_v14 = vpop.permute.xlu1 %8572  ;;  %v8555_v11 = vunpack.i.h.bf16 %v12425_v62 }
 0x9ef   :  { %v12432_v21 = vpack.c.bf16 %v5450_v18, %v5449_v22  ;;  %v8499_v44 = vunpack.i.l.bf16 %v8498_v57  ;;  %v8500_v36 = vunpack.i.h.bf16 %v8498_v57  ;;  %v8554_v22 = vunpack.i.l.bf16 %v12425_v62 }
 0x9f0   :  { %7211 = vmatpush3.bf16.msra.mxu1 %v12324_v40  ;;  %v8574_v16 = vunpack.i.l.bf16 %v12442_v14 }
 0x9f1   :  { %7212 = vmatprep.subr.bf16.mxu1 %v13062_v30  ;;  %v5085_v32 = vsel %vm2113_vm7, %v8499_v44, %v8504_v58  ;;  %v5086_v12 = vsel %vm2113_vm7, %v8500_v36, %v8505_v43  ;;  %v8535_v58 = vunpack.i.h.bf16 %v12386_v51  ;;  %v5483_v43 = vsel %vm2148_vm14, %v12134_v61, %v8554_v22 }
 0x9f2   :  { %v8508_v48 = vpop.permute.xlu0 %8507  ;;  %v12461_v34 = vpop.permute.xlu1 %8577 }
 0x9f3   :  { %v8509_v63 = vunpack.i.l.bf16 %v8508_v48  ;;  %v8510_v2 = vunpack.i.h.bf16 %v8508_v48 }
 0x9f4   :  { %7213 = vmatpush3.bf16.msra.mxu1 %v12402_v20 }
 0x9f5   :  { %7214 = vmatprep.subr.bf16.mxu1 %v13062_v30  ;;  %v5087_v59 = vsel %vm2148_vm14, %v5085_v32, %v8509_v63  ;;  %v5088_v53 = vsel %vm2148_vm14, %v5086_v12, %v8510_v2  ;;  %v8524_v63 = vunpack.i.l.bf16 %v12367_v3  ;;  %v8565_v12 = vunpack.i.h.bf16 %v12436_v46 }
 0x9f6   :  { %v8518_v15 = vpop.permute.xlu0 %8517  ;;  %v5089_v49 = vsel %vm3348_vm15, %v5087_v59, %v8514_v10  ;;  %v5090_v4 = vsel %vm3348_vm15, %v5088_v53, %v8515_v41  ;;  %v12493_v57 = vpop.permute.xlu1 %8582  ;;  %v8564_v59 = vunpack.i.l.bf16 %v12436_v46  ;;  %v8534_v41 = vunpack.i.l.bf16 %v12386_v51 }
 0x9f7   :  { %v5091_v26 = vsel %vm3353_vm3, %v5089_v49, %v8429_v0  ;;  %v5092_v45 = vsel %vm3353_vm3, %v5090_v4, %v8430_v56  ;;  %v8520_v18 = vunpack.i.h.bf16 %v8518_v15  ;;  %v8519_v0 = vunpack.i.l.bf16 %v8518_v15 }
 0x9f8   :  { %7215 = vmatpush3.bf16.msra.mxu1 %v12432_v21  ;;  %v5093_v48 = vsel %vm3358_vm2, %v5091_v26, %v8434_v23  ;;  %v5094_v62 = vsel %vm3358_vm2, %v5092_v45, %v8435_v39  ;;  %v5484_v23 = vsel %vm2148_vm14, %v12128_v1, %v8555_v11  ;;  %v8575_v49 = vunpack.i.h.bf16 %v12442_v14 }
 0x9f9   :  { %7220 = vmatprep.subr.bf16.mxu1 %v13062_v30  ;;  %v5316_v32 = vsel %vm2113_vm7, %v8520_v18, %v8525_v33  ;;  %v5095_v39 = vsel %vm3363_vm12, %v5093_v48, %v8449_v24  ;;  %v5315_v3 = vsel %vm2113_vm7, %v8519_v0, %v8524_v63  ;;  %v5096_v1 = vsel %vm3363_vm12, %v5094_v62, %v8450_v42 }
 0x9fa   :  { %v8528_v29 = vpop.permute.xlu0 %8527  ;;  %v8593_v4 = vpop.permute.xlu1 %8592  ;;  %v5905_v11 = vpack.c.bf16 %v5096_v1, %v5095_v39 }
 0x9fb   :  { %7217 = vmatmul.mubr.msk.bf16.vlgmr.msra.gmra.mxu1 %vm13132_vm4, %v12243_v37  ;;  %v8545_v37 = vunpack.i.h.bf16 %v12404_v38  ;;  %v8530_v44 = vunpack.i.h.bf16 %v8528_v29  ;;  %v8529_v56 = vunpack.i.l.bf16 %v8528_v29  ;;  %vm13140_vm4 = vmmov %vm13138_vm0 }
 0x9fc   :  { %7221 = vmatpush3.bf16.msra.mxu1 %v12144_v13  ;;  %7228 = vmatprep.mubr.msk.bf16.mxu1 %vm13127_vm13, %v13062_v30 }
 0x9fd   :  { %7222 = vmatprep.subr.bf16.mxu1 %v13062_v30  ;;  %v5317_v10 = vsel %vm2148_vm14, %v5315_v3, %v8529_v56  ;;  %v5318_v24 = vsel %vm2148_vm14, %v5316_v32, %v8530_v44 }
 0x9fe   :  { %v12458_v60 = vpop.permute.xlu0 %8537  ;;  %v5319_v51 = vsel %vm3348_vm15, %v5317_v10, %v8534_v41  ;;  %v5320_v22 = vsel %vm3348_vm15, %v5318_v24, %v8535_v58  ;;  %v8613_v58 = vpop.permute.xlu1 %8612  ;;  %v8584_v41 = vunpack.i.l.bf16 %v12493_v57 }
 0x9ff   :  { %v8540_v13 = vunpack.i.h.bf16 %v12458_v60  ;;  %v8539_v47 = vunpack.i.l.bf16 %v12458_v60 }
 0xa00   :  { %7223 = vmatpush3.bf16.msra.mxu1 %v12280_v54 }
 0xa01   :  { %v12474_v55 = vsel %vm2113_vm7, %v8540_v13, %v8545_v37  ;;  %7224 = vmatprep.subr.bf16.mxu1 %v13062_v30  ;;  %v12483_v35 = vsel %vm2113_vm7, %v8539_v47, %v8544_v5  ;;  %v5321_v14 = vsel %vm3353_vm3, %v5319_v51, %v8539_v47  ;;  %v8594_v47 = vunpack.i.l.bf16 %v8593_v4 }
 0xa02   :  { %v12485_v52 = vpop.permute.xlu0 %8547 }
 0xa03   :  { %v8550_v56 = vunpack.i.h.bf16 %v12485_v52 }
 0xa04   :  { %7225 = vmatpush3.bf16.msra.mxu1 %v12230_v27 }
 0xa05   :  { %7226 = vmatprep.subr.bf16.mxu1 %v13062_v30 }
 0xa06   :  { %v8558_v36 = vpop.permute.xlu0 %8557 }
 0xa07   :  { %v8560_v15 = vunpack.i.h.bf16 %v8558_v36  ;;  %v8559_v2 = vunpack.i.l.bf16 %v8558_v36  ;;  %v8549_v36 = vunpack.i.l.bf16 %v12485_v52 }
 0xa08   :  { %7227 = vmatpush3.bf16.msra.mxu1 %v12324_v40 }
 0xa09   :  { %v5485_v61 = vsel %vm3348_vm15, %v5483_v43, %v8559_v2  ;;  %v5486_v29 = vsel %vm3348_vm15, %v5484_v23, %v8560_v15  ;;  %7232 = vmatprep.subr.bf16.mxu1 %v13062_v30  ;;  %v5323_v2 = vsel %vm3358_vm2, %v5321_v14, %v8544_v5  ;;  %v8579_v23 = vunpack.i.l.bf16 %v12461_v34 }
 0xa0a   :  { %v8568_v53 = vpop.permute.xlu0 %8567  ;;  %v5487_v42 = vsel %vm3353_vm3, %v5485_v61, %v8564_v59  ;;  %v5488_v46 = vsel %vm3353_vm3, %v5486_v29, %v8565_v12  ;;  %v5325_v32 = vsel %vm3363_vm12, %v5323_v2, %v8549_v36  ;;  %v8618_v12 = vpop.permute.xlu1 %8617  ;;  %v8614_v14 = vunpack.i.l.bf16 %v8613_v58 }
 0xa0b   :  { %v8570_v26 = vunpack.i.h.bf16 %v8568_v53  ;;  %v8569_v45 = vunpack.i.l.bf16 %v8568_v53  ;;  %7229 = vmatmul.mubr.msk.bf16.vlgmr.msra.gmra.mxu1 %vm13133_vm8, %v12514_v25  ;;  %vm13141_vm8 = vmmov %vm13138_vm0 }
 0xa0c   :  { %7233 = vmatpush3.bf16.msra.mxu1 %v12280_v54  ;;  %7240 = vmatprep.mubr.msk.bf16.mxu1 %vm13127_vm13, %v13062_v30  ;;  %v5322_v54 = vsel %vm3353_vm3, %v5320_v22, %v8540_v13  ;;  %v8580_v13 = vunpack.i.h.bf16 %v12461_v34 }
 0xa0d   :  { %v5489_v18 = vsel %vm3358_vm2, %v5487_v42, %v8569_v45  ;;  %v5490_v0 = vsel %vm3358_vm2, %v5488_v46, %v8570_v26  ;;  %7234 = vmatprep.subr.bf16.mxu1 %v13062_v30  ;;  %v5324_v52 = vsel %vm3358_vm2, %v5322_v54, %v8545_v37  ;;  %v8595_v37 = vunpack.i.h.bf16 %v8593_v4 }
 0xa0e   :  { %v8588_v48 = vpop.permute.xlu0 %8587  ;;  %v5491_v33 = vsel %vm3363_vm12, %v5489_v18, %v8574_v16  ;;  %v5492_v44 = vsel %vm3363_vm12, %v5490_v0, %v8575_v49  ;;  %v5519_v1 = vsel %vm3240_vm6, %v8579_v23, %v8580_v13  ;;  %v8633_v51 = vpop.permute.xlu1 %8632  ;;  %v8615_v0 = vunpack.i.h.bf16 %v8613_v58 }
 0xa0f   :  { %v8589_v62 = vunpack.i.l.bf16 %v8588_v48  ;;  %v12553_v63 = vpack.c.bf16 %v5492_v44, %v5491_v33  ;;  %v8590_v15 = vunpack.i.h.bf16 %v8588_v48  ;;  %v8634_v2 = vunpack.i.l.bf16 %v8633_v51 }
 0xa10   :  { %7235 = vmatpush3.bf16.msra.mxu1 %v5905_v11 }
 0xa11   :  { %v5531_v60 = vsel %vm2148_vm14, %v12313_v19, %v8589_v62  ;;  %7236 = vmatprep.subr.bf16.mxu1 %v13062_v30  ;;  %v5326_v19 = vsel %vm3363_vm12, %v5324_v52, %v8550_v56  ;;  %v5532_v61 = vsel %vm2148_vm14, %v12305_v6, %v8590_v15  ;;  %v8585_v6 = vunpack.i.h.bf16 %v12493_v57 }
 0xa12   :  { %v8598_v43 = vpop.permute.xlu0 %8597  ;;  %v5533_v3 = vsel %vm3348_vm15, %v5531_v60, %v8594_v47  ;;  %v12574_v29 = vpack.c.bf16 %v5326_v19, %v5325_v32  ;;  %v5534_v24 = vsel %vm3348_vm15, %v5532_v61, %v8595_v37  ;;  %v8619_v62 = vunpack.i.l.bf16 %v8618_v12  ;;  %v8648_v60 = vpop.permute.xlu1 %8647 }
 0xa13   :  { %v8599_v39 = vunpack.i.l.bf16 %v8598_v43  ;;  %v8600_v5 = vunpack.i.h.bf16 %v8598_v43  ;;  %v8635_v47 = vunpack.i.h.bf16 %v8633_v51 }
 0xa14   :  { %7237 = vmatpush3.bf16.msra.mxu1 %v12324_v40 }
 0xa15   :  { %v5535_v38 = vsel %vm3353_vm3, %v5533_v3, %v8599_v39  ;;  %7238 = vmatprep.subr.bf16.mxu1 %v13062_v30  ;;  %v5536_v49 = vsel %vm3353_vm3, %v5534_v24, %v8600_v5  ;;  %v5617_v5 = vsel %vm2148_vm14, %v12034_v7, %v8634_v2 }
 0xa16   :  { %v8603_v34 = vpop.permute.xlu0 %8602  ;;  %v5537_v53 = vsel %vm3358_vm2, %v5535_v38, %v5519_v1  ;;  %v5618_v38 = vsel %vm2148_vm14, %v12045_v50, %v8635_v47  ;;  %v8653_v37 = vpop.permute.xlu1 %8652 }
 0xa17   :  { %v8605_v59 = vunpack.i.h.bf16 %v8603_v34  ;;  %v8604_v10 = vunpack.i.l.bf16 %v8603_v34  ;;  %v12589_v46 = vsel %vm3363_vm12, %v5537_v53, %v8584_v41  ;;  %v8655_v7 = vunpack.i.h.bf16 %v8653_v37 }
 0xa18   :  { %7239 = vmatpush3.bf16.msra.mxu1 %v12574_v29 }
 0xa19   :  { %v5520_v4 = vsel %vm3240_vm6, %v8604_v10, %v8605_v59  ;;  %7244 = vmatprep.subr.bf16.mxu1 %v13062_v30  ;;  %v8649_v59 = vunpack.i.l.bf16 %v8648_v60  ;;  %vm13135_vm6 = vmmov %vm13128_vm1 }
 0xa1a   :  { %v5538_v26 = vsel %vm3358_vm2, %v5536_v49, %v5520_v4  ;;  %v8608_v45 = vpop.permute.xlu0 %8607 }
 0xa1b   :  { %v8610_v16 = vunpack.i.h.bf16 %v8608_v45  ;;  %v8609_v42 = vunpack.i.l.bf16 %v8608_v45  ;;  %7241 = vmatmul.mubr.msk.bf16.vlgmr.msra.gmra.mxu1 %vm13134_vm10, %v12514_v25  ;;  %v12592_v11 = vsel %vm3363_vm12, %v5538_v26, %v8585_v6  ;;  %v8654_v6 = vunpack.i.l.bf16 %v8653_v37  ;;  %vm13142_vm10 = vmmov %vm13138_vm0 }
 0xa1c   :  { %7245 = vmatpush3.bf16.msra.mxu1 %v12230_v27  ;;  %7252 = vmatprep.mubr.msk.bf16.mxu1 %vm13127_vm13, %v13062_v30  ;;  %v6118_v57 = vpack.c.bf16 %v12592_v11, %v12589_v46 }
 0xa1d   :  { %v5573_v22 = vsel %vm2148_vm14, %v12483_v35, %v8609_v42  ;;  %v5574_v18 = vsel %vm2148_vm14, %v12474_v55, %v8610_v16  ;;  %7246 = vmatprep.subr.bf16.mxu1 %v13062_v30  ;;  %v8620_v55 = vunpack.i.h.bf16 %v8618_v12  ;;  %v8650_v12 = vunpack.i.h.bf16 %v8648_v60 }
 0xa1e   :  { %v8623_v54 = vpop.permute.xlu0 %8622  ;;  %v5575_v44 = vsel %vm3348_vm15, %v5573_v22, %v8614_v14  ;;  %v5576_v56 = vsel %vm3348_vm15, %v5574_v18, %v8615_v0  ;;  %v8663_v0 = vpop.permute.xlu1 %8662 }
 0xa1f   :  { %v8625_v48 = vunpack.i.h.bf16 %v8623_v54  ;;  %v8624_v33 = vunpack.i.l.bf16 %v8623_v54 }
 0xa20   :  { %7247 = vmatpush3.bf16.msra.mxu1 %v12324_v40 }
 0xa21   :  { %v5577_v36 = vsel %vm3353_vm3, %v5575_v44, %v8624_v33  ;;  %v5578_v35 = vsel %vm3353_vm3, %v5576_v56, %v8625_v48  ;;  %7248 = vmatprep.subr.bf16.mxu1 %v13062_v30  ;;  %v8664_v56 = vunpack.i.l.bf16 %v8663_v0 }
 0xa22   :  { %v8628_v15 = vpop.permute.xlu0 %8627  ;;  %v5579_v52 = vsel %vm3358_vm2, %v5577_v36, %v8619_v62  ;;  %v5580_v43 = vsel %vm3358_vm2, %v5578_v35, %v8620_v55  ;;  %v8678_v36 = vpop.permute.xlu1 %8677  ;;  %v8665_v62 = vunpack.i.h.bf16 %v8663_v0 }
 0xa23   :  { %v8630_v58 = vunpack.i.h.bf16 %v8628_v15  ;;  %v8629_v13 = vunpack.i.l.bf16 %v8628_v15 }
 0xa24   :  { %7249 = vmatpush3.bf16.msra.mxu1 %v12402_v20 }
 0xa25   :  { %v5581_v23 = vsel %vm3363_vm12, %v5579_v52, %v8629_v13  ;;  %v5582_v32 = vsel %vm3363_vm12, %v5580_v43, %v8630_v58  ;;  %7250 = vmatprep.subr.bf16.mxu1 %v13062_v30  ;;  %v8680_v52 = vunpack.i.h.bf16 %v8678_v36  ;;  %v8679_v43 = vunpack.i.l.bf16 %v8678_v36 }
 0xa26   :  { %v12616_v19 = vpack.c.bf16 %v5582_v32, %v5581_v23  ;;  %v8638_v39 = vpop.permute.xlu0 %8637  ;;  %v8683_v32 = vpop.permute.xlu1 %8682 }
 0xa27   :  { %v8640_v3 = vunpack.i.h.bf16 %v8638_v39  ;;  %v8639_v61 = vunpack.i.l.bf16 %v8638_v39 }
 0xa28   :  { %7251 = vmatpush3.bf16.msra.mxu1 %v12432_v21 }
 0xa29   :  { %v5620_v34 = vsel %vm3348_vm15, %v5618_v38, %v8640_v3  ;;  %v5619_v1 = vsel %vm3348_vm15, %v5617_v5, %v8639_v61  ;;  %7256 = vmatprep.subr.bf16.mxu1 %v13062_v30  ;;  %v8685_v5 = vunpack.i.h.bf16 %v8683_v32  ;;  %v8684_v38 = vunpack.i.l.bf16 %v8683_v32 }
 0xa2a   :  { %v8643_v10 = vpop.permute.xlu0 %8642  ;;  %v5621_v50 = vsel %vm3353_vm3, %v5619_v1, %v8649_v59  ;;  %v5622_v41 = vsel %vm3353_vm3, %v5620_v34, %v8650_v12 }
 0xa2b   :  { %v8645_v24 = vunpack.i.h.bf16 %v8643_v10  ;;  %v8644_v53 = vunpack.i.l.bf16 %v8643_v10  ;;  %7253 = vmatmul.mubr.msk.bf16.vlgmr.msra.gmra.mxu1 %vm13135_vm6, %v12514_v25 }
 0xa2c   :  { %7257 = vmatpush3.bf16.msra.mxu1 %v12324_v40  ;;  %7264 = vmatprep.mubr.msk.bf16.mxu1 %vm13127_vm13, %v13062_v30 }
 0xa2d   :  { %v5623_v49 = vsel %vm3358_vm2, %v5621_v50, %v8644_v53  ;;  %v5624_v4 = vsel %vm3358_vm2, %v5622_v41, %v8645_v24  ;;  %7258 = vmatprep.subr.bf16.mxu1 %v13062_v30 }
 0xa2e   :  { %v5625_v26 = vsel %vm3363_vm12, %v5623_v49, %v8654_v6  ;;  %v5626_v45 = vsel %vm3363_vm12, %v5624_v4, %v8655_v7  ;;  %v8658_v11 = vpop.permute.xlu0 %8657 }
 0xa2f   :  { %v12638_v16 = vpack.c.bf16 %v5626_v45, %v5625_v26  ;;  %v8659_v14 = vunpack.i.l.bf16 %v8658_v11  ;;  %v8660_v54 = vunpack.i.h.bf16 %v8658_v11 }
 0xa30   :  { %7259 = vmatpush3.bf16.msra.mxu1 %v12574_v29 }
 0xa31   :  { %7260 = vmatprep.subr.bf16.mxu1 %v13062_v30  ;;  %v5663_v33 = vsel %vm2113_vm7, %v8349_v17, %v8659_v14  ;;  %v5664_v35 = vsel %vm2113_vm7, %v8350_v28, %v8660_v54  ;;  %vm6414_vm7 = vcmask 1042432  }
 0xa32   :  { %v5665_v15 = vsel %vm2148_vm14, %v5663_v33, %v8664_v56  ;;  %v5666_v60 = vsel %vm2148_vm14, %v5664_v35, %v8665_v62  ;;  %vm6416_vm14 = vcmask 1045504  }
 0xa34   :  { %7261 = vmatpush3.bf16.msra.mxu1 %v12432_v21 }
 0xa35   :  { %7262 = vmatprep.subr.bf16.mxu1 %v13062_v30 }
 0xa38   :  { %7263 = vmatpush3.bf16.msra.mxu1 %v12553_v63 }
 0xa39   :  { %7268 = vmatprep.subr.bf16.mxu1 %v13062_v30 }
 0xa3b   :  { %7265 = vmatmul.mubr.msk.bf16.vlgmr.msra.gmra.mxu1 %vm13136_vm11, %v12514_v25  ;;  %v6666_v25 = vld [vmem:[%s12829_s9 + $0x4] sm:$0x3]  ;;  %vm6424_vm11 = vcmask 1041408  }
 0xa3c   :  { %7269 = vmatpush3.bf16.msra.mxu1 %v12192_v9  ;;  %7276 = vmatprep.mubr.msk.bf16.mxu1 %vm13127_vm13, %v13062_v30 }
 0xa3d   :  { %7270 = vmatprep.subr.bf16.mxu1 %v13062_v30 }
 0xa40   :  { %7271 = vmatpush3.bf16.msra.mxu1 %v12230_v27 }
 0xa41   :  { %7272 = vmatprep.subr.bf16.mxu1 %v13062_v30 }
 0xa44   :  { %7273 = vmatpush3.bf16.msra.mxu1 %v12390_v31 }
 0xa45   :  { %7274 = vmatprep.subr.bf16.mxu1 %v13062_v30 }
 0xa48   :  { %7275 = vmatpush3.bf16.msra.mxu1 %v12402_v20 }
 0xa49   :  { %7280 = vmatprep.subr.bf16.mxu1 %v13062_v30 }
 0xa4b   :  { %7277 = vmatmul.mubr.msk.bf16.vlgmr.msra.gmra.mxu1 %vm13128_vm1, %v6666_v25  ;;  %vm6426_vm1 = vcmask 1044480  }
 0xa4c   :  { %7281 = vmatpush3.bf16.msra.mxu1 %v12230_v27  ;;  %7288 = vmatprep.mubr.msk.bf16.mxu1 %vm13127_vm13, %v13062_v30 }
 0xa4d   :  { %7282 = vmatprep.subr.bf16.mxu1 %v13062_v30 }
 0xa50   :  { %7283 = vmatpush3.bf16.msra.mxu1 %v12324_v40 }
 0xa51   :  { %7284 = vmatprep.subr.bf16.mxu1 %v13062_v30 }
 0xa54   :  { %7285 = vmatpush3.bf16.msra.mxu1 %v12402_v20 }
 0xa55   :  { %7286 = vmatprep.subr.bf16.mxu1 %v13062_v30 }
 0xa58   :  { %7287 = vmatpush3.bf16.msra.mxu1 %v12432_v21 }
 0xa59   :  { %7292 = vmatprep.subr.bf16.mxu1 %v13062_v30 }
 0xa5b   :  { %7289 = vmatmul.mubr.msk.bf16.vlgmr.msra.gmra.mxu1 %vm13137_vm9, %v6666_v25 }
 0xa5c   :  { %7293 = vmatpush3.bf16.msra.mxu1 %v12390_v31  ;;  %7300 = vmatprep.mubr.msk.bf16.mxu1 %vm13127_vm13, %v13062_v30 }
 0xa5d   :  { %7294 = vmatprep.subr.bf16.mxu1 %v13062_v30 }
 0xa60   :  { %7295 = vmatpush3.bf16.msra.mxu1 %v12402_v20 }
 0xa61   :  { %7296 = vmatprep.subr.bf16.mxu1 %v13062_v30 }
 0xa64   :  { %7297 = vmatpush3.bf16.msra.mxu1 %v6118_v57  ;;  %v8668_v57 = vpop.permute.xlu0 %8667 }
 0xa65   :  { %7298 = vmatprep.subr.bf16.mxu1 %v13062_v30  ;;  %v8669_v44 = vunpack.i.l.bf16 %v8668_v57  ;;  %v8670_v55 = vunpack.i.h.bf16 %v8668_v57 }
 0xa67   :  { %v5667_v17 = vsel %vm3348_vm15, %v5665_v15, %v8669_v44  ;;  %v5668_v8 = vsel %vm3348_vm15, %v5666_v60, %v8670_v55  ;;  %vm6418_vm15 = vcmask 1040384  }
 0xa68   :  { %7299 = vmatpush3.bf16.msra.mxu1 %v12616_v19  ;;  %v8673_v22 = vpop.permute.xlu0 %8672  ;;  %v5670_v39 = vsel %vm3353_vm3, %v5668_v8, %v8680_v52 }
 0xa69   :  { %7304 = vmatprep.subr.bf16.mxu1 %v13062_v30  ;;  %v8675_v28 = vunpack.i.h.bf16 %v8673_v22  ;;  %v8674_v47 = vunpack.i.l.bf16 %v8673_v22 }
 0xa6b   :  { %7301 = vmatmul.mubr.msk.bf16.vlgmr.msra.gmra.mxu1 %vm13138_vm0, %v6666_v25 }
 0xa6c   :  { %7305 = vmatpush3.bf16.msra.mxu1 %v12402_v20  ;;  %7312 = vmatprep.mubr.msk.bf16.mxu1 %vm13127_vm13, %v13062_v30  ;;  %v12732_v48 = vpop.permute.xlu0 %5683 }
 0xa6d   :  { %7306 = vmatprep.subr.bf16.mxu1 %v13062_v30 }
 0xa70   :  { %7307 = vmatpush3.bf16.msra.mxu1 %v12432_v21 }
 0xa71   :  { %7308 = vmatprep.subr.bf16.mxu1 %v13062_v30 }
 0xa74   :  { %7309 = vmatpush3.bf16.msra.mxu1 %v12616_v19 }
 0xa75   :  { %7310 = vmatprep.subr.bf16.mxu1 %v13062_v30 }
 0xa78   :  { %7311 = vmatpush3.bf16.msra.mxu1 %v12638_v16 }
 0xa79   :  { %7316 = vmatprep.subr.bf16.mxu1 %v13062_v30 }
 0xa7b   :  { %7313 = vmatmul.mubr.msk.bf16.vlgmr.msra.gmra.mxu1 %vm13139_vm5, %v6666_v25 }
 0xa7c   :  { %7317 = vmatpush3.bf16.msra.mxu1 %v12230_v27  ;;  %7324 = vmatprep.mubr.msk.bf16.mxu1 %vm13127_vm13, %v13062_v30  ;;  %v12709_v27 = vld [vmem:[%s12829_s9 + $0x6] sm:$0x3] }
 0xa7d   :  { %7318 = vmatprep.subr.bf16.mxu1 %v13062_v30 }
 0xa80   :  { %7319 = vmatpush3.bf16.msra.mxu1 %v12324_v40 }
 0xa81   :  { %v5723_v9 = vpop.f32.mrf.mxu1  ;;  %7320 = vmatprep.subr.bf16.mxu1 %v13062_v30 }
 0xa82   :  { %v5724_v58 = vadd.f32 %v5723_v9, %v12732_v48 }
 0xa83   :  { %v7182_v31 = vpop.f32.mrf.mxu1 }
 0xa84   :  { %7321 = vmatpush3.bf16.msra.mxu1 %v12402_v20 }
 0xa85   :  { %7322 = vmatprep.subr.bf16.mxu1 %v13062_v30  ;;  %v5726_v42 = vpop.f32.mrf.mxu1 }
 0xa87   :  { %v7183_v46 = vpop.f32.mrf.mxu1 }
 0xa88   :  { %7323 = vmatpush3.bf16.msra.mxu1 %v12432_v21 }
 0xa89   :  { %7328 = vmatprep.subr.bf16.mxu1 %v13062_v30 }
 0xa8b   :  { %7325 = vmatmul.mubr.msk.bf16.vlgmr.msra.gmra.mxu1 %vm13140_vm4, %v12709_v27 }
 0xa8c   :  { %7329 = vmatpush3.bf16.msra.mxu1 %v12324_v40  ;;  %7336 = vmatprep.mubr.msk.bf16.mxu1 %vm13127_vm13, %v13062_v30 }
 0xa8d   :  { %7330 = vmatprep.subr.bf16.mxu1 %v13062_v30 }
 0xa90   :  { %7331 = vmatpush3.bf16.msra.mxu1 %v12574_v29 }
 0xa91   :  { %7332 = vmatprep.subr.bf16.mxu1 %v13062_v30 }
 0xa94   :  { %7333 = vmatpush3.bf16.msra.mxu1 %v12432_v21 }
 0xa95   :  { %7334 = vmatprep.subr.bf16.mxu1 %v13062_v30 }
 0xa98   :  { %7335 = vmatpush3.bf16.msra.mxu1 %v12553_v63 }
 0xa99   :  { %7340 = vmatprep.subr.bf16.mxu1 %v13062_v30  ;;  %v5766_v40 = vpop.f32.mrf.mxu1 }
 0xa9b   :  { %7337 = vmatmul.mubr.msk.bf16.vlgmr.msra.gmra.mxu1 %vm13141_vm8, %v12709_v27  ;;  %v7194_v51 = vpop.f32.mrf.mxu1 }
 0xa9c   :  { %7341 = vmatpush3.bf16.msra.mxu1 %v12402_v20  ;;  %7348 = vmatprep.mubr.msk.bf16.mxu1 %vm13127_vm13, %v13062_v30  ;;  %v5767_v20 = vadd.f32 %v5766_v40, %v12732_v48 }
 0xa9d   :  { %7342 = vmatprep.subr.bf16.mxu1 %v13062_v30  ;;  %v5769_v29 = vpop.f32.mrf.mxu1 }
 0xa9e   :  { %8800 = vtanh.f32 %v5767_v20 }
 0xa9f   :  { %v7195_v18 = vpop.f32.mrf.mxu1 }
 0xaa0   :  { %7343 = vmatpush3.bf16.msra.mxu1 %v12432_v21 }
 0xaa1   :  { %7344 = vmatprep.subr.bf16.mxu1 %v13062_v30 }
 0xaa4   :  { %7345 = vmatpush3.bf16.msra.mxu1 %v12616_v19  ;;  %v5669_v19 = vsel %vm3353_vm3, %v5667_v17, %v8679_v43  ;;  %vm6420_vm3 = vcmask 1043456  }
 0xaa5   :  { %7346 = vmatprep.subr.bf16.mxu1 %v13062_v30  ;;  %v5671_v61 = vsel %vm3358_vm2, %v5669_v19, %v8674_v47 }
 0xaa6   :  { %v5673_v34 = vsel %vm3363_vm12, %v5671_v61, %v8684_v38 }
 0xaa8   :  { %7347 = vmatpush3.bf16.msra.mxu1 %v12638_v16 }
 0xaa9   :  { %7352 = vmatprep.subr.bf16.mxu1 %v13062_v30 }
 0xaab   :  { %v5809_v13 = vpop.f32.mrf.mxu1  ;;  %7349 = vmatmul.mubr.msk.bf16.vlgmr.msra.gmra.mxu1 %vm13142_vm10, %v12709_v27  ;;  %v8801_v12 = vpop.eup %8800 }
 0xaac   :  { %v5810_v2 = vadd.f32 %v5809_v13, %v12732_v48  ;;  %7353 = vmatpush3.bf16.msra.mxu1 %v12432_v21  ;;  %7360 = vmatprep.mubr.msk.bf16.mxu1 %vm13127_vm13, %v13062_v30  ;;  %v5672_v21 = vsel %vm3358_vm2, %v5670_v39, %v8675_v28  ;;  %v6373_v10 = vrot.slane %v8801_v12, 5  ;;  %vm13143_vm2 = vmmov %vm13138_vm0  ;;  %vm6422_vm13 = vcmask 1046528  }
 0xaad   :  { %v7206_v23 = vpop.f32.mrf.mxu1  ;;  %7354 = vmatprep.subr.bf16.mxu1 %v13062_v30  ;;  %v5674_v1 = vsel %vm3363_vm12, %v5672_v21, %v8685_v5  ;;  %vm13144_vm12 = vcmask 801792  }
 0xaae   :  { %8802 = vtanh.f32 %v5810_v2  ;;  %v6330_v59 = vpack.c.bf16 %v5674_v1, %v5673_v34  ;;  %vm13145_vm6 = vmmov %vm13144_vm12 }
 0xaaf   :  { %8804 = vtanh.f32 %v5724_v58  ;;  %v5812_v3 = vpop.f32.mrf.mxu1  ;;  %vm13146_vm9 = vmmov %vm13145_vm6 }
 0xab0   :  { %7355 = vmatpush3.bf16.msra.mxu1 %v12553_v63  ;;  %vm13147_vm0 = vmmov %vm13145_vm6 }
 0xab1   :  { %v7207_v37 = vpop.f32.mrf.mxu1  ;;  %7356 = vmatprep.subr.bf16.mxu1 %v13062_v30  ;;  %vm13148_vm5 = vmmov %vm13147_vm0 }
 0xab2   :  { %vm13149_vm4 = vmmov %vm13147_vm0 }
 0xab4   :  { %7357 = vmatpush3.bf16.msra.mxu1 %v12638_v16 }
 0xab5   :  { %7358 = vmatprep.subr.bf16.mxu1 %v13062_v30 }
 0xab8   :  { %7359 = vmatpush3.bf16.msra.mxu1 %v6330_v59 }
 0xabb   :  { %v8803_v24 = vpop.eup %8802  ;;  %v5851_v63 = vpop.f32.mrf.mxu1  ;;  %7361 = vmatmul.mubr.msk.bf16.vlgmr.msra.gmra.mxu1 %vm13143_vm2, %v12709_v27 }
 0xabc   :  { %v8805_v53 = vpop.eup %8804  ;;  %v6376_v7 = vrot.slane %v8803_v24, 2  ;;  %v5852_v9 = vadd.f32 %v5851_v63, %v12732_v48 }
 0xabd   :  { %v6415_v6 = vsel %vm6414_vm7, %v8805_v53, %v6373_v10  ;;  %v7218_v50 = vpop.f32.mrf.mxu1 }
 0xabe   :  { %v6417_v41 = vsel %vm6416_vm14, %v6415_v6, %v6376_v7  ;;  %8806 = vtanh.f32 %v5852_v9 }
 0xabf   :  { %v6435_v30 = vsel %vm13144_vm12, %v6417_v41, 0.0  ;;  %v5854_v49 = vpop.f32.mrf.mxu1 }
 0xac0   :  { %6441 = vst [vmem:[%s12831_s11] sm:$0xff] %v6435_v30 }
 0xac1   :  { %v7219_v4 = vpop.f32.mrf.mxu1 }
 0xacb   :  { %v5897_v26 = vpop.f32.mrf.mxu1  ;;  %v8807_v40 = vpop.eup %8806 }
 0xacc   :  { %v5898_v31 = vadd.f32 %v5897_v26, %v12732_v48  ;;  %v6379_v29 = vrot.slane %v8807_v40, 7 }
 0xacd   :  { %v7230_v45 = vpop.f32.mrf.mxu1 }
 0xace   :  { %8808 = vtanh.f32 %v5898_v31  ;;  %v6419_v14 = vsel %vm6418_vm15, %v6376_v7, %v6379_v29 }
 0xacf   :  { %v5900_v16 = vpop.f32.mrf.mxu1 }
 0xad1   :  { %v7231_v25 = vpop.f32.mrf.mxu1 }
 0xadb   :  { %v5940_v42 = vpop.f32.mrf.mxu1  ;;  %v8809_v51 = vpop.eup %8808 }
 0xadc   :  { %v5941_v46 = vadd.f32 %v5940_v42, %v12732_v48  ;;  %v6382_v22 = vrot.slane %v8809_v51, 4 }
 0xadd   :  { %v7242_v27 = vpop.f32.mrf.mxu1 }
 0xade   :  { %8810 = vtanh.f32 %v5941_v46  ;;  %v6421_v20 = vsel %vm6420_vm3, %v6419_v14, %v6382_v22 }
 0xadf   :  { %v5943_v11 = vpop.f32.mrf.mxu1 }
 0xae1   :  { %v7243_v57 = vpop.f32.mrf.mxu1 }
 0xaeb   :  { %v8811_v18 = vpop.eup %8810  ;;  %v5981_v0 = vpop.f32.mrf.mxu1 }
 0xaec   :  { %v6385_v54 = vrot.slane %v8811_v18, 1  ;;  %v5982_v55 = vadd.f32 %v5981_v0, %v12732_v48 }
 0xaed   :  { %v7254_v33 = vpop.f32.mrf.mxu1 }
 0xaee   :  { %v6423_v44 = vsel %vm6422_vm13, %v6421_v20, %v6385_v54  ;;  %8812 = vtanh.f32 %v5982_v55 }
 0xaef   :  { %v6436_v56 = vsel %vm13145_vm6, %v6423_v44, 0.0  ;;  %v5984_v36 = vpop.f32.mrf.mxu1 }
 0xaf0   :  { %6442 = vst [vmem:[%s12831_s11 + $0x8] sm:$0xff] %v6436_v56 }
 0xaf1   :  { %v7255_v35 = vpop.f32.mrf.mxu1 }
 0xafb   :  { %v6023_v62 = vpop.f32.mrf.mxu1  ;;  %v8813_v13 = vpop.eup %8812 }
 0xafc   :  { %v6024_v15 = vadd.f32 %v6023_v62, %v12732_v48  ;;  %v6388_v8 = vrot.slane %v8813_v13, 6 }
 0xafd   :  { %v7266_v60 = vpop.f32.mrf.mxu1 }
 0xafe   :  { %8814 = vtanh.f32 %v6024_v15  ;;  %v6425_v52 = vsel %vm6424_vm11, %v6385_v54, %v6388_v8 }
 0xaff   :  { %v6026_v17 = vpop.f32.mrf.mxu1 }
 0xb01   :  { %v7267_v58 = vpop.f32.mrf.mxu1 }
 0xb0b   :  { %v8815_v28 = vpop.eup %8814  ;;  %v6069_v47 = vpop.f32.mrf.mxu1 }
 0xb0c   :  { %v6391_v2 = vrot.slane %v8815_v28, 3  ;;  %v6070_v37 = vadd.f32 %v6069_v47, %v12732_v48 }
 0xb0d   :  { %v7278_v43 = vpop.f32.mrf.mxu1 }
 0xb0e   :  { %v6427_v23 = vsel %vm6426_vm1, %v6425_v52, %v6391_v2 }
 0xb0f   :  { %v6437_v32 = vsel %vm13146_vm9, %v6427_v23, 0.0  ;;  %v6072_v19 = vpop.f32.mrf.mxu1 }
 0xb10   :  { %6443 = vst [vmem:[%s12831_s11 + $0x10] sm:$0xff] %v6437_v32 }
 0xb11   :  { %v7279_v39 = vpop.f32.mrf.mxu1 }
 0xb1b   :  { %v6110_v3 = vpop.f32.mrf.mxu1 }
 0xb1c   :  { %v6111_v38 = vadd.f32 %v6110_v3, %v12732_v48 }
 0xb1d   :  { %v7290_v61 = vpop.f32.mrf.mxu1 }
 0xb1e   :  { %8816 = vtanh.f32 %v6111_v38 }
 0xb1f   :  { %v6113_v21 = vpop.f32.mrf.mxu1 }
 0xb21   :  { %v7291_v5 = vpop.f32.mrf.mxu1 }
 0xb2b   :  { %v6153_v34 = vpop.f32.mrf.mxu1  ;;  %v8817_v24 = vpop.eup %8816 }
 0xb2c   :  { %v6154_v1 = vadd.f32 %v6153_v34, %v12732_v48  ;;  %v6394_v63 = vrot.slane %v8817_v24, 5 }
 0xb2d   :  { %v7302_v12 = vpop.f32.mrf.mxu1 }
 0xb2e   :  { %8818 = vtanh.f32 %v6154_v1 }
 0xb2f   :  { %8820 = vtanh.f32 %v6070_v37  ;;  %v6156_v59 = vpop.f32.mrf.mxu1 }
 0xb31   :  { %v7303_v10 = vpop.f32.mrf.mxu1 }
 0xb3b   :  { %v8819_v53 = vpop.eup %8818  ;;  %v6195_v7 = vpop.f32.mrf.mxu1 }
 0xb3c   :  { %v8821_v6 = vpop.eup %8820  ;;  %v6397_v50 = vrot.slane %v8819_v53, 2  ;;  %v6196_v42 = vadd.f32 %v6195_v7, %v12732_v48 }
 0xb3d   :  { %v6428_v41 = vsel %vm6414_vm7, %v8821_v6, %v6394_v63  ;;  %v7314_v30 = vpop.f32.mrf.mxu1 }
 0xb3e   :  { %v6429_v49 = vsel %vm6416_vm14, %v6428_v41, %v6397_v50  ;;  %8822 = vtanh.f32 %v6196_v42 }
 0xb3f   :  { %v6438_v4 = vsel %vm13147_vm0, %v6429_v49, 0.0  ;;  %v6198_v26 = vpop.f32.mrf.mxu1 }
 0xb40   :  { %6444 = vst [vmem:[%s12831_s11 + $0x18] sm:$0xff] %v6438_v4 }
 0xb41   :  { %v7315_v45 = vpop.f32.mrf.mxu1 }
 0xb4b   :  { %v6241_v16 = vpop.f32.mrf.mxu1  ;;  %v8823_v29 = vpop.eup %8822 }
 0xb4c   :  { %v6242_v46 = vadd.f32 %v6241_v16, %v12732_v48  ;;  %v6400_v18 = vrot.slane %v8823_v29, 7 }
 0xb4d   :  { %v7326_v25 = vpop.f32.mrf.mxu1 }
 0xb4e   :  { %8824 = vtanh.f32 %v6242_v46  ;;  %v6430_v20 = vsel %vm6418_vm15, %v6397_v50, %v6400_v18 }
 0xb4f   :  { %v6244_v9 = vpop.f32.mrf.mxu1 }
 0xb51   :  { %v7327_v31 = vpop.f32.mrf.mxu1 }
 0xb5b   :  { %v6282_v27 = vpop.f32.mrf.mxu1  ;;  %v8825_v22 = vpop.eup %8824 }
 0xb5c   :  { %v6283_v11 = vadd.f32 %v6282_v27, %v12732_v48  ;;  %v6403_v0 = vrot.slane %v8825_v22, 4 }
 0xb5d   :  { %v7338_v57 = vpop.f32.mrf.mxu1 }
 0xb5e   :  { %8826 = vtanh.f32 %v6283_v11  ;;  %v6431_v44 = vsel %vm6420_vm3, %v6430_v20, %v6403_v0 }
 0xb5f   :  { %v6285_v40 = vpop.f32.mrf.mxu1 }
 0xb61   :  { %v7339_v51 = vpop.f32.mrf.mxu1 }
 0xb6b   :  { %v8827_v14 = vpop.eup %8826  ;;  %v6323_v54 = vpop.f32.mrf.mxu1 }
 0xb6c   :  { %v6406_v33 = vrot.slane %v8827_v14, 1  ;;  %v6324_v15 = vadd.f32 %v6323_v54, %v12732_v48 }
 0xb6d   :  { %v7350_v56 = vpop.f32.mrf.mxu1 }
 0xb6e   :  { %v6432_v36 = vsel %vm6422_vm13, %v6431_v44, %v6406_v33  ;;  %8828 = vtanh.f32 %v6324_v15 }
 0xb6f   :  { %v6439_v35 = vsel %vm13148_vm5, %v6432_v36, 0.0  ;;  %v6326_v55 = vpop.f32.mrf.mxu1 }
 0xb70   :  { %6445 = vst [vmem:[%s12831_s11 + $0x20] sm:$0xff] %v6439_v35 }
 0xb71   :  { %v7351_v62 = vpop.f32.mrf.mxu1 }
 0xb7b   :  { %v6365_v60 = vpop.f32.mrf.mxu1  ;;  %v8829_v28 = vpop.eup %8828 }
 0xb7c   :  { %v6366_v17 = vadd.f32 %v6365_v60, %v12732_v48  ;;  %v6409_v47 = vrot.slane %v8829_v28, 6 }
 0xb7d   :  { %v7362_v58 = vpop.f32.mrf.mxu1 }
 0xb7e   :  { %8830 = vtanh.f32 %v6366_v17  ;;  %v6433_v43 = vsel %vm6424_vm11, %v6406_v33, %v6409_v47 }
 0xb7f   :  { %v6368_v13 = vpop.f32.mrf.mxu1 }
 0xb81   :  { %v7363_v8 = vpop.f32.mrf.mxu1 }
 0xb8b   :  { %v8831_v2 = vpop.eup %8830 }
 0xb8c   :  { %v6412_v52 = vrot.slane %v8831_v2, 3 }
 0xb8e   :  { %v6434_v23 = vsel %vm6426_vm1, %v6433_v43, %v6412_v52 }
 0xb8f   :  { %v6440_v32 = vsel %vm13149_vm4, %v6434_v23, 0.0 }
 0xb90   :  { %6446 = vst [vmem:[%s12831_s11 + $0x28] sm:$0xff] %v6440_v32 }

</bundles_post_ra>
